<compile_context>
chip_gen: v7x
topology: tpu7x:2x2x1
jax: 0.10.0
libtpu: 0.0.40
codegen_flags: <defaults>
</compile_context>

<pallas_src>
import math

import jax
import jax.numpy as jnp
from jax.experimental import pallas as pl
from jax.experimental.pallas import tpu as pltpu


# ----------------------------------------------------------------------------------
# Pallas kernels
# ----------------------------------------------------------------------------------
def _conv1_rec_kernel(eps_ref, delta_ref, p_ref, w_ref, b_ref, o_ref):
    """ReccurrentBlock (floor(x*eps), clamp >delta) fused into conv1 matmul+bias+ReLU."""
    eps = eps_ref[...]        # (1, 1) f32
    delta = delta_ref[...]    # (1, 1) f32
    x = jnp.floor(p_ref[...] * eps)
    x = jnp.where(x > delta, delta, x)          # values are small integers -> exact in bf16
    y = jnp.dot(x.astype(jnp.bfloat16), w_ref[...],
                preferred_element_type=jnp.float32)
    o_ref[...] = jnp.maximum(y + b_ref[...], 0.0)


def _conv_relu_kernel(p_ref, w_ref, b_ref, o_ref):
    """im2col conv as matmul + bias + ReLU (bf16 MXU operands, f32 accumulate)."""
    y = jnp.dot(p_ref[...].astype(jnp.bfloat16), w_ref[...],
                preferred_element_type=jnp.float32)
    o_ref[...] = jnp.maximum(y + b_ref[...], 0.0)


def _head_kernel(p3_ref, w3_ref, b3_ref, w1_ref, b1_ref, w2_ref, b2_ref, o_ref):
    """Fused head: conv3(+bias,ReLU) + flatten + fc1(+bias,ReLU) + fc2(+bias).

    p3_ref: (P=9, B, K3=800)  conv3 im2col patches, one slab per output pixel.
    w3_ref: (K3, C3=64) bf16, b3_ref: (1, C3) f32.
    w1_ref: (P, C3, N1=1024) bf16 (fc1 weight, rows indexed (pixel, channel)),
    b1_ref: (1, N1) f32.  w2_ref: (N1, N2=12) bf16, b2_ref: (1, N2) f32.
    """
    nb = o_ref.shape[0]
    n1 = w1_ref.shape[2]
    w3 = w3_ref[...]
    b3 = b3_ref[...]
    h = jnp.zeros((nb, n1), jnp.float32)
    for p in range(p3_ref.shape[0]):            # static unroll over the 9 output pixels
        y = jnp.dot(p3_ref[p].astype(jnp.bfloat16), w3,
                    preferred_element_type=jnp.float32)
        y = jnp.maximum(y + b3, 0.0)            # conv3 ReLU
        h = h + jnp.dot(y.astype(jnp.bfloat16), w1_ref[p],
                        preferred_element_type=jnp.float32)
    h = jnp.maximum(h + b1_ref[...], 0.0)       # fc1 ReLU
    out = jnp.dot(h.astype(jnp.bfloat16), w2_ref[...],
                  preferred_element_type=jnp.float32) + b2_ref[...]
    o_ref[...] = out


# ----------------------------------------------------------------------------------
# Wrappers
# ----------------------------------------------------------------------------------
def _im2col(x_nhwc, ksize, stride):
    """Patch extraction glue (tiny tensors). Returns (B, Ho, Wo, k*k*C)."""
    B, H, W, C = x_nhwc.shape
    Ho = (H - ksize) // stride + 1
    Wo = (W - ksize) // stride + 1
    cols = []
    for kh in range(ksize):
        for kw in range(ksize):
            cols.append(x_nhwc[:, kh:kh + stride * (Ho - 1) + 1:stride,
                               kw:kw + stride * (Wo - 1) + 1:stride, :])
    return jnp.concatenate(cols, axis=-1), Ho, Wo


def _tile_rows(M, num_tiles=2):
    """Row tile (multiple of 8) giving `num_tiles` grid steps; returns (tm, Mp)."""
    tm = max(8, ((M + num_tiles - 1) // num_tiles + 7) // 8 * 8)
    Mp = ((M + tm - 1) // tm) * tm
    return tm, Mp


def conv_relu(x_nhwc, w, b, rec=None):
    """conv5x5 stride2 (no padding) + bias + ReLU via im2col matmul in Pallas.

    If `rec` = (eps, delta) is given, the ReccurrentBlock is applied elementwise to the
    patches inside the kernel (equivalent to applying it to the raw input, since im2col
    only replicates elements).
    """
    B, H, W, C = x_nhwc.shape
    patches, Ho, Wo = _im2col(x_nhwc, 5, 2)
    M = B * Ho * Wo
    K = patches.shape[-1]
    N = w.shape[1]
    p2d = patches.reshape(M, K)
    tm, Mp = _tile_rows(M)
    if Mp != M:
        p2d = jnp.pad(p2d, ((0, Mp - M), (0, 0)))
    cp = pltpu.CompilerParams(dimension_semantics=("parallel",))
    if rec is not None:
        eps, delta = rec
        out = pl.pallas_call(
            _conv1_rec_kernel,
            out_shape=jax.ShapeDtypeStruct((Mp, N), jnp.float32),
            grid=(Mp // tm,),
            in_specs=[
                pl.BlockSpec((1, 1), lambda i: (0, 0)),       # eps
                pl.BlockSpec((1, 1), lambda i: (0, 0)),       # delta
                pl.BlockSpec((tm, K), lambda i: (i, 0)),      # patches
                pl.BlockSpec((K, N), lambda i: (0, 0)),       # weight (bf16)
                pl.BlockSpec((1, N), lambda i: (0, 0)),       # bias
            ],
            out_specs=pl.BlockSpec((tm, N), lambda i: (i, 0)),
            compiler_params=cp,
        )(eps, delta, p2d, w, b)
    else:
        out = pl.pallas_call(
            _conv_relu_kernel,
            out_shape=jax.ShapeDtypeStruct((Mp, N), jnp.float32),
            grid=(Mp // tm,),
            in_specs=[
                pl.BlockSpec((tm, K), lambda i: (i, 0)),
                pl.BlockSpec((K, N), lambda i: (0, 0)),
                pl.BlockSpec((1, N), lambda i: (0, 0)),
            ],
            out_specs=pl.BlockSpec((tm, N), lambda i: (i, 0)),
            compiler_params=cp,
        )(p2d, w, b)
    return out[:M].reshape(B, Ho, Wo, N)


def head_forward(h2_nhwc, params):
    """conv3 + ReLU + flatten + fc1 + ReLU + (dropout=identity) + fc2, one pallas_call."""
    B = h2_nhwc.shape[0]
    patches, Ho, Wo = _im2col(h2_nhwc, 5, 2)                 # (B, 3, 3, 800)
    P = Ho * Wo
    K3 = patches.shape[-1]
    p3 = jnp.transpose(patches, (1, 2, 0, 3)).reshape(P, B, K3)   # (9, B, 800)
    w3, b3 = params["conv3_w"], params["conv3_b"]
    w1, b1 = params["fc1_w"], params["fc1_b"]
    w2, b2 = params["fc2_w"], params["fc2_b"]
    N2 = w2.shape[1]
    return pl.pallas_call(
        _head_kernel,
        out_shape=jax.ShapeDtypeStruct((B, N2), jnp.float32),
        grid=(1,),
        in_specs=[
            pl.BlockSpec(p3.shape, lambda i: (0, 0, 0)),
            pl.BlockSpec(w3.shape, lambda i: (0, 0)),
            pl.BlockSpec(b3.shape, lambda i: (0, 0)),
            pl.BlockSpec(w1.shape, lambda i: (0, 0, 0)),
            pl.BlockSpec(b1.shape, lambda i: (0, 0)),
            pl.BlockSpec(w2.shape, lambda i: (0, 0)),
            pl.BlockSpec(b2.shape, lambda i: (0, 0)),
        ],
        out_specs=pl.BlockSpec((B, N2), lambda i: (0, 0)),
        compiler_params=pltpu.CompilerParams(dimension_semantics=("arbitrary",)),
    )(p3, w3, b3, w1, b1, w2, b2)


def conv2d_adaptive_recurrence_forward(params, x_nchw):
    """Forward pass matching Conv2DAdaptiveRecurrence (in_size=1, out_size=12, width=50)."""
    x_nhwc = jnp.transpose(x_nchw, (0, 2, 3, 1))             # NCHW -> NHWC (C=1)
    # ReccurrentBlock fused into conv1 (5x5, stride 2) + ReLU
    h1 = conv_relu(x_nhwc, params["conv1_w"], params["conv1_b"],
                   rec=(params["rec_eps"], params["rec_delta"]))   # (B, 23, 23, 16)
    # conv2 (5x5, stride 2) + ReLU
    h2 = conv_relu(h1, params["conv2_w"], params["conv2_b"])       # (B, 10, 10, 32)
    # conv3 + ReLU + flatten + fc1 + ReLU + fc2 (fused head kernel)
    logits = head_forward(h2, params)                              # (B, 12)
    return logits


# ----------------------------------------------------------------------------------
# Deterministic parameter construction (synthetic; matches module shapes/init scheme)
# ----------------------------------------------------------------------------------
def init_params(key, in_size=1, out_size=12, width=50, eps=10.0, delta=10.0):
    assert width == 50, "width=50 -> hidden_out=576 (input spatial 50x50)"
    keys = jax.random.split(key, 16)

    def _uniform(k, shape, fan_in):
        bound = 1.0 / math.sqrt(fan_in)
        return jax.random.uniform(k, shape, jnp.float32, -bound, bound)

    params = {}
    # conv1: Conv2d(in_size, 16, 5, 2) — im2col weight layout (k*k*cin, cout)
    params["conv1_w"] = _uniform(keys[0], (25 * in_size, 16), 25 * in_size).astype(jnp.bfloat16)
    params["conv1_b"] = _uniform(keys[1], (1, 16), 25 * in_size)
    # conv2: Conv2d(16, 32, 5, 2)
    params["conv2_w"] = _uniform(keys[2], (25 * 16, 32), 25 * 16).astype(jnp.bfloat16)
    params["conv2_b"] = _uniform(keys[3], (1, 32), 25 * 16)
    # conv3: Conv2d(32, 64, 5, 2)
    params["conv3_w"] = _uniform(keys[4], (25 * 32, 64), 25 * 32).astype(jnp.bfloat16)
    params["conv3_b"] = _uniform(keys[5], (1, 64), 25 * 32)
    # fc1: Linear(576, 1024); rows indexed (output-pixel p, channel c) of conv3 output
    # (a fixed permutation of PyTorch's NCHW flatten order — equivalent for synthetic init).
    params["fc1_w"] = _uniform(keys[6], (9, 64, 1024), 576).astype(jnp.bfloat16)
    params["fc1_b"] = _uniform(keys[7], (1, 1024), 576)
    # fc2: Linear(1024, out_size)
    params["fc2_w"] = _uniform(keys[8], (1024, out_size), 1024).astype(jnp.bfloat16)
    params["fc2_b"] = _uniform(keys[9], (1, out_size), 1024)
    # ReccurrentBlock parameters (constant-initialized, as in the PyTorch module)
    params["rec_eps"] = jnp.full((1, 1), eps, jnp.float32)
    params["rec_delta"] = jnp.full((1, 1), delta, jnp.float32)
    return params


# ----------------------------------------------------------------------------------
if __name__ == "__main__":
    key = jax.random.PRNGKey(0)
    pkey, xkey = jax.random.split(key)
    params = init_params(pkey, in_size=1, out_size=12, width=50, eps=10.0, delta=10.0)

    # PyTorch-style NCHW input: batch=2, channels=in_size=1, spatial=50x50 (width=50)
    x = jax.random.normal(xkey, (2, 1, 50, 50), jnp.float32)

    fwd = jax.jit(lambda inp: conv2d_adaptive_recurrence_forward(params, inp))
    out = jax.block_until_ready(fwd(x))
    assert out.shape == (2, 12), out.shape
    print("KERNEL_OK")
</pallas_src>

<mosaic_0001>
module attributes {stable_mosaic.version = 11 : i64} {
  func.func @_conv1_rec_kernel(%arg0: i32, %arg1: memref<1x1xf32, #tpu.memory_space<vmem>>, %arg2: memref<1x1xf32, #tpu.memory_space<vmem>>, %arg3: memref<536x25xf32, #tpu.memory_space<vmem>>, %arg4: memref<25x16xbf16, #tpu.memory_space<vmem>>, %arg5: memref<1x16xf32, #tpu.memory_space<vmem>>, %arg6: memref<536x16xf32, #tpu.memory_space<vmem>>) attributes {dimension_semantics = [#tpu.dimension_semantics<parallel>], iteration_bounds = array<i64: 2>, scalar_prefetch = 0 : i64, scratch_operands = 0 : i64, tpu.core_type = #tpu.core_type<tc>, window_params = [{pipeline_mode = #tpu.pipeline_mode<synchronous>, transform_indices = @transform_0, window_bounds = array<i64: 1, 1>}, {pipeline_mode = #tpu.pipeline_mode<synchronous>, transform_indices = @transform_1, window_bounds = array<i64: 1, 1>}, {transform_indices = @transform_2, window_bounds = array<i64: 536, 25>}, {pipeline_mode = #tpu.pipeline_mode<synchronous>, transform_indices = @transform_3, window_bounds = array<i64: 25, 16>}, {pipeline_mode = #tpu.pipeline_mode<synchronous>, transform_indices = @transform_4, window_bounds = array<i64: 1, 16>}, {transform_indices = @transform_5, window_bounds = array<i64: 536, 16>}]} {
    %c0 = arith.constant 0 : index
    %c0_0 = arith.constant 0 : index
    %0 = vector.load %arg1[%c0, %c0_0] : memref<1x1xf32, #tpu.memory_space<vmem>>, vector<1x1xf32>
    %c0_1 = arith.constant 0 : index
    %c0_2 = arith.constant 0 : index
    %1 = vector.load %arg2[%c0_1, %c0_2] : memref<1x1xf32, #tpu.memory_space<vmem>>, vector<1x1xf32>
    %c0_3 = arith.constant 0 : index
    %c0_4 = arith.constant 0 : index
    %2 = vector.load %arg3[%c0_3, %c0_4] : memref<536x25xf32, #tpu.memory_space<vmem>>, vector<536x25xf32>
    %3 = vector.broadcast %0 : vector<1x1xf32> to vector<536x25xf32>
    %4 = arith.mulf %2, %3 : vector<536x25xf32>
    %5 = math.floor %4 : vector<536x25xf32>
    %6 = vector.broadcast %1 : vector<1x1xf32> to vector<536x25xf32>
    %7 = arith.cmpf ogt, %5, %6 : vector<536x25xf32>
    %8 = vector.shape_cast %1 : vector<1x1xf32> to vector<1x1xf32>
    %9 = vector.broadcast %8 : vector<1x1xf32> to vector<536x25xf32>
    %10 = arith.select %7, %9, %5 : vector<536x25xi1>, vector<536x25xf32>
    %11 = arith.truncf %10 : vector<536x25xf32> to vector<536x25xbf16>
    %c0_5 = arith.constant 0 : index
    %c0_6 = arith.constant 0 : index
    %12 = vector.load %arg4[%c0_5, %c0_6] : memref<25x16xbf16, #tpu.memory_space<vmem>>, vector<25x16xbf16>
    %cst = arith.constant dense<0.000000e+00> : vector<536x16xf32>
    %13 = tpu.matmul %11, %12, %cst {dimension_numbers = #tpu.dot_dimension_numbers<[1], [0], [0], [1], [0, 0, 1, 1], [], []>} : vector<536x25xbf16>, vector<25x16xbf16>, vector<536x16xf32> -> vector<536x16xf32>
    %c0_7 = arith.constant 0 : index
    %c0_8 = arith.constant 0 : index
    %14 = vector.load %arg5[%c0_7, %c0_8] : memref<1x16xf32, #tpu.memory_space<vmem>>, vector<1x16xf32>
    %15 = vector.broadcast %14 : vector<1x16xf32> to vector<536x16xf32>
    %16 = arith.addf %13, %15 : vector<536x16xf32>
    %cst_9 = arith.constant 0.000000e+00 : f32
    %17 = vector.broadcast %cst_9 : f32 to vector<536x16xf32>
    %18 = arith.maximumf %16, %17 : vector<536x16xf32>
    %c0_10 = arith.constant 0 : index
    %c0_11 = arith.constant 0 : index
    %19 = vector.load %arg6[%c0_10, %c0_11] : memref<536x16xf32, #tpu.memory_space<vmem>>, vector<536x16xf32>
    tpu.vector_store %arg6[%c0_10, %c0_11], %18 {strides = array<i32>} : memref<536x16xf32, #tpu.memory_space<vmem>>, vector<536x16xf32>,
    return
  }
  func.func @transform_0(%arg0: i32) -> (i32, i32) {
    %c0_i32 = arith.constant 0 : i32
    %c0_i32_0 = arith.constant 0 : i32
    %c0_i32_1 = arith.constant 0 : i32
    return %c0_i32, %c0_i32_0 : i32, i32
  }
  func.func @transform_1(%arg0: i32) -> (i32, i32) {
    %c0_i32 = arith.constant 0 : i32
    %c0_i32_0 = arith.constant 0 : i32
    %c0_i32_1 = arith.constant 0 : i32
    return %c0_i32, %c0_i32_0 : i32, i32
  }
  func.func @transform_2(%arg0: i32) -> (i32, i32) {
    %c0_i32 = arith.constant 0 : i32
    %c0_i32_0 = arith.constant 0 : i32
    return %arg0, %c0_i32 : i32, i32
  }
  func.func @transform_3(%arg0: i32) -> (i32, i32) {
    %c0_i32 = arith.constant 0 : i32
    %c0_i32_0 = arith.constant 0 : i32
    %c0_i32_1 = arith.constant 0 : i32
    return %c0_i32, %c0_i32_0 : i32, i32
  }
  func.func @transform_4(%arg0: i32) -> (i32, i32) {
    %c0_i32 = arith.constant 0 : i32
    %c0_i32_0 = arith.constant 0 : i32
    %c0_i32_1 = arith.constant 0 : i32
    return %c0_i32, %c0_i32_0 : i32, i32
  }
  func.func @transform_5(%arg0: i32) -> (i32, i32) {
    %c0_i32 = arith.constant 0 : i32
    %c0_i32_0 = arith.constant 0 : i32
    return %arg0, %c0_i32 : i32, i32
  }
}

module attributes {stable_mosaic.version = 11 : i64} {
  func.func @_conv_relu_kernel(%arg0: i32, %arg1: memref<104x400xf32, #tpu.memory_space<vmem>>, %arg2: memref<400x32xbf16, #tpu.memory_space<vmem>>, %arg3: memref<1x32xf32, #tpu.memory_space<vmem>>, %arg4: memref<104x32xf32, #tpu.memory_space<vmem>>) attributes {dimension_semantics = [#tpu.dimension_semantics<parallel>], iteration_bounds = array<i64: 2>, scalar_prefetch = 0 : i64, scratch_operands = 0 : i64, tpu.core_type = #tpu.core_type<tc>, window_params = [{transform_indices = @transform_0, window_bounds = array<i64: 104, 400>}, {pipeline_mode = #tpu.pipeline_mode<synchronous>, transform_indices = @transform_1, window_bounds = array<i64: 400, 32>}, {pipeline_mode = #tpu.pipeline_mode<synchronous>, transform_indices = @transform_2, window_bounds = array<i64: 1, 32>}, {transform_indices = @transform_3, window_bounds = array<i64: 104, 32>}]} {
    %c0 = arith.constant 0 : index
    %c0_0 = arith.constant 0 : index
    %0 = vector.load %arg1[%c0, %c0_0] : memref<104x400xf32, #tpu.memory_space<vmem>>, vector<104x400xf32>
    %1 = arith.truncf %0 : vector<104x400xf32> to vector<104x400xbf16>
    %c0_1 = arith.constant 0 : index
    %c0_2 = arith.constant 0 : index
    %2 = vector.load %arg2[%c0_1, %c0_2] : memref<400x32xbf16, #tpu.memory_space<vmem>>, vector<400x32xbf16>
    %cst = arith.constant dense<0.000000e+00> : vector<104x32xf32>
    %3 = tpu.matmul %1, %2, %cst {dimension_numbers = #tpu.dot_dimension_numbers<[1], [0], [0], [1], [0, 0, 1, 1], [], []>} : vector<104x400xbf16>, vector<400x32xbf16>, vector<104x32xf32> -> vector<104x32xf32>
    %c0_3 = arith.constant 0 : index
    %c0_4 = arith.constant 0 : index
    %4 = vector.load %arg3[%c0_3, %c0_4] : memref<1x32xf32, #tpu.memory_space<vmem>>, vector<1x32xf32>
    %5 = vector.broadcast %4 : vector<1x32xf32> to vector<104x32xf32>
    %6 = arith.addf %3, %5 : vector<104x32xf32>
    %cst_5 = arith.constant 0.000000e+00 : f32
    %7 = vector.broadcast %cst_5 : f32 to vector<104x32xf32>
    %8 = arith.maximumf %6, %7 : vector<104x32xf32>
    %c0_6 = arith.constant 0 : index
    %c0_7 = arith.constant 0 : index
    %9 = vector.load %arg4[%c0_6, %c0_7] : memref<104x32xf32, #tpu.memory_space<vmem>>, vector<104x32xf32>
    tpu.vector_store %arg4[%c0_6, %c0_7], %8 {strides = array<i32>} : memref<104x32xf32, #tpu.memory_space<vmem>>, vector<104x32xf32>,
    return
  }
  func.func @transform_0(%arg0: i32) -> (i32, i32) {
    %c0_i32 = arith.constant 0 : i32
    %c0_i32_0 = arith.constant 0 : i32
    return %arg0, %c0_i32 : i32, i32
  }
  func.func @transform_1(%arg0: i32) -> (i32, i32) {
    %c0_i32 = arith.constant 0 : i32
    %c0_i32_0 = arith.constant 0 : i32
    %c0_i32_1 = arith.constant 0 : i32
    return %c0_i32, %c0_i32_0 : i32, i32
  }
  func.func @transform_2(%arg0: i32) -> (i32, i32) {
    %c0_i32 = arith.constant 0 : i32
    %c0_i32_0 = arith.constant 0 : i32
    %c0_i32_1 = arith.constant 0 : i32
    return %c0_i32, %c0_i32_0 : i32, i32
  }
  func.func @transform_3(%arg0: i32) -> (i32, i32) {
    %c0_i32 = arith.constant 0 : i32
    %c0_i32_0 = arith.constant 0 : i32
    return %arg0, %c0_i32 : i32, i32
  }
}

module attributes {stable_mosaic.version = 11 : i64} {
  func.func @_head_kernel(%arg0: i32, %arg1: memref<9x2x800xf32, #tpu.memory_space<vmem>>, %arg2: memref<800x64xbf16, #tpu.memory_space<vmem>>, %arg3: memref<1x64xf32, #tpu.memory_space<vmem>>, %arg4: memref<9x64x1024xbf16, #tpu.memory_space<vmem>>, %arg5: memref<1x1024xf32, #tpu.memory_space<vmem>>, %arg6: memref<1024x12xbf16, #tpu.memory_space<vmem>>, %arg7: memref<1x12xf32, #tpu.memory_space<vmem>>, %arg8: memref<2x12xf32, #tpu.memory_space<vmem>>) attributes {dimension_semantics = [#tpu.dimension_semantics<arbitrary>], iteration_bounds = array<i64: 1>, scalar_prefetch = 0 : i64, scratch_operands = 0 : i64, tpu.core_type = #tpu.core_type<tc>, window_params = [{pipeline_mode = #tpu.pipeline_mode<synchronous>, transform_indices = @transform_0, window_bounds = array<i64: 9, 2, 800>}, {pipeline_mode = #tpu.pipeline_mode<synchronous>, transform_indices = @transform_1, window_bounds = array<i64: 800, 64>}, {pipeline_mode = #tpu.pipeline_mode<synchronous>, transform_indices = @transform_2, window_bounds = array<i64: 1, 64>}, {pipeline_mode = #tpu.pipeline_mode<synchronous>, transform_indices = @transform_3, window_bounds = array<i64: 9, 64, 1024>}, {pipeline_mode = #tpu.pipeline_mode<synchronous>, transform_indices = @transform_4, window_bounds = array<i64: 1, 1024>}, {pipeline_mode = #tpu.pipeline_mode<synchronous>, transform_indices = @transform_5, window_bounds = array<i64: 1024, 12>}, {pipeline_mode = #tpu.pipeline_mode<synchronous>, transform_indices = @transform_6, window_bounds = array<i64: 1, 12>}, {pipeline_mode = #tpu.pipeline_mode<synchronous>, transform_indices = @transform_7, window_bounds = array<i64: 2, 12>}]} {
    %c0 = arith.constant 0 : index
    %c0_0 = arith.constant 0 : index
    %0 = vector.load %arg2[%c0, %c0_0] : memref<800x64xbf16, #tpu.memory_space<vmem>>, vector<800x64xbf16>
    %c0_1 = arith.constant 0 : index
    %c0_2 = arith.constant 0 : index
    %1 = vector.load %arg3[%c0_1, %c0_2] : memref<1x64xf32, #tpu.memory_space<vmem>>, vector<1x64xf32>
    %cst = arith.constant 0.000000e+00 : f32
    %2 = vector.broadcast %cst : f32 to vector<2x1024xf32>
    %c0_3 = arith.constant 0 : index
    %c0_4 = arith.constant 0 : index
    %c0_5 = arith.constant 0 : index
    %3 = vector.load %arg1[%c0_3, %c0_4, %c0_5] : memref<9x2x800xf32, #tpu.memory_space<vmem>>, vector<1x2x800xf32>
    %4 = vector.shape_cast %3 : vector<1x2x800xf32> to vector<2x800xf32>
    %5 = arith.truncf %4 : vector<2x800xf32> to vector<2x800xbf16>
    %cst_6 = arith.constant dense<0.000000e+00> : vector<2x64xf32>
    %6 = tpu.matmul %5, %0, %cst_6 {dimension_numbers = #tpu.dot_dimension_numbers<[1], [0], [0], [1], [0, 0, 1, 1], [], []>} : vector<2x800xbf16>, vector<800x64xbf16>, vector<2x64xf32> -> vector<2x64xf32>
    %7 = vector.broadcast %1 : vector<1x64xf32> to vector<2x64xf32>
    %8 = arith.addf %6, %7 : vector<2x64xf32>
    %cst_7 = arith.constant 0.000000e+00 : f32
    %9 = vector.broadcast %cst_7 : f32 to vector<2x64xf32>
    %10 = arith.maximumf %8, %9 : vector<2x64xf32>
    %11 = arith.truncf %10 : vector<2x64xf32> to vector<2x64xbf16>
    %c0_8 = arith.constant 0 : index
    %c0_9 = arith.constant 0 : index
    %c0_10 = arith.constant 0 : index
    %12 = vector.load %arg4[%c0_8, %c0_9, %c0_10] : memref<9x64x1024xbf16, #tpu.memory_space<vmem>>, vector<1x64x1024xbf16>
    %13 = vector.shape_cast %12 : vector<1x64x1024xbf16> to vector<64x1024xbf16>
    %cst_11 = arith.constant dense<0.000000e+00> : vector<2x1024xf32>
    %14 = tpu.matmul %11, %13, %cst_11 {dimension_numbers = #tpu.dot_dimension_numbers<[1], [0], [0], [1], [0, 0, 1, 1], [], []>} : vector<2x64xbf16>, vector<64x1024xbf16>, vector<2x1024xf32> -> vector<2x1024xf32>
    %15 = arith.addf %2, %14 : vector<2x1024xf32>
    %c1 = arith.constant 1 : index
    %c0_12 = arith.constant 0 : index
    %c0_13 = arith.constant 0 : index
    %16 = vector.load %arg1[%c1, %c0_12, %c0_13] : memref<9x2x800xf32, #tpu.memory_space<vmem>>, vector<1x2x800xf32>
    %17 = vector.shape_cast %16 : vector<1x2x800xf32> to vector<2x800xf32>
    %18 = arith.truncf %17 : vector<2x800xf32> to vector<2x800xbf16>
    %cst_14 = arith.constant dense<0.000000e+00> : vector<2x64xf32>
    %19 = tpu.matmul %18, %0, %cst_14 {dimension_numbers = #tpu.dot_dimension_numbers<[1], [0], [0], [1], [0, 0, 1, 1], [], []>} : vector<2x800xbf16>, vector<800x64xbf16>, vector<2x64xf32> -> vector<2x64xf32>
    %20 = vector.broadcast %1 : vector<1x64xf32> to vector<2x64xf32>
    %21 = arith.addf %19, %20 : vector<2x64xf32>
    %cst_15 = arith.constant 0.000000e+00 : f32
    %22 = vector.broadcast %cst_15 : f32 to vector<2x64xf32>
    %23 = arith.maximumf %21, %22 : vector<2x64xf32>
    %24 = arith.truncf %23 : vector<2x64xf32> to vector<2x64xbf16>
    %c1_16 = arith.constant 1 : index
    %c0_17 = arith.constant 0 : index
    %c0_18 = arith.constant 0 : index
    %25 = vector.load %arg4[%c1_16, %c0_17, %c0_18] : memref<9x64x1024xbf16, #tpu.memory_space<vmem>>, vector<1x64x1024xbf16>
    %26 = vector.shape_cast %25 : vector<1x64x1024xbf16> to vector<64x1024xbf16>
    %cst_19 = arith.constant dense<0.000000e+00> : vector<2x1024xf32>
    %27 = tpu.matmul %24, %26, %cst_19 {dimension_numbers = #tpu.dot_dimension_numbers<[1], [0], [0], [1], [0, 0, 1, 1], [], []>} : vector<2x64xbf16>, vector<64x1024xbf16>, vector<2x1024xf32> -> vector<2x1024xf32>
    %28 = arith.addf %15, %27 : vector<2x1024xf32>
    %c2 = arith.constant 2 : index
    %c0_20 = arith.constant 0 : index
    %c0_21 = arith.constant 0 : index
    %29 = vector.load %arg1[%c2, %c0_20, %c0_21] : memref<9x2x800xf32, #tpu.memory_space<vmem>>, vector<1x2x800xf32>
    %30 = vector.shape_cast %29 : vector<1x2x800xf32> to vector<2x800xf32>
    %31 = arith.truncf %30 : vector<2x800xf32> to vector<2x800xbf16>
    %cst_22 = arith.constant dense<0.000000e+00> : vector<2x64xf32>
    %32 = tpu.matmul %31, %0, %cst_22 {dimension_numbers = #tpu.dot_dimension_numbers<[1], [0], [0], [1], [0, 0, 1, 1], [], []>} : vector<2x800xbf16>, vector<800x64xbf16>, vector<2x64xf32> -> vector<2x64xf32>
    %33 = vector.broadcast %1 : vector<1x64xf32> to vector<2x64xf32>
    %34 = arith.addf %32, %33 : vector<2x64xf32>
    %cst_23 = arith.constant 0.000000e+00 : f32
    %35 = vector.broadcast %cst_23 : f32 to vector<2x64xf32>
    %36 = arith.maximumf %34, %35 : vector<2x64xf32>
    %37 = arith.truncf %36 : vector<2x64xf32> to vector<2x64xbf16>
    %c2_24 = arith.constant 2 : index
    %c0_25 = arith.constant 0 : index
    %c0_26 = arith.constant 0 : index
    %38 = vector.load %arg4[%c2_24, %c0_25, %c0_26] : memref<9x64x1024xbf16, #tpu.memory_space<vmem>>, vector<1x64x1024xbf16>
    %39 = vector.shape_cast %38 : vector<1x64x1024xbf16> to vector<64x1024xbf16>
    %cst_27 = arith.constant dense<0.000000e+00> : vector<2x1024xf32>
    %40 = tpu.matmul %37, %39, %cst_27 {dimension_numbers = #tpu.dot_dimension_numbers<[1], [0], [0], [1], [0, 0, 1, 1], [], []>} : vector<2x64xbf16>, vector<64x1024xbf16>, vector<2x1024xf32> -> vector<2x1024xf32>
    %41 = arith.addf %28, %40 : vector<2x1024xf32>
    %c3 = arith.constant 3 : index
    %c0_28 = arith.constant 0 : index
    %c0_29 = arith.constant 0 : index
    %42 = vector.load %arg1[%c3, %c0_28, %c0_29] : memref<9x2x800xf32, #tpu.memory_space<vmem>>, vector<1x2x800xf32>
    %43 = vector.shape_cast %42 : vector<1x2x800xf32> to vector<2x800xf32>
    %44 = arith.truncf %43 : vector<2x800xf32> to vector<2x800xbf16>
    %cst_30 = arith.constant dense<0.000000e+00> : vector<2x64xf32>
    %45 = tpu.matmul %44, %0, %cst_30 {dimension_numbers = #tpu.dot_dimension_numbers<[1], [0], [0], [1], [0, 0, 1, 1], [], []>} : vector<2x800xbf16>, vector<800x64xbf16>, vector<2x64xf32> -> vector<2x64xf32>
    %46 = vector.broadcast %1 : vector<1x64xf32> to vector<2x64xf32>
    %47 = arith.addf %45, %46 : vector<2x64xf32>
    %cst_31 = arith.constant 0.000000e+00 : f32
    %48 = vector.broadcast %cst_31 : f32 to vector<2x64xf32>
    %49 = arith.maximumf %47, %48 : vector<2x64xf32>
    %50 = arith.truncf %49 : vector<2x64xf32> to vector<2x64xbf16>
    %c3_32 = arith.constant 3 : index
    %c0_33 = arith.constant 0 : index
    %c0_34 = arith.constant 0 : index
    %51 = vector.load %arg4[%c3_32, %c0_33, %c0_34] : memref<9x64x1024xbf16, #tpu.memory_space<vmem>>, vector<1x64x1024xbf16>
    %52 = vector.shape_cast %51 : vector<1x64x1024xbf16> to vector<64x1024xbf16>
    %cst_35 = arith.constant dense<0.000000e+00> : vector<2x1024xf32>
    %53 = tpu.matmul %50, %52, %cst_35 {dimension_numbers = #tpu.dot_dimension_numbers<[1], [0], [0], [1], [0, 0, 1, 1], [], []>} : vector<2x64xbf16>, vector<64x1024xbf16>, vector<2x1024xf32> -> vector<2x1024xf32>
    %54 = arith.addf %41, %53 : vector<2x1024xf32>
    %c4 = arith.constant 4 : index
    %c0_36 = arith.constant 0 : index
    %c0_37 = arith.constant 0 : index
    %55 = vector.load %arg1[%c4, %c0_36, %c0_37] : memref<9x2x800xf32, #tpu.memory_space<vmem>>, vector<1x2x800xf32>
    %56 = vector.shape_cast %55 : vector<1x2x800xf32> to vector<2x800xf32>
    %57 = arith.truncf %56 : vector<2x800xf32> to vector<2x800xbf16>
    %cst_38 = arith.constant dense<0.000000e+00> : vector<2x64xf32>
    %58 = tpu.matmul %57, %0, %cst_38 {dimension_numbers = #tpu.dot_dimension_numbers<[1], [0], [0], [1], [0, 0, 1, 1], [], []>} : vector<2x800xbf16>, vector<800x64xbf16>, vector<2x64xf32> -> vector<2x64xf32>
    %59 = vector.broadcast %1 : vector<1x64xf32> to vector<2x64xf32>
    %60 = arith.addf %58, %59 : vector<2x64xf32>
    %cst_39 = arith.constant 0.000000e+00 : f32
    %61 = vector.broadcast %cst_39 : f32 to vector<2x64xf32>
    %62 = arith.maximumf %60, %61 : vector<2x64xf32>
    %63 = arith.truncf %62 : vector<2x64xf32> to vector<2x64xbf16>
    %c4_40 = arith.constant 4 : index
    %c0_41 = arith.constant 0 : index
    %c0_42 = arith.constant 0 : index
    %64 = vector.load %arg4[%c4_40, %c0_41, %c0_42] : memref<9x64x1024xbf16, #tpu.memory_space<vmem>>, vector<1x64x1024xbf16>
    %65 = vector.shape_cast %64 : vector<1x64x1024xbf16> to vector<64x1024xbf16>
    %cst_43 = arith.constant dense<0.000000e+00> : vector<2x1024xf32>
    %66 = tpu.matmul %63, %65, %cst_43 {dimension_numbers = #tpu.dot_dimension_numbers<[1], [0], [0], [1], [0, 0, 1, 1], [], []>} : vector<2x64xbf16>, vector<64x1024xbf16>, vector<2x1024xf32> -> vector<2x1024xf32>
    %67 = arith.addf %54, %66 : vector<2x1024xf32>
    %c5 = arith.constant 5 : index
    %c0_44 = arith.constant 0 : index
    %c0_45 = arith.constant 0 : index
    %68 = vector.load %arg1[%c5, %c0_44, %c0_45] : memref<9x2x800xf32, #tpu.memory_space<vmem>>, vector<1x2x800xf32>
    %69 = vector.shape_cast %68 : vector<1x2x800xf32> to vector<2x800xf32>
    %70 = arith.truncf %69 : vector<2x800xf32> to vector<2x800xbf16>
    %cst_46 = arith.constant dense<0.000000e+00> : vector<2x64xf32>
    %71 = tpu.matmul %70, %0, %cst_46 {dimension_numbers = #tpu.dot_dimension_numbers<[1], [0], [0], [1], [0, 0, 1, 1], [], []>} : vector<2x800xbf16>, vector<800x64xbf16>, vector<2x64xf32> -> vector<2x64xf32>
    %72 = vector.broadcast %1 : vector<1x64xf32> to vector<2x64xf32>
    %73 = arith.addf %71, %72 : vector<2x64xf32>
    %cst_47 = arith.constant 0.000000e+00 : f32
    %74 = vector.broadcast %cst_47 : f32 to vector<2x64xf32>
    %75 = arith.maximumf %73, %74 : vector<2x64xf32>
    %76 = arith.truncf %75 : vector<2x64xf32> to vector<2x64xbf16>
    %c5_48 = arith.constant 5 : index
    %c0_49 = arith.constant 0 : index
    %c0_50 = arith.constant 0 : index
    %77 = vector.load %arg4[%c5_48, %c0_49, %c0_50] : memref<9x64x1024xbf16, #tpu.memory_space<vmem>>, vector<1x64x1024xbf16>
    %78 = vector.shape_cast %77 : vector<1x64x1024xbf16> to vector<64x1024xbf16>
    %cst_51 = arith.constant dense<0.000000e+00> : vector<2x1024xf32>
    %79 = tpu.matmul %76, %78, %cst_51 {dimension_numbers = #tpu.dot_dimension_numbers<[1], [0], [0], [1], [0, 0, 1, 1], [], []>} : vector<2x64xbf16>, vector<64x1024xbf16>, vector<2x1024xf32> -> vector<2x1024xf32>
    %80 = arith.addf %67, %79 : vector<2x1024xf32>
    %c6 = arith.constant 6 : index
    %c0_52 = arith.constant 0 : index
    %c0_53 = arith.constant 0 : index
    %81 = vector.load %arg1[%c6, %c0_52, %c0_53] : memref<9x2x800xf32, #tpu.memory_space<vmem>>, vector<1x2x800xf32>
    %82 = vector.shape_cast %81 : vector<1x2x800xf32> to vector<2x800xf32>
    %83 = arith.truncf %82 : vector<2x800xf32> to vector<2x800xbf16>
    %cst_54 = arith.constant dense<0.000000e+00> : vector<2x64xf32>
    %84 = tpu.matmul %83, %0, %cst_54 {dimension_numbers = #tpu.dot_dimension_numbers<[1], [0], [0], [1], [0, 0, 1, 1], [], []>} : vector<2x800xbf16>, vector<800x64xbf16>, vector<2x64xf32> -> vector<2x64xf32>
    %85 = vector.broadcast %1 : vector<1x64xf32> to vector<2x64xf32>
    %86 = arith.addf %84, %85 : vector<2x64xf32>
    %cst_55 = arith.constant 0.000000e+00 : f32
    %87 = vector.broadcast %cst_55 : f32 to vector<2x64xf32>
    %88 = arith.maximumf %86, %87 : vector<2x64xf32>
    %89 = arith.truncf %88 : vector<2x64xf32> to vector<2x64xbf16>
    %c6_56 = arith.constant 6 : index
    %c0_57 = arith.constant 0 : index
    %c0_58 = arith.constant 0 : index
    %90 = vector.load %arg4[%c6_56, %c0_57, %c0_58] : memref<9x64x1024xbf16, #tpu.memory_space<vmem>>, vector<1x64x1024xbf16>
    %91 = vector.shape_cast %90 : vector<1x64x1024xbf16> to vector<64x1024xbf16>
    %cst_59 = arith.constant dense<0.000000e+00> : vector<2x1024xf32>
    %92 = tpu.matmul %89, %91, %cst_59 {dimension_numbers = #tpu.dot_dimension_numbers<[1], [0], [0], [1], [0, 0, 1, 1], [], []>} : vector<2x64xbf16>, vector<64x1024xbf16>, vector<2x1024xf32> -> vector<2x1024xf32>
    %93 = arith.addf %80, %92 : vector<2x1024xf32>
    %c7 = arith.constant 7 : index
    %c0_60 = arith.constant 0 : index
    %c0_61 = arith.constant 0 : index
    %94 = vector.load %arg1[%c7, %c0_60, %c0_61] : memref<9x2x800xf32, #tpu.memory_space<vmem>>, vector<1x2x800xf32>
    %95 = vector.shape_cast %94 : vector<1x2x800xf32> to vector<2x800xf32>
    %96 = arith.truncf %95 : vector<2x800xf32> to vector<2x800xbf16>
    %cst_62 = arith.constant dense<0.000000e+00> : vector<2x64xf32>
    %97 = tpu.matmul %96, %0, %cst_62 {dimension_numbers = #tpu.dot_dimension_numbers<[1], [0], [0], [1], [0, 0, 1, 1], [], []>} : vector<2x800xbf16>, vector<800x64xbf16>, vector<2x64xf32> -> vector<2x64xf32>
    %98 = vector.broadcast %1 : vector<1x64xf32> to vector<2x64xf32>
    %99 = arith.addf %97, %98 : vector<2x64xf32>
    %cst_63 = arith.constant 0.000000e+00 : f32
    %100 = vector.broadcast %cst_63 : f32 to vector<2x64xf32>
    %101 = arith.maximumf %99, %100 : vector<2x64xf32>
    %102 = arith.truncf %101 : vector<2x64xf32> to vector<2x64xbf16>
    %c7_64 = arith.constant 7 : index
    %c0_65 = arith.constant 0 : index
    %c0_66 = arith.constant 0 : index
    %103 = vector.load %arg4[%c7_64, %c0_65, %c0_66] : memref<9x64x1024xbf16, #tpu.memory_space<vmem>>, vector<1x64x1024xbf16>
    %104 = vector.shape_cast %103 : vector<1x64x1024xbf16> to vector<64x1024xbf16>
    %cst_67 = arith.constant dense<0.000000e+00> : vector<2x1024xf32>
    %105 = tpu.matmul %102, %104, %cst_67 {dimension_numbers = #tpu.dot_dimension_numbers<[1], [0], [0], [1], [0, 0, 1, 1], [], []>} : vector<2x64xbf16>, vector<64x1024xbf16>, vector<2x1024xf32> -> vector<2x1024xf32>
    %106 = arith.addf %93, %105 : vector<2x1024xf32>
    %c8 = arith.constant 8 : index
    %c0_68 = arith.constant 0 : index
    %c0_69 = arith.constant 0 : index
    %107 = vector.load %arg1[%c8, %c0_68, %c0_69] : memref<9x2x800xf32, #tpu.memory_space<vmem>>, vector<1x2x800xf32>
    %108 = vector.shape_cast %107 : vector<1x2x800xf32> to vector<2x800xf32>
    %109 = arith.truncf %108 : vector<2x800xf32> to vector<2x800xbf16>
    %cst_70 = arith.constant dense<0.000000e+00> : vector<2x64xf32>
    %110 = tpu.matmul %109, %0, %cst_70 {dimension_numbers = #tpu.dot_dimension_numbers<[1], [0], [0], [1], [0, 0, 1, 1], [], []>} : vector<2x800xbf16>, vector<800x64xbf16>, vector<2x64xf32> -> vector<2x64xf32>
    %111 = vector.broadcast %1 : vector<1x64xf32> to vector<2x64xf32>
    %112 = arith.addf %110, %111 : vector<2x64xf32>
    %cst_71 = arith.constant 0.000000e+00 : f32
    %113 = vector.broadcast %cst_71 : f32 to vector<2x64xf32>
    %114 = arith.maximumf %112, %113 : vector<2x64xf32>
    %115 = arith.truncf %114 : vector<2x64xf32> to vector<2x64xbf16>
    %c8_72 = arith.constant 8 : index
    %c0_73 = arith.constant 0 : index
    %c0_74 = arith.constant 0 : index
    %116 = vector.load %arg4[%c8_72, %c0_73, %c0_74] : memref<9x64x1024xbf16, #tpu.memory_space<vmem>>, vector<1x64x1024xbf16>
    %117 = vector.shape_cast %116 : vector<1x64x1024xbf16> to vector<64x1024xbf16>
    %cst_75 = arith.constant dense<0.000000e+00> : vector<2x1024xf32>
    %118 = tpu.matmul %115, %117, %cst_75 {dimension_numbers = #tpu.dot_dimension_numbers<[1], [0], [0], [1], [0, 0, 1, 1], [], []>} : vector<2x64xbf16>, vector<64x1024xbf16>, vector<2x1024xf32> -> vector<2x1024xf32>
    %119 = arith.addf %106, %118 : vector<2x1024xf32>
    %c0_76 = arith.constant 0 : index
    %c0_77 = arith.constant 0 : index
    %120 = vector.load %arg5[%c0_76, %c0_77] : memref<1x1024xf32, #tpu.memory_space<vmem>>, vector<1x1024xf32>
    %121 = vector.broadcast %120 : vector<1x1024xf32> to vector<2x1024xf32>
    %122 = arith.addf %119, %121 : vector<2x1024xf32>
    %cst_78 = arith.constant 0.000000e+00 : f32
    %123 = vector.broadcast %cst_78 : f32 to vector<2x1024xf32>
    %124 = arith.maximumf %122, %123 : vector<2x1024xf32>
    %125 = arith.truncf %124 : vector<2x1024xf32> to vector<2x1024xbf16>
    %c0_79 = arith.constant 0 : index
    %c0_80 = arith.constant 0 : index
    %126 = vector.load %arg6[%c0_79, %c0_80] : memref<1024x12xbf16, #tpu.memory_space<vmem>>, vector<1024x12xbf16>
    %cst_81 = arith.constant dense<0.000000e+00> : vector<2x12xf32>
    %127 = tpu.matmul %125, %126, %cst_81 {dimension_numbers = #tpu.dot_dimension_numbers<[1], [0], [0], [1], [0, 0, 1, 1], [], []>} : vector<2x1024xbf16>, vector<1024x12xbf16>, vector<2x12xf32> -> vector<2x12xf32>
    %c0_82 = arith.constant 0 : index
    %c0_83 = arith.constant 0 : index
    %128 = vector.load %arg7[%c0_82, %c0_83] : memref<1x12xf32, #tpu.memory_space<vmem>>, vector<1x12xf32>
    %129 = vector.broadcast %128 : vector<1x12xf32> to vector<2x12xf32>
    %130 = arith.addf %127, %129 : vector<2x12xf32>
    %c0_84 = arith.constant 0 : index
    %c0_85 = arith.constant 0 : index
    %131 = vector.load %arg8[%c0_84, %c0_85] : memref<2x12xf32, #tpu.memory_space<vmem>>, vector<2x12xf32>
    tpu.vector_store %arg8[%c0_84, %c0_85], %130 {strides = array<i32>} : memref<2x12xf32, #tpu.memory_space<vmem>>, vector<2x12xf32>,
    return
  }
  func.func @transform_0(%arg0: i32) -> (i32, i32, i32) {
    %c0_i32 = arith.constant 0 : i32
    %c0_i32_0 = arith.constant 0 : i32
    %c0_i32_1 = arith.constant 0 : i32
    %c0_i32_2 = arith.constant 0 : i32
    return %c0_i32, %c0_i32_0, %c0_i32_1 : i32, i32, i32
  }
  func.func @transform_1(%arg0: i32) -> (i32, i32) {
    %c0_i32 = arith.constant 0 : i32
    %c0_i32_0 = arith.constant 0 : i32
    %c0_i32_1 = arith.constant 0 : i32
    return %c0_i32, %c0_i32_0 : i32, i32
  }
  func.func @transform_2(%arg0: i32) -> (i32, i32) {
    %c0_i32 = arith.constant 0 : i32
    %c0_i32_0 = arith.constant 0 : i32
    %c0_i32_1 = arith.constant 0 : i32
    return %c0_i32, %c0_i32_0 : i32, i32
  }
  func.func @transform_3(%arg0: i32) -> (i32, i32, i32) {
    %c0_i32 = arith.constant 0 : i32
    %c0_i32_0 = arith.constant 0 : i32
    %c0_i32_1 = arith.constant 0 : i32
    %c0_i32_2 = arith.constant 0 : i32
    return %c0_i32, %c0_i32_0, %c0_i32_1 : i32, i32, i32
  }
  func.func @transform_4(%arg0: i32) -> (i32, i32) {
    %c0_i32 = arith.constant 0 : i32
    %c0_i32_0 = arith.constant 0 : i32
    %c0_i32_1 = arith.constant 0 : i32
    return %c0_i32, %c0_i32_0 : i32, i32
  }
  func.func @transform_5(%arg0: i32) -> (i32, i32) {
    %c0_i32 = arith.constant 0 : i32
    %c0_i32_0 = arith.constant 0 : i32
    %c0_i32_1 = arith.constant 0 : i32
    return %c0_i32, %c0_i32_0 : i32, i32
  }
  func.func @transform_6(%arg0: i32) -> (i32, i32) {
    %c0_i32 = arith.constant 0 : i32
    %c0_i32_0 = arith.constant 0 : i32
    %c0_i32_1 = arith.constant 0 : i32
    return %c0_i32, %c0_i32_0 : i32, i32
  }
  func.func @transform_7(%arg0: i32) -> (i32, i32) {
    %c0_i32 = arith.constant 0 : i32
    %c0_i32_0 = arith.constant 0 : i32
    %c0_i32_1 = arith.constant 0 : i32
    return %c0_i32, %c0_i32_0 : i32, i32
  }
}

</mosaic_0001>

<bundles_post_ra>
// kernel: _lambda_.3
= control target key start
LH: loop header
LB: loop body
LE: loop exit
PB: predicated region body
PF: predicated region fallthrough
CT: control target
= control target key end

     0   :  { %s2230_s0 = inlined_call_operand.<no memory space> [shape: f32[1,1], index: 0, kind: input, shape index: {}, may-alias: {0,1}]   ;;  %s2231_s2 = inlined_call_operand.vmem [shape: f32[1072,25], index: 2, kind: input, shape index: {}]   ;;  %s2232_s3 = inlined_call_operand.hbm [shape: bf16[25,16], index: 3, kind: input, shape index: {}]   ;;  %s2233_s4 = inlined_call_operand.hbm [shape: f32[1,16], index: 4, kind: input, shape index: {}]   ;;  %s2234_s5 = inlined_call_operand.vmem [shape: f32[1072,16], index: 5, kind: output, shape index: {}]   ;;  %s2235_s1 = inlined_call_operand.<no memory space> [shape: f32[1,1], index: 1, kind: input, shape index: {}, may-alias: {0,1}]  }
   0x1   :  { %v10_v0 = vstv %s2230_s0  ;;  %v12_v1 = vstv %s2235_s1 }
   0x2   :  { %11 = vst [vmem:[#allocation2] sm:$0x1] %v10_v0  ;;  %13 = vst [vmem:[#allocation3] sm:$0x1] %v12_v1 }
   0x3   :  { %14 = vsyncpa [#allocation5], 0 }
   0x4   :  { %15 = vsyncpa [#allocation7], 0  ;;  %s1613_s22 = smov 0  }
   0x5 LB: > { %s1299_s0 = sadd.s32 4294967295, %s1569_s22   ;;  %p1301_p0 = scmp.ge.s32.totalorder %s1569_s22, 1  ;;  %s1569_s22 = sphi %s1613_s22, %s21_s22  }
   0x6   : > { %p162_p1 = scmp.lt.s32.totalorder %s1569_s22, 3  ;;  %s1571_s23 = smov [#allocation4]  }
   0x7   : > { %s180_s1 = sshll.u32 %s1571_s23, 4  ;;  %p1627_p3 = scmp.eq.s32.totalorder %s1299_s0, 0  ;;  %s181_s1 = int_to_ptr.vmem [resolvable:$true] %s180_s1 }
   0x8   : > { %p1621_p2 = pnand %p1301_p0, %p162_p1  ;;  %s1572_s26 = smov [#allocation6]  }
   0x9   : > { %s2240_s25 = scalar_select %p1627_p3, 1, 0 }
   0xa   : > { %s2239_s24 = scalar_select %p1621_p2, 1, 0 }
   0xb   : > { %p1471_p4 = pneg %p1621_p2  ;;  %s194_s27 = sshll.u32 %s1572_s26, 4  ;;  %s1639_s27 = int_to_ptr.vmem [resolvable:$true] %s194_s27 }
   0xc   : > { %s1499_s6 = scalar_lea.hbm %s2232_s3, 256 }
   0xd   : > { %p1635_p5 = pnand %p1627_p3, %p1471_p4  ;;  %p1500_p6 = scmp.ne.s32.totalorder %s2232_s3, %s1499_s6 }
   0xe   : > { %p1506_p10 = scmp.lt.u32.totalorder %s1499_s6, %s2232_s3 }
   0xf   : > { %p1501_p7 = pneg %p1635_p5 }
  0x11   : > { %p1502_p8 = pnand %p1501_p7, %p1500_p6 }
  0x13   : > { %p1503_p9 = pneg %p1502_p8 }
  0x15   : > { %p1508_p11 = pnand %p1506_p10, %p1503_p9 }
  0x17   : > { %1511 = shalt.err (!%p1508_p11)
}
  0x18   : > { %s1512_s11 = scalar_lea.vmem %s181_s1, 256  ;;  %p1520_p1 = scmp.lt.s32.totalorder %s181_s1, %s181_s1 }
  0x19   : > { %p1513_p12 = scmp.ne.s32.totalorder %s181_s1, %s1512_s11  ;;  %p1521_p4 = scmp.lt.s32.totalorder %s1512_s11, %s1512_s11 }
  0x1b   : > { %p1515_p13 = pnand %p1513_p12, %p1501_p7  ;;  %p1522_p3 = por %p1521_p4, %p1520_p1 }
  0x1d   : > { %p1516_p0 = pneg %p1515_p13 }
  0x1f   : > { %p1523_p2 = pnand %p1522_p3, %p1516_p0 }
  0x21   : > { %1526 = shalt.err (!%p1523_p2)
}
  0x22   : > { %s1573_s12 = smov 64   ;;  %s1574_s13 = smov 4  }
  0x23   : > { %1474 = dma.hbm_to_vmem [thread:$0]  (!%p1635_p5), %s2232_s3, 256, %s181_s1, [#allocation5], %s1573_s12, %s1573_s12, %s1574_s13  }
  0x24   : > { %s1527_s18 = scalar_lea.hbm %s2233_s4, 16 }
  0x25   : > { %p1528_p6 = scmp.ne.s32.totalorder %s2233_s4, %s1527_s18  ;;  %p1534_p8 = scmp.lt.u32.totalorder %s1527_s18, %s2233_s4 }
  0x27   : > { %p1530_p2 = pnand %p1528_p6, %p1501_p7 }
  0x29   : > { %p1531_p3 = pneg %p1530_p2 }
  0x2b   : > { %p1536_p9 = pnand %p1534_p8, %p1531_p3 }
  0x2d   : > { %1539 = shalt.err (!%p1536_p9)
}
  0x2e   : > { %s1540_s1 = scalar_lea.vmem %s1639_s27, 16  ;;  %s1547_s26 = scalar_lea.vmem %s1639_s27, 32 }
  0x2f   : > { %p1541_p10 = scmp.ne.s32.totalorder %s1639_s27, %s1540_s1  ;;  %p1548_p13 = scmp.lt.s32.totalorder %s1639_s27, %s1639_s27 }
  0x30   : > { %p1549_p0 = scmp.lt.s32.totalorder %s1547_s26, %s1540_s1 }
  0x31   : > { %p1543_p11 = pnand %p1541_p10, %p1501_p7 }
  0x32   : > { %p1550_p1 = por %p1549_p0, %p1548_p13 }
  0x33   : > { %p1544_p12 = pneg %p1543_p11 }
  0x35   : > { %p1551_p4 = pnand %p1550_p1, %p1544_p12 }
  0x37   : > { %1554 = shalt.err (!%p1551_p4)
}
  0x38   : > { %1477 = dma.hbm_to_vmem [thread:$0]  (!%p1635_p5), %s2233_s4, 16, %s1639_s27, [#allocation7]  }
  0x39   : > { %p2242_p6 = scmp.ne.s32.totalorder %s2239_s24, 0 }
  0x3a   : > { %p2243_p7 = scmp.ne.s32.totalorder (!%p2242_p6), %s2240_s25, 0 }
  0x3b   : > { %216 = sbr.rel (%p2242_p6) target bundleno = 501 (0x1f5), region = 40 }
  0x42   : > { %1560 = dma.done.wait (%p2243_p7), [#allocation5], 256  }
  0x43   : > { %1562 = vsyncadd (%p2243_p7), [#allocation5], 4294967040 }
  0x44   : > { %1564 = dma.done.wait (%p2243_p7), [#allocation7], 16  }
  0x45   : > { %1566 = vsyncadd (%p2243_p7), [#allocation7], 4294967280  ;;  %v1575_v2 = vmov 0   ;;  %v1310_v3 = vld [vmem:[#allocation2] ss:$0 sm:$0xff]  ;;  %v1497_v5 = vld [vmem:[#allocation4] sm:$0xff]  }
  0x46   : > { %1496 = vset.pattern.permute.xlu0 %v1575_v2  ;;  %v1311_v4 = vld [vmem:[#allocation3] ss:$0 sm:$0xff]  ;;  %vm775_vm0 = vcmask 1043456   ;;  %v1498_v6 = vld [vmem:[#allocation4 + $0x8] sm:$0x1f]   ;;  %vm776_vm1 = vcmask 1044480   ;;  %1387 = vmatprep.subr.bf16.mxu0 %v1497_v5 }
  0x47   : > { %336 = vperm.xlu0 %1496, %v1310_v3   ;;  %1459 = vmatprep.subr.bf16.mxu1 %v1497_v5  ;;  %v1576_v7 = vmov 65535   ;;  %s248_s24 = smul.u32 67, %s1299_s0  ;;  %vm672_vm2 = vcmask 203776  }
  0x48   : > { %v777_v8 = vsel %vm775_vm0, 4294967295, %v1576_v7  ;;  %1388 = vmatpush3.bf16.msra.mxu0 %v1497_v5  ;;  %1461 = vmatpush3.bf16.msra.mxu1 %v1497_v5 }
  0x49   : > { %v778_v9 = vsel %vm776_vm1, %v777_v8, 0  ;;  %p249_p5 = scmp.lt.s32.totalorder %s248_s24, 133 }
  0x4a   : > { %v780_v10 = vand.u32 %v1498_v6, %v778_v9 }
  0x4b   : > { %479 = vperm.xlu0 %1496, %v1311_v4   ;;  %s2245_s24 = smov (!%p249_p5, %s248_s24), 133 }
  0x4c   : > { %1389 = vmatprep.subr.bf16.mxu0 %v780_v10  ;;  %1460 = vmatprep.subr.bf16.mxu1 %v780_v10  ;;  %s1308_s25 = sshll.u32 %s2245_s24, 3 }
  0x4d   : > { %1390 = vmatpush3.bf16.msra.mxu0 %v780_v10  ;;  %1462 = vmatpush3.bf16.msra.mxu1 %v780_v10  ;;  %s1709_s6 = scalar_lea.vmem %s2231_s2, %s1308_s25  ;;  %s2025_s8 = scalar_lea.vmem %s2234_s5, %s1308_s25 }
  0x4e   : > { %v263_v11 = vld [vmem:[%s1709_s6] sm:$0xff]  ;;  %v264_v12 = vld [vmem:[%s1709_s6 + $0x8] sm:$0xff]  ;;  %v265_v15 = vld [vmem:[%s1709_s6 + $0x10] sm:$0xff] }
  0x4f   : > { %v299_v13 = vld [vmem:[%s1709_s6 + $0x120] sm:$0xff]  ;;  %v300_v14 = vld [vmem:[%s1709_s6 + $0x128] sm:$0xff]  ;;  %v266_v16 = vld [vmem:[%s1709_s6 + $0x18] sm:$0xff] }
  0x50   : > { %v301_v17 = vld [vmem:[%s1709_s6 + $0x130] sm:$0xff]  ;;  %v302_v18 = vld [vmem:[%s1709_s6 + $0x138] sm:$0xff]  ;;  %v267_v41 = vld [vmem:[%s1709_s6 + $0x20] sm:$0xff] }
  0x51   : > { %v268_v44 = vld [vmem:[%s1709_s6 + $0x28] sm:$0xff]  ;;  %v303_v45 = vld [vmem:[%s1709_s6 + $0x140] sm:$0xff]  ;;  %v269_v49 = vld [vmem:[%s1709_s6 + $0x30] sm:$0xff] }
  0x52   : > { %v304_v46 = vld [vmem:[%s1709_s6 + $0x148] sm:$0xff]  ;;  %v270_v50 = vld [vmem:[%s1709_s6 + $0x38] sm:$0xff]  ;;  %v305_v51 = vld [vmem:[%s1709_s6 + $0x150] sm:$0xff] }
  0x53   : > { %v306_v55 = vld [vmem:[%s1709_s6 + $0x158] sm:$0xff] }
  0xc6   : > { %v1719_v19 = vpop.permute.xlu0 %336 }
  0xc7   : > { %v339_v20 = vmul.f32 %v1719_v19, %v263_v11  ;;  %v340_v21 = vmul.f32 %v1719_v19, %v264_v12  ;;  %v375_v22 = vmul.f32 %v1719_v19, %v299_v13  ;;  %v376_v23 = vmul.f32 %v1719_v19, %v300_v14  ;;  %v271_v12 = vld [vmem:[%s1709_s6 + $0x40] sm:$0xff] }
  0xc8   : > { %v341_v24 = vmul.f32 %v1719_v19, %v265_v15  ;;  %v342_v25 = vmul.f32 %v1719_v19, %v266_v16  ;;  %v377_v26 = vmul.f32 %v1719_v19, %v301_v17  ;;  %v378_v27 = vmul.f32 %v1719_v19, %v302_v18  ;;  %v272_v15 = vld [vmem:[%s1709_s6 + $0x48] sm:$0xff]  ;;  %v307_v16 = vld [vmem:[%s1709_s6 + $0x160] sm:$0xff] }
  0xc9   : > { %v406_v28 = vfloor.f32 %v339_v20  ;;  %v407_v29 = vfloor.f32 %v340_v21  ;;  %v442_v30 = vfloor.f32 %v375_v22  ;;  %v443_v31 = vfloor.f32 %v376_v23  ;;  %v308_v17 = vld [vmem:[%s1709_s6 + $0x168] sm:$0xff]  ;;  %v273_v22 = vld [vmem:[%s1709_s6 + $0x50] sm:$0xff]  ;;  %v274_v23 = vld [vmem:[%s1709_s6 + $0x58] sm:$0xff] }
  0xca   : > { %v1729_v32 = vpop.permute.xlu0 %479  ;;  %v408_v33 = vfloor.f32 %v341_v24  ;;  %v409_v34 = vfloor.f32 %v342_v25  ;;  %v444_v35 = vfloor.f32 %v377_v26  ;;  %v445_v36 = vfloor.f32 %v378_v27  ;;  %v309_v27 = vld [vmem:[%s1709_s6 + $0x170] sm:$0xff] }
  0xcb   : > { %vm482_vm3 = vcmp.gt.f32.partialorder %v406_v28, %v1729_v32  ;;  %vm483_vm4 = vcmp.gt.f32.partialorder %v407_v29, %v1729_v32  ;;  %vm518_vm5 = vcmp.gt.f32.partialorder %v442_v30, %v1729_v32  ;;  %vm519_vm6 = vcmp.gt.f32.partialorder %v443_v31, %v1729_v32 }
  0xcc   : > { %v549_v37 = vsel %vm482_vm3, %v1729_v32, %v406_v28  ;;  %v550_v38 = vsel %vm483_vm4, %v1729_v32, %v407_v29  ;;  %v585_v39 = vsel %vm518_vm5, %v1729_v32, %v442_v30  ;;  %v586_v40 = vsel %vm519_vm6, %v1729_v32, %v443_v31 }
  0xcd   : > { %v616_v42 = vpack.c.bf16 %v550_v38, %v549_v37  ;;  %v634_v43 = vpack.c.bf16 %v586_v40, %v585_v39  ;;  %vm484_vm7 = vcmp.gt.f32.partialorder %v408_v33, %v1729_v32  ;;  %vm485_vm8 = vcmp.gt.f32.partialorder %v409_v34, %v1729_v32 }
  0xce   : > { %v551_v47 = vsel %vm484_vm7, %v1729_v32, %v408_v33  ;;  %v552_v48 = vsel %vm485_vm8, %v1729_v32, %v409_v34  ;;  %vm520_vm9 = vcmp.gt.f32.partialorder %v444_v35, %v1729_v32  ;;  %vm521_vm10 = vcmp.gt.f32.partialorder %v445_v36, %v1729_v32  ;;  %v310_v33 = vld [vmem:[%s1709_s6 + $0x178] sm:$0xff] }
  0xcf   : > { %1391 = vmatprep.mubr.msk.bf16.mxu0 %vm672_vm2, %v616_v42  ;;  %1427 = vmatprep.mubr.msk.bf16.mxu1 %vm672_vm2, %v634_v43  ;;  %v617_v52 = vpack.c.bf16 %v552_v48, %v551_v47  ;;  %v587_v53 = vsel %vm520_vm9, %v1729_v32, %v444_v35  ;;  %v588_v54 = vsel %vm521_vm10, %v1729_v32, %v445_v36 }
  0xd0   : > { %v635_v56 = vpack.c.bf16 %v588_v54, %v587_v53  ;;  %v343_v57 = vmul.f32 %v1719_v19, %v267_v41  ;;  %v344_v58 = vmul.f32 %v1719_v19, %v268_v44  ;;  %v379_v59 = vmul.f32 %v1719_v19, %v303_v45 }
  0xd1   : > { %1392 = vmatmul.mubr.msk.bf16.vlgmr.msra.gmra.mrb[0].mxu0 %vm672_vm2, %v617_v52  ;;  %v380_v60 = vmul.f32 %v1719_v19, %v304_v46  ;;  %v345_v61 = vmul.f32 %v1719_v19, %v269_v49  ;;  %v346_v62 = vmul.f32 %v1719_v19, %v270_v50  ;;  %v381_v63 = vmul.f32 %v1719_v19, %v305_v51  ;;  %v275_v46 = vld [vmem:[%s1709_s6 + $0x60] sm:$0xff]  ;;  %v276_v50 = vld [vmem:[%s1709_s6 + $0x68] sm:$0xff] }
  0xd2   : > { %1428 = vmatmul.mubr.msk.bf16.vlgmr.msra.gmra.mrb[0].mxu1 %vm672_vm2, %v635_v56  ;;  %v410_v0 = vfloor.f32 %v343_v57  ;;  %v411_v1 = vfloor.f32 %v344_v58  ;;  %v446_v2 = vfloor.f32 %v379_v59  ;;  %v382_v3 = vmul.f32 %v1719_v19, %v306_v55  ;;  %v311_v51 = vld [vmem:[%s1709_s6 + $0x180] sm:$0xff]  ;;  %v312_v55 = vld [vmem:[%s1709_s6 + $0x188] sm:$0xff] }
  0xd3   : > { %v447_v4 = vfloor.f32 %v380_v60  ;;  %v412_v5 = vfloor.f32 %v345_v61  ;;  %v413_v6 = vfloor.f32 %v346_v62  ;;  %v448_v7 = vfloor.f32 %v381_v63  ;;  %v277_v63 = vld [vmem:[%s1709_s6 + $0x70] sm:$0xff] }
  0xd4   : > { %vm486_vm11 = vcmp.gt.f32.partialorder %v410_v0, %v1729_v32  ;;  %vm487_vm12 = vcmp.gt.f32.partialorder %v411_v1, %v1729_v32  ;;  %vm522_vm13 = vcmp.gt.f32.partialorder %v446_v2, %v1729_v32  ;;  %v449_v8 = vfloor.f32 %v382_v3 }
  0xd5   : > { %v553_v9 = vsel %vm486_vm11, %v1729_v32, %v410_v0  ;;  %v554_v10 = vsel %vm487_vm12, %v1729_v32, %v411_v1  ;;  %vm523_vm14 = vcmp.gt.f32.partialorder %v447_v4, %v1729_v32  ;;  %v589_v11 = vsel %vm522_vm13, %v1729_v32, %v446_v2  ;;  %v278_v2 = vld [vmem:[%s1709_s6 + $0x78] sm:$0xff] }
  0xd6   : > { %v618_v13 = vpack.c.bf16 %v554_v10, %v553_v9  ;;  %v590_v14 = vsel %vm523_vm14, %v1729_v32, %v447_v4  ;;  %vm488_vm15 = vcmp.gt.f32.partialorder %v412_v5, %v1729_v32  ;;  %vm489_vm0 = vcmp.gt.f32.partialorder %v413_v6, %v1729_v32  ;;  %v313_v10 = vld [vmem:[%s1709_s6 + $0x190] sm:$0xff] }
  0xd7   : > { %v636_v18 = vpack.c.bf16 %v590_v14, %v589_v11  ;;  %v555_v20 = vsel %vm488_vm15, %v1729_v32, %v412_v5  ;;  %v556_v21 = vsel %vm489_vm0, %v1729_v32, %v413_v6  ;;  %vm524_vm1 = vcmp.gt.f32.partialorder %v448_v7, %v1729_v32  ;;  %v279_v14 = vld [vmem:[%s1709_s6 + $0x80] sm:$0xff] }
  0xd8   : > { %1395 = vmatprep.mubr.msk.bf16.mxu0 %vm672_vm2, %v618_v13  ;;  %v619_v24 = vpack.c.bf16 %v556_v21, %v555_v20  ;;  %vm525_vm3 = vcmp.gt.f32.partialorder %v449_v8, %v1729_v32  ;;  %v591_v25 = vsel %vm524_vm1, %v1729_v32, %v448_v7  ;;  %v347_v26 = vmul.f32 %v1719_v19, %v271_v12  ;;  %v314_v13 = vld [vmem:[%s1709_s6 + $0x198] sm:$0xff] }
  0xd9   : > { %1431 = vmatprep.mubr.msk.bf16.mxu1 %vm672_vm2, %v636_v18  ;;  %v592_v28 = vsel %vm525_vm3, %v1729_v32, %v449_v8  ;;  %v348_v29 = vmul.f32 %v1719_v19, %v272_v15  ;;  %v383_v30 = vmul.f32 %v1719_v19, %v307_v16  ;;  %v384_v31 = vmul.f32 %v1719_v19, %v308_v17  ;;  %v280_v18 = vld [vmem:[%s1709_s6 + $0x88] sm:$0xff] }
  0xda   : > { %1396 = vmatmul.mubr.msk.bf16.gmra.mrb[4].mxu0 %vm672_vm2, %v619_v24  ;;  %v637_v34 = vpack.c.bf16 %v592_v28, %v591_v25  ;;  %v414_v35 = vfloor.f32 %v347_v26  ;;  %v349_v36 = vmul.f32 %v1719_v19, %v273_v22  ;;  %v350_v37 = vmul.f32 %v1719_v19, %v274_v23  ;;  %v315_v24 = vld [vmem:[%s1709_s6 + $0x1a0] sm:$0xff]  ;;  %v316_v28 = vld [vmem:[%s1709_s6 + $0x1a8] sm:$0xff] }
  0xdb   : > { %v415_v38 = vfloor.f32 %v348_v29  ;;  %v450_v39 = vfloor.f32 %v383_v30  ;;  %v451_v40 = vfloor.f32 %v384_v31  ;;  %v385_v41 = vmul.f32 %v1719_v19, %v309_v27 }
  0xdc   : > { %1432 = vmatmul.mubr.msk.bf16.gmra.mrb[4].mxu1 %vm672_vm2, %v637_v34  ;;  %vm490_vm4 = vcmp.gt.f32.partialorder %v414_v35, %v1729_v32  ;;  %v416_v42 = vfloor.f32 %v349_v36  ;;  %v417_v43 = vfloor.f32 %v350_v37  ;;  %v386_v44 = vmul.f32 %v1719_v19, %v310_v33 }
  0xdd   : > { %vm491_vm5 = vcmp.gt.f32.partialorder %v415_v38, %v1729_v32  ;;  %v557_v45 = vsel %vm490_vm4, %v1729_v32, %v414_v35  ;;  %vm526_vm6 = vcmp.gt.f32.partialorder %v450_v39, %v1729_v32  ;;  %vm527_vm7 = vcmp.gt.f32.partialorder %v451_v40, %v1729_v32 }
  0xde   : > { %v558_v47 = vsel %vm491_vm5, %v1729_v32, %v415_v38  ;;  %v593_v48 = vsel %vm526_vm6, %v1729_v32, %v450_v39  ;;  %v594_v49 = vsel %vm527_vm7, %v1729_v32, %v451_v40  ;;  %vm492_vm8 = vcmp.gt.f32.partialorder %v416_v42, %v1729_v32  ;;  %v281_v40 = vld [vmem:[%s1709_s6 + $0x90] sm:$0xff] }
  0xdf   : > { %v620_v52 = vpack.c.bf16 %v558_v47, %v557_v45  ;;  %v638_v53 = vpack.c.bf16 %v594_v49, %v593_v48  ;;  %vm493_vm9 = vcmp.gt.f32.partialorder %v417_v43, %v1729_v32  ;;  %v559_v54 = vsel %vm492_vm8, %v1729_v32, %v416_v42  ;;  %v317_v47 = vld [vmem:[%s1709_s6 + $0x1b0] sm:$0xff]  ;;  %v318_v48 = vld [vmem:[%s1709_s6 + $0x1b8] sm:$0xff] }
  0xe0   : > { %v560_v56 = vsel %vm493_vm9, %v1729_v32, %v417_v43  ;;  %v452_v57 = vfloor.f32 %v385_v41  ;;  %v453_v58 = vfloor.f32 %v386_v44  ;;  %v351_v59 = vmul.f32 %v1719_v19, %v275_v46  ;;  %v282_v43 = vld [vmem:[%s1709_s6 + $0x98] sm:$0xff] }
  0xe1   : > { %1399 = vmatprep.mubr.msk.bf16.mxu0 %vm672_vm2, %v620_v52  ;;  %1435 = vmatprep.mubr.msk.bf16.mxu1 %vm672_vm2, %v638_v53  ;;  %v621_v60 = vpack.c.bf16 %v560_v56, %v559_v54  ;;  %v352_v61 = vmul.f32 %v1719_v19, %v276_v50  ;;  %v387_v62 = vmul.f32 %v1719_v19, %v311_v51  ;;  %v283_v52 = vld [vmem:[%s1709_s6 + $0xa0] sm:$0xff]  ;;  %v284_v53 = vld [vmem:[%s1709_s6 + $0xa8] sm:$0xff] }
  0xe2   : > { %vm528_vm10 = vcmp.gt.f32.partialorder %v452_v57, %v1729_v32  ;;  %vm529_vm11 = vcmp.gt.f32.partialorder %v453_v58, %v1729_v32  ;;  %v418_v0 = vfloor.f32 %v351_v59  ;;  %v388_v1 = vmul.f32 %v1719_v19, %v312_v55 }
  0xe3   : > { %1400 = vmatmul.mubr.msk.bf16.gmra.mrb[8].mxu0 %vm672_vm2, %v621_v60  ;;  %v595_v3 = vsel %vm528_vm10, %v1729_v32, %v452_v57  ;;  %v596_v4 = vsel %vm529_vm11, %v1729_v32, %v453_v58  ;;  %v419_v5 = vfloor.f32 %v352_v61  ;;  %v454_v6 = vfloor.f32 %v387_v62  ;;  %v319_v57 = vld [vmem:[%s1709_s6 + $0x1c0] sm:$0xff] }
  0xe4   : > { %v639_v7 = vpack.c.bf16 %v596_v4, %v595_v3  ;;  %vm494_vm12 = vcmp.gt.f32.partialorder %v418_v0, %v1729_v32  ;;  %v455_v8 = vfloor.f32 %v388_v1  ;;  %v353_v9 = vmul.f32 %v1719_v19, %v277_v63 }
  0xe5   : > { %vm495_vm13 = vcmp.gt.f32.partialorder %v419_v5, %v1729_v32  ;;  %v561_v11 = vsel %vm494_vm12, %v1729_v32, %v418_v0  ;;  %vm530_vm14 = vcmp.gt.f32.partialorder %v454_v6, %v1729_v32  ;;  %v354_v12 = vmul.f32 %v1719_v19, %v278_v2  ;;  %v320_v2 = vld [vmem:[%s1709_s6 + $0x1c8] sm:$0xff] }
  0xe6   : > { %1436 = vmatmul.mubr.msk.bf16.gmra.mrb[8].mxu1 %vm672_vm2, %v639_v7  ;;  %v562_v15 = vsel %vm495_vm13, %v1729_v32, %v419_v5  ;;  %vm531_vm15 = vcmp.gt.f32.partialorder %v455_v8, %v1729_v32  ;;  %v597_v16 = vsel %vm530_vm14, %v1729_v32, %v454_v6  ;;  %v420_v17 = vfloor.f32 %v353_v9 }
  0xe7   : > { %v622_v20 = vpack.c.bf16 %v562_v15, %v561_v11  ;;  %v598_v21 = vsel %vm531_vm15, %v1729_v32, %v455_v8  ;;  %v421_v22 = vfloor.f32 %v354_v12  ;;  %v389_v23 = vmul.f32 %v1719_v19, %v313_v10  ;;  %v285_v11 = vld [vmem:[%s1709_s6 + $0xb0] sm:$0xff]  ;;  %v286_v12 = vld [vmem:[%s1709_s6 + $0xb8] sm:$0xff] }
  0xe8   : > { %v640_v25 = vpack.c.bf16 %v598_v21, %v597_v16  ;;  %vm496_vm0 = vcmp.gt.f32.partialorder %v420_v17, %v1729_v32  ;;  %v390_v26 = vmul.f32 %v1719_v19, %v314_v13  ;;  %v355_v27 = vmul.f32 %v1719_v19, %v279_v14  ;;  %v321_v16 = vld [vmem:[%s1709_s6 + $0x1d0] sm:$0xff] }
  0xe9   : > { %1403 = vmatprep.mubr.msk.bf16.mxu0 %vm672_vm2, %v622_v20  ;;  %vm497_vm1 = vcmp.gt.f32.partialorder %v421_v22, %v1729_v32  ;;  %v563_v29 = vsel %vm496_vm0, %v1729_v32, %v420_v17  ;;  %v456_v30 = vfloor.f32 %v389_v23  ;;  %v356_v31 = vmul.f32 %v1719_v19, %v280_v18  ;;  %v322_v17 = vld [vmem:[%s1709_s6 + $0x1d8] sm:$0xff] }
  0xea   : > { %1439 = vmatprep.mubr.msk.bf16.mxu1 %vm672_vm2, %v640_v25  ;;  %v564_v33 = vsel %vm497_vm1, %v1729_v32, %v421_v22  ;;  %v457_v34 = vfloor.f32 %v390_v26  ;;  %v422_v35 = vfloor.f32 %v355_v27  ;;  %v391_v36 = vmul.f32 %v1719_v19, %v315_v24  ;;  %v287_v26 = vld [vmem:[%s1709_s6 + $0xc0] sm:$0xff] }
  0xeb   : > { %v623_v37 = vpack.c.bf16 %v564_v33, %v563_v29  ;;  %vm532_vm3 = vcmp.gt.f32.partialorder %v456_v30, %v1729_v32  ;;  %v423_v38 = vfloor.f32 %v356_v31  ;;  %v392_v39 = vmul.f32 %v1719_v19, %v316_v28 }
  0xec   : > { %vm533_vm4 = vcmp.gt.f32.partialorder %v457_v34, %v1729_v32  ;;  %v599_v41 = vsel %vm532_vm3, %v1729_v32, %v456_v30  ;;  %vm498_vm5 = vcmp.gt.f32.partialorder %v422_v35, %v1729_v32  ;;  %v458_v42 = vfloor.f32 %v391_v36  ;;  %v288_v30 = vld [vmem:[%s1709_s6 + $0xc8] sm:$0xff] }
  0xed   : > { %1404 = vmatmul.mubr.msk.bf16.gmra.mrb[12].mxu0 %vm672_vm2, %v623_v37  ;;  %v600_v44 = vsel %vm533_vm4, %v1729_v32, %v457_v34  ;;  %vm499_vm6 = vcmp.gt.f32.partialorder %v423_v38, %v1729_v32  ;;  %v565_v45 = vsel %vm498_vm5, %v1729_v32, %v422_v35  ;;  %v459_v46 = vfloor.f32 %v392_v39 }
  0xee   : > { %v641_v49 = vpack.c.bf16 %v600_v44, %v599_v41  ;;  %v566_v50 = vsel %vm499_vm6, %v1729_v32, %v423_v38  ;;  %vm534_vm7 = vcmp.gt.f32.partialorder %v458_v42, %v1729_v32  ;;  %v357_v51 = vmul.f32 %v1719_v19, %v281_v40  ;;  %v323_v41 = vld [vmem:[%s1709_s6 + $0x1e0] sm:$0xff] }
  0xef   : > { %v624_v54 = vpack.c.bf16 %v566_v50, %v565_v45  ;;  %vm535_vm8 = vcmp.gt.f32.partialorder %v459_v46, %v1729_v32  ;;  %v601_v55 = vsel %vm534_vm7, %v1729_v32, %v458_v42  ;;  %v358_v56 = vmul.f32 %v1719_v19, %v282_v43  ;;  %v324_v42 = vld [vmem:[%s1709_s6 + $0x1e8] sm:$0xff]  ;;  %v289_v45 = vld [vmem:[%s1709_s6 + $0xd0] sm:$0xff] }
  0xf0   : > { %1440 = vmatmul.mubr.msk.bf16.gmra.mrb[12].mxu1 %vm672_vm2, %v641_v49  ;;  %v602_v58 = vsel %vm535_vm8, %v1729_v32, %v459_v46  ;;  %v424_v59 = vfloor.f32 %v357_v51  ;;  %v393_v60 = vmul.f32 %v1719_v19, %v317_v47  ;;  %v394_v61 = vmul.f32 %v1719_v19, %v318_v48  ;;  %v290_v46 = vld [vmem:[%s1709_s6 + $0xd8] sm:$0xff]  ;;  %v325_v47 = vld [vmem:[%s1709_s6 + $0x1f0] sm:$0xff] }
  0xf1   : > { %1407 = vmatprep.mubr.msk.bf16.mxu0 %vm672_vm2, %v624_v54  ;;  %v642_v62 = vpack.c.bf16 %v602_v58, %v601_v55  ;;  %v425_v63 = vfloor.f32 %v358_v56  ;;  %v359_v0 = vmul.f32 %v1719_v19, %v283_v52  ;;  %v360_v1 = vmul.f32 %v1719_v19, %v284_v53  ;;  %v326_v56 = vld [vmem:[%s1709_s6 + $0x1f8] sm:$0xff] }
  0xf2   : > { %vm500_vm9 = vcmp.gt.f32.partialorder %v424_v59, %v1729_v32  ;;  %v460_v3 = vfloor.f32 %v393_v60  ;;  %v461_v4 = vfloor.f32 %v394_v61  ;;  %v395_v5 = vmul.f32 %v1719_v19, %v319_v57 }
  0xf3   : > { %1443 = vmatprep.mubr.msk.bf16.mxu1 %vm672_vm2, %v642_v62  ;;  %vm501_vm10 = vcmp.gt.f32.partialorder %v425_v63, %v1729_v32  ;;  %v567_v6 = vsel %vm500_vm9, %v1729_v32, %v424_v59  ;;  %v426_v7 = vfloor.f32 %v359_v0  ;;  %v427_v8 = vfloor.f32 %v360_v1 }
  0xf4   : > { %v568_v9 = vsel %vm501_vm10, %v1729_v32, %v425_v63  ;;  %vm536_vm11 = vcmp.gt.f32.partialorder %v460_v3, %v1729_v32  ;;  %vm537_vm12 = vcmp.gt.f32.partialorder %v461_v4, %v1729_v32  ;;  %v396_v10 = vmul.f32 %v1719_v19, %v320_v2 }
  0xf5   : > { %v625_v13 = vpack.c.bf16 %v568_v9, %v567_v6  ;;  %v603_v14 = vsel %vm536_vm11, %v1729_v32, %v460_v3  ;;  %v604_v15 = vsel %vm537_vm12, %v1729_v32, %v461_v4  ;;  %vm502_vm13 = vcmp.gt.f32.partialorder %v426_v7, %v1729_v32  ;;  %v292_v6 = vld [vmem:[%s1709_s6 + $0xe8] sm:$0xff]  ;;  %v327_v9 = vld [vmem:[%s1709_s6 + $0x200] sm:$0xff] }
  0xf6   : > { %v643_v18 = vpack.c.bf16 %v604_v15, %v603_v14  ;;  %vm503_vm14 = vcmp.gt.f32.partialorder %v427_v8, %v1729_v32  ;;  %v569_v20 = vsel %vm502_vm13, %v1729_v32, %v426_v7  ;;  %v462_v21 = vfloor.f32 %v395_v5  ;;  %v291_v5 = vld [vmem:[%s1709_s6 + $0xe0] sm:$0xff]  ;;  %v293_v15 = vld [vmem:[%s1709_s6 + $0xf0] sm:$0xff] }
  0xf7   : > { %1408 = vmatmul.mubr.msk.bf16.gmra.mrb[16].mxu0 %vm672_vm2, %v625_v13  ;;  %v570_v22 = vsel %vm503_vm14, %v1729_v32, %v427_v8  ;;  %v463_v23 = vfloor.f32 %v396_v10  ;;  %v361_v24 = vmul.f32 %v1719_v19, %v285_v11  ;;  %v362_v25 = vmul.f32 %v1719_v19, %v286_v12  ;;  %v328_v10 = vld [vmem:[%s1709_s6 + $0x208] sm:$0xff] }
  0xf8   : > { %1444 = vmatmul.mubr.msk.bf16.gmra.mrb[16].mxu1 %vm672_vm2, %v643_v18  ;;  %v626_v27 = vpack.c.bf16 %v570_v22, %v569_v20  ;;  %vm538_vm15 = vcmp.gt.f32.partialorder %v462_v21, %v1729_v32  ;;  %v397_v28 = vmul.f32 %v1719_v19, %v321_v16  ;;  %v398_v29 = vmul.f32 %v1719_v19, %v322_v17  ;;  %v294_v20 = vld [vmem:[%s1709_s6 + $0xf8] sm:$0xff] }
  0xf9   : > { %vm539_vm0 = vcmp.gt.f32.partialorder %v463_v23, %v1729_v32  ;;  %v605_v31 = vsel %vm538_vm15, %v1729_v32, %v462_v21  ;;  %v428_v33 = vfloor.f32 %v361_v24  ;;  %v429_v34 = vfloor.f32 %v362_v25  ;;  %v329_v24 = vld [vmem:[%s1709_s6 + $0x210] sm:$0xff] }
  0xfa   : > { %1411 = vmatprep.mubr.msk.bf16.mxu0 %vm672_vm2, %v626_v27  ;;  %v606_v35 = vsel %vm539_vm0, %v1729_v32, %v463_v23  ;;  %v464_v36 = vfloor.f32 %v397_v28  ;;  %v465_v37 = vfloor.f32 %v398_v29  ;;  %v363_v38 = vmul.f32 %v1719_v19, %v287_v26 }
  0xfb   : > { %v644_v39 = vpack.c.bf16 %v606_v35, %v605_v31  ;;  %vm504_vm1 = vcmp.gt.f32.partialorder %v428_v33, %v1729_v32  ;;  %vm505_vm3 = vcmp.gt.f32.partialorder %v429_v34, %v1729_v32  ;;  %v364_v40 = vmul.f32 %v1719_v19, %v288_v30 }
  0xfc   : > { %v571_v43 = vsel %vm504_vm1, %v1729_v32, %v428_v33  ;;  %v572_v44 = vsel %vm505_vm3, %v1729_v32, %v429_v34  ;;  %vm540_vm4 = vcmp.gt.f32.partialorder %v464_v36, %v1729_v32  ;;  %vm541_vm5 = vcmp.gt.f32.partialorder %v465_v37, %v1729_v32 }
  0xfd   : > { %1447 = vmatprep.mubr.msk.bf16.mxu1 %vm672_vm2, %v644_v39  ;;  %v627_v48 = vpack.c.bf16 %v572_v44, %v571_v43  ;;  %v607_v49 = vsel %vm540_vm4, %v1729_v32, %v464_v36  ;;  %v608_v50 = vsel %vm541_vm5, %v1729_v32, %v465_v37  ;;  %v430_v51 = vfloor.f32 %v363_v38  ;;  %v295_v36 = vld [vmem:[%s1709_s6 + $0x100] sm:$0xff]  ;;  %v296_v39 = vld [vmem:[%s1709_s6 + $0x108] sm:$0xff] }
  0xfe   : > { %v645_v52 = vpack.c.bf16 %v608_v50, %v607_v49  ;;  %v431_v53 = vfloor.f32 %v364_v40  ;;  %v399_v54 = vmul.f32 %v1719_v19, %v323_v41  ;;  %v400_v55 = vmul.f32 %v1719_v19, %v324_v42  ;;  %v297_v40 = vld [vmem:[%s1709_s6 + $0x110] sm:$0xff] }
  0xff   : > { %1412 = vmatmul.mubr.msk.bf16.gmra.mrb[20].mxu0 %vm672_vm2, %v627_v48  ;;  %vm506_vm6 = vcmp.gt.f32.partialorder %v430_v51, %v1729_v32  ;;  %v365_v57 = vmul.f32 %v1719_v19, %v289_v45  ;;  %v366_v58 = vmul.f32 %v1719_v19, %v290_v46  ;;  %v401_v59 = vmul.f32 %v1719_v19, %v325_v47  ;;  %v298_v45 = vld [vmem:[%s1709_s6 + $0x118] sm:$0xff] }
 0x100   : > { %1448 = vmatmul.mubr.msk.bf16.gmra.mrb[20].mxu1 %vm672_vm2, %v645_v52  ;;  %vm507_vm7 = vcmp.gt.f32.partialorder %v431_v53, %v1729_v32  ;;  %v573_v60 = vsel %vm506_vm6, %v1729_v32, %v430_v51  ;;  %v466_v61 = vfloor.f32 %v399_v54  ;;  %v467_v62 = vfloor.f32 %v400_v55 }
 0x101   : > { %v574_v63 = vsel %vm507_vm7, %v1729_v32, %v431_v53  ;;  %v432_v0 = vfloor.f32 %v365_v57  ;;  %v433_v1 = vfloor.f32 %v366_v58  ;;  %v402_v2 = vmul.f32 %v1719_v19, %v326_v56 }
 0x102   : > { %v628_v3 = vpack.c.bf16 %v574_v63, %v573_v60  ;;  %vm542_vm8 = vcmp.gt.f32.partialorder %v466_v61, %v1729_v32  ;;  %vm543_vm9 = vcmp.gt.f32.partialorder %v467_v62, %v1729_v32  ;;  %v468_v4 = vfloor.f32 %v401_v59 }
 0x103   : > { %v609_v7 = vsel %vm542_vm8, %v1729_v32, %v466_v61  ;;  %v610_v8 = vsel %vm543_vm9, %v1729_v32, %v467_v62  ;;  %vm508_vm10 = vcmp.gt.f32.partialorder %v432_v0, %v1729_v32  ;;  %vm509_vm11 = vcmp.gt.f32.partialorder %v433_v1, %v1729_v32 }
 0x104   : > { %1415 = vmatprep.mubr.msk.bf16.mxu0 %vm672_vm2, %v628_v3  ;;  %v646_v11 = vpack.c.bf16 %v610_v8, %v609_v7  ;;  %v575_v12 = vsel %vm508_vm10, %v1729_v32, %v432_v0  ;;  %v576_v13 = vsel %vm509_vm11, %v1729_v32, %v433_v1  ;;  %v469_v14 = vfloor.f32 %v402_v2  ;;  %v2017_v2 = vld [vmem:[#allocation6] ss:$0 sm:$0xff] }
 0x105   : > { %v629_v16 = vpack.c.bf16 %v576_v13, %v575_v12  ;;  %vm544_vm12 = vcmp.gt.f32.partialorder %v468_v4, %v1729_v32  ;;  %v367_v17 = vmul.f32 %v1719_v19, %v291_v5  ;;  %v368_v18 = vmul.f32 %v1719_v19, %v292_v6 }
 0x106   : > { %1451 = vmatprep.mubr.msk.bf16.mxu1 %vm672_vm2, %v646_v11  ;;  %vm545_vm13 = vcmp.gt.f32.partialorder %v469_v14, %v1729_v32  ;;  %v611_v21 = vsel %vm544_vm12, %v1729_v32, %v468_v4  ;;  %v403_v22 = vmul.f32 %v1719_v19, %v327_v9  ;;  %v404_v23 = vmul.f32 %v1719_v19, %v328_v10 }
 0x107   : > { %1416 = vmatmul.mubr.msk.bf16.gmra.mrb[24].mxu0 %vm672_vm2, %v629_v16  ;;  %v612_v25 = vsel %vm545_vm13, %v1729_v32, %v469_v14  ;;  %v434_v26 = vfloor.f32 %v367_v17  ;;  %v435_v27 = vfloor.f32 %v368_v18  ;;  %v369_v28 = vmul.f32 %v1719_v19, %v293_v15 }
 0x108   : > { %v647_v29 = vpack.c.bf16 %v612_v25, %v611_v21  ;;  %v470_v30 = vfloor.f32 %v403_v22  ;;  %v471_v31 = vfloor.f32 %v404_v23  ;;  %v370_v33 = vmul.f32 %v1719_v19, %v294_v20 }
 0x109   : > { %vm510_vm14 = vcmp.gt.f32.partialorder %v434_v26, %v1729_v32  ;;  %vm511_vm15 = vcmp.gt.f32.partialorder %v435_v27, %v1729_v32  ;;  %v436_v34 = vfloor.f32 %v369_v28  ;;  %v405_v35 = vmul.f32 %v1719_v19, %v329_v24 }
 0x10a   : > { %1452 = vmatmul.mubr.msk.bf16.gmra.mrb[24].mxu1 %vm672_vm2, %v647_v29  ;;  %v577_v37 = vsel %vm510_vm14, %v1729_v32, %v434_v26  ;;  %v578_v38 = vsel %vm511_vm15, %v1729_v32, %v435_v27  ;;  %vm546_vm0 = vcmp.gt.f32.partialorder %v470_v30, %v1729_v32  ;;  %vm547_vm1 = vcmp.gt.f32.partialorder %v471_v31, %v1729_v32 }
 0x10b   : > { %v630_v41 = vpack.c.bf16 %v578_v38, %v577_v37  ;;  %v613_v42 = vsel %vm546_vm0, %v1729_v32, %v470_v30  ;;  %v614_v43 = vsel %vm547_vm1, %v1729_v32, %v471_v31  ;;  %v437_v44 = vfloor.f32 %v370_v33 }
 0x10c   : > { %v648_v46 = vpack.c.bf16 %v614_v43, %v613_v42  ;;  %vm512_vm3 = vcmp.gt.f32.partialorder %v436_v34, %v1729_v32  ;;  %v472_v47 = vfloor.f32 %v405_v35  ;;  %v371_v48 = vmul.f32 %v1719_v19, %v295_v36 }
 0x10d   : > { %1419 = vmatprep.mubr.msk.bf16.mxu0 %vm672_vm2, %v630_v41  ;;  %vm513_vm4 = vcmp.gt.f32.partialorder %v437_v44, %v1729_v32  ;;  %v579_v49 = vsel %vm512_vm3, %v1729_v32, %v436_v34  ;;  %v372_v50 = vmul.f32 %v1719_v19, %v296_v39  ;;  %v373_v51 = vmul.f32 %v1719_v19, %v297_v40 }
 0x10e   : > { %1455 = vmatprep.mubr.msk.bf16.mxu1 %vm672_vm2, %v648_v46  ;;  %v580_v52 = vsel %vm513_vm4, %v1729_v32, %v437_v44  ;;  %vm548_vm5 = vcmp.gt.f32.partialorder %v472_v47, %v1729_v32  ;;  %v438_v53 = vfloor.f32 %v371_v48  ;;  %v374_v54 = vmul.f32 %v1719_v19, %v298_v45 }
 0x10f   : > { %v631_v55 = vpack.c.bf16 %v580_v52, %v579_v49  ;;  %v615_v56 = vsel %vm548_vm5, %v1729_v32, %v472_v47  ;;  %v439_v57 = vfloor.f32 %v372_v50  ;;  %v440_v58 = vfloor.f32 %v373_v51 }
 0x110   : > { %v649_v59 = vpack.c.bf16 %v615_v56, %v615_v56  ;;  %vm514_vm6 = vcmp.gt.f32.partialorder %v438_v53, %v1729_v32  ;;  %v441_v60 = vfloor.f32 %v374_v54  ;;  %vm1153_vm10 = vcmask 130048  }
 0x111   : > { %1420 = vmatmul.mubr.msk.bf16.gmra.mrb[28].mxu0 %vm672_vm2, %v631_v55  ;;  %vm515_vm7 = vcmp.gt.f32.partialorder %v439_v57, %v1729_v32  ;;  %v581_v61 = vsel %vm514_vm6, %v1729_v32, %v438_v53  ;;  %vm516_vm8 = vcmp.gt.f32.partialorder %v440_v58, %v1729_v32 }
 0x112   : > { %1456 = vmatmul.mubr.msk.bf16.gmra.mrb[28].mxu1 %vm672_vm2, %v649_v59  ;;  %v582_v19 = vsel %vm515_vm7, %v1729_v32, %v439_v57  ;;  %vm517_vm9 = vcmp.gt.f32.partialorder %v441_v60, %v1729_v32  ;;  %v583_v63 = vsel %vm516_vm8, %v1729_v32, %v440_v58 }
 0x113   : > { %v632_v62 = vpack.c.bf16 %v582_v19, %v581_v61  ;;  %v584_v0 = vsel %vm517_vm9, %v1729_v32, %v441_v60 }
 0x114   : > { %v633_v1 = vpack.c.bf16 %v584_v0, %v583_v63 }
 0x115   : > { %1423 = vmatprep.mubr.msk.bf16.mxu0 %vm672_vm2, %v632_v62 }
 0x119   : > { %1424 = vmatmul.mubr.msk.bf16.gmra.mrb[32].mxu0 %vm672_vm2, %v633_v1 }
 0x1a4   : > { %v1393_v3 = vpop.f32.mrb[0].mxu0 }
 0x1a5   : > { %v825_v4 = vadd.f32 %v1393_v3, %v2017_v2  ;;  %v1429_v5 = vpop.f32.mrb[0].mxu1  ;;  %v816_v6 = vpop.f32.mrb[1].mxu0 }
 0x1a6   : > { %v969_v32 = vadd.f32 %v1429_v5, %v2017_v2  ;;  %v817_v7 = vadd.f32 %v2017_v2, %v816_v6  ;;  %v960_v8 = vpop.f32.mrb[1].mxu1  ;;  %v1394_v9 = vpop.f32.mrb[2].mxu0 }
 0x1a7   : > { %v1088_v10 = vmax.f32 %v825_v4, 0.0  ;;  %v961_v11 = vadd.f32 %v2017_v2, %v960_v8  ;;  %v828_v12 = vadd.f32 %v1394_v9, %v2017_v2  ;;  %v1430_v13 = vpop.f32.mrb[2].mxu1  ;;  %v819_v14 = vpop.f32.mrb[3].mxu0 }
 0x1a8   : > { %v1124_v15 = vmax.f32 %v969_v32, 0.0  ;;  %v1086_v16 = vmax.f32 %v817_v7, 0.0  ;;  %v972_v17 = vadd.f32 %v1430_v13, %v2017_v2  ;;  %v820_v18 = vadd.f32 %v2017_v2, %v819_v14  ;;  %v963_v20 = vpop.f32.mrb[3].mxu1 }
 0x1a9   : > { %1156 = vst.msk [vmem:[%s2025_s8 + $0x10] sm:$0xff] %vm1153_vm10, %v1088_v10  ;;  %v1122_v21 = vmax.f32 %v961_v11, 0.0  ;;  %v1089_v22 = vmax.f32 %v828_v12, 0.0  ;;  %v964_v23 = vadd.f32 %v2017_v2, %v963_v20 }
 0x1aa   : > { %1192 = vst.msk [vmem:[%s2025_s8 + $0x130] sm:$0xff] %vm1153_vm10, %v1124_v15  ;;  %1154 = vst.msk [vmem:[%s2025_s8] sm:$0xff] %vm1153_vm10, %v1086_v16  ;;  %v1125_v24 = vmax.f32 %v972_v17, 0.0  ;;  %v1087_v25 = vmax.f32 %v820_v18, 0.0 }
 0x1ab   : > { %1190 = vst.msk [vmem:[%s2025_s8 + $0x120] sm:$0xff] %vm1153_vm10, %v1122_v21  ;;  %1157 = vst.msk [vmem:[%s2025_s8 + $0x18] sm:$0xff] %vm1153_vm10, %v1089_v22  ;;  %v1123_v26 = vmax.f32 %v964_v23, 0.0 }
 0x1ac   : > { %1193 = vst.msk [vmem:[%s2025_s8 + $0x138] sm:$0xff] %vm1153_vm10, %v1125_v24  ;;  %1155 = vst.msk [vmem:[%s2025_s8 + $0x8] sm:$0xff] %vm1153_vm10, %v1087_v25 }
 0x1ad   : > { %1191 = vst.msk [vmem:[%s2025_s8 + $0x128] sm:$0xff] %vm1153_vm10, %v1123_v26  ;;  %v1397_v27 = vpop.f32.mrb[4].mxu0 }
 0x1ae   : > { %v841_v28 = vadd.f32 %v1397_v27, %v2017_v2  ;;  %v832_v29 = vpop.f32.mrb[5].mxu0 }
 0x1af   : > { %v1433_v30 = vpop.f32.mrb[4].mxu1  ;;  %v833_v31 = vadd.f32 %v2017_v2, %v832_v29  ;;  %v1398_v33 = vpop.f32.mrb[6].mxu0 }
 0x1b0   : > { %v1092_v34 = vmax.f32 %v841_v28, 0.0  ;;  %v985_v35 = vadd.f32 %v1433_v30, %v2017_v2  ;;  %v976_v36 = vpop.f32.mrb[5].mxu1  ;;  %v844_v37 = vadd.f32 %v1398_v33, %v2017_v2  ;;  %v835_v38 = vpop.f32.mrb[7].mxu0 }
 0x1b1   : > { %v1090_v39 = vmax.f32 %v833_v31, 0.0  ;;  %v977_v40 = vadd.f32 %v2017_v2, %v976_v36  ;;  %v1434_v41 = vpop.f32.mrb[6].mxu1  ;;  %v836_v42 = vadd.f32 %v2017_v2, %v835_v38 }
 0x1b2   : > { %1160 = vst.msk [vmem:[%s2025_s8 + $0x30] sm:$0xff] %vm1153_vm10, %v1092_v34  ;;  %v1128_v43 = vmax.f32 %v985_v35, 0.0  ;;  %v1093_v44 = vmax.f32 %v844_v37, 0.0  ;;  %v988_v45 = vadd.f32 %v1434_v41, %v2017_v2  ;;  %v979_v46 = vpop.f32.mrb[7].mxu1 }
 0x1b3   : > { %1158 = vst.msk [vmem:[%s2025_s8 + $0x20] sm:$0xff] %vm1153_vm10, %v1090_v39  ;;  %v1126_v47 = vmax.f32 %v977_v40, 0.0  ;;  %v1091_v48 = vmax.f32 %v836_v42, 0.0  ;;  %v980_v49 = vadd.f32 %v2017_v2, %v979_v46 }
 0x1b4   : > { %1196 = vst.msk [vmem:[%s2025_s8 + $0x150] sm:$0xff] %vm1153_vm10, %v1128_v43  ;;  %1161 = vst.msk [vmem:[%s2025_s8 + $0x38] sm:$0xff] %vm1153_vm10, %v1093_v44  ;;  %v1129_v50 = vmax.f32 %v988_v45, 0.0 }
 0x1b5   : > { %1194 = vst.msk [vmem:[%s2025_s8 + $0x140] sm:$0xff] %vm1153_vm10, %v1126_v47  ;;  %1159 = vst.msk [vmem:[%s2025_s8 + $0x28] sm:$0xff] %vm1153_vm10, %v1091_v48  ;;  %v1127_v51 = vmax.f32 %v980_v49, 0.0 }
 0x1b6   : > { %1197 = vst.msk [vmem:[%s2025_s8 + $0x158] sm:$0xff] %vm1153_vm10, %v1129_v50  ;;  %v1401_v52 = vpop.f32.mrb[8].mxu0 }
 0x1b7   : > { %1195 = vst.msk [vmem:[%s2025_s8 + $0x148] sm:$0xff] %vm1153_vm10, %v1127_v51  ;;  %v857_v53 = vadd.f32 %v1401_v52, %v2017_v2  ;;  %v848_v54 = vpop.f32.mrb[9].mxu0 }
 0x1b8   : > { %v849_v55 = vadd.f32 %v2017_v2, %v848_v54  ;;  %v1402_v56 = vpop.f32.mrb[10].mxu0 }
 0x1b9   : > { %v1096_v57 = vmax.f32 %v857_v53, 0.0  ;;  %v1437_v58 = vpop.f32.mrb[8].mxu1  ;;  %v860_v59 = vadd.f32 %v1402_v56, %v2017_v2  ;;  %v851_v60 = vpop.f32.mrb[11].mxu0 }
 0x1ba   : > { %v1001_v61 = vadd.f32 %v1437_v58, %v2017_v2  ;;  %v1094_v19 = vmax.f32 %v849_v55, 0.0  ;;  %v992_v62 = vpop.f32.mrb[9].mxu1  ;;  %v852_v63 = vadd.f32 %v2017_v2, %v851_v60 }
 0x1bb   : > { %1164 = vst.msk [vmem:[%s2025_s8 + $0x50] sm:$0xff] %vm1153_vm10, %v1096_v57  ;;  %v993_v0 = vadd.f32 %v2017_v2, %v992_v62  ;;  %v1097_v1 = vmax.f32 %v860_v59, 0.0  ;;  %v1438_v3 = vpop.f32.mrb[10].mxu1 }
 0x1bc   : > { %v1132_v4 = vmax.f32 %v1001_v61, 0.0  ;;  %1162 = vst.msk [vmem:[%s2025_s8 + $0x40] sm:$0xff] %vm1153_vm10, %v1094_v19  ;;  %v1004_v5 = vadd.f32 %v1438_v3, %v2017_v2  ;;  %v1095_v6 = vmax.f32 %v852_v63, 0.0  ;;  %v995_v32 = vpop.f32.mrb[11].mxu1 }
 0x1bd   : > { %v1130_v7 = vmax.f32 %v993_v0, 0.0  ;;  %1165 = vst.msk [vmem:[%s2025_s8 + $0x58] sm:$0xff] %vm1153_vm10, %v1097_v1  ;;  %v996_v8 = vadd.f32 %v2017_v2, %v995_v32 }
 0x1be   : > { %1200 = vst.msk [vmem:[%s2025_s8 + $0x170] sm:$0xff] %vm1153_vm10, %v1132_v4  ;;  %v1133_v9 = vmax.f32 %v1004_v5, 0.0  ;;  %1163 = vst.msk [vmem:[%s2025_s8 + $0x48] sm:$0xff] %vm1153_vm10, %v1095_v6 }
 0x1bf   : > { %1198 = vst.msk [vmem:[%s2025_s8 + $0x160] sm:$0xff] %vm1153_vm10, %v1130_v7  ;;  %v1131_v10 = vmax.f32 %v996_v8, 0.0 }
 0x1c0   : > { %1201 = vst.msk [vmem:[%s2025_s8 + $0x178] sm:$0xff] %vm1153_vm10, %v1133_v9  ;;  %v1405_v11 = vpop.f32.mrb[12].mxu0 }
 0x1c1   : > { %1199 = vst.msk [vmem:[%s2025_s8 + $0x168] sm:$0xff] %vm1153_vm10, %v1131_v10  ;;  %v873_v12 = vadd.f32 %v1405_v11, %v2017_v2  ;;  %v864_v13 = vpop.f32.mrb[13].mxu0 }
 0x1c2   : > { %v865_v14 = vadd.f32 %v2017_v2, %v864_v13  ;;  %v1406_v15 = vpop.f32.mrb[14].mxu0 }
 0x1c3   : > { %v1100_v16 = vmax.f32 %v873_v12, 0.0  ;;  %v1441_v17 = vpop.f32.mrb[12].mxu1  ;;  %v876_v18 = vadd.f32 %v1406_v15, %v2017_v2  ;;  %v867_v20 = vpop.f32.mrb[15].mxu0 }
 0x1c4   : > { %v1017_v21 = vadd.f32 %v1441_v17, %v2017_v2  ;;  %v1098_v22 = vmax.f32 %v865_v14, 0.0  ;;  %v1008_v23 = vpop.f32.mrb[13].mxu1  ;;  %v868_v24 = vadd.f32 %v2017_v2, %v867_v20 }
 0x1c5   : > { %1168 = vst.msk [vmem:[%s2025_s8 + $0x70] sm:$0xff] %vm1153_vm10, %v1100_v16  ;;  %v1009_v25 = vadd.f32 %v2017_v2, %v1008_v23  ;;  %v1101_v26 = vmax.f32 %v876_v18, 0.0  ;;  %v1442_v27 = vpop.f32.mrb[14].mxu1 }
 0x1c6   : > { %v1136_v28 = vmax.f32 %v1017_v21, 0.0  ;;  %1166 = vst.msk [vmem:[%s2025_s8 + $0x60] sm:$0xff] %vm1153_vm10, %v1098_v22  ;;  %v1020_v29 = vadd.f32 %v1442_v27, %v2017_v2  ;;  %v1099_v30 = vmax.f32 %v868_v24, 0.0  ;;  %v1011_v31 = vpop.f32.mrb[15].mxu1 }
 0x1c7   : > { %v1134_v33 = vmax.f32 %v1009_v25, 0.0  ;;  %1169 = vst.msk [vmem:[%s2025_s8 + $0x78] sm:$0xff] %vm1153_vm10, %v1101_v26  ;;  %v1012_v34 = vadd.f32 %v2017_v2, %v1011_v31 }
 0x1c8   : > { %1204 = vst.msk [vmem:[%s2025_s8 + $0x190] sm:$0xff] %vm1153_vm10, %v1136_v28  ;;  %v1137_v35 = vmax.f32 %v1020_v29, 0.0  ;;  %1167 = vst.msk [vmem:[%s2025_s8 + $0x68] sm:$0xff] %vm1153_vm10, %v1099_v30 }
 0x1c9   : > { %1202 = vst.msk [vmem:[%s2025_s8 + $0x180] sm:$0xff] %vm1153_vm10, %v1134_v33  ;;  %v1135_v36 = vmax.f32 %v1012_v34, 0.0 }
 0x1ca   : > { %1205 = vst.msk [vmem:[%s2025_s8 + $0x198] sm:$0xff] %vm1153_vm10, %v1137_v35  ;;  %v1409_v37 = vpop.f32.mrb[16].mxu0 }
 0x1cb   : > { %1203 = vst.msk [vmem:[%s2025_s8 + $0x188] sm:$0xff] %vm1153_vm10, %v1135_v36  ;;  %v889_v38 = vadd.f32 %v1409_v37, %v2017_v2  ;;  %v1445_v39 = vpop.f32.mrb[16].mxu1  ;;  %v880_v40 = vpop.f32.mrb[17].mxu0 }
 0x1cc   : > { %v1033_v41 = vadd.f32 %v1445_v39, %v2017_v2  ;;  %v881_v42 = vadd.f32 %v2017_v2, %v880_v40  ;;  %v1024_v43 = vpop.f32.mrb[17].mxu1  ;;  %v1410_v44 = vpop.f32.mrb[18].mxu0 }
 0x1cd   : > { %v1104_v45 = vmax.f32 %v889_v38, 0.0  ;;  %v1025_v46 = vadd.f32 %v2017_v2, %v1024_v43  ;;  %v892_v47 = vadd.f32 %v1410_v44, %v2017_v2  ;;  %v1446_v48 = vpop.f32.mrb[18].mxu1  ;;  %v883_v49 = vpop.f32.mrb[19].mxu0 }
 0x1ce   : > { %v1140_v50 = vmax.f32 %v1033_v41, 0.0  ;;  %v1102_v51 = vmax.f32 %v881_v42, 0.0  ;;  %v1036_v52 = vadd.f32 %v1446_v48, %v2017_v2  ;;  %v884_v53 = vadd.f32 %v2017_v2, %v883_v49  ;;  %v1027_v54 = vpop.f32.mrb[19].mxu1 }
 0x1cf   : > { %1172 = vst.msk [vmem:[%s2025_s8 + $0x90] sm:$0xff] %vm1153_vm10, %v1104_v45  ;;  %v1138_v55 = vmax.f32 %v1025_v46, 0.0  ;;  %v1105_v56 = vmax.f32 %v892_v47, 0.0  ;;  %v1028_v57 = vadd.f32 %v2017_v2, %v1027_v54 }
 0x1d0   : > { %1208 = vst.msk [vmem:[%s2025_s8 + $0x1b0] sm:$0xff] %vm1153_vm10, %v1140_v50  ;;  %1170 = vst.msk [vmem:[%s2025_s8 + $0x80] sm:$0xff] %vm1153_vm10, %v1102_v51  ;;  %v1141_v58 = vmax.f32 %v1036_v52, 0.0  ;;  %v1103_v59 = vmax.f32 %v884_v53, 0.0 }
 0x1d1   : > { %1206 = vst.msk [vmem:[%s2025_s8 + $0x1a0] sm:$0xff] %vm1153_vm10, %v1138_v55  ;;  %1173 = vst.msk [vmem:[%s2025_s8 + $0x98] sm:$0xff] %vm1153_vm10, %v1105_v56  ;;  %v1139_v60 = vmax.f32 %v1028_v57, 0.0 }
 0x1d2   : > { %1209 = vst.msk [vmem:[%s2025_s8 + $0x1b8] sm:$0xff] %vm1153_vm10, %v1141_v58  ;;  %1171 = vst.msk [vmem:[%s2025_s8 + $0x88] sm:$0xff] %vm1153_vm10, %v1103_v59  ;;  %v1413_v61 = vpop.f32.mrb[20].mxu0 }
 0x1d3   : > { %1207 = vst.msk [vmem:[%s2025_s8 + $0x1a8] sm:$0xff] %vm1153_vm10, %v1139_v60  ;;  %v905_v19 = vadd.f32 %v1413_v61, %v2017_v2  ;;  %v1449_v62 = vpop.f32.mrb[20].mxu1  ;;  %v896_v63 = vpop.f32.mrb[21].mxu0 }
 0x1d4   : > { %v1049_v0 = vadd.f32 %v1449_v62, %v2017_v2  ;;  %v897_v1 = vadd.f32 %v2017_v2, %v896_v63  ;;  %v1040_v3 = vpop.f32.mrb[21].mxu1  ;;  %v1414_v4 = vpop.f32.mrb[22].mxu0 }
 0x1d5   : > { %v1108_v5 = vmax.f32 %v905_v19, 0.0  ;;  %v1041_v6 = vadd.f32 %v2017_v2, %v1040_v3  ;;  %v908_v32 = vadd.f32 %v1414_v4, %v2017_v2  ;;  %v1450_v7 = vpop.f32.mrb[22].mxu1  ;;  %v899_v8 = vpop.f32.mrb[23].mxu0 }
 0x1d6   : > { %v1144_v9 = vmax.f32 %v1049_v0, 0.0  ;;  %v1106_v10 = vmax.f32 %v897_v1, 0.0  ;;  %v1052_v11 = vadd.f32 %v1450_v7, %v2017_v2  ;;  %v900_v12 = vadd.f32 %v2017_v2, %v899_v8  ;;  %v1043_v13 = vpop.f32.mrb[23].mxu1 }
 0x1d7   : > { %1176 = vst.msk [vmem:[%s2025_s8 + $0xb0] sm:$0xff] %vm1153_vm10, %v1108_v5  ;;  %v1142_v14 = vmax.f32 %v1041_v6, 0.0  ;;  %v1109_v15 = vmax.f32 %v908_v32, 0.0  ;;  %v1044_v16 = vadd.f32 %v2017_v2, %v1043_v13 }
 0x1d8   : > { %1212 = vst.msk [vmem:[%s2025_s8 + $0x1d0] sm:$0xff] %vm1153_vm10, %v1144_v9  ;;  %1174 = vst.msk [vmem:[%s2025_s8 + $0xa0] sm:$0xff] %vm1153_vm10, %v1106_v10  ;;  %v1145_v17 = vmax.f32 %v1052_v11, 0.0  ;;  %v1107_v18 = vmax.f32 %v900_v12, 0.0 }
 0x1d9   : > { %1210 = vst.msk [vmem:[%s2025_s8 + $0x1c0] sm:$0xff] %vm1153_vm10, %v1142_v14  ;;  %1177 = vst.msk [vmem:[%s2025_s8 + $0xb8] sm:$0xff] %vm1153_vm10, %v1109_v15  ;;  %v1143_v20 = vmax.f32 %v1044_v16, 0.0 }
 0x1da   : > { %1213 = vst.msk [vmem:[%s2025_s8 + $0x1d8] sm:$0xff] %vm1153_vm10, %v1145_v17  ;;  %1175 = vst.msk [vmem:[%s2025_s8 + $0xa8] sm:$0xff] %vm1153_vm10, %v1107_v18  ;;  %v1417_v21 = vpop.f32.mrb[24].mxu0 }
 0x1db   : > { %1211 = vst.msk [vmem:[%s2025_s8 + $0x1c8] sm:$0xff] %vm1153_vm10, %v1143_v20  ;;  %v921_v22 = vadd.f32 %v1417_v21, %v2017_v2  ;;  %v912_v23 = vpop.f32.mrb[25].mxu0 }
 0x1dc   : > { %v913_v24 = vadd.f32 %v2017_v2, %v912_v23  ;;  %v1418_v25 = vpop.f32.mrb[26].mxu0 }
 0x1dd   : > { %v1112_v26 = vmax.f32 %v921_v22, 0.0  ;;  %v1453_v27 = vpop.f32.mrb[24].mxu1  ;;  %v924_v28 = vadd.f32 %v1418_v25, %v2017_v2  ;;  %v915_v29 = vpop.f32.mrb[27].mxu0 }
 0x1de   : > { %v1065_v30 = vadd.f32 %v1453_v27, %v2017_v2  ;;  %v1110_v31 = vmax.f32 %v913_v24, 0.0  ;;  %v1056_v33 = vpop.f32.mrb[25].mxu1  ;;  %v916_v34 = vadd.f32 %v2017_v2, %v915_v29 }
 0x1df   : > { %1180 = vst.msk [vmem:[%s2025_s8 + $0xd0] sm:$0xff] %vm1153_vm10, %v1112_v26  ;;  %v1057_v35 = vadd.f32 %v2017_v2, %v1056_v33  ;;  %v1113_v36 = vmax.f32 %v924_v28, 0.0  ;;  %v1454_v37 = vpop.f32.mrb[26].mxu1 }
 0x1e0   : > { %v1148_v38 = vmax.f32 %v1065_v30, 0.0  ;;  %1178 = vst.msk [vmem:[%s2025_s8 + $0xc0] sm:$0xff] %vm1153_vm10, %v1110_v31  ;;  %v1068_v39 = vadd.f32 %v1454_v37, %v2017_v2  ;;  %v1111_v40 = vmax.f32 %v916_v34, 0.0  ;;  %v1059_v41 = vpop.f32.mrb[27].mxu1 }
 0x1e1   : > { %v1146_v42 = vmax.f32 %v1057_v35, 0.0  ;;  %1181 = vst.msk [vmem:[%s2025_s8 + $0xd8] sm:$0xff] %vm1153_vm10, %v1113_v36  ;;  %v1060_v43 = vadd.f32 %v2017_v2, %v1059_v41 }
 0x1e2   : > { %1216 = vst.msk [vmem:[%s2025_s8 + $0x1f0] sm:$0xff] %vm1153_vm10, %v1148_v38  ;;  %v1149_v44 = vmax.f32 %v1068_v39, 0.0  ;;  %1179 = vst.msk [vmem:[%s2025_s8 + $0xc8] sm:$0xff] %vm1153_vm10, %v1111_v40 }
 0x1e3   : > { %1214 = vst.msk [vmem:[%s2025_s8 + $0x1e0] sm:$0xff] %vm1153_vm10, %v1146_v42  ;;  %v1147_v45 = vmax.f32 %v1060_v43, 0.0 }
 0x1e4   : > { %1217 = vst.msk [vmem:[%s2025_s8 + $0x1f8] sm:$0xff] %vm1153_vm10, %v1149_v44  ;;  %v1421_v46 = vpop.f32.mrb[28].mxu0 }
 0x1e5   : > { %1215 = vst.msk [vmem:[%s2025_s8 + $0x1e8] sm:$0xff] %vm1153_vm10, %v1147_v45  ;;  %v937_v47 = vadd.f32 %v1421_v46, %v2017_v2  ;;  %v1457_v48 = vpop.f32.mrb[28].mxu1  ;;  %v928_v49 = vpop.f32.mrb[29].mxu0 }
 0x1e6   : > { %v1081_v50 = vadd.f32 %v1457_v48, %v2017_v2  ;;  %v929_v51 = vadd.f32 %v2017_v2, %v928_v49  ;;  %v1072_v52 = vpop.f32.mrb[29].mxu1  ;;  %v1422_v53 = vpop.f32.mrb[30].mxu0 }
 0x1e7   : > { %v1116_v54 = vmax.f32 %v937_v47, 0.0  ;;  %v1073_v55 = vadd.f32 %v2017_v2, %v1072_v52  ;;  %v940_v56 = vadd.f32 %v1422_v53, %v2017_v2  ;;  %v1458_v57 = vpop.f32.mrb[30].mxu1  ;;  %v931_v58 = vpop.f32.mrb[31].mxu0 }
 0x1e8   : > { %v1152_v59 = vmax.f32 %v1081_v50, 0.0  ;;  %v1114_v60 = vmax.f32 %v929_v51, 0.0  ;;  %v932_v61 = vadd.f32 %v2017_v2, %v931_v58  ;;  %v1075_v19 = vpop.f32.mrb[31].mxu1 }
 0x1e9   : > { %1184 = vst.msk [vmem:[%s2025_s8 + $0xf0] sm:$0xff] %vm1153_vm10, %v1116_v54  ;;  %v1150_v62 = vmax.f32 %v1073_v55, 0.0  ;;  %v1117_v63 = vmax.f32 %v940_v56, 0.0  ;;  %v1076_v0 = vadd.f32 %v2017_v2, %v1075_v19 }
 0x1ea   : > { %1220 = vst.msk [vmem:[%s2025_s8 + $0x210] sm:$0xff] %vm1153_vm10, %v1152_v59  ;;  %1182 = vst.msk [vmem:[%s2025_s8 + $0xe0] sm:$0xff] %vm1153_vm10, %v1114_v60  ;;  %v1115_v1 = vmax.f32 %v932_v61, 0.0 }
 0x1eb   : > { %1218 = vst.msk [vmem:[%s2025_s8 + $0x200] sm:$0xff] %vm1153_vm10, %v1150_v62  ;;  %1185 = vst.msk [vmem:[%s2025_s8 + $0xf8] sm:$0xff] %vm1153_vm10, %v1117_v63  ;;  %v1151_v3 = vmax.f32 %v1076_v0, 0.0 }
 0x1ec   : > { %1183 = vst.msk [vmem:[%s2025_s8 + $0xe8] sm:$0xff] %vm1153_vm10, %v1115_v1  ;;  %v1425_v4 = vpop.f32.mrb[32].mxu0 }
 0x1ed   : > { %1219 = vst.msk [vmem:[%s2025_s8 + $0x208] sm:$0xff] %vm1153_vm10, %v1151_v3  ;;  %v953_v5 = vadd.f32 %v1425_v4, %v2017_v2  ;;  %v944_v6 = vpop.f32.mrb[33].mxu0 }
 0x1ee   : > { %v945_v32 = vadd.f32 %v2017_v2, %v944_v6  ;;  %v1426_v7 = vpop.f32.mrb[34].mxu0 }
 0x1ef   : > { %v1120_v8 = vmax.f32 %v953_v5, 0.0  ;;  %v956_v9 = vadd.f32 %v1426_v7, %v2017_v2  ;;  %v947_v10 = vpop.f32.mrb[35].mxu0 }
 0x1f0   : > { %v1118_v11 = vmax.f32 %v945_v32, 0.0  ;;  %v948_v12 = vadd.f32 %v2017_v2, %v947_v10 }
 0x1f1   : > { %1188 = vst.msk [vmem:[%s2025_s8 + $0x110] sm:$0xff] %vm1153_vm10, %v1120_v8  ;;  %v1121_v13 = vmax.f32 %v956_v9, 0.0 }
 0x1f2   : > { %1186 = vst.msk [vmem:[%s2025_s8 + $0x100] sm:$0xff] %vm1153_vm10, %v1118_v11  ;;  %v1119_v14 = vmax.f32 %v948_v12, 0.0 }
 0x1f3   : > { %1189 = vst.msk [vmem:[%s2025_s8 + $0x118] sm:$0xff] %vm1153_vm10, %v1121_v13 }
 0x1f4   : > { %1187 = vst.msk [vmem:[%s2025_s8 + $0x108] sm:$0xff] %vm1153_vm10, %v1119_v14 }
 0x1f5 PF: > { %s21_s22 = sadd.s32 1, %s1569_s22  }
 0x1f6   : > { %p18_p2 = scmp.ge.s32.totalorder %s21_s22, 4  }
 0x1f8   :  { %20 = sbr.rel (!%p18_p2) target bundleno = 5 (0x5), region = 79 }
 0x1ff   :  { %1243 = vsyncpa [#allocation5], 1 }
 0x200   :  { %1245 = vsyncpa [#allocation5 + $0x1], 1 }
 0x201   :  { %1246 = vsyncpa [#allocation7], 1 }

// kernel: _lambda_.4
= control target key start
LH: loop header
LB: loop body
LE: loop exit
PB: predicated region body
PF: predicated region fallthrough
CT: control target
= control target key end

     0   :  { %s911_s12 = smov 0   ;;  %s1123_s0 = inlined_call_operand.vmem [shape: f32[208,400], index: 0, kind: input, shape index: {}]   ;;  %s1124_s1 = inlined_call_operand.vmem [shape: bf16[400,32], index: 1, kind: input, shape index: {}]   ;;  %s1125_s2 = inlined_call_operand.vmem [shape: f32[1,32], index: 2, kind: input, shape index: {}]   ;;  %s1126_s3 = inlined_call_operand.vmem [shape: f32[208,32], index: 3, kind: output, shape index: {}]  }
   0x1 LB: > { %s746_s13 = sadd.s32 4294967295, %s888_s12   ;;  %p750_p0 = scmp.ge.s32.totalorder %s888_s12, 1  ;;  %s888_s12 = sphi %s911_s12, %s13_s12  }
   0x2   : > { %p139_p1 = scmp.lt.s32.totalorder %s888_s12, 3 }
   0x4   : > { %p140_p2 = pnand %p750_p0, %p139_p1 }
   0x5   : > { %v857_v0 = vld [vmem:[%s1124_s1 + $0x40] sm:$0xff] (!%p140_p2)   ;;  %v890_v1 = vmov (!%p140_p2), 0   ;;  %v860_v4 = vld [vmem:[%s1124_s1 + $0x48] sm:$0xff] (!%p140_p2)   ;;  %v863_v7 = vld [vmem:[%s1124_s1 + $0x50] sm:$0xff] (!%p140_p2)   ;;  %s164_s28 = smul.u32 (!%p140_p2), 13, %s746_s13  ;;  %vm465_vm0 = vcmask (!%p140_p2), 130048  }
   0x6   : > { %143 = sbr.rel (%p140_p2) target bundleno = 309 (0x135), region = 32  ;;  %575 = vmatprep.subr.bf16.mxu1 (!%p140_p2), %v890_v1  ;;  %v858_v2 = vld [vmem:[%s1124_s1 + $0x80] sm:$0xff] (!%p140_p2)   ;;  %790 = vmatprep.subr.bf16.mxu0 (!%p140_p2), %v857_v0  ;;  %v861_v5 = vld [vmem:[%s1124_s1 + $0x88] sm:$0xff] (!%p140_p2)   ;;  %v864_v8 = vld [vmem:[%s1124_s1 + $0x90] sm:$0xff] (!%p140_p2)   ;;  %vm676_vm1 = vcmask (!%p140_p2), 261120  }
   0x7   : > { %v859_v3 = vld [vmem:[%s1124_s1] sm:$0xff] (!%p140_p2)   ;;  %576 = vmatpush1.bf16.msra.mxu1 (!%p140_p2), %v858_v2  ;;  %v862_v6 = vld [vmem:[%s1124_s1 + $0x8] sm:$0xff] (!%p140_p2)   ;;  %v865_v9 = vld [vmem:[%s1124_s1 + $0x10] sm:$0xff] (!%p140_p2)   ;;  %p165_p3 = scmp.lt.s32.totalorder (!%p140_p2), %s164_s28, 25 }
   0x8   : > { %791 = vmatpush3.bf16.msra.mxu0 (!%p140_p2), %v859_v3  ;;  %577 = vmatprep.subr.bf16.mxu1 (!%p140_p2), %v890_v1  ;;  %v866_v10 = vld [vmem:[%s1124_s1 + $0x58] sm:$0xff] (!%p140_p2)   ;;  %v869_v13 = vld [vmem:[%s1124_s1 + $0x60] sm:$0xff] (!%p140_p2)   ;;  %v872_v16 = vld [vmem:[%s1124_s1 + $0x68] sm:$0xff] (!%p140_p2)  }
   0x9   : > { %792 = vmatprep.subr.bf16.mxu0 (!%p140_p2), %v860_v4  ;;  %v867_v11 = vld [vmem:[%s1124_s1 + $0x98] sm:$0xff] (!%p140_p2)   ;;  %v870_v14 = vld [vmem:[%s1124_s1 + $0xa0] sm:$0xff] (!%p140_p2)   ;;  %v873_v17 = vld [vmem:[%s1124_s1 + $0xa8] sm:$0xff] (!%p140_p2)  }
   0xa   : > { %v868_v12 = vld [vmem:[%s1124_s1 + $0x18] sm:$0xff] (!%p140_p2)   ;;  %v871_v15 = vld [vmem:[%s1124_s1 + $0x20] sm:$0xff] (!%p140_p2)   ;;  %v874_v18 = vld [vmem:[%s1124_s1 + $0x28] sm:$0xff] (!%p140_p2)  }
   0xb   : > { %578 = vmatpush1.bf16.msra.mxu1 (!%p140_p2), %v861_v5  ;;  %v875_v19 = vld [vmem:[%s1124_s1 + $0x70] sm:$0xff] (!%p140_p2)   ;;  %v878_v24 = vld [vmem:[%s1124_s1 + $0x78] sm:$0xff] (!%p140_p2)   ;;  %v881_v36 = vld [vmem:[%s1124_s1 + $0xc0] sm:$0xff] (!%p140_p2)  }
   0xc   : > { %793 = vmatpush3.bf16.msra.mxu0 (!%p140_p2), %v862_v6  ;;  %579 = vmatprep.subr.bf16.mxu1 (!%p140_p2), %v890_v1  ;;  %v876_v20 = vld [vmem:[%s1124_s1 + $0xb0] sm:$0xff] (!%p140_p2)   ;;  %v879_v28 = vld [vmem:[%s1124_s1 + $0xb8] sm:$0xff] (!%p140_p2)  }
   0xd   : > { %794 = vmatprep.subr.bf16.mxu0 %v863_v7  ;;  %s1128_s28 = smov (!%p165_p3, %s164_s28), 25  ;;  %v877_v21 = vld [vmem:[%s1124_s1 + $0x30] sm:$0xff]   ;;  %v880_v30 = vld [vmem:[%s1124_s1 + $0x38] sm:$0xff]  }
   0xe   : > { %s789_s21 = sshll.u32 %s1128_s28, 5  ;;  %s753_s20 = sshll.u32 %s1128_s28, 3 }
   0xf   : > { %580 = vmatpush1.bf16.msra.mxu1 %v864_v8  ;;  %s988_s4 = scalar_lea.vmem %s1123_s0, %s789_s21  ;;  %s1081_s23 = scalar_lea.vmem %s1126_s3, %s753_s20 }
  0x10   : > { %795 = vmatpush3.bf16.msra.mxu0 %v865_v9  ;;  %581 = vmatprep.subr.bf16.mxu1 %v890_v1  ;;  %v179_v22 = vld [vmem:[%s988_s4 + $0x8] sm:$0xff]  ;;  %v181_v26 = vld [vmem:[%s988_s4 + $0x18] sm:$0xff]  ;;  %v178_v31 = vld [vmem:[%s988_s4] sm:$0xff] }
  0x11   : > { %796 = vmatprep.subr.bf16.mxu0 %v866_v10  ;;  %v183_v23 = vld [vmem:[%s988_s4 + $0x28] sm:$0xff]  ;;  %v185_v27 = vld [vmem:[%s988_s4 + $0x38] sm:$0xff]  ;;  %v182_v32 = vld [vmem:[%s988_s4 + $0x20] sm:$0xff] }
  0x12   : > { %v231_v25 = vpack.c.bf16 %v183_v23, %v179_v22  ;;  %v233_v29 = vpack.c.bf16 %v185_v27, %v181_v26  ;;  %v187_v33 = vld [vmem:[%s988_s4 + $0x48] sm:$0xff]  ;;  %v230_v35 = vpack.c.bf16 %v182_v32, %v178_v31  ;;  %v180_v37 = vld [vmem:[%s988_s4 + $0x10] sm:$0xff]  ;;  %v189_v40 = vld [vmem:[%s988_s4 + $0x58] sm:$0xff] }
  0x13   : > { %582 = vmatpush1.bf16.msra.mxu1 %v867_v11  ;;  %v191_v34 = vld [vmem:[%s988_s4 + $0x68] sm:$0xff]  ;;  %v184_v38 = vld [vmem:[%s988_s4 + $0x30] sm:$0xff]  ;;  %v193_v41 = vld [vmem:[%s988_s4 + $0x78] sm:$0xff] }
  0x14   : > { %797 = vmatpush3.bf16.msra.mxu0 %v868_v12  ;;  %583 = vmatprep.subr.bf16.mxu1 %v890_v1  ;;  %v235_v39 = vpack.c.bf16 %v191_v34, %v187_v33  ;;  %v232_v42 = vpack.c.bf16 %v184_v38, %v180_v37  ;;  %v237_v43 = vpack.c.bf16 %v193_v41, %v189_v40  ;;  %v186_v44 = vld [vmem:[%s988_s4 + $0x40] sm:$0xff]  ;;  %v195_v46 = vld [vmem:[%s988_s4 + $0x88] sm:$0xff]  ;;  %v188_v49 = vld [vmem:[%s988_s4 + $0x50] sm:$0xff] }
  0x15   : > { %798 = vmatprep.subr.bf16.mxu0 %v869_v13  ;;  %519 = vmatprep.mubr.bf16.mxu0 %v231_v25  ;;  %v190_v45 = vld [vmem:[%s988_s4 + $0x60] sm:$0xff]  ;;  %v199_v47 = vld [vmem:[%s988_s4 + $0xa8] sm:$0xff]  ;;  %v192_v50 = vld [vmem:[%s988_s4 + $0x70] sm:$0xff] }
  0x16   : > { %780 = vmatprep.mubr.msk.bf16.mxu1 %vm465_vm0, %v233_v29  ;;  %v234_v48 = vpack.c.bf16 %v190_v45, %v186_v44  ;;  %v239_v51 = vpack.c.bf16 %v199_v47, %v195_v46  ;;  %v197_v52 = vld [vmem:[%s988_s4 + $0x98] sm:$0xff]  ;;  %v236_v54 = vpack.c.bf16 %v192_v50, %v188_v49  ;;  %v194_v56 = vld [vmem:[%s988_s4 + $0x80] sm:$0xff]  ;;  %v203_v58 = vld [vmem:[%s988_s4 + $0xc8] sm:$0xff] }
  0x17   : > { %584 = vmatpush1.bf16.msra.mxu1 %v870_v14  ;;  %v201_v53 = vld [vmem:[%s988_s4 + $0xb8] sm:$0xff]  ;;  %v198_v57 = vld [vmem:[%s988_s4 + $0xa0] sm:$0xff]  ;;  %v207_v59 = vld [vmem:[%s988_s4 + $0xe8] sm:$0xff] }
  0x18   : > { %799 = vmatpush3.bf16.msra.mxu0 %v871_v15  ;;  %585 = vmatprep.subr.bf16.mxu1 %v890_v1  ;;  %v241_v55 = vpack.c.bf16 %v201_v53, %v197_v52  ;;  %v238_v60 = vpack.c.bf16 %v198_v57, %v194_v56  ;;  %v196_v61 = vld [vmem:[%s988_s4 + $0x90] sm:$0xff]  ;;  %v243_v63 = vpack.c.bf16 %v207_v59, %v203_v58  ;;  %v205_v0 = vld [vmem:[%s988_s4 + $0xd8] sm:$0xff]  ;;  %v202_v4 = vld [vmem:[%s988_s4 + $0xc0] sm:$0xff] }
  0x19   : > { %800 = vmatprep.subr.bf16.mxu0 %v872_v16  ;;  %v200_v62 = vld [vmem:[%s988_s4 + $0xb0] sm:$0xff]  ;;  %v206_v5 = vld [vmem:[%s988_s4 + $0xe0] sm:$0xff]  ;;  %v211_v6 = vld [vmem:[%s988_s4 + $0x108] sm:$0xff] }
  0x1a   : > { %v240_v2 = vpack.c.bf16 %v200_v62, %v196_v61  ;;  %v215_v7 = vld [vmem:[%s988_s4 + $0x128] sm:$0xff]  ;;  %v242_v8 = vpack.c.bf16 %v206_v5, %v202_v4  ;;  %v204_v9 = vld [vmem:[%s988_s4 + $0xd0] sm:$0xff]  ;;  %v213_v12 = vld [vmem:[%s988_s4 + $0x118] sm:$0xff] }
  0x1b   : > { %586 = vmatpush1.bf16.msra.mxu1 %v873_v17  ;;  %v208_v10 = vld [vmem:[%s988_s4 + $0xf0] sm:$0xff]  ;;  %v247_v11 = vpack.c.bf16 %v215_v7, %v211_v6  ;;  %v217_v13 = vld [vmem:[%s988_s4 + $0x138] sm:$0xff]  ;;  %v210_v16 = vld [vmem:[%s988_s4 + $0x100] sm:$0xff] }
  0x1c   : > { %801 = vmatpush3.bf16.msra.mxu0 %v874_v18  ;;  %587 = vmatprep.subr.bf16.mxu1 %v890_v1  ;;  %v244_v14 = vpack.c.bf16 %v208_v10, %v204_v9  ;;  %v249_v15 = vpack.c.bf16 %v217_v13, %v213_v12  ;;  %v214_v17 = vld [vmem:[%s988_s4 + $0x120] sm:$0xff]  ;;  %v219_v18 = vld [vmem:[%s988_s4 + $0x148] sm:$0xff]  ;;  %v216_v22 = vld [vmem:[%s988_s4 + $0x130] sm:$0xff] }
  0x1d   : > { %802 = vmatprep.subr.bf16.mxu0 %v875_v19  ;;  %v223_v19 = vld [vmem:[%s988_s4 + $0x168] sm:$0xff]  ;;  %v225_v25 = vld [vmem:[%s988_s4 + $0x178] sm:$0xff]  ;;  %v222_v29 = vld [vmem:[%s988_s4 + $0x160] sm:$0xff] }
  0x1e   : > { %v251_v23 = vpack.c.bf16 %v223_v19, %v219_v18  ;;  %v220_v32 = vld [vmem:[%s988_s4 + $0x150] sm:$0xff]  ;;  %v226_v38 = vld [vmem:[%s988_s4 + $0x180] sm:$0xff] }
  0x1f   : > { %588 = vmatpush1.bf16.msra.mxu1 %v876_v20  ;;  %v246_v20 = vpack.c.bf16 %v214_v17, %v210_v16  ;;  %v224_v33 = vld [vmem:[%s988_s4 + $0x170] sm:$0xff]  ;;  %v1073_v44 = vld [vmem:[%s1125_s2] ss:$0 sm:$0xff] }
  0x20   : > { %803 = vmatpush3.bf16.msra.mxu0 %v877_v21  ;;  %589 = vmatprep.subr.bf16.mxu1 %v890_v1  ;;  %v212_v21 = vld [vmem:[%s988_s4 + $0x110] sm:$0xff] }
  0x21   : > { %804 = vmatprep.subr.bf16.mxu0 %v878_v24  ;;  %v221_v24 = vld [vmem:[%s988_s4 + $0x158] sm:$0xff]  ;;  %v248_v26 = vpack.c.bf16 %v216_v22, %v212_v21  ;;  %v228_v40 = vld [vmem:[%s988_s4 + $0x190] sm:$0xff] }
  0x22   : > { %v253_v27 = vpack.c.bf16 %v225_v25, %v221_v24  ;;  %v256_v41 = vpack.c.bf16 %v228_v40, %v228_v40 }
  0x23   : > { %590 = vmatpush1.bf16.msra.mxu1 %v879_v28  ;;  %v218_v28 = vld [vmem:[%s988_s4 + $0x140] sm:$0xff] }
  0x24   : > { %805 = vmatpush3.bf16.msra.mxu0 %v880_v30  ;;  %591 = vmatprep.subr.bf16.mxu1 %v890_v1  ;;  %v209_v1 = vld [vmem:[%s988_s4 + $0xf8] sm:$0xff]  ;;  %v227_v30 = vld [vmem:[%s988_s4 + $0x188] sm:$0xff]  ;;  %v250_v31 = vpack.c.bf16 %v222_v29, %v218_v28 }
  0x25   : > { %v245_v3 = vpack.c.bf16 %v209_v1, %v205_v0  ;;  %v255_v34 = vpack.c.bf16 %v227_v30, %v227_v30 }
  0x27   : > { %520 = vmatmul.mubr.bf16.vlgmr.msra.gmra.mrb[0].mxu0 %v230_v35  ;;  %592 = vmatpush1.bf16.msra.mxu1 %v881_v36  ;;  %v229_v35 = vld [vmem:[%s988_s4 + $0x198] sm:$0xff]  ;;  %v252_v36 = vpack.c.bf16 %v224_v33, %v220_v32 }
  0x28   : > { %527 = vmatprep.mubr.bf16.mxu0 %v235_v39  ;;  %v257_v37 = vpack.c.bf16 %v229_v35, %v229_v35  ;;  %v254_v39 = vpack.c.bf16 %v226_v38, %v226_v38 }
  0x2a   : > { %608 = vmatmul.mubr.bf16.vlgmr.msra.gmra.mrb[0].mxu1 %v232_v42 }
  0x2b   : > { %781 = vmatprep.mubr.msk.bf16.mxu1 %vm465_vm0, %v237_v43 }
  0x2f   : > { %528 = vmatmul.mubr.bf16.gmra.mrb[4].mxu0 %v234_v48 }
  0x30   : > { %535 = vmatprep.mubr.bf16.mxu0 %v239_v51 }
  0x32   : > { %616 = vmatmul.mubr.bf16.gmra.mrb[4].mxu1 %v236_v54 }
  0x33   : > { %782 = vmatprep.mubr.msk.bf16.mxu1 %vm465_vm0, %v241_v55 }
  0x37   : > { %536 = vmatmul.mubr.bf16.gmra.mrb[8].mxu0 %v238_v60 }
  0x38   : > { %543 = vmatprep.mubr.bf16.mxu0 %v243_v63 }
  0x3a   : > { %624 = vmatmul.mubr.bf16.gmra.mrb[8].mxu1 %v240_v2 }
  0x3b   : > { %783 = vmatprep.mubr.msk.bf16.mxu1 %vm465_vm0, %v245_v3 }
  0x3f   : > { %544 = vmatmul.mubr.bf16.gmra.mrb[12].mxu0 %v242_v8 }
  0x40   : > { %551 = vmatprep.mubr.bf16.mxu0 %v247_v11 }
  0x42   : > { %632 = vmatmul.mubr.bf16.gmra.mrb[12].mxu1 %v244_v14 }
  0x43   : > { %784 = vmatprep.mubr.msk.bf16.mxu1 %vm465_vm0, %v249_v15 }
  0x47   : > { %552 = vmatmul.mubr.bf16.gmra.mrb[16].mxu0 %v246_v20 }
  0x48   : > { %559 = vmatprep.mubr.bf16.mxu0 %v251_v23 }
  0x4a   : > { %640 = vmatmul.mubr.bf16.gmra.mrb[16].mxu1 %v248_v26 }
  0x4b   : > { %785 = vmatprep.mubr.msk.bf16.mxu1 %vm465_vm0, %v253_v27 }
  0x4f   : > { %560 = vmatmul.mubr.bf16.gmra.mrb[20].mxu0 %v250_v31 }
  0x50   : > { %567 = vmatprep.mubr.bf16.mxu0 %v255_v34 }
  0x52   : > { %648 = vmatmul.mubr.bf16.gmra.mrb[20].mxu1 %v252_v36 }
  0x53   : > { %786 = vmatprep.mubr.msk.bf16.mxu1 %vm465_vm0, %v257_v37 }
  0x57   : > { %568 = vmatmul.mubr.bf16.gmra.mrb[24].mxu0 %v254_v39 }
  0x5a   : > { %656 = vmatmul.mubr.bf16.gmra.mrb[24].mxu1 %v256_v41 }
  0xfa   : > { %v806_v42 = vpop.f32.mrb[0].mxu0 }
  0xfb   : > { %v807_v43 = vpop.f32.mrb[1].mxu0 }
  0xfc   : > { %v808_v45 = vadd.f32 %v807_v43, %v806_v42  ;;  %v809_v46 = vpop.f32.mrb[2].mxu0 }
  0xfd   : > { %v810_v47 = vpop.f32.mrb[3].mxu0  ;;  %v609_v48 = vpop.f32.mrb[0].mxu1 }
  0xfe   : > { %v811_v49 = vadd.f32 %v810_v47, %v809_v46  ;;  %v522_v50 = vadd.f32 %v808_v45, %v1073_v44  ;;  %v611_v51 = vpop.f32.mrb[1].mxu1 }
  0xff   : > { %v612_v52 = vpop.f32.mrb[2].mxu1 }
 0x100   : > { %v610_v53 = vadd.f32 %v609_v48, %v522_v50  ;;  %v525_v54 = vadd.f32 %v811_v49, %v1073_v44  ;;  %v614_v55 = vpop.f32.mrb[3].mxu1 }
 0x102   : > { %v663_v56 = vmax.f32 %v610_v53, 0.0  ;;  %v613_v57 = vadd.f32 %v612_v52, %v525_v54  ;;  %v812_v58 = vpop.f32.mrb[4].mxu0 }
 0x103   : > { %v813_v59 = vpop.f32.mrb[5].mxu0 }
 0x104   : > { %677 = vst.msk [vmem:[%s1081_s23] sm:$0xff] %vm676_vm1, %v663_v56  ;;  %v664_v60 = vmax.f32 %v613_v57, 0.0  ;;  %v814_v61 = vadd.f32 %v813_v59, %v812_v58  ;;  %v815_v62 = vpop.f32.mrb[6].mxu0 }
 0x105   : > { %v816_v63 = vpop.f32.mrb[7].mxu0  ;;  %v617_v0 = vpop.f32.mrb[4].mxu1 }
 0x106   : > { %678 = vst.msk [vmem:[%s1081_s23 + $0x8] sm:$0xff] %vm676_vm1, %v664_v60  ;;  %v817_v1 = vadd.f32 %v816_v63, %v815_v62  ;;  %v530_v2 = vadd.f32 %v814_v61, %v1073_v44  ;;  %v619_v3 = vpop.f32.mrb[5].mxu1 }
 0x107   : > { %v620_v4 = vpop.f32.mrb[6].mxu1 }
 0x108   : > { %v618_v5 = vadd.f32 %v617_v0, %v530_v2  ;;  %v533_v6 = vadd.f32 %v817_v1, %v1073_v44  ;;  %v622_v7 = vpop.f32.mrb[7].mxu1 }
 0x10a   : > { %v665_v8 = vmax.f32 %v618_v5, 0.0  ;;  %v621_v9 = vadd.f32 %v620_v4, %v533_v6  ;;  %v818_v10 = vpop.f32.mrb[8].mxu0 }
 0x10b   : > { %v819_v11 = vpop.f32.mrb[9].mxu0 }
 0x10c   : > { %679 = vst.msk [vmem:[%s1081_s23 + $0x10] sm:$0xff] %vm676_vm1, %v665_v8  ;;  %v666_v12 = vmax.f32 %v621_v9, 0.0  ;;  %v820_v13 = vadd.f32 %v819_v11, %v818_v10  ;;  %v821_v14 = vpop.f32.mrb[10].mxu0 }
 0x10d   : > { %v822_v15 = vpop.f32.mrb[11].mxu0  ;;  %v625_v16 = vpop.f32.mrb[8].mxu1 }
 0x10e   : > { %680 = vst.msk [vmem:[%s1081_s23 + $0x18] sm:$0xff] %vm676_vm1, %v666_v12  ;;  %v823_v17 = vadd.f32 %v822_v15, %v821_v14  ;;  %v538_v18 = vadd.f32 %v820_v13, %v1073_v44  ;;  %v627_v19 = vpop.f32.mrb[9].mxu1 }
 0x10f   : > { %v628_v20 = vpop.f32.mrb[10].mxu1 }
 0x110   : > { %v626_v21 = vadd.f32 %v625_v16, %v538_v18  ;;  %v541_v22 = vadd.f32 %v823_v17, %v1073_v44  ;;  %v630_v23 = vpop.f32.mrb[11].mxu1 }
 0x112   : > { %v667_v24 = vmax.f32 %v626_v21, 0.0  ;;  %v629_v25 = vadd.f32 %v628_v20, %v541_v22  ;;  %v824_v26 = vpop.f32.mrb[12].mxu0 }
 0x113   : > { %v825_v27 = vpop.f32.mrb[13].mxu0 }
 0x114   : > { %681 = vst.msk [vmem:[%s1081_s23 + $0x20] sm:$0xff] %vm676_vm1, %v667_v24  ;;  %v668_v28 = vmax.f32 %v629_v25, 0.0  ;;  %v826_v29 = vadd.f32 %v825_v27, %v824_v26  ;;  %v827_v30 = vpop.f32.mrb[14].mxu0 }
 0x115   : > { %v828_v31 = vpop.f32.mrb[15].mxu0  ;;  %v633_v32 = vpop.f32.mrb[12].mxu1 }
 0x116   : > { %682 = vst.msk [vmem:[%s1081_s23 + $0x28] sm:$0xff] %vm676_vm1, %v668_v28  ;;  %v829_v33 = vadd.f32 %v828_v31, %v827_v30  ;;  %v546_v34 = vadd.f32 %v826_v29, %v1073_v44  ;;  %v635_v35 = vpop.f32.mrb[13].mxu1 }
 0x117   : > { %v636_v36 = vpop.f32.mrb[14].mxu1 }
 0x118   : > { %v634_v37 = vadd.f32 %v633_v32, %v546_v34  ;;  %v549_v38 = vadd.f32 %v829_v33, %v1073_v44  ;;  %v638_v39 = vpop.f32.mrb[15].mxu1 }
 0x11a   : > { %v669_v40 = vmax.f32 %v634_v37, 0.0  ;;  %v637_v41 = vadd.f32 %v636_v36, %v549_v38  ;;  %v830_v42 = vpop.f32.mrb[16].mxu0 }
 0x11b   : > { %v831_v43 = vpop.f32.mrb[17].mxu0 }
 0x11c   : > { %683 = vst.msk [vmem:[%s1081_s23 + $0x30] sm:$0xff] %vm676_vm1, %v669_v40  ;;  %v670_v45 = vmax.f32 %v637_v41, 0.0  ;;  %v832_v46 = vadd.f32 %v831_v43, %v830_v42  ;;  %v833_v47 = vpop.f32.mrb[18].mxu0 }
 0x11d   : > { %v834_v48 = vpop.f32.mrb[19].mxu0  ;;  %v641_v49 = vpop.f32.mrb[16].mxu1 }
 0x11e   : > { %684 = vst.msk [vmem:[%s1081_s23 + $0x38] sm:$0xff] %vm676_vm1, %v670_v45  ;;  %v835_v50 = vadd.f32 %v834_v48, %v833_v47  ;;  %v554_v51 = vadd.f32 %v832_v46, %v1073_v44  ;;  %v643_v52 = vpop.f32.mrb[17].mxu1 }
 0x11f   : > { %v644_v53 = vpop.f32.mrb[18].mxu1 }
 0x120   : > { %v642_v54 = vadd.f32 %v641_v49, %v554_v51  ;;  %v557_v55 = vadd.f32 %v835_v50, %v1073_v44  ;;  %v646_v56 = vpop.f32.mrb[19].mxu1 }
 0x122   : > { %v671_v57 = vmax.f32 %v642_v54, 0.0  ;;  %v645_v58 = vadd.f32 %v644_v53, %v557_v55  ;;  %v836_v59 = vpop.f32.mrb[20].mxu0 }
 0x123   : > { %v837_v60 = vpop.f32.mrb[21].mxu0 }
 0x124   : > { %685 = vst.msk [vmem:[%s1081_s23 + $0x40] sm:$0xff] %vm676_vm1, %v671_v57  ;;  %v672_v61 = vmax.f32 %v645_v58, 0.0  ;;  %v838_v62 = vadd.f32 %v837_v60, %v836_v59  ;;  %v839_v63 = vpop.f32.mrb[22].mxu0 }
 0x125   : > { %v840_v0 = vpop.f32.mrb[23].mxu0  ;;  %v649_v1 = vpop.f32.mrb[20].mxu1 }
 0x126   : > { %686 = vst.msk [vmem:[%s1081_s23 + $0x48] sm:$0xff] %vm676_vm1, %v672_v61  ;;  %v841_v2 = vadd.f32 %v840_v0, %v839_v63  ;;  %v562_v3 = vadd.f32 %v838_v62, %v1073_v44  ;;  %v651_v4 = vpop.f32.mrb[21].mxu1 }
 0x127   : > { %v652_v5 = vpop.f32.mrb[22].mxu1 }
 0x128   : > { %v650_v6 = vadd.f32 %v649_v1, %v562_v3  ;;  %v565_v7 = vadd.f32 %v841_v2, %v1073_v44  ;;  %v654_v8 = vpop.f32.mrb[23].mxu1 }
 0x12a   : > { %v673_v9 = vmax.f32 %v650_v6, 0.0  ;;  %v653_v10 = vadd.f32 %v652_v5, %v565_v7  ;;  %v842_v11 = vpop.f32.mrb[24].mxu0 }
 0x12b   : > { %v843_v12 = vpop.f32.mrb[25].mxu0 }
 0x12c   : > { %687 = vst.msk [vmem:[%s1081_s23 + $0x50] sm:$0xff] %vm676_vm1, %v673_v9  ;;  %v674_v13 = vmax.f32 %v653_v10, 0.0  ;;  %v844_v14 = vadd.f32 %v843_v12, %v842_v11  ;;  %v845_v15 = vpop.f32.mrb[26].mxu0 }
 0x12d   : > { %v846_v16 = vpop.f32.mrb[27].mxu0  ;;  %v657_v17 = vpop.f32.mrb[24].mxu1 }
 0x12e   : > { %688 = vst.msk [vmem:[%s1081_s23 + $0x58] sm:$0xff] %vm676_vm1, %v674_v13  ;;  %v570_v18 = vadd.f32 %v844_v14, %v1073_v44  ;;  %v659_v19 = vpop.f32.mrb[25].mxu1 }
 0x12f   : > { %v660_v20 = vpop.f32.mrb[26].mxu1 }
 0x130   : > { %v658_v21 = vadd.f32 %v657_v17, %v570_v18  ;;  %v661_v22 = vpop.f32.mrb[27].mxu1 }
 0x132   : > { %v675_v23 = vmax.f32 %v658_v21, 0.0 }
 0x134   : > { %689 = vst.msk [vmem:[%s1081_s23 + $0x60] sm:$0xff] %vm676_vm1, %v675_v23 }
 0x135 PF: > { %s13_s12 = sadd.s32 1, %s888_s12  }
 0x136   : > { %p10_p4 = scmp.ge.s32.totalorder %s13_s12, 4  }
 0x138   :  { %12 = sbr.rel (!%p10_p4) target bundleno = 1 (0x1), region = 62 }

// kernel: _lambda_.5
= control target key start
LH: loop header
LB: loop body
LE: loop exit
PB: predicated region body
PF: predicated region fallthrough
CT: control target
= control target key end

     0   :  { %v137_v28 = vlaneseq  ;;  %v8257_v36 = vmov 1983009808   ;;  %v11332_v38 = vmov 0.0   ;;  %vm8259_vm0 = vmmov 0   ;;  %s11324_s0 = inlined_call_operand.vmem [shape: f32[9,2,800], index: 0, kind: input, shape index: {}]   ;;  %s11325_s1 = inlined_call_operand.vmem [shape: bf16[800,64], index: 1, kind: input, shape index: {}]   ;;  %s11326_s2 = inlined_call_operand.vmem [shape: f32[1,64], index: 2, kind: input, shape index: {}]   ;;  %s11327_s3 = inlined_call_operand.vmem [shape: bf16[9,64,1024], index: 3, kind: input, shape index: {}]   ;;  %s11328_s4 = inlined_call_operand.vmem [shape: f32[1,1024], index: 4, kind: input, shape index: {}]   ;;  %s11329_s5 = inlined_call_operand.vmem [shape: bf16[1024,12], index: 5, kind: input, shape index: {}]   ;;  %s11330_s6 = inlined_call_operand.vmem [shape: f32[1,12], index: 6, kind: input, shape index: {}]   ;;  %s11331_s7 = inlined_call_operand.hbm [shape: f32[2,12], index: 7, kind: output, shape index: {}]  }
   0x1   :  { %v8305_v0 = vld [vmem:[%s11325_s1 + $0x40] sm:$0xff]   ;;  %v8328_v4 = vld [vmem:[%s11325_s1 + $0x48] sm:$0xff]   ;;  %v8352_v8 = vld [vmem:[%s11325_s1 + $0x50] sm:$0xff]   ;;  %v135_v37 = vunpack.c.l.s4 %v8257_v36  ;;  %vm486_vm1 = vcmask 261120  }
   0x2   :  { %v8310_v1 = vld [vmem:[%s11325_s1 + $0xc0] sm:$0xff]   ;;  %7166 = vmatprep.subr.bf16.mxu0 %v8305_v0  ;;  %v8334_v5 = vld [vmem:[%s11325_s1 + $0xc8] sm:$0xff]   ;;  %v8358_v9 = vld [vmem:[%s11325_s1 + $0xd0] sm:$0xff]   ;;  %v8492_v33 = vshrl.u32 %v137_v28, 7 }
   0x3   :  { %v8316_v2 = vld [vmem:[%s11325_s1] sm:$0xff]   ;;  %7188 = vmatprep.subr.bf16.mxu1 %v8310_v1  ;;  %v8340_v6 = vld [vmem:[%s11325_s1 + $0x8] sm:$0xff]   ;;  %v8364_v10 = vld [vmem:[%s11325_s1 + $0x10] sm:$0xff]   ;;  %v136_v39 = vunpack.c.0.s8 %v135_v37 }
   0x4   :  { %v8322_v3 = vld [vmem:[%s11325_s1 + $0x80] sm:$0xff]   ;;  %7167 = vmatpush3.bf16.msra.mxu0 %v8316_v2  ;;  %v8346_v7 = vld [vmem:[%s11325_s1 + $0x88] sm:$0xff]   ;;  %v8370_v11 = vld [vmem:[%s11325_s1 + $0x90] sm:$0xff]   ;;  %11411 = vst [vmem:[#allocation5_spill] sm:$0xff] %v8492_v33 }
   0x5   :  { %7189 = vmatpush3.bf16.msra.mxu1 %v8322_v3  ;;  %7168 = vmatprep.subr.bf16.mxu0 %v8328_v4  ;;  %v8376_v12 = vld [vmem:[%s11325_s1 + $0x58] sm:$0xff]   ;;  %v8400_v16 = vld [vmem:[%s11325_s1 + $0x60] sm:$0xff]   ;;  %v8424_v20 = vld [vmem:[%s11325_s1 + $0x68] sm:$0xff]   ;;  %v8507_v41 = vsub.s32 %v136_v39, %v8492_v33 }
   0x6   :  { %7190 = vmatprep.subr.bf16.mxu1 %v8334_v5  ;;  %v8382_v13 = vld [vmem:[%s11325_s1 + $0xd8] sm:$0xff]   ;;  %v8406_v17 = vld [vmem:[%s11325_s1 + $0xe0] sm:$0xff]   ;;  %v8430_v21 = vld [vmem:[%s11325_s1 + $0xe8] sm:$0xff]  }
   0x7   :  { %v8388_v14 = vld [vmem:[%s11325_s1 + $0x18] sm:$0xff]   ;;  %v8412_v18 = vld [vmem:[%s11325_s1 + $0x20] sm:$0xff]   ;;  %v8436_v22 = vld [vmem:[%s11325_s1 + $0x28] sm:$0xff]  }
   0x8   :  { %7169 = vmatpush3.bf16.msra.mxu0 %v8340_v6  ;;  %v8394_v15 = vld [vmem:[%s11325_s1 + $0x98] sm:$0xff]   ;;  %v8418_v19 = vld [vmem:[%s11325_s1 + $0xa0] sm:$0xff]   ;;  %v8442_v23 = vld [vmem:[%s11325_s1 + $0xa8] sm:$0xff]  }
   0x9   :  { %7191 = vmatpush3.bf16.msra.mxu1 %v8346_v7  ;;  %7170 = vmatprep.subr.bf16.mxu0 %v8352_v8  ;;  %v8448_v24 = vld [vmem:[%s11325_s1 + $0x70] sm:$0xff]   ;;  %v8472_v29 = vld [vmem:[%s11325_s1 + $0x78] sm:$0xff]   ;;  %v129_v34 = vld [vmem:[%s11324_s0] sm:$0xff] }
   0xa   :  { %7192 = vmatprep.subr.bf16.mxu1 %v8358_v9  ;;  %v8454_v25 = vld [vmem:[%s11325_s1 + $0xf0] sm:$0xff]   ;;  %v8478_v30 = vld [vmem:[%s11325_s1 + $0xf8] sm:$0xff]   ;;  %v8501_v35 = vld [vmem:[%s11325_s1 + $0x140] sm:$0xff]   ;;  %v133_v40 = vcombine.high %v129_v34, %v129_v34  ;;  %v140_v42 = vrot.slane %v129_v34, %v8507_v41 }
   0xb   :  { %v8460_v26 = vld [vmem:[%s11325_s1 + $0x30] sm:$0xff]   ;;  %v8484_v31 = vld [vmem:[%s11325_s1 + $0x38] sm:$0xff]   ;;  %v130_v44 = vld [vmem:[%s11324_s0 + $0x8] sm:$0x3f] }
   0xc   :  { %7171 = vmatpush3.bf16.msra.mxu0 %v8364_v10  ;;  %v8466_v27 = vld [vmem:[%s11325_s1 + $0xb0] sm:$0xff]   ;;  %v8490_v32 = vld [vmem:[%s11325_s1 + $0xb8] sm:$0xff]   ;;  %v147_v43 = vrot.slane %v133_v40, %v8507_v41  ;;  %v8515_v45 = vrot.slane %v130_v44, %v8507_v41  ;;  %v148_v46 = vcombine.high %v140_v42, %v140_v42  ;;  %v173_v48 = vpack.c.bf16 %v140_v42, %v140_v42  ;;  %v8520_v50 = vld [vmem:[%s11325_s1 + $0x100] sm:$0xff]  }
   0xd   :  { %7193 = vmatpush3.bf16.msra.mxu1 %v8370_v11  ;;  %7172 = vmatprep.subr.bf16.mxu0 %v8376_v12  ;;  %v150_v51 = vcombine.high %v130_v44, %v130_v44  ;;  %v8527_v55 = vld [vmem:[%s11325_s1 + $0x180] sm:$0xff]   ;;  %v8532_v56 = vld [vmem:[%s11325_s1 + $0x148] sm:$0xff]   ;;  %v8552_v61 = vld [vmem:[%s11325_s1 + $0x150] sm:$0xff]  }
   0xe   :  { %7194 = vmatprep.subr.bf16.mxu1 %v8382_v13  ;;  %v149_v47 = vcombine.high %v147_v43, %v147_v43  ;;  %v175_v49 = vpack.c.bf16 %v147_v43, %v147_v43  ;;  %v165_v52 = vcombine.high %v8515_v45, %v8515_v45  ;;  %v174_v53 = vpack.c.bf16 %v148_v46, %v148_v46  ;;  %v8537_v58 = vld [vmem:[%s11325_s1 + $0x108] sm:$0xff]   ;;  %v8559_v63 = vld [vmem:[%s11325_s1 + $0x110] sm:$0xff]   ;;  %v8569_v34 = vld [vmem:[%s11325_s1 + $0x158] sm:$0xff]  }
   0xf   :  { %v164_v59 = vrot.slane %v150_v51, %v8507_v41  ;;  %v8545_v60 = vld [vmem:[%s11325_s1 + $0x188] sm:$0xff]   ;;  %v8577_v37 = vld [vmem:[%s11325_s1 + $0x118] sm:$0xff]   ;;  %v8583_v40 = vld [vmem:[%s11325_s1 + $0x160] sm:$0xff]   ;;  %v177_v46 = vpack.c.bf16 %v8515_v45, %v8515_v45 }
  0x10   :  { %7173 = vmatpush3.bf16.msra.mxu0 %v8388_v14  ;;  %v176_v54 = vpack.c.bf16 %v149_v47, %v149_v47  ;;  %522 = vmatprep.mubr.bf16.mxu0 %v174_v53  ;;  %v178_v57 = vpack.c.bf16 %v165_v52, %v165_v52  ;;  %v6497_v28 = vld [vmem:[%s11324_s0 + $0xe] sm:$0xff]  ;;  %v8625_v44 = vld [vmem:[%s11325_s1 + $0x178] sm:$0xff]  }
  0x11   :  { %7195 = vmatpush3.bf16.msra.mxu1 %v8394_v15  ;;  %7174 = vmatprep.subr.bf16.mxu0 %v8400_v16  ;;  %v179_v62 = vpack.c.bf16 %v164_v59, %v164_v59  ;;  %v696_v36 = vrot.slane %v6497_v28, %v8507_v41  ;;  %v8597_v43 = vld [vmem:[%s11325_s1 + $0x168] sm:$0xff]  }
  0x12   :  { %7196 = vmatprep.subr.bf16.mxu1 %v8406_v17  ;;  %562 = vmatprep.mubr.bf16.mxu1 %v176_v54 }
  0x13   :  { %v704_v39 = vcombine.high %v696_v36, %v696_v36  ;;  %v729_v45 = vpack.c.bf16 %v696_v36, %v696_v36 }
  0x14   :  { %7175 = vmatpush3.bf16.msra.mxu0 %v8412_v18 }
  0x15   :  { %7197 = vmatpush3.bf16.msra.mxu1 %v8418_v19  ;;  %7176 = vmatprep.subr.bf16.mxu0 %v8424_v20  ;;  %v730_v42 = vpack.c.bf16 %v704_v39, %v704_v39 }
  0x16   :  { %7198 = vmatprep.subr.bf16.mxu1 %v8430_v21 }
  0x18   :  { %7177 = vmatpush3.bf16.msra.mxu0 %v8436_v22 }
  0x19   :  { %7199 = vmatpush3.bf16.msra.mxu1 %v8442_v23  ;;  %7178 = vmatprep.subr.bf16.mxu0 %v8448_v24 }
  0x1a   :  { %7200 = vmatprep.subr.bf16.mxu1 %v8454_v25 }
  0x1c   :  { %7179 = vmatpush3.bf16.msra.mxu0 %v8460_v26 }
  0x1d   :  { %7201 = vmatpush3.bf16.msra.mxu1 %v8466_v27  ;;  %7180 = vmatprep.subr.bf16.mxu0 %v8472_v29 }
  0x1e   :  { %7202 = vmatprep.subr.bf16.mxu1 %v8478_v30 }
  0x20   :  { %7181 = vmatpush3.bf16.msra.mxu0 %v8484_v31 }
  0x21   :  { %7203 = vmatpush3.bf16.msra.mxu1 %v8490_v32  ;;  %7210 = vmatprep.subr.bf16.mxu0 %v8501_v35 }
  0x22   :  { %7875 = vmatprep.subr.bf16.mxu1 %v11332_v38 }
  0x23   :  { %523 = vmatmul.mubr.bf16.vlgmr.msra.gmra.mrb[0].mxu0 %v173_v48 }
  0x24   :  { %563 = vmatmul.mubr.bf16.vlgmr.msra.gmra.mrb[0].mxu1 %v175_v49  ;;  %7211 = vmatpush3.bf16.msra.mxu0 %v8520_v50 }
  0x25   :  { %7876 = vmatpush3.bf16.msra.mxu1 %v8527_v55  ;;  %7212 = vmatprep.subr.bf16.mxu0 %v8532_v56 }
  0x26   :  { %7877 = vmatprep.subr.bf16.mxu1 %v11332_v38  ;;  %7879 = vmatprep.mubr.msk.bf16.mxu1 %vm8259_vm0, %v11332_v38 }
  0x27   :  { %602 = vmatprep.mubr.bf16.mxu0 %v178_v57 }
  0x28   :  { %7213 = vmatpush3.bf16.msra.mxu0 %v8537_v58 }
  0x29   :  { %7878 = vmatpush3.bf16.msra.mxu1 %v8545_v60  ;;  %7214 = vmatprep.subr.bf16.mxu0 %v8552_v61 }
  0x2a   :  { %7235 = vmatprep.subr.bf16.mxu1 %v8305_v0  ;;  %v8592_v0 = vld [vmem:[%s11325_s1 + $0x120] sm:$0xff]  }
  0x2c   :  { %7880 = vmatmul.mubr.msk.bf16.vlgmr.msra.gmra.mrb[4].mxu1 %vm486_vm1, %v179_v62  ;;  %7215 = vmatpush3.bf16.msra.mxu0 %v8559_v63 }
  0x2d   :  { %7236 = vmatpush3.bf16.msra.mxu1 %v8316_v2  ;;  %7216 = vmatprep.subr.bf16.mxu0 %v8569_v34  ;;  %v8606_v2 = vld [vmem:[%s11325_s1 + $0x128] sm:$0xff]  }
  0x2e   :  { %7237 = vmatprep.subr.bf16.mxu1 %v8328_v4  ;;  %771 = vmatprep.mubr.bf16.mxu1 %v730_v42  ;;  %v8611_v4 = vld [vmem:[%s11325_s1 + $0x170] sm:$0xff]  }
  0x30   :  { %7217 = vmatpush3.bf16.msra.mxu0 %v8577_v37 }
  0x31   :  { %7238 = vmatpush3.bf16.msra.mxu1 %v8340_v6  ;;  %7218 = vmatprep.subr.bf16.mxu0 %v8583_v40  ;;  %v8620_v6 = vld [vmem:[%s11325_s1 + $0x130] sm:$0xff]  }
  0x32   :  { %7239 = vmatprep.subr.bf16.mxu1 %v8352_v8  ;;  %v689_v8 = vcombine.high %v6497_v28, %v6497_v28 }
  0x34   :  { %7219 = vmatpush3.bf16.msra.mxu0 %v8592_v0 }
  0x35   :  { %7240 = vmatpush3.bf16.msra.mxu1 %v8364_v10  ;;  %7220 = vmatprep.subr.bf16.mxu0 %v8597_v43  ;;  %v8634_v10 = vld [vmem:[%s11325_s1 + $0x138] sm:$0xff]  }
  0x36   :  { %7241 = vmatprep.subr.bf16.mxu1 %v8376_v12  ;;  %v703_v12 = vrot.slane %v689_v8, %v8507_v41 }
  0x38   :  { %7221 = vmatpush3.bf16.msra.mxu0 %v8606_v2 }
  0x39   :  { %7242 = vmatpush3.bf16.msra.mxu1 %v8388_v14  ;;  %7222 = vmatprep.subr.bf16.mxu0 %v8611_v4  ;;  %v6498_v14 = vld [vmem:[%s11324_s0 + $0x16] sm:$0x3f] }
  0x3a   :  { %7243 = vmatprep.subr.bf16.mxu1 %v8400_v16  ;;  %v705_v16 = vcombine.high %v703_v12, %v703_v12  ;;  %v713_v47 = vrot.slane %v6498_v14, %v8507_v41 }
  0x3c   :  { %7223 = vmatpush3.bf16.msra.mxu0 %v8620_v6 }
  0x3d   :  { %7244 = vmatpush3.bf16.msra.mxu1 %v8412_v18  ;;  %7224 = vmatprep.subr.bf16.mxu0 %v8625_v44  ;;  %v732_v18 = vpack.c.bf16 %v705_v16, %v705_v16 }
  0x3e   :  { %7245 = vmatprep.subr.bf16.mxu1 %v8424_v20  ;;  %v721_v20 = vcombine.high %v713_v47, %v713_v47 }
  0x40   :  { %7225 = vmatpush3.bf16.msra.mxu0 %v8634_v10 }
  0x41   :  { %7246 = vmatpush3.bf16.msra.mxu1 %v8436_v22  ;;  %7257 = vmatprep.subr.bf16.mxu0 %v8310_v1  ;;  %v734_v1 = vpack.c.bf16 %v721_v20, %v721_v20 }
  0x42   :  { %7247 = vmatprep.subr.bf16.mxu1 %v8448_v24 }
  0x43   :  { %603 = vmatmul.mubr.bf16.vlgmr.msra.gmra.mrb[4].mxu0 %v177_v46 }
  0x44   :  { %7258 = vmatpush3.bf16.msra.mxu0 %v8322_v3  ;;  %811 = vmatprep.mubr.bf16.mxu0 %v732_v18 }
  0x45   :  { %7248 = vmatpush3.bf16.msra.mxu1 %v8460_v26  ;;  %7259 = vmatprep.subr.bf16.mxu0 %v8334_v5 }
  0x46   :  { %7249 = vmatprep.subr.bf16.mxu1 %v8472_v29 }
  0x48   :  { %7260 = vmatpush3.bf16.msra.mxu0 %v8346_v7 }
  0x49   :  { %7250 = vmatpush3.bf16.msra.mxu1 %v8484_v31  ;;  %7261 = vmatprep.subr.bf16.mxu0 %v8358_v9 }
  0x4a   :  { %7279 = vmatprep.subr.bf16.mxu1 %v8501_v35 }
  0x4c   :  { %772 = vmatmul.mubr.bf16.vlgmr.msra.gmra.mrb[8].mxu1 %v729_v45  ;;  %7262 = vmatpush3.bf16.msra.mxu0 %v8370_v11 }
  0x4d   :  { %7280 = vmatpush3.bf16.msra.mxu1 %v8520_v50  ;;  %7263 = vmatprep.subr.bf16.mxu0 %v8382_v13 }
  0x4e   :  { %7281 = vmatprep.subr.bf16.mxu1 %v8532_v56  ;;  %851 = vmatprep.mubr.bf16.mxu1 %v734_v1 }
  0x50   :  { %7264 = vmatpush3.bf16.msra.mxu0 %v8394_v15 }
  0x51   :  { %7282 = vmatpush3.bf16.msra.mxu1 %v8537_v58  ;;  %7265 = vmatprep.subr.bf16.mxu0 %v8406_v17 }
  0x52   :  { %7283 = vmatprep.subr.bf16.mxu1 %v8552_v61 }
  0x53   :  { %12 = vsyncpa [#allocation3], 0  ;;  %v731_v3 = vpack.c.bf16 %v703_v12, %v703_v12  ;;  %v706_v5 = vcombine.high %v6498_v14, %v6498_v14  ;;  %v733_v11 = vpack.c.bf16 %v713_v47, %v713_v47  ;;  %v6500_v13 = vld [vmem:[%s11327_s3 + $0x100] sm:$0xff]  ;;  %v6501_v17 = vld [vmem:[%s11327_s3 + $0x108] sm:$0xff]  ;;  %vm1094_vm2 = vcmask 523264  }
  0x54   :  { %7266 = vmatpush3.bf16.msra.mxu0 %v8418_v19  ;;  %v6504_v15 = vld [vmem:[%s11327_s3 + $0x120] sm:$0xff]  ;;  %v6513_v31 = vld [vmem:[%s11327_s3 + $0x168] sm:$0xff]  ;;  %v8744_v28 = vld [vmem:[%s11327_s3 + $0x110] sm:$0xff]  ;;  %vm6429_vm3 = vcmask 91136  }
  0x55   :  { %7284 = vmatpush3.bf16.msra.mxu1 %v8559_v63  ;;  %7267 = vmatprep.subr.bf16.mxu0 %v8430_v21  ;;  %v720_v7 = vrot.slane %v706_v5, %v8507_v41  ;;  %v6533_v19 = vcombine.high %v6500_v13, %v6504_v15  ;;  %v6505_v21 = vld [vmem:[%s11327_s3 + $0x128] sm:$0xff]  ;;  %v6532_v22 = vcombine.low %v6500_v13, %v6504_v15  ;;  %v6512_v26 = vld [vmem:[%s11327_s3 + $0x160] sm:$0xff]  ;;  %v8754_v36 = vld [vmem:[%s11327_s3 + $0x118] sm:$0xff] }
  0x56   :  { %7285 = vmatprep.subr.bf16.mxu1 %v8569_v34  ;;  %v6535_v24 = vcombine.high %v6501_v17, %v6505_v21  ;;  %v6516_v48 = vld [vmem:[%s11327_s3 + $0x180] sm:$0xff]  ;;  %v6517_v50 = vld [vmem:[%s11327_s3 + $0x188] sm:$0xff]  ;;  %v8749_v34 = vld [vmem:[%s11327_s3 + $0x130] sm:$0xff] }
  0x57   :  { %v735_v9 = vpack.c.bf16 %v720_v7, %v720_v7  ;;  %v6520_v49 = vld [vmem:[%s11327_s3 + $0x1a0] sm:$0xff]  ;;  %v6521_v52 = vld [vmem:[%s11327_s3 + $0x1a8] sm:$0xff]  ;;  %v8761_v39 = vld [vmem:[%s11327_s3 + $0x138] sm:$0xff] }
  0x58   :  { %7268 = vmatpush3.bf16.msra.mxu0 %v8442_v23  ;;  %v6534_v23 = vcombine.low %v6501_v17, %v6505_v21  ;;  %v6549_v51 = vcombine.high %v6516_v48, %v6520_v49  ;;  %v6548_v53 = vcombine.low %v6516_v48, %v6520_v49  ;;  %v6550_v54 = vcombine.low %v6517_v50, %v6521_v52  ;;  %v6524_v56 = vld [vmem:[%s11327_s3 + $0x1c0] sm:$0xff]  ;;  %v6525_v58 = vld [vmem:[%s11327_s3 + $0x1c8] sm:$0xff] }
  0x59   :  { %7286 = vmatpush3.bf16.msra.mxu1 %v8577_v37  ;;  %7269 = vmatprep.subr.bf16.mxu0 %v8454_v25  ;;  %v6508_v25 = vld [vmem:[%s11327_s3 + $0x140] sm:$0xff]  ;;  %v6537_v37 = vcombine.high %v8744_v28, %v8749_v34  ;;  %v6538_v42 = vcombine.low %v8754_v36, %v8761_v39 }
  0x5a   :  { %7287 = vmatprep.subr.bf16.mxu1 %v8583_v40  ;;  %v6540_v29 = vcombine.low %v6508_v25, %v6512_v26  ;;  %v6528_v57 = vld [vmem:[%s11327_s3 + $0x1e0] sm:$0xff]  ;;  %v6536_v40 = vcombine.low %v8744_v28, %v8749_v34  ;;  %v6527_v28 = vld [vmem:[%s11327_s3 + $0x1d8] sm:$0xff] }
  0x5b   :  { %v6557_v59 = vcombine.high %v6524_v56, %v6528_v57  ;;  %v6556_v61 = vcombine.low %v6524_v56, %v6528_v57  ;;  %v8774_v8 = vld [vmem:[%s11326_s2] ss:$0 sm:$0xff]  ;;  %v6531_v34 = vld [vmem:[%s11327_s3 + $0x1f8] sm:$0xff] }
  0x5c   :  { %7270 = vmatpush3.bf16.msra.mxu0 %v8466_v27  ;;  %v6509_v27 = vld [vmem:[%s11327_s3 + $0x148] sm:$0xff] }
  0x5d   :  { %7288 = vmatpush3.bf16.msra.mxu1 %v8592_v0  ;;  %7271 = vmatprep.subr.bf16.mxu0 %v8478_v30  ;;  %v6541_v30 = vcombine.high %v6508_v25, %v6512_v26  ;;  %v6543_v35 = vcombine.high %v6509_v27, %v6513_v31  ;;  %v6539_v0 = vcombine.high %v8754_v36, %v8761_v39 }
  0x5e   :  { %7289 = vmatprep.subr.bf16.mxu1 %v8597_v43  ;;  %v11334_v43 = vmov 0  }
  0x60   :  { %7272 = vmatpush3.bf16.msra.mxu0 %v8490_v32  ;;  %v6542_v32 = vcombine.low %v6509_v27, %v6513_v31 }
  0x61   :  { %7290 = vmatpush3.bf16.msra.mxu1 %v8606_v2  ;;  %7883 = vmatprep.subr.bf16.mxu0 %v11332_v38 }
  0x62   :  { %7291 = vmatprep.subr.bf16.mxu1 %v8611_v4 }
  0x63   :  { %812 = vmatmul.mubr.bf16.vlgmr.msra.gmra.mrb[8].mxu0 %v731_v3 }
  0x64   :  { %7884 = vmatpush3.bf16.msra.mxu0 %v8527_v55  ;;  %7887 = vmatprep.mubr.msk.bf16.mxu0 %vm8259_vm0, %v11332_v38  ;;  %v6551_v55 = vcombine.high %v6517_v50, %v6521_v52 }
  0x65   :  { %7292 = vmatpush3.bf16.msra.mxu1 %v8620_v6  ;;  %7885 = vmatprep.subr.bf16.mxu0 %v11332_v38 }
  0x66   :  { %7293 = vmatprep.subr.bf16.mxu1 %v8625_v44 }
  0x68   :  { %7886 = vmatpush3.bf16.msra.mxu0 %v8545_v60  ;;  %v6529_v60 = vld [vmem:[%s11327_s3 + $0x1e8] sm:$0xff] }
  0x69   :  { %7294 = vmatpush3.bf16.msra.mxu1 %v8634_v10  ;;  %1098 = vmatprep.subr.bf16.mxu0 %v6533_v19  ;;  %v6558_v62 = vcombine.low %v6525_v58, %v6529_v60  ;;  %v6559_v63 = vcombine.high %v6525_v58, %v6529_v60 }
  0x6a   :  { %1139 = vmatprep.subr.bf16.mxu1 %v6535_v24 }
  0x6b   :  { %7888 = vmatmul.mubr.msk.bf16.vlgmr.msra.gmra.mrb[12].mxu0 %vm486_vm1, %v735_v9 }
  0x6c   :  { %852 = vmatmul.mubr.bf16.vlgmr.msra.gmra.mrb[12].mxu1 %v733_v11  ;;  %1099 = vmatpush1.bf16.msra.mxu0 %v6532_v22 }
  0x6d   :  { %1140 = vmatpush1.bf16.msra.mxu1 %v6534_v23  ;;  %1100 = vmatprep.subr.bf16.mxu0 %v6541_v30 }
  0x6e   :  { %1141 = vmatprep.subr.bf16.mxu1 %v6543_v35  ;;  %1130 = vmatprep.mubr.bf16.mxu0 %v11334_v43 }
  0x6f   :  { %1171 = vmatprep.mubr.bf16.mxu1 %v11334_v43 }
  0x70   :  { %1101 = vmatpush1.bf16.msra.mxu0 %v6540_v29 }
  0x71   :  { %1142 = vmatpush1.bf16.msra.mxu1 %v6542_v32  ;;  %1102 = vmatprep.subr.bf16.mxu0 %v6549_v51 }
  0x72   :  { %1143 = vmatprep.subr.bf16.mxu1 %v6551_v55 }
  0x74   :  { %1103 = vmatpush1.bf16.msra.mxu0 %v6548_v53 }
  0x75   :  { %1144 = vmatpush1.bf16.msra.mxu1 %v6550_v54  ;;  %1104 = vmatprep.subr.bf16.mxu0 %v6557_v59 }
  0x76   :  { %1145 = vmatprep.subr.bf16.mxu1 %v6559_v63  ;;  %v6514_v63 = vld [vmem:[%s11327_s3 + $0x170] sm:$0xff] }
  0x78   :  { %1105 = vmatpush1.bf16.msra.mxu0 %v6556_v61 }
  0x79   :  { %1146 = vmatpush1.bf16.msra.mxu1 %v6558_v62  ;;  %1180 = vmatprep.subr.bf16.mxu0 %v6537_v37  ;;  %v6510_v62 = vld [vmem:[%s11327_s3 + $0x150] sm:$0xff]  ;;  %v6511_v37 = vld [vmem:[%s11327_s3 + $0x158] sm:$0xff] }
  0x7a   :  { %1221 = vmatprep.subr.bf16.mxu1 %v6539_v0  ;;  %v6515_v0 = vld [vmem:[%s11327_s3 + $0x178] sm:$0xff] }
  0xf6   :  { %v7182_v2 = vpop.f32.mrb[0].mxu0 }
  0xf7   :  { %v7204_v4 = vpop.f32.mrb[0].mxu1  ;;  %v7183_v12 = vpop.f32.mrb[1].mxu0 }
  0xf8   :  { %v7205_v14 = vpop.f32.mrb[1].mxu1  ;;  %v7184_v16 = vadd.f32 %v7183_v12, %v7182_v2  ;;  %v7185_v47 = vpop.f32.mrb[2].mxu0  ;;  %v6545_v12 = vcombine.high %v6510_v62, %v6514_v63 }
  0xf9   :  { %v7206_v46 = vadd.f32 %v7205_v14, %v7204_v4  ;;  %v7207_v18 = vpop.f32.mrb[2].mxu1  ;;  %v7186_v45 = vpop.f32.mrb[3].mxu0  ;;  %v6547_v14 = vcombine.high %v6511_v37, %v6515_v0  ;;  %v6523_v47 = vld [vmem:[%s11327_s3 + $0x1b8] sm:$0xff] }
  0xfa   :  { %v7208_v20 = vpop.f32.mrb[3].mxu1  ;;  %v525_v1 = vadd.f32 %v7184_v16, %v8774_v8  ;;  %v6518_v16 = vld [vmem:[%s11327_s3 + $0x190] sm:$0xff]  ;;  %v6519_v18 = vld [vmem:[%s11327_s3 + $0x198] sm:$0xff]  ;;  %v6546_v45 = vcombine.low %v6511_v37, %v6515_v0 }
  0xfb   :  { %v6544_v20 = vcombine.low %v6510_v62, %v6514_v63  ;;  %v6554_v39 = vcombine.low %v6519_v18, %v6523_v47  ;;  %v654_v63 = vld [vmem:[%s11327_s3 + $0x10] sm:$0xff]  ;;  %v655_v0 = vld [vmem:[%s11327_s3 + $0x18] sm:$0xff] }
  0xfc   :  { %v565_v3 = vadd.f32 %v7206_v46, %v525_v1  ;;  %v6522_v46 = vld [vmem:[%s11327_s3 + $0x1b0] sm:$0xff] }
  0xfd   :  { %v6553_v1 = vcombine.high %v6518_v16, %v6522_v46  ;;  %v6552_v36 = vcombine.low %v6518_v16, %v6522_v46  ;;  %v658_v37 = vld [vmem:[%s11327_s3 + $0x30] sm:$0xff] }
  0xfe   :  { %v6573_v16 = vcombine.high %v654_v63, %v658_v37 }
  0xff   :  { %v644_v5 = vpop.f32.mrb[4].mxu1 }
 0x100   :  { %v7881_v7 = vpop.f32.mrb[5].mxu1 }
 0x101   :  { %v647_v9 = vpop.f32.mrb[6].mxu1  ;;  %v6530_v7 = vld [vmem:[%s11327_s3 + $0x1f0] sm:$0xff] }
 0x102   :  { %v7882_v11 = vpop.f32.mrb[7].mxu1  ;;  %v652_v9 = vld [vmem:[%s11327_s3] sm:$0xff] }
 0x103   :  { %v656_v11 = vld [vmem:[%s11327_s3 + $0x20] sm:$0xff] }
 0x116   :  { %v7226_v13 = vpop.f32.mrb[4].mxu0 }
 0x117   :  { %v7227_v15 = vpop.f32.mrb[5].mxu0 }
 0x118   :  { %v7228_v17 = vadd.f32 %v7227_v15, %v7226_v13  ;;  %v7229_v19 = vpop.f32.mrb[6].mxu0  ;;  %v653_v13 = vld [vmem:[%s11327_s3 + $0x8] sm:$0xff] }
 0x119   :  { %v7230_v21 = vpop.f32.mrb[7].mxu0  ;;  %v657_v15 = vld [vmem:[%s11327_s3 + $0x28] sm:$0xff]  ;;  %v6562_v19 = vcombine.low %v6527_v28, %v6531_v34 }
 0x11a   :  { %v605_v22 = vadd.f32 %v7228_v17, %v565_v3  ;;  %v6555_v3 = vcombine.high %v6519_v18, %v6523_v47  ;;  %v6569_v21 = vcombine.high %v652_v9, %v656_v11  ;;  %v662_v18 = vld [vmem:[%s11327_s3 + $0x50] sm:$0xff] }
 0x11b   :  { %v666_v47 = vld [vmem:[%s11327_s3 + $0x70] sm:$0xff] }
 0x11c   :  { %v8777_v23 = vadd.f32 %v644_v5, %v605_v22  ;;  %v6526_v5 = vld [vmem:[%s11327_s3 + $0x1d0] sm:$0xff]  ;;  %v6571_v22 = vcombine.high %v653_v13, %v657_v15 }
 0x11d   :  { %v6560_v17 = vcombine.low %v6526_v5, %v6530_v7 }
 0x11f   :  { %v7251_v24 = vpop.f32.mrb[8].mxu1 }
 0x120   :  { %v7252_v25 = vpop.f32.mrb[9].mxu1 }
 0x121   :  { %v7253_v26 = vadd.f32 %v7252_v25, %v7251_v24  ;;  %v7254_v27 = vpop.f32.mrb[10].mxu1  ;;  %v660_v24 = vld [vmem:[%s11327_s3 + $0x40] sm:$0xff] }
 0x122   :  { %v7255_v29 = vpop.f32.mrb[11].mxu1  ;;  %v664_v25 = vld [vmem:[%s11327_s3 + $0x60] sm:$0xff]  ;;  %v665_v27 = vld [vmem:[%s11327_s3 + $0x68] sm:$0xff] }
 0x123   :  { %v774_v32 = vadd.f32 %v7253_v26, %v8774_v8  ;;  %v661_v26 = vld [vmem:[%s11327_s3 + $0x48] sm:$0xff]  ;;  %v6568_v29 = vcombine.low %v652_v9, %v656_v11 }
 0x136   :  { %v7273_v30 = vpop.f32.mrb[8].mxu0 }
 0x137   :  { %v7274_v31 = vpop.f32.mrb[9].mxu0 }
 0x138   :  { %v7275_v35 = vadd.f32 %v7274_v31, %v7273_v30  ;;  %v7276_v48 = vpop.f32.mrb[10].mxu0  ;;  %v6570_v30 = vcombine.low %v653_v13, %v657_v15  ;;  %v6577_v31 = vcombine.high %v660_v24, %v664_v25  ;;  %v678_v15 = vld [vmem:[%s11327_s3 + $0xd0] sm:$0xff] }
 0x139   :  { %v7277_v49 = vpop.f32.mrb[11].mxu0  ;;  %v672_v48 = vld [vmem:[%s11327_s3 + $0xa0] sm:$0xff] }
 0x13a   :  { %v814_v50 = vadd.f32 %v7275_v35, %v774_v32  ;;  %v6579_v32 = vcombine.high %v661_v26, %v665_v27  ;;  %v668_v35 = vld [vmem:[%s11327_s3 + $0x80] sm:$0xff]  ;;  %v669_v49 = vld [vmem:[%s11327_s3 + $0x88] sm:$0xff] }
 0x13e   :  { %v893_v52 = vpop.f32.mrb[12].mxu0 }
 0x13f   :  { %v7295_v51 = vpop.f32.mrb[12].mxu1  ;;  %v7889_v54 = vpop.f32.mrb[13].mxu0 }
 0x140   :  { %v7296_v53 = vpop.f32.mrb[13].mxu1  ;;  %v896_v57 = vpop.f32.mrb[14].mxu0 }
 0x141   :  { %v7297_v55 = vadd.f32 %v7296_v53, %v7295_v51  ;;  %v7298_v56 = vpop.f32.mrb[14].mxu1  ;;  %v7890_v59 = vpop.f32.mrb[15].mxu0  ;;  %v6576_v51 = vcombine.low %v660_v24, %v664_v25  ;;  %v6585_v53 = vcombine.high %v668_v35, %v672_v48  ;;  %v677_v57 = vld [vmem:[%s11327_s3 + $0xc8] sm:$0xff] }
 0x142   :  { %v7299_v58 = vpop.f32.mrb[15].mxu1  ;;  %v680_v56 = vld [vmem:[%s11327_s3 + $0xe0] sm:$0xff]  ;;  %v6584_v59 = vcombine.low %v668_v35, %v672_v48 }
 0x143   :  { %v854_v60 = vadd.f32 %v7297_v55, %v814_v50  ;;  %v673_v50 = vld [vmem:[%s11327_s3 + $0xa8] sm:$0xff]  ;;  %v676_v55 = vld [vmem:[%s11327_s3 + $0xc0] sm:$0xff] }
 0x144   :  { %v6587_v54 = vcombine.high %v669_v49, %v673_v50  ;;  %v681_v58 = vld [vmem:[%s11327_s3 + $0xe8] sm:$0xff] }
 0x145   :  { %v894_v61 = vadd.f32 %v893_v52, %v854_v60  ;;  %v6578_v52 = vcombine.low %v661_v26, %v665_v27  ;;  %v6586_v60 = vcombine.low %v669_v49, %v673_v50  ;;  %v6595_v62 = vcombine.high %v677_v57, %v681_v58  ;;  %v8947_v49 = vld [vmem:[%s11325_s1 + $0x40] sm:$0xff]  }
 0x146   :  { %11412 = vst [vmem:[#allocation6_spill] sm:$0xff] %v8947_v49  ;;  %v8953_v50 = vld [vmem:[%s11325_s1 + $0xc0] sm:$0xff]  }
 0x147   :  { %v899_v2 = vmax.f32 %v894_v61, 0.0  ;;  %v6593_v61 = vcombine.high %v676_v55, %v680_v56 }
 0x149   :  { %v900_v4 = vpack.c.bf16 %v899_v2, %v899_v2  ;;  %v659_v2 = vld [vmem:[%s11327_s3 + $0x38] sm:$0xff] }
 0x14a   :  { %v6575_v46 = vcombine.high %v655_v0, %v659_v2 }
 0x14b   :  { %6564 = vmatmul.mubr.msk.bf16.vlgmr.msra.gmra.mrb[16].mxu0 %vm1094_vm2, %v900_v4  ;;  %6565 = vmatmul.mubr.msk.bf16.vlgmr.msra.gmra.mrb[16].mxu1 %vm1094_vm2, %v900_v4 }
 0x14c   :  { %1181 = vmatpush1.bf16.msra.mxu0 %v6536_v40  ;;  %1222 = vmatpush1.bf16.msra.mxu1 %v6538_v42  ;;  %v6561_v40 = vcombine.high %v6526_v5, %v6530_v7  ;;  %v6563_v42 = vcombine.high %v6527_v28, %v6531_v34  ;;  %v6581_v5 = vcombine.high %v662_v18, %v666_v47  ;;  %v670_v28 = vld [vmem:[%s11327_s3 + $0x90] sm:$0xff] }
 0x14d   :  { %1182 = vmatprep.subr.bf16.mxu0 %v6545_v12  ;;  %1223 = vmatprep.subr.bf16.mxu1 %v6547_v14  ;;  %v6594_v12 = vcombine.low %v677_v57, %v681_v58  ;;  %v650_v14 = vmax.f32 %v8777_v23, 0.0  ;;  %v667_v23 = vld [vmem:[%s11327_s3 + $0x78] sm:$0xff]  ;;  %v674_v34 = vld [vmem:[%s11327_s3 + $0xb0] sm:$0xff]  ;;  %v8985_v57 = vld [vmem:[%s11325_s1 + $0x8] sm:$0xff]  }
 0x14e   :  { %1212 = vmatprep.mubr.bf16.mxu0 %v11334_v43  ;;  %1253 = vmatprep.mubr.bf16.mxu1 %v11334_v43  ;;  %v6589_v11 = vcombine.high %v670_v28, %v674_v34  ;;  %v6588_v24 = vcombine.low %v670_v28, %v674_v34  ;;  %v8991_v58 = vld [vmem:[%s11325_s1 + $0x88] sm:$0xff]   ;;  %v9121_v28 = vld [vmem:[%s11325_s1 + $0x78] sm:$0xff]  }
 0x14f   :  { %v9127_v34 = vld [vmem:[%s11325_s1 + $0xf8] sm:$0xff]  }
 0x150   :  { %1183 = vmatpush1.bf16.msra.mxu0 %v6544_v20  ;;  %1224 = vmatpush1.bf16.msra.mxu1 %v6546_v45  ;;  %v663_v20 = vld [vmem:[%s11327_s3 + $0x58] sm:$0xff]  ;;  %v6572_v45 = vcombine.low %v654_v63, %v658_v37  ;;  %11416 = vst [vmem:[#allocation10_spill] sm:$0xff] %v9127_v34 }
 0x151   :  { %1184 = vmatprep.subr.bf16.mxu0 %v6553_v1  ;;  %1225 = vmatprep.subr.bf16.mxu1 %v6555_v3  ;;  %v6574_v1 = vcombine.low %v655_v0, %v659_v2  ;;  %v651_v3 = vpack.c.bf16 %v650_v14, %v650_v14  ;;  %v6583_v7 = vcombine.high %v663_v20, %v667_v23  ;;  %v9021_v63 = vld [vmem:[%s11325_s1 + $0x58] sm:$0xff]   ;;  %v9057_v14 = vld [vmem:[%s11325_s1 + $0x20] sm:$0xff]  }
 0x152   :  { %v6582_v9 = vcombine.low %v663_v20, %v667_v23  ;;  %v9027_v37 = vld [vmem:[%s11325_s1 + $0xd8] sm:$0xff]   ;;  %v9084_v20 = vld [vmem:[%s11325_s1 + $0x28] sm:$0xff]  }
 0x153   :  { %v9033_v0 = vld [vmem:[%s11325_s1 + $0x18] sm:$0xff]   ;;  %v9090_v23 = vld [vmem:[%s11325_s1 + $0xa8] sm:$0xff]  }
 0x154   :  { %1185 = vmatpush1.bf16.msra.mxu0 %v6552_v36  ;;  %1226 = vmatpush1.bf16.msra.mxu1 %v6554_v39  ;;  %v671_v36 = vld [vmem:[%s11327_s3 + $0x98] sm:$0xff]  ;;  %11413 = vst [vmem:[#allocation7_spill] sm:$0xff] %v9090_v23 }
 0x155   :  { %1186 = vmatprep.subr.bf16.mxu0 %v6561_v40  ;;  %1227 = vmatprep.subr.bf16.mxu1 %v6563_v42  ;;  %v675_v39 = vld [vmem:[%s11327_s3 + $0xb8] sm:$0xff]  ;;  %v6580_v42 = vcombine.low %v662_v18, %v666_v47  ;;  %v9075_v18 = vld [vmem:[%s11325_s1 + $0xe8] sm:$0xff]  }
 0x156   :  { %v6604_v40 = vld [vmem:[%s11324_s0 + $0x1c] sm:$0xff]  ;;  %v6591_v13 = vcombine.high %v671_v36, %v675_v39  ;;  %v6590_v25 = vcombine.low %v671_v36, %v675_v39  ;;  %v6605_v47 = vld [vmem:[%s11324_s0 + $0x24] sm:$0x3f] }
 0x157   :  { %v9039_v2 = vld [vmem:[%s11325_s1 + $0x98] sm:$0xff]  }
 0x158   :  { %1187 = vmatpush1.bf16.msra.mxu0 %v6560_v17  ;;  %1228 = vmatpush1.bf16.msra.mxu1 %v6562_v19  ;;  %v682_v17 = vld [vmem:[%s11327_s3 + $0xf0] sm:$0xff]  ;;  %v679_v19 = vld [vmem:[%s11327_s3 + $0xd8] sm:$0xff] }
 0x159   :  { %1425 = vmatprep.subr.bf16.mxu0 %v6569_v21  ;;  %1466 = vmatprep.subr.bf16.mxu1 %v6571_v22  ;;  %v683_v21 = vld [vmem:[%s11327_s3 + $0xf8] sm:$0xff]  ;;  %v1594_v22 = vcombine.high %v6604_v40, %v6604_v40  ;;  %v6597_v26 = vcombine.high %v678_v15, %v682_v17 }
 0x15a   :  { %v6599_v27 = vcombine.high %v679_v19, %v683_v21 }
 0x15b   :  { %6566 = vmatmul.mubr.msk.bf16.vlgmr.msra.gmra.mrb[20].mxu0 %vm1094_vm2, %v900_v4  ;;  %6567 = vmatmul.mubr.msk.bf16.vlgmr.msra.gmra.mrb[20].mxu1 %vm1094_vm2, %v900_v4  ;;  %v6592_v4 = vcombine.low %v676_v55, %v680_v56  ;;  %v8973_v55 = vld [vmem:[%s11325_s1 + $0x48] sm:$0xff]  }
 0x15c   :  { %1426 = vmatpush1.bf16.msra.mxu0 %v6568_v29  ;;  %1467 = vmatpush1.bf16.msra.mxu1 %v6570_v30  ;;  %v8935_v29 = vrot.slane %v6604_v40, %v8507_v41  ;;  %v8938_v30 = vrot.slane %v1594_v22, %v8507_v41  ;;  %v8979_v56 = vld [vmem:[%s11325_s1 + $0xc8] sm:$0xff]  }
 0x15d   :  { %1427 = vmatprep.subr.bf16.mxu0 %v6577_v31  ;;  %1468 = vmatprep.subr.bf16.mxu1 %v6579_v32  ;;  %v6596_v31 = vcombine.low %v678_v15, %v682_v17  ;;  %v6598_v32 = vcombine.low %v679_v19, %v683_v21  ;;  %v9157_v19 = vld [vmem:[%s11325_s1 + $0x100] sm:$0xff]   ;;  %v9169_v22 = vld [vmem:[%s11325_s1 + $0x148] sm:$0xff]  }
 0x15e   :  { %1457 = vmatprep.mubr.bf16.mxu0 %v11334_v43  ;;  %1498 = vmatprep.mubr.bf16.mxu1 %v11334_v43  ;;  %v1609_v35 = vcombine.high %v8935_v29, %v8935_v29  ;;  %v1610_v48 = vcombine.high %v8938_v30, %v8938_v30  ;;  %v1634_v39 = vpack.c.bf16 %v8935_v29, %v8935_v29  ;;  %v9163_v21 = vld [vmem:[%s11325_s1 + $0x180] sm:$0xff]   ;;  %v9197_v29 = vld [vmem:[%s11325_s1 + $0x110] sm:$0xff]  }
 0x15f   :  { %v1636_v40 = vpack.c.bf16 %v8938_v30, %v8938_v30  ;;  %11418 = vst [vmem:[#allocation12_spill] sm:$0xff] %v9163_v21  ;;  %11421 = vst [vmem:[#allocation15_spill] sm:$0xff] %v9197_v29  ;;  %v9204_v30 = vld [vmem:[%s11325_s1 + $0x158] sm:$0xff]  }
 0x160   :  { %1428 = vmatpush1.bf16.msra.mxu0 %v6576_v51  ;;  %1469 = vmatpush1.bf16.msra.mxu1 %v6578_v52  ;;  %v1635_v51 = vpack.c.bf16 %v1609_v35, %v1609_v35  ;;  %v1637_v52 = vpack.c.bf16 %v1610_v48, %v1610_v48  ;;  %11422 = vst [vmem:[#allocation16_spill] sm:$0xff] %v9204_v30  ;;  %v9222_v35 = vld [vmem:[%s11325_s1 + $0x120] sm:$0xff]   ;;  %v9228_v48 = vld [vmem:[%s11325_s1 + $0x168] sm:$0xff]  }
 0x161   :  { %1429 = vmatprep.subr.bf16.mxu0 %v6585_v53  ;;  %1470 = vmatprep.subr.bf16.mxu1 %v6587_v54  ;;  %v8961_v53 = vld [vmem:[%s11325_s1] sm:$0xff]   ;;  %11425 = vst [vmem:[#allocation19_spill] sm:$0xff] %v9222_v35  ;;  %11426 = vst [vmem:[#allocation20_spill] sm:$0xff] %v9228_v48 }
 0x162   :  { %v8967_v54 = vld [vmem:[%s11325_s1 + $0x80] sm:$0xff]  }
 0x164   :  { %1430 = vmatpush1.bf16.msra.mxu0 %v6584_v59  ;;  %1471 = vmatpush1.bf16.msra.mxu1 %v6586_v60  ;;  %v8997_v59 = vld [vmem:[%s11325_s1 + $0x50] sm:$0xff]  }
 0x165   :  { %1431 = vmatprep.subr.bf16.mxu0 %v6593_v61  ;;  %1472 = vmatprep.subr.bf16.mxu1 %v6595_v62  ;;  %v9003_v60 = vld [vmem:[%s11325_s1 + $0xd0] sm:$0xff]  }
 0x166   :  { %v9009_v61 = vld [vmem:[%s11325_s1 + $0x10] sm:$0xff]  }
 0x167   :  { %v9015_v62 = vld [vmem:[%s11325_s1 + $0x90] sm:$0xff]  }
 0x168   :  { %1432 = vmatpush1.bf16.msra.mxu0 %v6592_v4  ;;  %1473 = vmatpush1.bf16.msra.mxu1 %v6594_v12  ;;  %v9045_v4 = vld [vmem:[%s11325_s1 + $0x60] sm:$0xff]  }
 0x169   :  { %1507 = vmatprep.subr.bf16.mxu0 %v6573_v16  ;;  %1548 = vmatprep.subr.bf16.mxu1 %v6575_v46  ;;  %v9051_v12 = vld [vmem:[%s11325_s1 + $0xe0] sm:$0xff]   ;;  %v9069_v46 = vld [vmem:[%s11325_s1 + $0x68] sm:$0xff]  }
 0x16a   :  { %v9063_v16 = vld [vmem:[%s11325_s1 + $0xa0] sm:$0xff]  }
 0x16b   :  { %6600 = vmatmul.mubr.msk.bf16.vlgmr.msra.gmra.mrb[24].mxu0 %vm1094_vm2, %v651_v3  ;;  %6601 = vmatmul.mubr.msk.bf16.vlgmr.msra.gmra.mrb[24].mxu1 %vm1094_vm2, %v651_v3 }
 0x16c   :  { %1508 = vmatpush1.bf16.msra.mxu0 %v6572_v45  ;;  %1549 = vmatpush1.bf16.msra.mxu1 %v6574_v1  ;;  %v9096_v45 = vld [vmem:[%s11325_s1 + $0x70] sm:$0xff]  }
 0x16d   :  { %1509 = vmatprep.subr.bf16.mxu0 %v6581_v5  ;;  %1550 = vmatprep.subr.bf16.mxu1 %v6583_v7  ;;  %v9102_v1 = vld [vmem:[%s11325_s1 + $0xf0] sm:$0xff]  }
 0x16e   :  { %1539 = vmatprep.mubr.bf16.mxu0 %v11334_v43  ;;  %1580 = vmatprep.mubr.bf16.mxu1 %v11334_v43  ;;  %11414 = vst [vmem:[#allocation8_spill] sm:$0xff] %v9102_v1  ;;  %v9109_v5 = vld [vmem:[%s11325_s1 + $0x30] sm:$0xff]  }
 0x16f   :  { %v9115_v7 = vld [vmem:[%s11325_s1 + $0xb0] sm:$0xff]  }
 0x170   :  { %1510 = vmatpush1.bf16.msra.mxu0 %v6580_v42  ;;  %1551 = vmatpush1.bf16.msra.mxu1 %v6582_v9  ;;  %11415 = vst [vmem:[#allocation9_spill] sm:$0xff] %v9115_v7  ;;  %v1611_v42 = vcombine.high %v6605_v47, %v6605_v47  ;;  %v9137_v9 = vld [vmem:[%s11325_s1 + $0x38] sm:$0xff]  }
 0x171   :  { %1511 = vmatprep.subr.bf16.mxu0 %v6589_v11  ;;  %1552 = vmatprep.subr.bf16.mxu1 %v6591_v13  ;;  %v9143_v11 = vld [vmem:[%s11325_s1 + $0xb8] sm:$0xff]   ;;  %v9149_v13 = vld [vmem:[%s11325_s1 + $0x140] sm:$0xff]  }
 0x172   :  { %11417 = vst [vmem:[#allocation11_spill] sm:$0xff] %v9143_v11  ;;  %v1625_v17 = vrot.slane %v1611_v42, %v8507_v41  ;;  %v6619_v42 = vld [vmem:[%s11327_s3 + $0x260] sm:$0xff] }
 0x174   :  { %1512 = vmatpush1.bf16.msra.mxu0 %v6588_v24  ;;  %1553 = vmatpush1.bf16.msra.mxu1 %v6590_v25  ;;  %v1640_v24 = vpack.c.bf16 %v1625_v17, %v1625_v17  ;;  %v9178_v25 = vld [vmem:[%s11325_s1 + $0x108] sm:$0xff]  }
 0x175   :  { %1513 = vmatprep.subr.bf16.mxu0 %v6597_v26  ;;  %1554 = vmatprep.subr.bf16.mxu1 %v6599_v27  ;;  %v9184_v26 = vld [vmem:[%s11325_s1 + $0x188] sm:$0xff]   ;;  %v9190_v27 = vld [vmem:[%s11325_s1 + $0x150] sm:$0xff]  }
 0x176   :  { %11419 = vst [vmem:[#allocation13_spill] sm:$0xff] %v9184_v26  ;;  %11420 = vst [vmem:[#allocation14_spill] sm:$0xff] %v9190_v27 }
 0x178   :  { %1514 = vmatpush1.bf16.msra.mxu0 %v6596_v31  ;;  %1555 = vmatpush1.bf16.msra.mxu1 %v6598_v32  ;;  %v9210_v31 = vld [vmem:[%s11325_s1 + $0x118] sm:$0xff]   ;;  %v9216_v32 = vld [vmem:[%s11325_s1 + $0x160] sm:$0xff]  }
 0x179   :  { %7304 = vmatprep.subr.bf16.mxu0 %v8947_v49  ;;  %7326 = vmatprep.subr.bf16.mxu1 %v8953_v50  ;;  %11423 = vst [vmem:[#allocation17_spill] sm:$0xff] %v9210_v31  ;;  %11424 = vst [vmem:[#allocation18_spill] sm:$0xff] %v9216_v32 }
 0x17b   :  { %6602 = vmatmul.mubr.msk.bf16.vlgmr.msra.gmra.mrb[28].mxu0 %vm1094_vm2, %v651_v3  ;;  %6603 = vmatmul.mubr.msk.bf16.vlgmr.msra.gmra.mrb[28].mxu1 %vm1094_vm2, %v651_v3  ;;  %v1618_v3 = vrot.slane %v6605_v47, %v8507_v41 }
 0x17c   :  { %7305 = vmatpush3.bf16.msra.mxu0 %v8961_v53  ;;  %7327 = vmatpush3.bf16.msra.mxu1 %v8967_v54 }
 0x17d   :  { %7306 = vmatprep.subr.bf16.mxu0 %v8973_v55  ;;  %7328 = vmatprep.subr.bf16.mxu1 %v8979_v56  ;;  %v1626_v36 = vcombine.high %v1618_v3, %v1618_v3  ;;  %v1638_v47 = vpack.c.bf16 %v1618_v3, %v1618_v3  ;;  %v6615_v3 = vld [vmem:[%s11327_s3 + $0x240] sm:$0xff] }
 0x17e   :  { %1676 = vmatprep.mubr.bf16.mxu0 %v1635_v51  ;;  %1716 = vmatprep.mubr.bf16.mxu1 %v1637_v52  ;;  %v9234_v51 = vld [vmem:[%s11325_s1 + $0x128] sm:$0xff]   ;;  %v9240_v52 = vld [vmem:[%s11325_s1 + $0x170] sm:$0xff]  }
 0x17f   :  { %v1639_v15 = vpack.c.bf16 %v1626_v36, %v1626_v36  ;;  %11427 = vst [vmem:[#allocation21_spill] sm:$0xff] %v9234_v51  ;;  %11428 = vst [vmem:[#allocation22_spill] sm:$0xff] %v9240_v52  ;;  %v6607_v36 = vld [vmem:[%s11327_s3 + $0x200] sm:$0xff] }
 0x180   :  { %7307 = vmatpush3.bf16.msra.mxu0 %v8985_v57  ;;  %7329 = vmatpush3.bf16.msra.mxu1 %v8991_v58 }
 0x181   :  { %7308 = vmatprep.subr.bf16.mxu0 %v8997_v59  ;;  %7330 = vmatprep.subr.bf16.mxu1 %v9003_v60 }
 0x184   :  { %7309 = vmatpush3.bf16.msra.mxu0 %v9009_v61  ;;  %7331 = vmatpush3.bf16.msra.mxu1 %v9015_v62 }
 0x185   :  { %7310 = vmatprep.subr.bf16.mxu0 %v9021_v63  ;;  %7332 = vmatprep.subr.bf16.mxu1 %v9027_v37 }
 0x188   :  { %7311 = vmatpush3.bf16.msra.mxu0 %v9033_v0  ;;  %7333 = vmatpush3.bf16.msra.mxu1 %v9039_v2 }
 0x189   :  { %7312 = vmatprep.subr.bf16.mxu0 %v9045_v4  ;;  %7334 = vmatprep.subr.bf16.mxu1 %v9051_v12 }
 0x18c   :  { %7313 = vmatpush3.bf16.msra.mxu0 %v9057_v14  ;;  %7335 = vmatpush3.bf16.msra.mxu1 %v9063_v16 }
 0x18d   :  { %7314 = vmatprep.subr.bf16.mxu0 %v9069_v46  ;;  %7336 = vmatprep.subr.bf16.mxu1 %v9075_v18 }
 0x190   :  { %7315 = vmatpush3.bf16.msra.mxu0 %v9084_v20  ;;  %7337 = vmatpush3.bf16.msra.mxu1 %v9090_v23 }
 0x191   :  { %7316 = vmatprep.subr.bf16.mxu0 %v9096_v45  ;;  %7338 = vmatprep.subr.bf16.mxu1 %v9102_v1 }
 0x194   :  { %7317 = vmatpush3.bf16.msra.mxu0 %v9109_v5  ;;  %7339 = vmatpush3.bf16.msra.mxu1 %v9115_v7 }
 0x195   :  { %7318 = vmatprep.subr.bf16.mxu0 %v9121_v28  ;;  %7340 = vmatprep.subr.bf16.mxu1 %v9127_v34 }
 0x198   :  { %7319 = vmatpush3.bf16.msra.mxu0 %v9137_v9  ;;  %7341 = vmatpush3.bf16.msra.mxu1 %v9143_v11 }
 0x199   :  { %7348 = vmatprep.subr.bf16.mxu0 %v9149_v13  ;;  %7891 = vmatprep.subr.bf16.mxu1 %v11332_v38 }
 0x19b   :  { %1677 = vmatmul.mubr.bf16.vlgmr.msra.gmra.mrb[32].mxu0 %v1634_v39  ;;  %1717 = vmatmul.mubr.bf16.vlgmr.msra.gmra.mrb[32].mxu1 %v1636_v40  ;;  %v6611_v39 = vld [vmem:[%s11327_s3 + $0x220] sm:$0xff] }
 0x19c   :  { %7349 = vmatpush3.bf16.msra.mxu0 %v9157_v19  ;;  %7892 = vmatpush3.bf16.msra.mxu1 %v9163_v21  ;;  %v6639_v40 = vcombine.low %v6607_v36, %v6611_v39 }
 0x19d   :  { %7350 = vmatprep.subr.bf16.mxu0 %v9169_v22  ;;  %7893 = vmatprep.subr.bf16.mxu1 %v11332_v38 }
 0x19e   :  { %1756 = vmatprep.mubr.bf16.mxu0 %v1639_v15  ;;  %7895 = vmatprep.mubr.msk.bf16.mxu1 %vm8259_vm0, %v11332_v38 }
 0x1a0   :  { %7351 = vmatpush3.bf16.msra.mxu0 %v9178_v25  ;;  %7894 = vmatpush3.bf16.msra.mxu1 %v9184_v26 }
 0x1a1   :  { %7352 = vmatprep.subr.bf16.mxu0 %v9190_v27 }
 0x1a3   :  { %7896 = vmatmul.mubr.msk.bf16.vlgmr.msra.gmra.mrb[36].mxu1 %vm486_vm1, %v1640_v24  ;;  %v6648_v24 = vcombine.high %v6615_v3, %v6619_v42 }
 0x1a4   :  { %7353 = vmatpush3.bf16.msra.mxu0 %v9197_v29  ;;  %2034 = vmatprep.mubr.bf16.mxu1 %v11334_v43 }
 0x1a5   :  { %7354 = vmatprep.subr.bf16.mxu0 %v9204_v30 }
 0x1a8   :  { %7355 = vmatpush3.bf16.msra.mxu0 %v9210_v31 }
 0x1a9   :  { %7356 = vmatprep.subr.bf16.mxu0 %v9216_v32 }
 0x1ac   :  { %7357 = vmatpush3.bf16.msra.mxu0 %v9222_v35 }
 0x1ad   :  { %7358 = vmatprep.subr.bf16.mxu0 %v9228_v48 }
 0x1b0   :  { %7359 = vmatpush3.bf16.msra.mxu0 %v9234_v51 }
 0x1b1   :  { %7360 = vmatprep.subr.bf16.mxu0 %v9240_v52 }
 0x1b4   :  { %7361 = vmatpush3.bf16.msra.mxu0 %v8620_v6  ;;  %v6609_v6 = vld [vmem:[%s11327_s3 + $0x210] sm:$0xff] }
 0x1b5   :  { %7362 = vmatprep.subr.bf16.mxu0 %v8625_v44  ;;  %v6640_v44 = vcombine.high %v6607_v36, %v6611_v39  ;;  %v6617_v36 = vld [vmem:[%s11327_s3 + $0x250] sm:$0xff] }
 0x1b6   :  { %v6621_v39 = vld [vmem:[%s11327_s3 + $0x270] sm:$0xff] }
 0x1b7   :  { %2002 = vmatprep.subr.bf16.mxu1 %v6640_v44  ;;  %v6652_v38 = vcombine.high %v6617_v36, %v6621_v39  ;;  %v6625_v44 = vld [vmem:[%s11327_s3 + $0x290] sm:$0xff] }
 0x1b8   :  { %7363 = vmatpush3.bf16.msra.mxu0 %v8634_v10  ;;  %v6613_v10 = vld [vmem:[%s11327_s3 + $0x230] sm:$0xff]  ;;  %2003 = vmatpush1.bf16.msra.mxu1 %v6639_v40  ;;  %v6627_v40 = vld [vmem:[%s11327_s3 + $0x2a0] sm:$0xff] }
 0x1b9   :  { %v6643_v15 = vcombine.low %v6609_v6, %v6613_v10  ;;  %v6644_v17 = vcombine.high %v6609_v6, %v6613_v10  ;;  %2004 = vmatprep.subr.bf16.mxu1 %v6648_v24  ;;  %v6623_v6 = vld [vmem:[%s11327_s3 + $0x280] sm:$0xff]  ;;  %v6633_v24 = vld [vmem:[%s11327_s3 + $0x2d0] sm:$0xff] }
 0x1ba   :  { %v6656_v10 = vcombine.high %v6623_v6, %v6627_v40 }
 0x1bb   :  { %1757 = vmatmul.mubr.bf16.vlgmr.msra.gmra.mrb[36].mxu0 %v1638_v47  ;;  %2084 = vmatprep.subr.bf16.mxu0 %v6644_v17  ;;  %v6647_v47 = vcombine.low %v6615_v3, %v6619_v42  ;;  %v6629_v3 = vld [vmem:[%s11327_s3 + $0x2b0] sm:$0xff]  ;;  %v6655_v42 = vcombine.low %v6623_v6, %v6627_v40  ;;  %v6635_v17 = vld [vmem:[%s11327_s3 + $0x2e0] sm:$0xff] }
 0x1bc   :  { %2116 = vmatprep.mubr.bf16.mxu0 %v11334_v43  ;;  %2085 = vmatpush1.bf16.msra.mxu0 %v6643_v15  ;;  %v6651_v43 = vcombine.low %v6617_v36, %v6621_v39  ;;  %v6631_v15 = vld [vmem:[%s11327_s3 + $0x2c0] sm:$0xff]  ;;  %v6637_v36 = vld [vmem:[%s11327_s3 + $0x2f0] sm:$0xff] }
 0x1bd   :  { %2005 = vmatpush1.bf16.msra.mxu1 %v6647_v47  ;;  %2086 = vmatprep.subr.bf16.mxu0 %v6652_v38  ;;  %v6659_v38 = vcombine.low %v6625_v44, %v6629_v3  ;;  %v6664_v47 = vcombine.high %v6631_v15, %v6635_v17  ;;  %v6663_v39 = vcombine.low %v6631_v15, %v6635_v17 }
 0x1be   :  { %2006 = vmatprep.subr.bf16.mxu1 %v6656_v10  ;;  %v6667_v6 = vcombine.low %v6633_v24, %v6637_v36  ;;  %v6668_v40 = vcombine.high %v6633_v24, %v6637_v36  ;;  %v9303_v10 = vld [vmem:[%s11327_s3 + $0x228] sm:$0xff] }
 0x1c0   :  { %2087 = vmatpush1.bf16.msra.mxu0 %v6651_v43  ;;  %v6660_v43 = vcombine.high %v6625_v44, %v6629_v3  ;;  %v9298_v44 = vld [vmem:[%s11327_s3 + $0x208] sm:$0xff] }
 0x1c1   :  { %2007 = vmatpush1.bf16.msra.mxu1 %v6655_v42  ;;  %v6642_v3 = vcombine.high %v9298_v44, %v9303_v10 }
 0x1c2   :  { %2088 = vmatprep.subr.bf16.mxu0 %v6660_v43  ;;  %2008 = vmatprep.subr.bf16.mxu1 %v6664_v47 }
 0x1c4   :  { %2089 = vmatpush1.bf16.msra.mxu0 %v6659_v38 }
 0x1c5   :  { %2009 = vmatpush1.bf16.msra.mxu1 %v6663_v39  ;;  %2090 = vmatprep.subr.bf16.mxu0 %v6668_v40 }
 0x1c6   :  { %2043 = vmatprep.subr.bf16.mxu1 %v6642_v3 }
 0x1c8   :  { %2091 = vmatpush1.bf16.msra.mxu0 %v6667_v6 }
 0x1c9   :  { %7373 = vmatprep.subr.bf16.mxu0 %v8947_v49 }
 0x21e   :  { %v1132_v38 = vpop.f32.mrb[16].mxu0  ;;  %v1173_v43 = vpop.f32.mrb[16].mxu1 }
 0x21f   :  { %v1134_v15 = vpop.f32.mrb[17].mxu0  ;;  %v1175_v17 = vpop.f32.mrb[17].mxu1 }
 0x220   :  { %v1136_v24 = vpop.f32.mrb[18].mxu0  ;;  %v1177_v47 = vpop.f32.mrb[18].mxu1 }
 0x221   :  { %v1137_v36 = vpop.f32.mrb[19].mxu0  ;;  %v1178_v39 = vpop.f32.mrb[19].mxu1 }
 0x22e   :  { %v1214_v40 = vpop.f32.mrb[20].mxu0  ;;  %v1255_v33 = vpop.f32.mrb[20].mxu1 }
 0x22f   :  { %v1216_v6 = vpop.f32.mrb[21].mxu0  ;;  %v1257_v26 = vpop.f32.mrb[21].mxu1 }
 0x230   :  { %v1218_v21 = vpop.f32.mrb[22].mxu0  ;;  %v1259_v11 = vpop.f32.mrb[22].mxu1 }
 0x231   :  { %v1219_v34 = vpop.f32.mrb[23].mxu0  ;;  %v1260_v7 = vpop.f32.mrb[23].mxu1 }
 0x23e   :  { %v1459_v42 = vpop.f32.mrb[24].mxu0  ;;  %v1500_v52 = vpop.f32.mrb[24].mxu1 }
 0x23f   :  { %v9310_v49 = vadd.f32 %v1459_v42, %v1132_v38  ;;  %v9312_v3 = vadd.f32 %v1500_v52, %v1173_v43  ;;  %v1461_v1 = vpop.f32.mrb[25].mxu0  ;;  %v1502_v51 = vpop.f32.mrb[25].mxu1 }
 0x240   :  { %v9314_v24 = vadd.f32 %v1461_v1, %v1134_v15  ;;  %v9316_v47 = vadd.f32 %v1502_v51, %v1175_v17  ;;  %v1463_v36 = vpop.f32.mrb[26].mxu0  ;;  %v1504_v39 = vpop.f32.mrb[26].mxu1 }
 0x241   :  { %11429 = vst [vmem:[#allocation23_spill] sm:$0xff] %v9312_v3  ;;  %v1464_v23 = vpop.f32.mrb[27].mxu0  ;;  %v1505_v48 = vpop.f32.mrb[27].mxu1 }
 0x242   :  { %11430 = vst [vmem:[#allocation24_spill] sm:$0xff] %v9316_v47 }
 0x24e   :  { %v1541_v21 = vpop.f32.mrb[28].mxu0  ;;  %v1582_v11 = vpop.f32.mrb[28].mxu1 }
 0x24f   :  { %v9318_v34 = vadd.f32 %v1541_v21, %v1214_v40  ;;  %v9320_v7 = vadd.f32 %v1582_v11, %v1255_v33  ;;  %v1543_v42 = vpop.f32.mrb[29].mxu0  ;;  %v1584_v38 = vpop.f32.mrb[29].mxu1 }
 0x250   :  { %v9322_v52 = vadd.f32 %v1543_v42, %v1216_v6  ;;  %v9324_v43 = vadd.f32 %v1584_v38, %v1257_v26  ;;  %v1545_v1 = vpop.f32.mrb[30].mxu0  ;;  %v1586_v15 = vpop.f32.mrb[30].mxu1 }
 0x251   :  { %11431 = vst [vmem:[#allocation25_spill] sm:$0xff] %v9320_v7  ;;  %v1546_v51 = vpop.f32.mrb[31].mxu0  ;;  %v1587_v17 = vpop.f32.mrb[31].mxu1 }
 0x252   :  { %v9330_v51 = vld [vmem:[%s11324_s0 + $0x2a] sm:$0xff] }
 0x26e   :  { %v7320_v36 = vpop.f32.mrb[32].mxu0  ;;  %v7342_v39 = vpop.f32.mrb[32].mxu1 }
 0x26f   :  { %v7321_v23 = vpop.f32.mrb[33].mxu0  ;;  %v7343_v48 = vpop.f32.mrb[33].mxu1 }
 0x270   :  { %v7322_v47 = vadd.f32 %v7321_v23, %v7320_v36  ;;  %v7323_v3 = vpop.f32.mrb[34].mxu0  ;;  %v7344_v40 = vadd.f32 %v7343_v48, %v7342_v39  ;;  %v7345_v21 = vpop.f32.mrb[34].mxu1  ;;  %v9334_v23 = vrot.slane %v9330_v51, %v8507_v41  ;;  %v6620_v48 = vld [vmem:[%s11327_s3 + $0x268] sm:$0xff] }
 0x271   :  { %v7324_v33 = vpop.f32.mrb[35].mxu0  ;;  %v7346_v11 = vpop.f32.mrb[35].mxu1 }
 0x272   :  { %v1679_v7 = vadd.f32 %v7322_v47, %v8774_v8 }
 0x274   :  { %v1719_v6 = vadd.f32 %v7344_v40, %v1679_v7  ;;  %v6616_v7 = vld [vmem:[%s11327_s3 + $0x248] sm:$0xff]  ;;  %v2194_v40 = vcombine.high %v9334_v23, %v9334_v23 }
 0x275   :  { %v6650_v11 = vcombine.high %v6616_v7, %v6620_v48 }
 0x276   :  { %v1798_v42 = vpop.f32.mrb[36].mxu1 }
 0x277   :  { %v7897_v26 = vpop.f32.mrb[37].mxu1 }
 0x278   :  { %v1801_v38 = vpop.f32.mrb[38].mxu1  ;;  %v2220_v26 = vpack.c.bf16 %v2194_v40, %v2194_v40  ;;  %v6622_v40 = vld [vmem:[%s11327_s3 + $0x278] sm:$0xff] }
 0x279   :  { %v7898_v1 = vpop.f32.mrb[39].mxu1  ;;  %v11432_v38 = vcombine.low %v9298_v44, %v9303_v10 }
 0x27a   :  { %v6649_v1 = vcombine.low %v6616_v7, %v6620_v48  ;;  %v6618_v48 = vld [vmem:[%s11327_s3 + $0x258] sm:$0xff] }
 0x28e   :  { %v7364_v15 = vpop.f32.mrb[36].mxu0 }
 0x28f   :  { %v7365_v17 = vpop.f32.mrb[37].mxu0 }
 0x290   :  { %v7366_v36 = vadd.f32 %v7365_v17, %v7364_v15  ;;  %v7367_v3 = vpop.f32.mrb[38].mxu0  ;;  %v6632_v17 = vld [vmem:[%s11327_s3 + $0x2c8] sm:$0xff] }
 0x291   :  { %v7368_v39 = vpop.f32.mrb[39].mxu0  ;;  %v11433_v3 = vmov 0  }
 0x292   :  { %v1759_v8 = vadd.f32 %v7366_v36, %v1719_v6  ;;  %v6624_v6 = vld [vmem:[%s11327_s3 + $0x288] sm:$0xff]  ;;  %v6610_v39 = vld [vmem:[%s11327_s3 + $0x218] sm:$0xff] }
 0x293   :  { %v6636_v36 = vld [vmem:[%s11327_s3 + $0x2e8] sm:$0xff] }
 0x294   :  { %v1799_v47 = vadd.f32 %v1798_v42, %v1759_v8  ;;  %v6628_v42 = vld [vmem:[%s11327_s3 + $0x2a8] sm:$0xff]  ;;  %v6666_v10 = vcombine.high %v6632_v17, %v6636_v36  ;;  %v6614_v8 = vld [vmem:[%s11327_s3 + $0x238] sm:$0xff] }
 0x295   :  { %v6658_v15 = vcombine.high %v6624_v6, %v6628_v42  ;;  %v6657_v44 = vcombine.low %v6624_v6, %v6628_v42  ;;  %v6646_v7 = vcombine.high %v6610_v39, %v6614_v8  ;;  %v6626_v6 = vld [vmem:[%s11327_s3 + $0x298] sm:$0xff] }
 0x296   :  { %v1804_v21 = vmax.f32 %v1799_v47, 0.0  ;;  %v6665_v47 = vcombine.low %v6632_v17, %v6636_v36  ;;  %v6630_v42 = vld [vmem:[%s11327_s3 + $0x2b8] sm:$0xff]  ;;  %v2179_v17 = vcombine.high %v9330_v51, %v9330_v51  ;;  %v9408_v36 = vld [vmem:[%s11324_s0 + $0x32] sm:$0x3f] }
 0x298   :  { %v9344_v33 = vpack.c.bf16 %v1804_v21, %v1804_v21  ;;  %v6645_v21 = vcombine.low %v6610_v39, %v6614_v8  ;;  %v2193_v39 = vrot.slane %v2179_v17, %v8507_v41  ;;  %v2203_v8 = vrot.slane %v9408_v36, %v8507_v41 }
 0x29a   :  { %6671 = vmatmul.mubr.msk.bf16.vlgmr.msra.gmra.mrb[40].mxu1 %vm1094_vm2, %v9344_v33  ;;  %6673 = vmatmul.mubr.msk.bf16.vlgmr.msra.gmra.mrb[40].mxu0 %vm1094_vm2, %v9344_v33  ;;  %v2221_v17 = vpack.c.bf16 %v2193_v39, %v2193_v39 }
 0x29b   :  { %2044 = vmatpush1.bf16.msra.mxu1 %v11432_v38  ;;  %7374 = vmatpush3.bf16.msra.mxu0 %v8961_v53  ;;  %v6662_v38 = vcombine.high %v6626_v6, %v6630_v42 }
 0x29c   :  { %2045 = vmatprep.subr.bf16.mxu1 %v6650_v11  ;;  %7375 = vmatprep.subr.bf16.mxu0 %v8973_v55  ;;  %v6654_v11 = vcombine.high %v6618_v48, %v6622_v40 }
 0x29d   :  { %2075 = vmatprep.mubr.bf16.mxu1 %v11433_v3  ;;  %2261 = vmatprep.mubr.bf16.mxu0 %v2220_v26  ;;  %v6653_v26 = vcombine.low %v6618_v48, %v6622_v40  ;;  %v2219_v48 = vpack.c.bf16 %v9334_v23, %v9334_v23  ;;  %v11434_v23 = vld [vmem:[#allocation20_spill] sm:$0xff] }
 0x29f   :  { %2046 = vmatpush1.bf16.msra.mxu1 %v6649_v1  ;;  %7376 = vmatpush3.bf16.msra.mxu0 %v8985_v57  ;;  %v6634_v1 = vld [vmem:[%s11327_s3 + $0x2d8] sm:$0xff] }
 0x2a0   :  { %2047 = vmatprep.subr.bf16.mxu1 %v6658_v15  ;;  %7377 = vmatprep.subr.bf16.mxu0 %v8997_v59  ;;  %v6638_v15 = vld [vmem:[%s11327_s3 + $0x2f8] sm:$0xff] }
 0x2a1   :  { %v6669_v51 = vcombine.low %v6634_v1, %v6638_v15 }
 0x2a3   :  { %2048 = vmatpush1.bf16.msra.mxu1 %v6657_v44  ;;  %7378 = vmatpush3.bf16.msra.mxu0 %v9009_v61  ;;  %v6661_v44 = vcombine.low %v6626_v6, %v6630_v42  ;;  %v11437_v6 = vld [vmem:[#allocation8_spill] sm:$0xff]  ;;  %v11438_v42 = vld [vmem:[#allocation22_spill] sm:$0xff] }
 0x2a4   :  { %2049 = vmatprep.subr.bf16.mxu1 %v6666_v10  ;;  %7379 = vmatprep.subr.bf16.mxu0 %v9021_v63  ;;  %v6670_v10 = vcombine.high %v6634_v1, %v6638_v15  ;;  %v11441_v1 = vld [vmem:[#allocation10_spill] sm:$0xff]  ;;  %v9459_v15 = vld [vmem:[%s11325_s1 + $0x178] sm:$0xff]  }
 0x2a5   :  { %11442 = vst [vmem:[#allocation8_spill] sm:$0xff] %v9459_v15 }
 0x2a7   :  { %2050 = vmatpush1.bf16.msra.mxu1 %v6665_v47  ;;  %7380 = vmatpush3.bf16.msra.mxu0 %v9033_v0  ;;  %v2195_v47 = vcombine.high %v2193_v39, %v2193_v39  ;;  %v11446_v39 = vld [vmem:[#allocation12_spill] sm:$0xff] }
 0x2a8   :  { %2125 = vmatprep.subr.bf16.mxu1 %v6646_v7  ;;  %7381 = vmatprep.subr.bf16.mxu0 %v9045_v4  ;;  %v2211_v7 = vcombine.high %v2203_v8, %v2203_v8 }
 0x2a9   :  { %v2222_v40 = vpack.c.bf16 %v2195_v47, %v2195_v47  ;;  %v9468_v47 = vld [vmem:[%s11325_s1 + $0x138] sm:$0xff]  }
 0x2aa   :  { %6672 = vmatmul.mubr.msk.bf16.vlgmr.msra.gmra.mrb[44].mxu1 %vm1094_vm2, %v9344_v33 }
 0x2ab   :  { %2126 = vmatpush1.bf16.msra.mxu1 %v6645_v21  ;;  %7382 = vmatpush3.bf16.msra.mxu0 %v9057_v14  ;;  %v2224_v21 = vpack.c.bf16 %v2211_v7, %v2211_v7  ;;  %v11445_v7 = vmov 0.0  }
 0x2ac   :  { %2127 = vmatprep.subr.bf16.mxu1 %v6654_v11  ;;  %7383 = vmatprep.subr.bf16.mxu0 %v9069_v46  ;;  %v11436_v11 = vld [vmem:[#allocation21_spill] sm:$0xff] }
 0x2ad   :  { %2157 = vmatprep.mubr.bf16.mxu1 %v11433_v3 }
 0x2af   :  { %2128 = vmatpush1.bf16.msra.mxu1 %v6653_v26  ;;  %7384 = vmatpush3.bf16.msra.mxu0 %v9084_v20  ;;  %v11439_v26 = vld [vmem:[#allocation9_spill] sm:$0xff] }
 0x2b0   :  { %2129 = vmatprep.subr.bf16.mxu1 %v6662_v38  ;;  %7385 = vmatprep.subr.bf16.mxu0 %v9096_v45  ;;  %v9452_v38 = vld [vmem:[%s11325_s1 + $0x130] sm:$0xff]   ;;  %11444 = vst [vmem:[#allocation9_spill] sm:$0xff] %v9468_v47 }
 0x2b3   :  { %2130 = vmatpush1.bf16.msra.mxu1 %v6661_v44  ;;  %7386 = vmatpush3.bf16.msra.mxu0 %v9109_v5  ;;  %v2196_v44 = vcombine.high %v9408_v36, %v9408_v36 }
 0x2b4   :  { %2131 = vmatprep.subr.bf16.mxu1 %v6670_v10  ;;  %7387 = vmatprep.subr.bf16.mxu0 %v9121_v28  ;;  %v2223_v10 = vpack.c.bf16 %v2203_v8, %v2203_v8  ;;  %v11447_v8 = vld [vmem:[#allocation13_spill] sm:$0xff] }
 0x2b7   :  { %2132 = vmatpush1.bf16.msra.mxu1 %v6669_v51  ;;  %7388 = vmatpush3.bf16.msra.mxu0 %v9137_v9  ;;  %v11443_v51 = vld [vmem:[#allocation11_spill] sm:$0xff] }
 0x2b8   :  { %7395 = vmatprep.subr.bf16.mxu1 %v8953_v50  ;;  %7417 = vmatprep.subr.bf16.mxu0 %v9149_v13 }
 0x2ba   :  { %6674 = vmatmul.mubr.msk.bf16.vlgmr.msra.gmra.mrb[48].mxu1 %vm1094_vm2, %v9344_v33  ;;  %2262 = vmatmul.mubr.bf16.vlgmr.msra.gmra.mrb[44].mxu0 %v2219_v48  ;;  %v11435_v33 = vld [vmem:[#allocation7_spill] sm:$0xff]  ;;  %v2210_v48 = vrot.slane %v2196_v44, %v8507_v41 }
 0x2bb   :  { %7396 = vmatpush3.bf16.msra.mxu1 %v8967_v54  ;;  %7418 = vmatpush3.bf16.msra.mxu0 %v9157_v19  ;;  %11440 = vst [vmem:[#allocation7_spill] sm:$0xff] %v9452_v38 }
 0x2bc   :  { %7397 = vmatprep.subr.bf16.mxu1 %v8979_v56  ;;  %7419 = vmatprep.subr.bf16.mxu0 %v9169_v22  ;;  %v2225_v36 = vpack.c.bf16 %v2210_v48, %v2210_v48  ;;  %v6683_v48 = vld [vmem:[%s11327_s3 + $0x328] sm:$0xff] }
 0x2bd   :  { %2301 = vmatprep.mubr.bf16.mxu1 %v2222_v40  ;;  %2341 = vmatprep.mubr.bf16.mxu0 %v2224_v21  ;;  %v6678_v40 = vld [vmem:[%s11327_s3 + $0x300] sm:$0xff] }
 0x2be   :  { %v6682_v21 = vld [vmem:[%s11327_s3 + $0x320] sm:$0xff] }
 0x2bf   :  { %7398 = vmatpush3.bf16.msra.mxu1 %v8991_v58  ;;  %7420 = vmatpush3.bf16.msra.mxu0 %v9178_v25  ;;  %v6710_v44 = vcombine.low %v6678_v40, %v6682_v21 }
 0x2c0   :  { %7399 = vmatprep.subr.bf16.mxu1 %v9003_v60  ;;  %7421 = vmatprep.subr.bf16.mxu0 %v9190_v27 }
 0x2c3   :  { %7400 = vmatpush3.bf16.msra.mxu1 %v9015_v62  ;;  %7422 = vmatpush3.bf16.msra.mxu0 %v9197_v29  ;;  %v11452_v29 = vld [vmem:[#allocation23_spill] sm:$0xff] }
 0x2c4   :  { %7401 = vmatprep.subr.bf16.mxu1 %v9027_v37  ;;  %7423 = vmatprep.subr.bf16.mxu0 %v9204_v30 }
 0x2c7   :  { %7402 = vmatpush3.bf16.msra.mxu1 %v9039_v2  ;;  %7424 = vmatpush3.bf16.msra.mxu0 %v9210_v31 }
 0x2c8   :  { %7403 = vmatprep.subr.bf16.mxu1 %v9051_v12  ;;  %7425 = vmatprep.subr.bf16.mxu0 %v9216_v32 }
 0x2cb   :  { %7404 = vmatpush3.bf16.msra.mxu1 %v9063_v16  ;;  %7426 = vmatpush3.bf16.msra.mxu0 %v9222_v35 }
 0x2cc   :  { %7405 = vmatprep.subr.bf16.mxu1 %v9075_v18  ;;  %7427 = vmatprep.subr.bf16.mxu0 %v11434_v23 }
 0x2cf   :  { %7406 = vmatpush3.bf16.msra.mxu1 %v11435_v33  ;;  %7428 = vmatpush3.bf16.msra.mxu0 %v11436_v11 }
 0x2d0   :  { %7407 = vmatprep.subr.bf16.mxu1 %v11437_v6  ;;  %7429 = vmatprep.subr.bf16.mxu0 %v11438_v42  ;;  %v6695_v42 = vld [vmem:[%s11327_s3 + $0x388] sm:$0xff] }
 0x2d3   :  { %7408 = vmatpush3.bf16.msra.mxu1 %v11439_v26  ;;  %7430 = vmatpush3.bf16.msra.mxu0 %v9452_v38  ;;  %v6690_v38 = vld [vmem:[%s11327_s3 + $0x360] sm:$0xff] }
 0x2d4   :  { %7409 = vmatprep.subr.bf16.mxu1 %v11441_v1  ;;  %7431 = vmatprep.subr.bf16.mxu0 %v9459_v15  ;;  %v6686_v15 = vld [vmem:[%s11327_s3 + $0x340] sm:$0xff] }
 0x2d7   :  { %7410 = vmatpush3.bf16.msra.mxu1 %v11443_v51  ;;  %7432 = vmatpush3.bf16.msra.mxu0 %v9468_v47 }
 0x2d8   :  { %7899 = vmatprep.subr.bf16.mxu1 %v11445_v7 }
 0x2da   :  { %2302 = vmatmul.mubr.bf16.vlgmr.msra.gmra.mrb[52].mxu1 %v2221_v17  ;;  %2342 = vmatmul.mubr.bf16.vlgmr.msra.gmra.mrb[48].mxu0 %v2223_v10  ;;  %v6679_v17 = vld [vmem:[%s11327_s3 + $0x308] sm:$0xff]  ;;  %v6711_v10 = vcombine.high %v6678_v40, %v6682_v21  ;;  %v6719_v21 = vcombine.high %v6686_v15, %v6690_v38 }
 0x2db   :  { %7900 = vmatpush3.bf16.msra.mxu1 %v11446_v39  ;;  %7903 = vmatprep.mubr.msk.bf16.mxu1 %vm8259_vm0, %v11445_v7  ;;  %v6713_v47 = vcombine.high %v6679_v17, %v6683_v48  ;;  %v6687_v40 = vld [vmem:[%s11327_s3 + $0x348] sm:$0xff] }
 0x2dc   :  { %7901 = vmatprep.subr.bf16.mxu1 %v11445_v7  ;;  %2660 = vmatprep.mubr.bf16.mxu0 %v11433_v3 }
 0x2dd   :  { %2628 = vmatprep.subr.bf16.mxu0 %v6713_v47  ;;  %v6718_v47 = vcombine.low %v6686_v15, %v6690_v38  ;;  %v6699_v15 = vld [vmem:[%s11327_s3 + $0x3a8] sm:$0xff] }
 0x2df   :  { %7902 = vmatpush3.bf16.msra.mxu1 %v11447_v8 }
 0x2e0   :  { %2587 = vmatprep.subr.bf16.mxu1 %v6711_v10 }
 0x2e2   :  { %7904 = vmatmul.mubr.msk.bf16.vlgmr.msra.gmra.mrb[56].mxu1 %vm486_vm1, %v2225_v36  ;;  %v6712_v36 = vcombine.low %v6679_v17, %v6683_v48  ;;  %v6691_v17 = vld [vmem:[%s11327_s3 + $0x368] sm:$0xff]  ;;  %v6694_v48 = vld [vmem:[%s11327_s3 + $0x380] sm:$0xff] }
 0x2e3   :  { %2619 = vmatprep.mubr.bf16.mxu1 %v11433_v3  ;;  %2588 = vmatpush1.bf16.msra.mxu1 %v6710_v44  ;;  %v6720_v44 = vcombine.low %v6687_v40, %v6691_v17  ;;  %v6721_v10 = vcombine.high %v6687_v40, %v6691_v17  ;;  %v6728_v40 = vcombine.low %v6695_v42, %v6699_v15  ;;  %v6702_v17 = vld [vmem:[%s11327_s3 + $0x3c0] sm:$0xff] }
 0x2e4   :  { %2629 = vmatpush1.bf16.msra.mxu0 %v6712_v36  ;;  %2589 = vmatprep.subr.bf16.mxu1 %v6719_v21  ;;  %v6698_v36 = vld [vmem:[%s11327_s3 + $0x3a0] sm:$0xff]  ;;  %v6729_v21 = vcombine.high %v6695_v42, %v6699_v15  ;;  %v6707_v42 = vld [vmem:[%s11327_s3 + $0x3e8] sm:$0xff]  ;;  %v9537_v15 = vld [vmem:[%s11327_s3 + $0x330] sm:$0xff] }
 0x2e5   :  { %2630 = vmatprep.subr.bf16.mxu0 %v6721_v10  ;;  %v6726_v11 = vcombine.low %v6694_v48, %v6698_v36  ;;  %v6727_v38 = vcombine.high %v6694_v48, %v6698_v36 }
 0x2e7   :  { %2590 = vmatpush1.bf16.msra.mxu1 %v6718_v47  ;;  %v6706_v47 = vld [vmem:[%s11327_s3 + $0x3e0] sm:$0xff] }
 0x2e8   :  { %2631 = vmatpush1.bf16.msra.mxu0 %v6720_v44  ;;  %2591 = vmatprep.subr.bf16.mxu1 %v6727_v38  ;;  %v6703_v44 = vld [vmem:[%s11327_s3 + $0x3c8] sm:$0xff]  ;;  %v6735_v10 = vcombine.high %v6702_v17, %v6706_v47  ;;  %v6734_v48 = vcombine.low %v6702_v17, %v6706_v47  ;;  %v9532_v38 = vld [vmem:[%s11327_s3 + $0x310] sm:$0xff]  ;;  %v9549_v17 = vld [vmem:[%s11327_s3 + $0x338] sm:$0xff] }
 0x2e9   :  { %2632 = vmatprep.subr.bf16.mxu0 %v6729_v21  ;;  %v6737_v36 = vcombine.high %v6703_v44, %v6707_v42  ;;  %v6715_v21 = vcombine.high %v9532_v38, %v9537_v15 }
 0x2eb   :  { %2592 = vmatpush1.bf16.msra.mxu1 %v6726_v11  ;;  %v6736_v11 = vcombine.low %v6703_v44, %v6707_v42 }
 0x2ec   :  { %2633 = vmatpush1.bf16.msra.mxu0 %v6728_v40  ;;  %2593 = vmatprep.subr.bf16.mxu1 %v6735_v10  ;;  %v9542_v40 = vld [vmem:[%s11327_s3 + $0x318] sm:$0xff] }
 0x2ed   :  { %2634 = vmatprep.subr.bf16.mxu0 %v6737_v36  ;;  %v6717_v10 = vcombine.high %v9542_v40, %v9549_v17 }
 0x2ef   :  { %2594 = vmatpush1.bf16.msra.mxu1 %v6734_v48 }
 0x2f0   :  { %2635 = vmatpush1.bf16.msra.mxu0 %v6736_v11  ;;  %2669 = vmatprep.subr.bf16.mxu1 %v6715_v21 }
 0x2f1   :  { %2710 = vmatprep.subr.bf16.mxu0 %v6717_v10 }
 0x36d   :  { %v2036_v42 = vpop.f32.mrb[40].mxu1  ;;  %v2118_v48 = vpop.f32.mrb[40].mxu0 }
 0x36e   :  { %v9558_v11 = vadd.f32 %v2036_v42, %v9310_v49  ;;  %v9561_v36 = vadd.f32 %v2118_v48, %v9318_v34  ;;  %v2038_v23 = vpop.f32.mrb[41].mxu1  ;;  %v2120_v35 = vpop.f32.mrb[41].mxu0  ;;  %v11454_v42 = vld [vmem:[#allocation24_spill] sm:$0xff] }
 0x36f   :  { %v9564_v47 = vadd.f32 %v2038_v23, %v9314_v24  ;;  %v9567_v44 = vadd.f32 %v2120_v35, %v9322_v52  ;;  %v2040_v32 = vpop.f32.mrb[42].mxu1  ;;  %v2122_v31 = vpop.f32.mrb[42].mxu0  ;;  %v11456_v23 = vld [vmem:[#allocation25_spill] sm:$0xff] }
 0x370   :  { %11448 = vst [vmem:[#allocation10_spill] sm:$0xff] %v9558_v11  ;;  %11449 = vst [vmem:[#allocation11_spill] sm:$0xff] %v9561_v36  ;;  %v2041_v21 = vpop.f32.mrb[43].mxu1  ;;  %v2123_v10 = vpop.f32.mrb[43].mxu0 }
 0x371   :  { %11450 = vst [vmem:[#allocation12_spill] sm:$0xff] %v9564_v47  ;;  %11451 = vst [vmem:[#allocation13_spill] sm:$0xff] %v9567_v44 }
 0x37d   :  { %v2077_v30 = vpop.f32.mrb[44].mxu1 }
 0x37e   :  { %v9570_v27 = vadd.f32 %v2077_v30, %v11452_v29  ;;  %v2079_v49 = vpop.f32.mrb[45].mxu1 }
 0x37f   :  { %v9573_v34 = vadd.f32 %v2079_v49, %v11454_v42  ;;  %v2081_v48 = vpop.f32.mrb[46].mxu1 }
 0x380   :  { %11453 = vst [vmem:[#allocation23_spill] sm:$0xff] %v9570_v27  ;;  %v2082_v36 = vpop.f32.mrb[47].mxu1 }
 0x381   :  { %11455 = vst [vmem:[#allocation24_spill] sm:$0xff] %v9573_v34  ;;  %v9584_v36 = vld [vmem:[%s11326_s2] ss:$0 sm:$0xff]  ;;  %v6688_v34 = vld [vmem:[%s11327_s3 + $0x350] sm:$0xff] }
 0x382   :  { %11459 = vst [vmem:[#allocation27_spill] sm:$0xff] %v9584_v36 }
 0x38d   :  { %v2159_v11 = vpop.f32.mrb[48].mxu1  ;;  %v7389_v24 = vpop.f32.mrb[44].mxu0 }
 0x38e   :  { %v9576_v47 = vadd.f32 %v2159_v11, %v11456_v23  ;;  %v2161_v35 = vpop.f32.mrb[49].mxu1  ;;  %v7390_v32 = vpop.f32.mrb[45].mxu0 }
 0x38f   :  { %v9579_v31 = vadd.f32 %v2161_v35, %v9324_v43  ;;  %v2163_v52 = vpop.f32.mrb[50].mxu1  ;;  %v7391_v21 = vadd.f32 %v7390_v32, %v7389_v24  ;;  %v7392_v29 = vpop.f32.mrb[46].mxu0 }
 0x390   :  { %11457 = vst [vmem:[#allocation25_spill] sm:$0xff] %v9576_v47  ;;  %v2164_v30 = vpop.f32.mrb[51].mxu1  ;;  %v7393_v10 = vpop.f32.mrb[47].mxu0 }
 0x391   :  { %11458 = vst [vmem:[#allocation26_spill] sm:$0xff] %v9579_v31  ;;  %v2264_v11 = vadd.f32 %v9584_v36, %v7391_v21  ;;  %v6692_v21 = vld [vmem:[%s11327_s3 + $0x370] sm:$0xff] }
 0x392   :  { %v6708_v36 = vld [vmem:[%s11327_s3 + $0x3f0] sm:$0xff] }
 0x3ad   :  { %v7411_v44 = vpop.f32.mrb[52].mxu1  ;;  %v7433_v49 = vpop.f32.mrb[48].mxu0 }
 0x3ae   :  { %v7412_v42 = vpop.f32.mrb[53].mxu1  ;;  %v7434_v48 = vpop.f32.mrb[49].mxu0 }
 0x3af   :  { %v7413_v23 = vadd.f32 %v7412_v42, %v7411_v44  ;;  %v7414_v47 = vpop.f32.mrb[54].mxu1  ;;  %v7435_v43 = vadd.f32 %v7434_v48, %v7433_v49  ;;  %v7436_v35 = vpop.f32.mrb[50].mxu0  ;;  %v6693_v44 = vld [vmem:[%s11327_s3 + $0x378] sm:$0xff]  ;;  %v6723_v48 = vcombine.high %v6688_v34, %v6692_v21 }
 0x3b0   :  { %v7415_v52 = vpop.f32.mrb[55].mxu1  ;;  %v7437_v24 = vpop.f32.mrb[51].mxu0  ;;  %v6689_v47 = vld [vmem:[%s11327_s3 + $0x358] sm:$0xff] }
 0x3b1   :  { %v2304_v32 = vadd.f32 %v7413_v23, %v2264_v11  ;;  %v6725_v11 = vcombine.high %v6689_v47, %v6693_v44  ;;  %v6700_v23 = vld [vmem:[%s11327_s3 + $0x3b0] sm:$0xff]  ;;  %v6701_v35 = vld [vmem:[%s11327_s3 + $0x3b8] sm:$0xff]  ;;  %v11460_v24 = vcombine.low %v9532_v38, %v9537_v15 }
 0x3b2   :  { %v6746_v52 = vld [vmem:[%s11324_s0 + $0x38] sm:$0xff] }
 0x3b3   :  { %v2344_v29 = vadd.f32 %v7435_v43, %v2304_v32  ;;  %v6697_v43 = vld [vmem:[%s11327_s3 + $0x398] sm:$0xff]  ;;  %v11461_v32 = vcombine.low %v9542_v40, %v9549_v17  ;;  %v2764_v40 = vcombine.high %v6746_v52, %v6746_v52 }
 0x3b4   :  { %v6705_v38 = vld [vmem:[%s11327_s3 + $0x3d8] sm:$0xff] }
 0x3b5   :  { %v2383_v30 = vpop.f32.mrb[56].mxu1  ;;  %v6709_v15 = vld [vmem:[%s11327_s3 + $0x3f8] sm:$0xff] }
 0x3b6   :  { %v2384_v10 = vadd.f32 %v2383_v30, %v2344_v29  ;;  %v7905_v31 = vpop.f32.mrb[57].mxu1  ;;  %v6722_v29 = vcombine.low %v6688_v34, %v6692_v21  ;;  %v6724_v30 = vcombine.low %v6689_v47, %v6693_v44  ;;  %v6732_v34 = vcombine.low %v6697_v43, %v6701_v35 }
 0x3b7   :  { %v2386_v27 = vpop.f32.mrb[58].mxu1  ;;  %v6741_v47 = vcombine.high %v6705_v38, %v6709_v15  ;;  %v2771_v44 = vrot.slane %v6746_v52, %v8507_v41  ;;  %v6766_v52 = vld [vmem:[%s11327_s3 + $0x488] sm:$0xff] }
 0x3b8   :  { %v2389_v49 = vmax.f32 %v2384_v10, 0.0  ;;  %v7906_v42 = vpop.f32.mrb[59].mxu1  ;;  %v6696_v27 = vld [vmem:[%s11327_s3 + $0x390] sm:$0xff] }
 0x3b9   :  { %v6731_v10 = vcombine.high %v6696_v27, %v6700_v23  ;;  %v6704_v42 = vld [vmem:[%s11327_s3 + $0x3d0] sm:$0xff]  ;;  %v6730_v17 = vcombine.low %v6696_v27, %v6700_v23 }
 0x3ba   :  { %v2390_v31 = vpack.c.bf16 %v2389_v49, %v2389_v49  ;;  %v6733_v49 = vcombine.high %v6697_v43, %v6701_v35  ;;  %v6739_v21 = vcombine.high %v6704_v42, %v6708_v36  ;;  %v11462_v27 = vld [vmem:[#allocation6_spill] sm:$0xff]  ;;  %v6769_v35 = vld [vmem:[%s11327_s3 + $0x4a0] sm:$0xff] }
 0x3bc   :  { %6742 = vmatmul.mubr.msk.bf16.vlgmr.msra.gmra.mrb[60].mxu1 %vm1094_vm2, %v2390_v31  ;;  %6743 = vmatmul.mubr.msk.bf16.vlgmr.msra.gmra.mrb[52].mxu0 %vm1094_vm2, %v2390_v31 }
 0x3bd   :  { %2670 = vmatpush1.bf16.msra.mxu1 %v11460_v24  ;;  %2711 = vmatpush1.bf16.msra.mxu0 %v11461_v32  ;;  %v6740_v24 = vcombine.low %v6705_v38, %v6709_v15  ;;  %v2779_v32 = vcombine.high %v2771_v44, %v2771_v44  ;;  %v6773_v38 = vld [vmem:[%s11327_s3 + $0x4c0] sm:$0xff] }
 0x3be   :  { %2671 = vmatprep.subr.bf16.mxu1 %v6723_v48  ;;  %2712 = vmatprep.subr.bf16.mxu0 %v6725_v11  ;;  %v2778_v48 = vrot.slane %v2764_v40, %v8507_v41  ;;  %v6738_v11 = vcombine.low %v6704_v42, %v6708_v36  ;;  %v6777_v15 = vld [vmem:[%s11327_s3 + $0x4e0] sm:$0xff]  ;;  %v6774_v40 = vld [vmem:[%s11327_s3 + $0x4c8] sm:$0xff] }
 0x3bf   :  { %2701 = vmatprep.mubr.bf16.mxu1 %v11433_v3  ;;  %2742 = vmatprep.mubr.bf16.mxu0 %v11433_v3  ;;  %v2805_v23 = vpack.c.bf16 %v2779_v32, %v2779_v32 }
 0x3c0   :  { %v2780_v3 = vcombine.high %v2778_v48, %v2778_v48 }
 0x3c1   :  { %2672 = vmatpush1.bf16.msra.mxu1 %v6722_v29  ;;  %2713 = vmatpush1.bf16.msra.mxu0 %v6724_v30  ;;  %v6770_v30 = vld [vmem:[%s11327_s3 + $0x4a8] sm:$0xff] }
 0x3c2   :  { %2673 = vmatprep.subr.bf16.mxu1 %v6731_v10  ;;  %2714 = vmatprep.subr.bf16.mxu0 %v6733_v49  ;;  %v2807_v43 = vpack.c.bf16 %v2780_v3, %v2780_v3  ;;  %v6761_v3 = vld [vmem:[%s11327_s3 + $0x460] sm:$0xff]  ;;  %v6799_v49 = vcombine.low %v6766_v52, %v6770_v30  ;;  %v6800_v42 = vcombine.high %v6766_v52, %v6770_v30 }
 0x3c5   :  { %2674 = vmatpush1.bf16.msra.mxu1 %v6730_v17  ;;  %2715 = vmatpush1.bf16.msra.mxu0 %v6732_v34  ;;  %v6806_v17 = vcombine.high %v6773_v38, %v6777_v15  ;;  %v6778_v34 = vld [vmem:[%s11327_s3 + $0x4e8] sm:$0xff] }
 0x3c6   :  { %2675 = vmatprep.subr.bf16.mxu1 %v6739_v21  ;;  %2716 = vmatprep.subr.bf16.mxu0 %v6741_v47  ;;  %v6805_v21 = vcombine.low %v6773_v38, %v6777_v15  ;;  %v6807_v47 = vcombine.low %v6774_v40, %v6778_v34  ;;  %v11484_v38 = vld [vmem:[#allocation27_spill] sm:$0xff] }
 0x3c9   :  { %2676 = vmatpush1.bf16.msra.mxu1 %v6738_v11  ;;  %2717 = vmatpush1.bf16.msra.mxu0 %v6740_v24  ;;  %v9758_v11 = vld [vmem:[%s11327_s3 + $0x430] sm:$0xff]  ;;  %v9763_v24 = vld [vmem:[%s11327_s3 + $0x418] sm:$0xff] }
 0x3ca   :  { %7442 = vmatprep.subr.bf16.mxu1 %v11462_v27  ;;  %7464 = vmatprep.subr.bf16.mxu0 %v8953_v50  ;;  %v6747_v50 = vld [vmem:[%s11324_s0 + $0x40] sm:$0x3f]  ;;  %v9770_v27 = vld [vmem:[%s11327_s3 + $0x438] sm:$0xff] }
 0x3cc   :  { %6744 = vmatmul.mubr.msk.bf16.vlgmr.msra.gmra.mrb[64].mxu1 %vm1094_vm2, %v2390_v31  ;;  %6745 = vmatmul.mubr.msk.bf16.vlgmr.msra.gmra.mrb[56].mxu0 %vm1094_vm2, %v2390_v31  ;;  %v6765_v31 = vld [vmem:[%s11327_s3 + $0x480] sm:$0xff] }
 0x3cd   :  { %7443 = vmatpush3.bf16.msra.mxu1 %v8961_v53  ;;  %7465 = vmatpush3.bf16.msra.mxu0 %v8967_v54  ;;  %v2788_v53 = vrot.slane %v6747_v50, %v8507_v41  ;;  %v6798_v29 = vcombine.high %v6765_v31, %v6769_v35  ;;  %v6797_v10 = vcombine.low %v6765_v31, %v6769_v35 }
 0x3ce   :  { %7444 = vmatprep.subr.bf16.mxu1 %v8973_v55  ;;  %7466 = vmatprep.subr.bf16.mxu0 %v8979_v56  ;;  %v2804_v55 = vpack.c.bf16 %v2771_v44, %v2771_v44  ;;  %v2806_v56 = vpack.c.bf16 %v2778_v48, %v2778_v48  ;;  %v6808_v44 = vcombine.high %v6774_v40, %v6778_v34  ;;  %v9753_v48 = vld [vmem:[%s11327_s3 + $0x410] sm:$0xff] }
 0x3cf   :  { %2846 = vmatprep.mubr.bf16.mxu1 %v2805_v23  ;;  %2886 = vmatprep.mubr.bf16.mxu0 %v2807_v43  ;;  %v2796_v54 = vcombine.high %v2788_v53, %v2788_v53  ;;  %v6786_v32 = vcombine.high %v9753_v48, %v9758_v11  ;;  %v6785_v23 = vcombine.low %v9753_v48, %v9758_v11  ;;  %v6776_v48 = vld [vmem:[%s11327_s3 + $0x4d8] sm:$0xff] }
 0x3d0   :  { %v6787_v43 = vcombine.low %v9763_v24, %v9770_v27  ;;  %v6780_v11 = vld [vmem:[%s11327_s3 + $0x4f8] sm:$0xff] }
 0x3d1   :  { %7445 = vmatpush3.bf16.msra.mxu1 %v8985_v57  ;;  %7467 = vmatpush3.bf16.msra.mxu0 %v8991_v58  ;;  %v2781_v57 = vcombine.high %v6747_v50, %v6747_v50  ;;  %v2809_v58 = vpack.c.bf16 %v2796_v54, %v2796_v54  ;;  %v6788_v50 = vcombine.high %v9763_v24, %v9770_v27 }
 0x3d2   :  { %7446 = vmatprep.subr.bf16.mxu1 %v8997_v59  ;;  %7468 = vmatprep.subr.bf16.mxu0 %v9003_v60 }
 0x3d3   :  { %v2795_v59 = vrot.slane %v2781_v57, %v8507_v41  ;;  %v11477_v57 = vld [vmem:[#allocation23_spill] sm:$0xff] }
 0x3d5   :  { %7447 = vmatpush3.bf16.msra.mxu1 %v9009_v61  ;;  %7469 = vmatpush3.bf16.msra.mxu0 %v9015_v62  ;;  %v2810_v60 = vpack.c.bf16 %v2795_v59, %v2795_v59  ;;  %v11463_v61 = vld [vmem:[#allocation14_spill] sm:$0xff]  ;;  %v11464_v62 = vld [vmem:[#allocation15_spill] sm:$0xff] }
 0x3d6   :  { %7448 = vmatprep.subr.bf16.mxu1 %v9021_v63  ;;  %7470 = vmatprep.subr.bf16.mxu0 %v9027_v37  ;;  %v11465_v63 = vmov 0   ;;  %v11466_v37 = vld [vmem:[#allocation16_spill] sm:$0xff] }
 0x3d9   :  { %7449 = vmatpush3.bf16.msra.mxu1 %v9033_v0  ;;  %7471 = vmatpush3.bf16.msra.mxu0 %v9039_v2  ;;  %v11467_v0 = vld [vmem:[#allocation17_spill] sm:$0xff]  ;;  %v11468_v2 = vld [vmem:[#allocation18_spill] sm:$0xff] }
 0x3da   :  { %7450 = vmatprep.subr.bf16.mxu1 %v9045_v4  ;;  %7472 = vmatprep.subr.bf16.mxu0 %v9051_v12  ;;  %v11469_v4 = vld [vmem:[#allocation19_spill] sm:$0xff]  ;;  %v11470_v12 = vld [vmem:[#allocation20_spill] sm:$0xff] }
 0x3dd   :  { %7451 = vmatpush3.bf16.msra.mxu1 %v9057_v14  ;;  %7473 = vmatpush3.bf16.msra.mxu0 %v9063_v16  ;;  %v11471_v14 = vld [vmem:[#allocation21_spill] sm:$0xff]  ;;  %v11472_v16 = vld [vmem:[#allocation22_spill] sm:$0xff] }
 0x3de   :  { %7452 = vmatprep.subr.bf16.mxu1 %v9069_v46  ;;  %7474 = vmatprep.subr.bf16.mxu0 %v9075_v18  ;;  %v11473_v46 = vld [vmem:[#allocation7_spill] sm:$0xff]  ;;  %v11474_v18 = vld [vmem:[#allocation8_spill] sm:$0xff] }
 0x3e1   :  { %7453 = vmatpush3.bf16.msra.mxu1 %v9084_v20  ;;  %7475 = vmatpush3.bf16.msra.mxu0 %v11435_v33  ;;  %v2808_v20 = vpack.c.bf16 %v2788_v53, %v2788_v53 }
 0x3e2   :  { %7454 = vmatprep.subr.bf16.mxu1 %v9096_v45  ;;  %7476 = vmatprep.subr.bf16.mxu0 %v11437_v6  ;;  %v11475_v45 = vld [vmem:[#allocation9_spill] sm:$0xff] }
 0x3e5   :  { %7455 = vmatpush3.bf16.msra.mxu1 %v9109_v5  ;;  %7477 = vmatpush3.bf16.msra.mxu0 %v11439_v26  ;;  %v6749_v5 = vld [vmem:[%s11327_s3 + $0x400] sm:$0xff] }
 0x3e6   :  { %7456 = vmatprep.subr.bf16.mxu1 %v9121_v28  ;;  %7478 = vmatprep.subr.bf16.mxu0 %v11441_v1  ;;  %v6753_v28 = vld [vmem:[%s11327_s3 + $0x420] sm:$0xff]  ;;  %v6758_v1 = vld [vmem:[%s11327_s3 + $0x448] sm:$0xff] }
 0x3e9   :  { %7457 = vmatpush3.bf16.msra.mxu1 %v9137_v9  ;;  %7479 = vmatpush3.bf16.msra.mxu0 %v11443_v51  ;;  %v6750_v9 = vld [vmem:[%s11327_s3 + $0x408] sm:$0xff] }
 0x3ea   :  { %7486 = vmatprep.subr.bf16.mxu1 %v9149_v13  ;;  %7907 = vmatprep.subr.bf16.mxu0 %v11445_v7  ;;  %v6781_v13 = vcombine.low %v6749_v5, %v6753_v28  ;;  %v6762_v51 = vld [vmem:[%s11327_s3 + $0x468] sm:$0xff] }
 0x3eb   :  { %v6791_v36 = vcombine.low %v6758_v1, %v6762_v51 }
 0x3ec   :  { %2847 = vmatmul.mubr.bf16.vlgmr.msra.gmra.mrb[68].mxu1 %v2804_v55  ;;  %2887 = vmatmul.mubr.bf16.vlgmr.msra.gmra.mrb[60].mxu0 %v2806_v56  ;;  %v11476_v55 = vld [vmem:[#allocation10_spill] sm:$0xff] }
 0x3ed   :  { %7487 = vmatpush3.bf16.msra.mxu1 %v9157_v19  ;;  %7908 = vmatpush3.bf16.msra.mxu0 %v11446_v39  ;;  %v6782_v19 = vcombine.high %v6749_v5, %v6753_v28  ;;  %v6792_v39 = vcombine.high %v6758_v1, %v6762_v51  ;;  %v11480_v5 = vld [vmem:[#allocation11_spill] sm:$0xff] }
 0x3ee   :  { %7488 = vmatprep.subr.bf16.mxu1 %v9169_v22  ;;  %2926 = vmatprep.mubr.bf16.mxu1 %v2809_v58  ;;  %v6754_v22 = vld [vmem:[%s11327_s3 + $0x428] sm:$0xff] }
 0x3ef   :  { %7909 = vmatprep.subr.bf16.mxu0 %v11445_v7  ;;  %7911 = vmatprep.mubr.msk.bf16.mxu0 %vm8259_vm0, %v11445_v7  ;;  %v6783_v33 = vcombine.low %v6750_v9, %v6754_v22  ;;  %v6784_v6 = vcombine.high %v6750_v9, %v6754_v22  ;;  %v11481_v9 = vld [vmem:[#allocation25_spill] sm:$0xff] }
 0x3f1   :  { %7489 = vmatpush3.bf16.msra.mxu1 %v9178_v25  ;;  %7910 = vmatpush3.bf16.msra.mxu0 %v11447_v8  ;;  %v6757_v25 = vld [vmem:[%s11327_s3 + $0x440] sm:$0xff] }
 0x3f2   :  { %7490 = vmatprep.subr.bf16.mxu1 %v11463_v61  ;;  %v6790_v26 = vcombine.high %v6757_v25, %v6761_v3  ;;  %3172 = vmatprep.subr.bf16.mxu0 %v6782_v19  ;;  %v6789_v8 = vcombine.low %v6757_v25, %v6761_v3  ;;  %v11478_v61 = vld [vmem:[#allocation12_spill] sm:$0xff]  ;;  %v11482_v25 = vld [vmem:[#allocation13_spill] sm:$0xff] }
 0x3f4   :  { %7912 = vmatmul.mubr.msk.bf16.vlgmr.msra.gmra.mrb[64].mxu0 %vm486_vm1, %v2810_v60 }
 0x3f5   :  { %7491 = vmatpush3.bf16.msra.mxu1 %v11464_v62  ;;  %3204 = vmatprep.mubr.bf16.mxu0 %v11465_v63 }
 0x3f6   :  { %7492 = vmatprep.subr.bf16.mxu1 %v11466_v37  ;;  %3173 = vmatpush1.bf16.msra.mxu0 %v6781_v13  ;;  %v11479_v37 = vld [vmem:[#allocation24_spill] sm:$0xff] }
 0x3f7   :  { %3174 = vmatprep.subr.bf16.mxu0 %v6790_v26 }
 0x3f9   :  { %7493 = vmatpush3.bf16.msra.mxu1 %v11467_v0 }
 0x3fa   :  { %7494 = vmatprep.subr.bf16.mxu1 %v11468_v2  ;;  %3175 = vmatpush1.bf16.msra.mxu0 %v6789_v8 }
 0x3fb   :  { %3176 = vmatprep.subr.bf16.mxu0 %v6798_v29 }
 0x3fd   :  { %7495 = vmatpush3.bf16.msra.mxu1 %v11469_v4 }
 0x3fe   :  { %7496 = vmatprep.subr.bf16.mxu1 %v11470_v12  ;;  %3177 = vmatpush1.bf16.msra.mxu0 %v6797_v10 }
 0x3ff   :  { %3178 = vmatprep.subr.bf16.mxu0 %v6806_v17 }
 0x401   :  { %7497 = vmatpush3.bf16.msra.mxu1 %v11471_v14 }
 0x402   :  { %7498 = vmatprep.subr.bf16.mxu1 %v11472_v16  ;;  %3179 = vmatpush1.bf16.msra.mxu0 %v6805_v21 }
 0x403   :  { %3254 = vmatprep.subr.bf16.mxu0 %v6786_v32 }
 0x405   :  { %7499 = vmatpush3.bf16.msra.mxu1 %v11473_v46 }
 0x406   :  { %7500 = vmatprep.subr.bf16.mxu1 %v11474_v18 }
 0x409   :  { %7501 = vmatpush3.bf16.msra.mxu1 %v11475_v45 }
 0x40a   :  { %3213 = vmatprep.subr.bf16.mxu1 %v6784_v6 }
 0x40c   :  { %2927 = vmatmul.mubr.bf16.vlgmr.msra.gmra.mrb[72].mxu1 %v2808_v20 }
 0x40d   :  { %3245 = vmatprep.mubr.bf16.mxu1 %v11465_v63  ;;  %3214 = vmatpush1.bf16.msra.mxu1 %v6783_v33  ;;  %v11483_v33 = vld [vmem:[#allocation26_spill] sm:$0xff] }
 0x40e   :  { %3215 = vmatprep.subr.bf16.mxu1 %v6792_v39 }
 0x411   :  { %3216 = vmatpush1.bf16.msra.mxu1 %v6791_v36 }
 0x412   :  { %3217 = vmatprep.subr.bf16.mxu1 %v6800_v42 }
 0x415   :  { %3218 = vmatpush1.bf16.msra.mxu1 %v6799_v49 }
 0x416   :  { %3219 = vmatprep.subr.bf16.mxu1 %v6808_v44 }
 0x419   :  { %3220 = vmatpush1.bf16.msra.mxu1 %v6807_v47 }
 0x41a   :  { %3295 = vmatprep.subr.bf16.mxu1 %v6788_v50 }
 0x48f   :  { %v2621_v53 = vpop.f32.mrb[60].mxu1  ;;  %v2662_v54 = vpop.f32.mrb[52].mxu0 }
 0x490   :  { %v9779_v56 = vadd.f32 %v2621_v53, %v11476_v55  ;;  %v9782_v58 = vadd.f32 %v2662_v54, %v11477_v57  ;;  %v2623_v59 = vpop.f32.mrb[61].mxu1  ;;  %v2664_v60 = vpop.f32.mrb[53].mxu0 }
 0x491   :  { %v9785_v62 = vadd.f32 %v2623_v59, %v11478_v61  ;;  %v9788_v0 = vadd.f32 %v2664_v60, %v11479_v37  ;;  %v2625_v2 = vpop.f32.mrb[62].mxu1  ;;  %v2666_v4 = vpop.f32.mrb[54].mxu0  ;;  %v6759_v59 = vld [vmem:[%s11327_s3 + $0x450] sm:$0xff]  ;;  %v6760_v61 = vld [vmem:[%s11327_s3 + $0x458] sm:$0xff] }
 0x492   :  { %v2626_v12 = vpop.f32.mrb[63].mxu1  ;;  %v2667_v14 = vpop.f32.mrb[55].mxu0  ;;  %v6763_v60 = vld [vmem:[%s11327_s3 + $0x470] sm:$0xff]  ;;  %v6764_v37 = vld [vmem:[%s11327_s3 + $0x478] sm:$0xff] }
 0x493   :  { %v6794_v12 = vcombine.high %v6759_v59, %v6763_v60  ;;  %v6796_v14 = vcombine.high %v6760_v61, %v6764_v37 }
 0x49f   :  { %v2703_v16 = vpop.f32.mrb[64].mxu1  ;;  %v2744_v20 = vpop.f32.mrb[56].mxu0 }
 0x4a0   :  { %v9791_v28 = vadd.f32 %v2703_v16, %v11480_v5  ;;  %v9794_v13 = vadd.f32 %v2744_v20, %v11481_v9  ;;  %v2705_v19 = vpop.f32.mrb[65].mxu1  ;;  %v2746_v22 = vpop.f32.mrb[57].mxu0  ;;  %v6767_v16 = vld [vmem:[%s11327_s3 + $0x490] sm:$0xff]  ;;  %v6768_v5 = vld [vmem:[%s11327_s3 + $0x498] sm:$0xff] }
 0x4a1   :  { %v9797_v3 = vadd.f32 %v2705_v19, %v11482_v25  ;;  %v9800_v6 = vadd.f32 %v2746_v22, %v11483_v33  ;;  %v2707_v26 = vpop.f32.mrb[66].mxu1  ;;  %v2748_v1 = vpop.f32.mrb[58].mxu0  ;;  %v6771_v20 = vld [vmem:[%s11327_s3 + $0x4b0] sm:$0xff]  ;;  %v6772_v9 = vld [vmem:[%s11327_s3 + $0x4b8] sm:$0xff]  ;;  %v6817_v19 = vld [vmem:[%s11324_s0 + $0x46] sm:$0xff]  ;;  %v6793_v22 = vcombine.low %v6759_v59, %v6763_v60  ;;  %v6795_v25 = vcombine.low %v6760_v61, %v6764_v37 }
 0x4a2   :  { %v2708_v51 = vpop.f32.mrb[67].mxu1  ;;  %v2749_v39 = vpop.f32.mrb[59].mxu0  ;;  %v6802_v33 = vcombine.high %v6767_v16, %v6771_v20  ;;  %v6804_v26 = vcombine.high %v6768_v5, %v6772_v9  ;;  %v6775_v1 = vld [vmem:[%s11327_s3 + $0x4d0] sm:$0xff]  ;;  %v3349_v24 = vcombine.high %v6817_v19, %v6817_v19  ;;  %v6801_v27 = vcombine.low %v6767_v16, %v6771_v20  ;;  %v9957_v59 = vld [vmem:[%s11325_s1 + $0x98] sm:$0xff]   ;;  %v9963_v60 = vld [vmem:[%s11325_s1 + $0x60] sm:$0xff]  }
 0x4a3   :  { %v6779_v51 = vld [vmem:[%s11327_s3 + $0x4f0] sm:$0xff]  ;;  %v6812_v39 = vcombine.high %v6776_v48, %v6780_v11  ;;  %v9969_v61 = vld [vmem:[%s11325_s1 + $0xe0] sm:$0xff]   ;;  %v10002_v16 = vld [vmem:[%s11325_s1 + $0x28] sm:$0xff]  }
 0x4a4   :  { %v9975_v37 = vld [vmem:[%s11325_s1 + $0x20] sm:$0xff]   ;;  %v10008_v20 = vld [vmem:[%s11325_s1 + $0xa8] sm:$0xff]  }
 0x4bf   :  { %v7458_v8 = vpop.f32.mrb[68].mxu1  ;;  %v7480_v36 = vpop.f32.mrb[60].mxu0 }
 0x4c0   :  { %v7459_v31 = vpop.f32.mrb[69].mxu1  ;;  %v7481_v35 = vpop.f32.mrb[61].mxu0 }
 0x4c1   :  { %v7460_v52 = vadd.f32 %v7459_v31, %v7458_v8  ;;  %v7461_v29 = vpop.f32.mrb[70].mxu1  ;;  %v7482_v30 = vadd.f32 %v7481_v35, %v7480_v36  ;;  %v7483_v10 = vpop.f32.mrb[62].mxu0  ;;  %v9853_v8 = vrot.slane %v6817_v19, %v8507_v41  ;;  %v9856_v36 = vrot.slane %v3349_v24, %v8507_v41  ;;  %v10055_v24 = vld [vmem:[%s11325_s1 + $0x38] sm:$0xff]  }
 0x4c2   :  { %v7462_v49 = vpop.f32.mrb[71].mxu1  ;;  %v7484_v42 = vpop.f32.mrb[63].mxu0  ;;  %v6809_v31 = vcombine.low %v6775_v1, %v6779_v51  ;;  %v6811_v35 = vcombine.low %v6776_v48, %v6780_v11  ;;  %v9871_v10 = vld [vmem:[%s11325_s1 + $0xc0] sm:$0xff]  }
 0x4c3   :  { %v2849_v15 = vadd.f32 %v11484_v38, %v7460_v52  ;;  %v3364_v52 = vcombine.high %v9853_v8, %v9853_v8  ;;  %v3365_v29 = vcombine.high %v9856_v36, %v9856_v36  ;;  %v3391_v48 = vpack.c.bf16 %v9856_v36, %v9856_v36  ;;  %v10081_v36 = vld [vmem:[%s11325_s1 + $0x180] sm:$0xff]  }
 0x4c4   :  { %11486 = vst [vmem:[#allocation14_spill] sm:$0xff] %v10081_v36 }
 0x4c5   :  { %v2889_v40 = vadd.f32 %v7482_v30, %v2849_v15  ;;  %v9865_v30 = vld [vmem:[%s11325_s1 + $0x40] sm:$0xff]   ;;  %v3390_v49 = vpack.c.bf16 %v3364_v52, %v3364_v52  ;;  %v3392_v42 = vpack.c.bf16 %v3365_v29, %v3365_v29  ;;  %v10096_v52 = vld [vmem:[%s11325_s1 + $0x108] sm:$0xff]  }
 0x4c6   :  { %v9879_v15 = vld [vmem:[%s11325_s1] sm:$0xff]   ;;  %11488 = vst [vmem:[#allocation16_spill] sm:$0xff] %v10096_v52  ;;  %v10102_v29 = vld [vmem:[%s11325_s1 + $0x188] sm:$0xff]  }
 0x4c7   :  { %v2968_v17 = vpop.f32.mrb[64].mxu0  ;;  %11489 = vst [vmem:[#allocation17_spill] sm:$0xff] %v10102_v29 }
 0x4c8   :  { %v7913_v34 = vpop.f32.mrb[65].mxu0 }
 0x4c9   :  { %v2971_v21 = vpop.f32.mrb[66].mxu0  ;;  %v9897_v34 = vld [vmem:[%s11325_s1 + $0xc8] sm:$0xff]  }
 0x4ca   :  { %v7914_v47 = vpop.f32.mrb[67].mxu0  ;;  %v9903_v21 = vld [vmem:[%s11325_s1 + $0x8] sm:$0xff]  }
 0x4cb   :  { %v9909_v47 = vld [vmem:[%s11325_s1 + $0x88] sm:$0xff]  }
 0x4df   :  { %v7502_v44 = vpop.f32.mrb[72].mxu1 }
 0x4e0   :  { %v7503_v32 = vpop.f32.mrb[73].mxu1 }
 0x4e1   :  { %v7504_v50 = vadd.f32 %v7503_v32, %v7502_v44  ;;  %v7505_v53 = vpop.f32.mrb[74].mxu1  ;;  %v9915_v44 = vld [vmem:[%s11325_s1 + $0x50] sm:$0xff]  }
 0x4e2   :  { %v7506_v54 = vpop.f32.mrb[75].mxu1  ;;  %v9921_v32 = vld [vmem:[%s11325_s1 + $0xd0] sm:$0xff]  }
 0x4e3   :  { %v2929_v55 = vadd.f32 %v7504_v50, %v2889_v40  ;;  %v9885_v40 = vld [vmem:[%s11325_s1 + $0x80] sm:$0xff]   ;;  %v9927_v50 = vld [vmem:[%s11325_s1 + $0x10] sm:$0xff]   ;;  %v9939_v54 = vld [vmem:[%s11325_s1 + $0x58] sm:$0xff]  }
 0x4e4   :  { %v9933_v53 = vld [vmem:[%s11325_s1 + $0x90] sm:$0xff]  }
 0x4e5   :  { %v2969_v57 = vadd.f32 %v2968_v17, %v2929_v55  ;;  %v9891_v17 = vld [vmem:[%s11325_s1 + $0x48] sm:$0xff]   ;;  %v9945_v55 = vld [vmem:[%s11325_s1 + $0xd8] sm:$0xff]  }
 0x4e7   :  { %v2974_v2 = vmax.f32 %v2969_v57, 0.0  ;;  %v9951_v57 = vld [vmem:[%s11325_s1 + $0x18] sm:$0xff]  }
 0x4e9   :  { %v2975_v4 = vpack.c.bf16 %v2974_v2, %v2974_v2  ;;  %v9981_v2 = vld [vmem:[%s11325_s1 + $0xa0] sm:$0xff]  }
 0x4eb   :  { %6813 = vmatmul.mubr.msk.bf16.vlgmr.msra.gmra.mrb[68].mxu0 %vm1094_vm2, %v2975_v4  ;;  %6814 = vmatmul.mubr.msk.bf16.vlgmr.msra.gmra.mrb[76].mxu1 %vm1094_vm2, %v2975_v4 }
 0x4ec   :  { %3255 = vmatpush1.bf16.msra.mxu0 %v6785_v23  ;;  %3296 = vmatpush1.bf16.msra.mxu1 %v6787_v43  ;;  %v6803_v23 = vcombine.low %v6768_v5, %v6772_v9  ;;  %v6810_v43 = vcombine.high %v6775_v1, %v6779_v51  ;;  %v10014_v5 = vld [vmem:[%s11325_s1 + $0x70] sm:$0xff]   ;;  %v3389_v51 = vpack.c.bf16 %v9853_v8, %v9853_v8  ;;  %v10075_v8 = vld [vmem:[%s11325_s1 + $0x100] sm:$0xff]  }
 0x4ed   :  { %3256 = vmatprep.subr.bf16.mxu0 %v6794_v12  ;;  %3297 = vmatprep.subr.bf16.mxu1 %v6796_v14  ;;  %v9993_v12 = vld [vmem:[%s11325_s1 + $0xe8] sm:$0xff]   ;;  %v10020_v9 = vld [vmem:[%s11325_s1 + $0xf0] sm:$0xff]   ;;  %11485 = vst [vmem:[#allocation6_spill] sm:$0xff] %v10075_v8 }
 0x4ee   :  { %3286 = vmatprep.mubr.bf16.mxu0 %v11465_v63  ;;  %3327 = vmatprep.mubr.bf16.mxu1 %v11465_v63  ;;  %v6818_v14 = vld [vmem:[%s11324_s0 + $0x4e] sm:$0x3f] }
 0x4ef   :  { %v3373_v19 = vrot.slane %v6818_v14, %v8507_v41  ;;  %v3366_v11 = vcombine.high %v6818_v14, %v6818_v14  ;;  %v10122_v14 = vld [vmem:[%s11325_s1 + $0x158] sm:$0xff]  }
 0x4f0   :  { %3257 = vmatpush1.bf16.msra.mxu0 %v6793_v22  ;;  %3298 = vmatpush1.bf16.msra.mxu1 %v6795_v25  ;;  %v10027_v22 = vld [vmem:[%s11325_s1 + $0x30] sm:$0xff]   ;;  %11492 = vst [vmem:[#allocation20_spill] sm:$0xff] %v10122_v14 }
 0x4f1   :  { %3258 = vmatprep.subr.bf16.mxu0 %v6802_v33  ;;  %3299 = vmatprep.subr.bf16.mxu1 %v6804_v26  ;;  %v10033_v25 = vld [vmem:[%s11325_s1 + $0xb0] sm:$0xff]   ;;  %v10039_v33 = vld [vmem:[%s11325_s1 + $0x78] sm:$0xff]   ;;  %v3381_v1 = vcombine.high %v3373_v19, %v3373_v19 }
 0x4f2   :  { %v10045_v26 = vld [vmem:[%s11325_s1 + $0xf8] sm:$0xff]  }
 0x4f4   :  { %3259 = vmatpush1.bf16.msra.mxu0 %v6801_v27  ;;  %3300 = vmatpush1.bf16.msra.mxu1 %v6803_v23  ;;  %v10061_v27 = vld [vmem:[%s11325_s1 + $0xb8] sm:$0xff]   ;;  %v10067_v23 = vld [vmem:[%s11325_s1 + $0x140] sm:$0xff]  }
 0x4f5   :  { %3260 = vmatprep.subr.bf16.mxu0 %v6810_v43  ;;  %3301 = vmatprep.subr.bf16.mxu1 %v6812_v39  ;;  %v3394_v43 = vpack.c.bf16 %v3381_v1, %v3381_v1  ;;  %v3380_v39 = vrot.slane %v3366_v11, %v8507_v41  ;;  %v10128_v1 = vld [vmem:[%s11325_s1 + $0x118] sm:$0xff]   ;;  %v10146_v11 = vld [vmem:[%s11325_s1 + $0x168] sm:$0xff]  }
 0x4f6   :  { %11493 = vst [vmem:[#allocation21_spill] sm:$0xff] %v10128_v1  ;;  %11496 = vst [vmem:[#allocation8_spill] sm:$0xff] %v10146_v11 }
 0x4f8   :  { %3261 = vmatpush1.bf16.msra.mxu0 %v6809_v31  ;;  %3302 = vmatpush1.bf16.msra.mxu1 %v6811_v35  ;;  %v10087_v31 = vld [vmem:[%s11325_s1 + $0x148] sm:$0xff]   ;;  %v3395_v35 = vpack.c.bf16 %v3380_v39, %v3380_v39  ;;  %v10158_v39 = vld [vmem:[%s11325_s1 + $0x170] sm:$0xff]  }
 0x4f9   :  { %7511 = vmatprep.subr.bf16.mxu0 %v9865_v30  ;;  %7533 = vmatprep.subr.bf16.mxu1 %v9871_v10  ;;  %11487 = vst [vmem:[#allocation15_spill] sm:$0xff] %v10087_v31  ;;  %11498 = vst [vmem:[#allocation10_spill] sm:$0xff] %v10158_v39 }
 0x4fb   :  { %6815 = vmatmul.mubr.msk.bf16.vlgmr.msra.gmra.mrb[72].mxu0 %vm1094_vm2, %v2975_v4  ;;  %6816 = vmatmul.mubr.msk.bf16.vlgmr.msra.gmra.mrb[80].mxu1 %vm1094_vm2, %v2975_v4  ;;  %v9987_v4 = vld [vmem:[%s11325_s1 + $0x68] sm:$0xff]  }
 0x4fc   :  { %7512 = vmatpush3.bf16.msra.mxu0 %v9879_v15  ;;  %7534 = vmatpush3.bf16.msra.mxu1 %v9885_v40 }
 0x4fd   :  { %7513 = vmatprep.subr.bf16.mxu0 %v9891_v17  ;;  %7535 = vmatprep.subr.bf16.mxu1 %v9897_v34 }
 0x4fe   :  { %3431 = vmatprep.mubr.bf16.mxu0 %v3390_v49  ;;  %3471 = vmatprep.mubr.bf16.mxu1 %v3392_v42  ;;  %v10108_v49 = vld [vmem:[%s11325_s1 + $0x150] sm:$0xff]  }
 0x4ff   :  { %11490 = vst [vmem:[#allocation18_spill] sm:$0xff] %v10108_v49  ;;  %v10115_v42 = vld [vmem:[%s11325_s1 + $0x110] sm:$0xff]  }
 0x500   :  { %7514 = vmatpush3.bf16.msra.mxu0 %v9903_v21  ;;  %7536 = vmatpush3.bf16.msra.mxu1 %v9909_v47  ;;  %11491 = vst [vmem:[#allocation19_spill] sm:$0xff] %v10115_v42 }
 0x501   :  { %7515 = vmatprep.subr.bf16.mxu0 %v9915_v44  ;;  %7537 = vmatprep.subr.bf16.mxu1 %v9921_v32 }
 0x504   :  { %7516 = vmatpush3.bf16.msra.mxu0 %v9927_v50  ;;  %7538 = vmatpush3.bf16.msra.mxu1 %v9933_v53 }
 0x505   :  { %7517 = vmatprep.subr.bf16.mxu0 %v9939_v54  ;;  %7539 = vmatprep.subr.bf16.mxu1 %v9945_v55 }
 0x508   :  { %7518 = vmatpush3.bf16.msra.mxu0 %v9951_v57  ;;  %7540 = vmatpush3.bf16.msra.mxu1 %v9957_v59 }
 0x509   :  { %7519 = vmatprep.subr.bf16.mxu0 %v9963_v60  ;;  %7541 = vmatprep.subr.bf16.mxu1 %v9969_v61 }
 0x50c   :  { %7520 = vmatpush3.bf16.msra.mxu0 %v9975_v37  ;;  %7542 = vmatpush3.bf16.msra.mxu1 %v9981_v2 }
 0x50d   :  { %7521 = vmatprep.subr.bf16.mxu0 %v9987_v4  ;;  %7543 = vmatprep.subr.bf16.mxu1 %v9993_v12 }
 0x510   :  { %7522 = vmatpush3.bf16.msra.mxu0 %v10002_v16  ;;  %7544 = vmatpush3.bf16.msra.mxu1 %v10008_v20 }
 0x511   :  { %7523 = vmatprep.subr.bf16.mxu0 %v10014_v5  ;;  %7545 = vmatprep.subr.bf16.mxu1 %v10020_v9 }
 0x514   :  { %7524 = vmatpush3.bf16.msra.mxu0 %v10027_v22  ;;  %7546 = vmatpush3.bf16.msra.mxu1 %v10033_v25 }
 0x515   :  { %7525 = vmatprep.subr.bf16.mxu0 %v10039_v33  ;;  %7547 = vmatprep.subr.bf16.mxu1 %v10045_v26 }
 0x518   :  { %7526 = vmatpush3.bf16.msra.mxu0 %v10055_v24  ;;  %7548 = vmatpush3.bf16.msra.mxu1 %v10061_v27 }
 0x519   :  { %7555 = vmatprep.subr.bf16.mxu0 %v10067_v23  ;;  %7915 = vmatprep.subr.bf16.mxu1 %v11445_v7 }
 0x51b   :  { %3432 = vmatmul.mubr.bf16.vlgmr.msra.gmra.mrb[76].mxu0 %v3389_v51  ;;  %3472 = vmatmul.mubr.bf16.vlgmr.msra.gmra.mrb[84].mxu1 %v3391_v48  ;;  %v10134_v51 = vld [vmem:[%s11325_s1 + $0x160] sm:$0xff]  }
 0x51c   :  { %7556 = vmatpush3.bf16.msra.mxu0 %v10075_v8  ;;  %7916 = vmatpush3.bf16.msra.mxu1 %v10081_v36  ;;  %11494 = vst [vmem:[#allocation22_spill] sm:$0xff] %v10134_v51  ;;  %v10140_v48 = vld [vmem:[%s11325_s1 + $0x120] sm:$0xff]  }
 0x51d   :  { %7557 = vmatprep.subr.bf16.mxu0 %v10087_v31  ;;  %3511 = vmatprep.mubr.bf16.mxu0 %v3394_v43  ;;  %11495 = vst [vmem:[#allocation7_spill] sm:$0xff] %v10140_v48  ;;  %v10152_v43 = vld [vmem:[%s11325_s1 + $0x128] sm:$0xff]  }
 0x51e   :  { %7917 = vmatprep.subr.bf16.mxu1 %v11445_v7  ;;  %7919 = vmatprep.mubr.msk.bf16.mxu1 %vm8259_vm0, %v11445_v7  ;;  %11497 = vst [vmem:[#allocation9_spill] sm:$0xff] %v10152_v43 }
 0x520   :  { %7558 = vmatpush3.bf16.msra.mxu0 %v10096_v52  ;;  %7918 = vmatpush3.bf16.msra.mxu1 %v10102_v29 }
 0x521   :  { %7559 = vmatprep.subr.bf16.mxu0 %v10108_v49 }
 0x523   :  { %7920 = vmatmul.mubr.msk.bf16.vlgmr.msra.gmra.mrb[88].mxu1 %vm486_vm1, %v3395_v35  ;;  %v3393_v35 = vpack.c.bf16 %v3373_v19, %v3373_v19  ;;  %v6828_v19 = vld [vmem:[%s11327_s3 + $0x540] sm:$0xff] }
 0x524   :  { %7560 = vmatpush3.bf16.msra.mxu0 %v10115_v42  ;;  %3789 = vmatprep.mubr.bf16.mxu1 %v11465_v63 }
 0x525   :  { %7561 = vmatprep.subr.bf16.mxu0 %v10122_v14  ;;  %v6829_v14 = vld [vmem:[%s11327_s3 + $0x548] sm:$0xff] }
 0x528   :  { %7562 = vmatpush3.bf16.msra.mxu0 %v10128_v1 }
 0x529   :  { %7563 = vmatprep.subr.bf16.mxu0 %v10134_v51 }
 0x52c   :  { %7564 = vmatpush3.bf16.msra.mxu0 %v10140_v48 }
 0x52d   :  { %7565 = vmatprep.subr.bf16.mxu0 %v10146_v11  ;;  %v6824_v11 = vld [vmem:[%s11327_s3 + $0x520] sm:$0xff] }
 0x530   :  { %7566 = vmatpush3.bf16.msra.mxu0 %v10152_v43  ;;  %v6820_v43 = vld [vmem:[%s11327_s3 + $0x500] sm:$0xff] }
 0x531   :  { %7567 = vmatprep.subr.bf16.mxu0 %v10158_v39  ;;  %v6852_v39 = vcombine.low %v6820_v43, %v6824_v11 }
 0x534   :  { %7568 = vmatpush3.bf16.msra.mxu0 %v11473_v46  ;;  %v6821_v46 = vld [vmem:[%s11327_s3 + $0x508] sm:$0xff] }
 0x535   :  { %7569 = vmatprep.subr.bf16.mxu0 %v11474_v18  ;;  %v6853_v18 = vcombine.high %v6820_v43, %v6824_v11  ;;  %v6833_v11 = vld [vmem:[%s11327_s3 + $0x568] sm:$0xff] }
 0x536   :  { %v6863_v43 = vcombine.high %v6829_v14, %v6833_v11  ;;  %v6862_v49 = vcombine.low %v6829_v14, %v6833_v11  ;;  %v6841_v14 = vld [vmem:[%s11327_s3 + $0x5a8] sm:$0xff] }
 0x537   :  { %3757 = vmatprep.subr.bf16.mxu1 %v6853_v18  ;;  %v6848_v18 = vld [vmem:[%s11327_s3 + $0x5e0] sm:$0xff]  ;;  %v6849_v11 = vld [vmem:[%s11327_s3 + $0x5e8] sm:$0xff] }
 0x538   :  { %7570 = vmatpush3.bf16.msra.mxu0 %v11475_v45  ;;  %v6825_v45 = vld [vmem:[%s11327_s3 + $0x528] sm:$0xff]  ;;  %3758 = vmatpush1.bf16.msra.mxu1 %v6852_v39 }
 0x539   :  { %v6854_v48 = vcombine.low %v6821_v46, %v6825_v45  ;;  %v6855_v51 = vcombine.high %v6821_v46, %v6825_v45  ;;  %v6836_v46 = vld [vmem:[%s11327_s3 + $0x580] sm:$0xff] }
 0x53a   :  { %v6840_v45 = vld [vmem:[%s11327_s3 + $0x5a0] sm:$0xff] }
 0x53b   :  { %3512 = vmatmul.mubr.bf16.vlgmr.msra.gmra.mrb[80].mxu0 %v3393_v35  ;;  %v6832_v35 = vld [vmem:[%s11327_s3 + $0x560] sm:$0xff]  ;;  %3798 = vmatprep.subr.bf16.mxu0 %v6855_v51  ;;  %v6837_v51 = vld [vmem:[%s11327_s3 + $0x588] sm:$0xff]  ;;  %v6869_v39 = vcombine.high %v6836_v46, %v6840_v45 }
 0x53c   :  { %3830 = vmatprep.mubr.bf16.mxu0 %v11465_v63  ;;  %v6861_v1 = vcombine.high %v6828_v19, %v6832_v35  ;;  %v6860_v42 = vcombine.low %v6828_v19, %v6832_v35  ;;  %3799 = vmatpush1.bf16.msra.mxu0 %v6854_v48  ;;  %v6844_v48 = vld [vmem:[%s11327_s3 + $0x5c0] sm:$0xff]  ;;  %v6845_v19 = vld [vmem:[%s11327_s3 + $0x5c8] sm:$0xff] }
 0x53d   :  { %3800 = vmatprep.subr.bf16.mxu0 %v6863_v43  ;;  %v6877_v35 = vcombine.high %v6844_v48, %v6848_v18  ;;  %v6876_v43 = vcombine.low %v6844_v48, %v6848_v18 }
 0x53e   :  { %3759 = vmatprep.subr.bf16.mxu1 %v6861_v1  ;;  %v6868_v1 = vcombine.low %v6836_v46, %v6840_v45  ;;  %v6878_v46 = vcombine.low %v6845_v19, %v6849_v11  ;;  %v6879_v45 = vcombine.high %v6845_v19, %v6849_v11 }
 0x53f   :  { %3760 = vmatpush1.bf16.msra.mxu1 %v6860_v42  ;;  %v6870_v42 = vcombine.low %v6837_v51, %v6841_v14 }
 0x540   :  { %3801 = vmatpush1.bf16.msra.mxu0 %v6862_v49  ;;  %v6871_v49 = vcombine.high %v6837_v51, %v6841_v14  ;;  %3761 = vmatprep.subr.bf16.mxu1 %v6869_v39  ;;  %v10216_v51 = vld [vmem:[%s11327_s3 + $0x510] sm:$0xff]  ;;  %v10226_v14 = vld [vmem:[%s11327_s3 + $0x518] sm:$0xff] }
 0x541   :  { %v10221_v39 = vld [vmem:[%s11327_s3 + $0x530] sm:$0xff] }
 0x542   :  { %3802 = vmatprep.subr.bf16.mxu0 %v6871_v49 }
 0x543   :  { %3762 = vmatpush1.bf16.msra.mxu1 %v6868_v1  ;;  %v6857_v1 = vcombine.high %v10216_v51, %v10221_v39 }
 0x544   :  { %3803 = vmatpush1.bf16.msra.mxu0 %v6870_v42  ;;  %3763 = vmatprep.subr.bf16.mxu1 %v6877_v35  ;;  %v10233_v42 = vld [vmem:[%s11327_s3 + $0x538] sm:$0xff] }
 0x545   :  { %3804 = vmatprep.subr.bf16.mxu0 %v6879_v45  ;;  %v6859_v18 = vcombine.high %v10226_v14, %v10233_v42 }
 0x547   :  { %3764 = vmatpush1.bf16.msra.mxu1 %v6876_v43 }
 0x548   :  { %3805 = vmatpush1.bf16.msra.mxu0 %v6878_v46  ;;  %3839 = vmatprep.subr.bf16.mxu1 %v6857_v1 }
 0x549   :  { %3880 = vmatprep.subr.bf16.mxu0 %v6859_v18 }
 0x5be   :  { %v3206_v19 = vpop.f32.mrb[68].mxu0  ;;  %v3247_v35 = vpop.f32.mrb[76].mxu1 }
 0x5bf   :  { %v10242_v11 = vadd.f32 %v3206_v19, %v9779_v56  ;;  %v10245_v43 = vadd.f32 %v3247_v35, %v9782_v58  ;;  %v3208_v46 = vpop.f32.mrb[69].mxu0  ;;  %v3249_v45 = vpop.f32.mrb[77].mxu1 }
 0x5c0   :  { %v10248_v49 = vadd.f32 %v3208_v46, %v9785_v62  ;;  %v10251_v48 = vadd.f32 %v3249_v45, %v9788_v0  ;;  %v3210_v29 = vpop.f32.mrb[70].mxu0  ;;  %v3251_v52 = vpop.f32.mrb[78].mxu1 }
 0x5c1   :  { %11499 = vst [vmem:[#allocation23_spill] sm:$0xff] %v10242_v11  ;;  %11500 = vst [vmem:[#allocation12_spill] sm:$0xff] %v10245_v43  ;;  %v3211_v1 = vpop.f32.mrb[71].mxu0  ;;  %v3252_v18 = vpop.f32.mrb[79].mxu1 }
 0x5c2   :  { %11501 = vst [vmem:[#allocation24_spill] sm:$0xff] %v10248_v49  ;;  %11502 = vst [vmem:[#allocation11_spill] sm:$0xff] %v10251_v48 }
 0x5ce   :  { %v3288_v31 = vpop.f32.mrb[72].mxu0  ;;  %v3329_v36 = vpop.f32.mrb[80].mxu1 }
 0x5cf   :  { %v10254_v56 = vadd.f32 %v3288_v31, %v9791_v28  ;;  %v10257_v58 = vadd.f32 %v3329_v36, %v9794_v13  ;;  %v3290_v19 = vpop.f32.mrb[73].mxu0  ;;  %v3331_v35 = vpop.f32.mrb[81].mxu1 }
 0x5d0   :  { %v10260_v62 = vadd.f32 %v3290_v19, %v9797_v3  ;;  %v10263_v0 = vadd.f32 %v3331_v35, %v9800_v6  ;;  %v3292_v29 = vpop.f32.mrb[74].mxu0  ;;  %v3333_v52 = vpop.f32.mrb[82].mxu1 }
 0x5d1   :  { %11503 = vst [vmem:[#allocation25_spill] sm:$0xff] %v10254_v56  ;;  %11504 = vst [vmem:[#allocation13_spill] sm:$0xff] %v10257_v58  ;;  %v3293_v46 = vpop.f32.mrb[75].mxu0  ;;  %v3334_v45 = vpop.f32.mrb[83].mxu1 }
 0x5d2   :  { %11505 = vst [vmem:[#allocation26_spill] sm:$0xff] %v10260_v62  ;;  %11506 = vst [vmem:[#allocation27_spill] sm:$0xff] %v10263_v0 }
 0x5ee   :  { %v7527_v1 = vpop.f32.mrb[76].mxu0  ;;  %v7549_v18 = vpop.f32.mrb[84].mxu1 }
 0x5ef   :  { %v7528_v48 = vpop.f32.mrb[77].mxu0  ;;  %v7550_v28 = vpop.f32.mrb[85].mxu1 }
 0x5f0   :  { %v7529_v31 = vadd.f32 %v7528_v48, %v7527_v1  ;;  %v7530_v56 = vpop.f32.mrb[78].mxu0  ;;  %v7551_v13 = vadd.f32 %v7550_v28, %v7549_v18  ;;  %v7552_v36 = vpop.f32.mrb[86].mxu1  ;;  %v6830_v48 = vld [vmem:[%s11327_s3 + $0x550] sm:$0xff]  ;;  %v6839_v18 = vld [vmem:[%s11327_s3 + $0x598] sm:$0xff] }
 0x5f1   :  { %v7531_v58 = vpop.f32.mrb[79].mxu0  ;;  %v7553_v49 = vpop.f32.mrb[87].mxu1  ;;  %v6835_v56 = vld [vmem:[%s11327_s3 + $0x578] sm:$0xff]  ;;  %v6842_v1 = vld [vmem:[%s11327_s3 + $0x5b0] sm:$0xff] }
 0x5f2   :  { %v3434_v3 = vadd.f32 %v11484_v38, %v7529_v31  ;;  %v6834_v38 = vld [vmem:[%s11327_s3 + $0x570] sm:$0xff]  ;;  %v6831_v49 = vld [vmem:[%s11327_s3 + $0x558] sm:$0xff]  ;;  %v11507_v31 = vcombine.low %v10216_v51, %v10221_v39 }
 0x5f3   :  { %v6843_v28 = vld [vmem:[%s11327_s3 + $0x5b8] sm:$0xff]  ;;  %v6864_v36 = vcombine.low %v6830_v48, %v6834_v38 }
 0x5f4   :  { %v3474_v19 = vadd.f32 %v7551_v13, %v3434_v3  ;;  %v11508_v13 = vcombine.low %v10226_v14, %v10233_v42  ;;  %v6866_v3 = vcombine.low %v6831_v49, %v6835_v56  ;;  %v6847_v51 = vld [vmem:[%s11327_s3 + $0x5d8] sm:$0xff] }
 0x5f5   :  { %v6851_v39 = vld [vmem:[%s11327_s3 + $0x5f8] sm:$0xff] }
 0x5f6   :  { %v3553_v62 = vpop.f32.mrb[88].mxu1 }
 0x5f7   :  { %v7921_v6 = vpop.f32.mrb[89].mxu1 }
 0x5f8   :  { %v3556_v35 = vpop.f32.mrb[90].mxu1  ;;  %v6875_v6 = vcombine.high %v6839_v18, %v6843_v28 }
 0x5f9   :  { %v7922_v29 = vpop.f32.mrb[91].mxu1  ;;  %v6846_v35 = vld [vmem:[%s11327_s3 + $0x5d0] sm:$0xff] }
 0x5fa   :  { %v6850_v29 = vld [vmem:[%s11327_s3 + $0x5f0] sm:$0xff] }
 0x60e   :  { %v7571_v52 = vpop.f32.mrb[80].mxu0 }
 0x60f   :  { %v7572_v46 = vpop.f32.mrb[81].mxu0 }
 0x610   :  { %v7573_v45 = vadd.f32 %v7572_v46, %v7571_v52  ;;  %v7574_v0 = vpop.f32.mrb[82].mxu0  ;;  %v6874_v52 = vcombine.low %v6839_v18, %v6843_v28  ;;  %v6881_v46 = vcombine.high %v6846_v35, %v6850_v29 }
 0x611   :  { %v7575_v43 = vpop.f32.mrb[83].mxu0  ;;  %v6865_v0 = vcombine.high %v6830_v48, %v6834_v38 }
 0x612   :  { %v3514_v11 = vadd.f32 %v7573_v45, %v3474_v19  ;;  %v6883_v45 = vcombine.high %v6847_v51, %v6851_v39 }
 0x614   :  { %v3554_v8 = vadd.f32 %v3553_v62, %v3514_v11  ;;  %v6867_v11 = vcombine.high %v6831_v49, %v6835_v56  ;;  %v6838_v62 = vld [vmem:[%s11327_s3 + $0x590] sm:$0xff]  ;;  %v6880_v49 = vcombine.low %v6846_v35, %v6850_v29  ;;  %v6882_v56 = vcombine.low %v6847_v51, %v6851_v39  ;;  %v11512_v29 = vld [vmem:[#allocation16_spill] sm:$0xff]  ;;  %v11513_v51 = vld [vmem:[#allocation17_spill] sm:$0xff] }
 0x615   :  { %v6873_v19 = vcombine.high %v6838_v62, %v6842_v1  ;;  %v6872_v42 = vcombine.low %v6838_v62, %v6842_v1  ;;  %v11514_v39 = vld [vmem:[#allocation18_spill] sm:$0xff] }
 0x616   :  { %v3559_v58 = vmax.f32 %v3554_v8, 0.0  ;;  %v6888_v8 = vld [vmem:[%s11324_s0 + $0x54] sm:$0xff] }
 0x617   :  { %v3934_v14 = vcombine.high %v6888_v8, %v6888_v8  ;;  %v3941_v48 = vrot.slane %v6888_v8, %v8507_v41 }
 0x618   :  { %v3560_v43 = vpack.c.bf16 %v3559_v58, %v3559_v58 }
 0x619   :  { %v3948_v38 = vrot.slane %v3934_v14, %v8507_v41  ;;  %v3949_v58 = vcombine.high %v3941_v48, %v3941_v48  ;;  %v3974_v28 = vpack.c.bf16 %v3941_v48, %v3941_v48  ;;  %v11515_v14 = vld [vmem:[#allocation19_spill] sm:$0xff]  ;;  %v11520_v48 = vld [vmem:[#allocation8_spill] sm:$0xff] }
 0x61a   :  { %6884 = vmatmul.mubr.msk.bf16.vlgmr.msra.gmra.mrb[92].mxu1 %vm1094_vm2, %v3560_v43  ;;  %6885 = vmatmul.mubr.msk.bf16.vlgmr.msra.gmra.mrb[84].mxu0 %vm1094_vm2, %v3560_v43 }
 0x61b   :  { %3840 = vmatpush1.bf16.msra.mxu1 %v11507_v31  ;;  %3881 = vmatpush1.bf16.msra.mxu0 %v11508_v13  ;;  %v3976_v8 = vpack.c.bf16 %v3948_v38, %v3948_v38 }
 0x61c   :  { %3841 = vmatprep.subr.bf16.mxu1 %v6865_v0  ;;  %3882 = vmatprep.subr.bf16.mxu0 %v6867_v11  ;;  %v3950_v0 = vcombine.high %v3948_v38, %v3948_v38  ;;  %v3975_v11 = vpack.c.bf16 %v3949_v58, %v3949_v58  ;;  %v11521_v38 = vld [vmem:[#allocation9_spill] sm:$0xff]  ;;  %v10386_v58 = vld [vmem:[%s11325_s1 + $0x178] sm:$0xff]  }
 0x61d   :  { %3871 = vmatprep.mubr.bf16.mxu1 %v11465_v63  ;;  %3912 = vmatprep.mubr.bf16.mxu0 %v11465_v63 }
 0x61e   :  { %v3977_v62 = vpack.c.bf16 %v3950_v0, %v3950_v0 }
 0x61f   :  { %3842 = vmatpush1.bf16.msra.mxu1 %v6864_v36  ;;  %3883 = vmatpush1.bf16.msra.mxu0 %v6866_v3  ;;  %v11509_v3 = vld [vmem:[#allocation6_spill] sm:$0xff] }
 0x620   :  { %3843 = vmatprep.subr.bf16.mxu1 %v6873_v19  ;;  %3884 = vmatprep.subr.bf16.mxu0 %v6875_v6  ;;  %v11510_v19 = vld [vmem:[#allocation14_spill] sm:$0xff]  ;;  %v11511_v6 = vld [vmem:[#allocation15_spill] sm:$0xff] }
 0x621   :  { %11524 = vst [vmem:[#allocation14_spill] sm:$0xff] %v10386_v58 }
 0x623   :  { %3844 = vmatpush1.bf16.msra.mxu1 %v6872_v42  ;;  %3885 = vmatpush1.bf16.msra.mxu0 %v6874_v52  ;;  %v11516_v42 = vld [vmem:[#allocation20_spill] sm:$0xff]  ;;  %v11517_v52 = vld [vmem:[#allocation21_spill] sm:$0xff] }
 0x624   :  { %3845 = vmatprep.subr.bf16.mxu1 %v6881_v46  ;;  %3886 = vmatprep.subr.bf16.mxu0 %v6883_v45  ;;  %v11518_v46 = vld [vmem:[#allocation22_spill] sm:$0xff]  ;;  %v11519_v45 = vld [vmem:[#allocation7_spill] sm:$0xff] }
 0x627   :  { %3846 = vmatpush1.bf16.msra.mxu1 %v6880_v49  ;;  %3887 = vmatpush1.bf16.msra.mxu0 %v6882_v56  ;;  %v11522_v49 = vld [vmem:[#allocation10_spill] sm:$0xff] }
 0x628   :  { %7580 = vmatprep.subr.bf16.mxu1 %v9865_v30  ;;  %7602 = vmatprep.subr.bf16.mxu0 %v9871_v10  ;;  %v10380_v56 = vld [vmem:[%s11325_s1 + $0x130] sm:$0xff]  }
 0x629   :  { %11523 = vst [vmem:[#allocation6_spill] sm:$0xff] %v10380_v56 }
 0x62a   :  { %6886 = vmatmul.mubr.msk.bf16.vlgmr.msra.gmra.mrb[96].mxu1 %vm1094_vm2, %v3560_v43  ;;  %6887 = vmatmul.mubr.msk.bf16.vlgmr.msra.gmra.mrb[88].mxu0 %vm1094_vm2, %v3560_v43  ;;  %v6889_v43 = vld [vmem:[%s11324_s0 + $0x5c] sm:$0x3f] }
 0x62b   :  { %7581 = vmatpush3.bf16.msra.mxu1 %v9879_v15  ;;  %7603 = vmatpush3.bf16.msra.mxu0 %v9885_v40  ;;  %v3958_v1 = vrot.slane %v6889_v43, %v8507_v41  ;;  %v3951_v31 = vcombine.high %v6889_v43, %v6889_v43  ;;  %v6895_v43 = vld [vmem:[%s11327_s3 + $0x620] sm:$0xff] }
 0x62c   :  { %7582 = vmatprep.subr.bf16.mxu1 %v9891_v17  ;;  %7604 = vmatprep.subr.bf16.mxu0 %v9897_v34 }
 0x62d   :  { %4016 = vmatprep.mubr.bf16.mxu1 %v3975_v11  ;;  %4056 = vmatprep.mubr.bf16.mxu0 %v3977_v62  ;;  %v3966_v18 = vcombine.high %v3958_v1, %v3958_v1  ;;  %v3965_v36 = vrot.slane %v3951_v31, %v8507_v41  ;;  %v3978_v0 = vpack.c.bf16 %v3958_v1, %v3958_v1  ;;  %v10392_v11 = vld [vmem:[%s11325_s1 + $0x138] sm:$0xff]   ;;  %v6891_v62 = vld [vmem:[%s11327_s3 + $0x600] sm:$0xff]  ;;  %v6892_v1 = vld [vmem:[%s11327_s3 + $0x608] sm:$0xff] }
 0x62e   :  { %11525 = vst [vmem:[#allocation15_spill] sm:$0xff] %v10392_v11  ;;  %v6899_v31 = vld [vmem:[%s11327_s3 + $0x640] sm:$0xff] }
 0x62f   :  { %7583 = vmatpush3.bf16.msra.mxu1 %v9903_v21  ;;  %7605 = vmatpush3.bf16.msra.mxu0 %v9909_v47  ;;  %v3979_v13 = vpack.c.bf16 %v3966_v18, %v3966_v18  ;;  %v3980_v35 = vpack.c.bf16 %v3965_v36, %v3965_v36  ;;  %v6923_v18 = vcombine.low %v6891_v62, %v6895_v43 }
 0x630   :  { %7584 = vmatprep.subr.bf16.mxu1 %v9915_v44  ;;  %7606 = vmatprep.subr.bf16.mxu0 %v9921_v32 }
 0x633   :  { %7585 = vmatpush3.bf16.msra.mxu1 %v9927_v50  ;;  %7607 = vmatpush3.bf16.msra.mxu0 %v9933_v53 }
 0x634   :  { %7586 = vmatprep.subr.bf16.mxu1 %v9939_v54  ;;  %7608 = vmatprep.subr.bf16.mxu0 %v9945_v55 }
 0x637   :  { %7587 = vmatpush3.bf16.msra.mxu1 %v9951_v57  ;;  %7609 = vmatpush3.bf16.msra.mxu0 %v9957_v59 }
 0x638   :  { %7588 = vmatprep.subr.bf16.mxu1 %v9963_v60  ;;  %7610 = vmatprep.subr.bf16.mxu0 %v9969_v61 }
 0x63b   :  { %7589 = vmatpush3.bf16.msra.mxu1 %v9975_v37  ;;  %7611 = vmatpush3.bf16.msra.mxu0 %v9981_v2 }
 0x63c   :  { %7590 = vmatprep.subr.bf16.mxu1 %v9987_v4  ;;  %7612 = vmatprep.subr.bf16.mxu0 %v9993_v12 }
 0x63f   :  { %7591 = vmatpush3.bf16.msra.mxu1 %v10002_v16  ;;  %7613 = vmatpush3.bf16.msra.mxu0 %v10008_v20 }
 0x640   :  { %7592 = vmatprep.subr.bf16.mxu1 %v10014_v5  ;;  %7614 = vmatprep.subr.bf16.mxu0 %v10020_v9 }
 0x643   :  { %7593 = vmatpush3.bf16.msra.mxu1 %v10027_v22  ;;  %7615 = vmatpush3.bf16.msra.mxu0 %v10033_v25 }
 0x644   :  { %7594 = vmatprep.subr.bf16.mxu1 %v10039_v33  ;;  %7616 = vmatprep.subr.bf16.mxu0 %v10045_v26 }
 0x647   :  { %7595 = vmatpush3.bf16.msra.mxu1 %v10055_v24  ;;  %7617 = vmatpush3.bf16.msra.mxu0 %v10061_v27 }
 0x648   :  { %7624 = vmatprep.subr.bf16.mxu1 %v10067_v23  ;;  %7923 = vmatprep.subr.bf16.mxu0 %v11445_v7 }
 0x64a   :  { %4017 = vmatmul.mubr.bf16.vlgmr.msra.gmra.mrb[100].mxu1 %v3974_v28  ;;  %4057 = vmatmul.mubr.bf16.vlgmr.msra.gmra.mrb[92].mxu0 %v3976_v8  ;;  %v6924_v28 = vcombine.high %v6891_v62, %v6895_v43  ;;  %v6896_v8 = vld [vmem:[%s11327_s3 + $0x628] sm:$0xff] }
 0x64b   :  { %7625 = vmatpush3.bf16.msra.mxu1 %v11509_v3  ;;  %7924 = vmatpush3.bf16.msra.mxu0 %v11510_v19  ;;  %v6925_v36 = vcombine.low %v6892_v1, %v6896_v8  ;;  %v6904_v62 = vld [vmem:[%s11327_s3 + $0x668] sm:$0xff] }
 0x64c   :  { %7626 = vmatprep.subr.bf16.mxu1 %v11511_v6  ;;  %4096 = vmatprep.mubr.bf16.mxu1 %v3979_v13  ;;  %v6903_v13 = vld [vmem:[%s11327_s3 + $0x660] sm:$0xff] }
 0x64d   :  { %7925 = vmatprep.subr.bf16.mxu0 %v11445_v7  ;;  %7927 = vmatprep.mubr.msk.bf16.mxu0 %vm8259_vm0, %v11445_v7 }
 0x64f   :  { %7627 = vmatpush3.bf16.msra.mxu1 %v11512_v29  ;;  %7926 = vmatpush3.bf16.msra.mxu0 %v11513_v51 }
 0x650   :  { %7628 = vmatprep.subr.bf16.mxu1 %v11514_v39  ;;  %4342 = vmatprep.subr.bf16.mxu0 %v6924_v28  ;;  %v6908_v28 = vld [vmem:[%s11327_s3 + $0x688] sm:$0xff] }
 0x651   :  { %v11534_v39 = vld [vmem:[#allocation25_spill] sm:$0xff] }
 0x652   :  { %7928 = vmatmul.mubr.msk.bf16.vlgmr.msra.gmra.mrb[96].mxu0 %vm486_vm1, %v3980_v35  ;;  %v6926_v35 = vcombine.high %v6892_v1, %v6896_v8  ;;  %v6907_v1 = vld [vmem:[%s11327_s3 + $0x680] sm:$0xff] }
 0x653   :  { %7629 = vmatpush3.bf16.msra.mxu1 %v11515_v14  ;;  %4374 = vmatprep.mubr.bf16.mxu0 %v11465_v63  ;;  %v6911_v8 = vld [vmem:[%s11327_s3 + $0x6a0] sm:$0xff] }
 0x654   :  { %7630 = vmatprep.subr.bf16.mxu1 %v11516_v42  ;;  %4343 = vmatpush1.bf16.msra.mxu0 %v6923_v18  ;;  %v6940_v18 = vcombine.high %v6907_v1, %v6911_v8 }
 0x657   :  { %7631 = vmatpush3.bf16.msra.mxu1 %v11517_v52 }
 0x658   :  { %7632 = vmatprep.subr.bf16.mxu1 %v11518_v46 }
 0x65b   :  { %7633 = vmatpush3.bf16.msra.mxu1 %v11519_v45  ;;  %v11532_v45 = vld [vmem:[#allocation11_spill] sm:$0xff] }
 0x65c   :  { %7634 = vmatprep.subr.bf16.mxu1 %v11520_v48  ;;  %v11530_v48 = vld [vmem:[#allocation24_spill] sm:$0xff] }
 0x65f   :  { %7635 = vmatpush3.bf16.msra.mxu1 %v11521_v38 }
 0x660   :  { %7636 = vmatprep.subr.bf16.mxu1 %v11522_v49 }
 0x663   :  { %7637 = vmatpush3.bf16.msra.mxu1 %v10380_v56 }
 0x664   :  { %7638 = vmatprep.subr.bf16.mxu1 %v10386_v58  ;;  %v6931_v58 = vcombine.low %v6899_v31, %v6903_v13 }
 0x667   :  { %7639 = vmatpush3.bf16.msra.mxu1 %v10392_v11  ;;  %v6900_v11 = vld [vmem:[%s11327_s3 + $0x648] sm:$0xff] }
 0x668   :  { %v6934_v43 = vcombine.high %v6900_v11, %v6904_v62  ;;  %4383 = vmatprep.subr.bf16.mxu1 %v6926_v35  ;;  %v6933_v56 = vcombine.low %v6900_v11, %v6904_v62  ;;  %v6912_v11 = vld [vmem:[%s11327_s3 + $0x6a8] sm:$0xff] }
 0x669   :  { %v6916_v35 = vld [vmem:[%s11327_s3 + $0x6c8] sm:$0xff] }
 0x66a   :  { %4097 = vmatmul.mubr.bf16.vlgmr.msra.gmra.mrb[104].mxu1 %v3978_v0  ;;  %v6932_v0 = vcombine.high %v6899_v31, %v6903_v13  ;;  %v6939_v31 = vcombine.low %v6907_v1, %v6911_v8  ;;  %v6915_v13 = vld [vmem:[%s11327_s3 + $0x6c0] sm:$0xff]  ;;  %v6920_v62 = vld [vmem:[%s11327_s3 + $0x6e8] sm:$0xff] }
 0x66b   :  { %4415 = vmatprep.mubr.bf16.mxu1 %v11465_v63  ;;  %4384 = vmatpush1.bf16.msra.mxu1 %v6925_v36  ;;  %v6919_v36 = vld [vmem:[%s11327_s3 + $0x6e0] sm:$0xff]  ;;  %v6949_v1 = vcombine.low %v6916_v35, %v6920_v62  ;;  %v6950_v8 = vcombine.high %v6916_v35, %v6920_v62  ;;  %v11526_v62 = vld [vmem:[#allocation23_spill] sm:$0xff] }
 0x66c   :  { %4344 = vmatprep.subr.bf16.mxu0 %v6932_v0  ;;  %4385 = vmatprep.subr.bf16.mxu1 %v6934_v43  ;;  %v6948_v0 = vcombine.high %v6915_v13, %v6919_v36  ;;  %v6947_v43 = vcombine.low %v6915_v13, %v6919_v36 }
 0x66d   :  { %4345 = vmatpush1.bf16.msra.mxu0 %v6931_v58  ;;  %v6941_v58 = vcombine.low %v6908_v28, %v6912_v11 }
 0x66e   :  { %4346 = vmatprep.subr.bf16.mxu0 %v6940_v18  ;;  %v10452_v18 = vld [vmem:[%s11327_s3 + $0x630] sm:$0xff] }
 0x66f   :  { %4386 = vmatpush1.bf16.msra.mxu1 %v6933_v56  ;;  %v6942_v56 = vcombine.high %v6908_v28, %v6912_v11  ;;  %v10447_v28 = vld [vmem:[%s11327_s3 + $0x610] sm:$0xff]  ;;  %v10457_v11 = vld [vmem:[%s11327_s3 + $0x618] sm:$0xff] }
 0x671   :  { %4387 = vmatprep.subr.bf16.mxu1 %v6942_v56  ;;  %4347 = vmatpush1.bf16.msra.mxu0 %v6939_v31  ;;  %v6928_v31 = vcombine.high %v10447_v28, %v10452_v18 }
 0x672   :  { %4348 = vmatprep.subr.bf16.mxu0 %v6948_v0 }
 0x673   :  { %4388 = vmatpush1.bf16.msra.mxu1 %v6941_v58  ;;  %v10464_v58 = vld [vmem:[%s11327_s3 + $0x638] sm:$0xff] }
 0x674   :  { %4389 = vmatprep.subr.bf16.mxu1 %v6950_v8  ;;  %v6930_v36 = vcombine.high %v10457_v11, %v10464_v58 }
 0x675   :  { %4349 = vmatpush1.bf16.msra.mxu0 %v6947_v43 }
 0x676   :  { %4424 = vmatprep.subr.bf16.mxu0 %v6928_v31 }
 0x677   :  { %4390 = vmatpush1.bf16.msra.mxu1 %v6949_v1  ;;  %v11528_v1 = vld [vmem:[#allocation12_spill] sm:$0xff] }
 0x678   :  { %4465 = vmatprep.subr.bf16.mxu1 %v6930_v36 }
 0x6ed   :  { %v3791_v35 = vpop.f32.mrb[92].mxu1  ;;  %v3832_v0 = vpop.f32.mrb[84].mxu0 }
 0x6ee   :  { %v10473_v43 = vadd.f32 %v3791_v35, %v11526_v62  ;;  %v10476_v8 = vadd.f32 %v3832_v0, %v11528_v1  ;;  %v3793_v49 = vpop.f32.mrb[93].mxu1  ;;  %v3834_v38 = vpop.f32.mrb[85].mxu0  ;;  %v11536_v62 = vld [vmem:[#allocation13_spill] sm:$0xff] }
 0x6ef   :  { %v10479_v56 = vadd.f32 %v3793_v49, %v11530_v48  ;;  %v10482_v13 = vadd.f32 %v3834_v38, %v11532_v45  ;;  %v3795_v46 = vpop.f32.mrb[94].mxu1  ;;  %v3836_v52 = vpop.f32.mrb[86].mxu0  ;;  %v11540_v49 = vld [vmem:[#allocation27_spill] sm:$0xff] }
 0x6f0   :  { %11527 = vst [vmem:[#allocation16_spill] sm:$0xff] %v10473_v43  ;;  %11529 = vst [vmem:[#allocation23_spill] sm:$0xff] %v10476_v8  ;;  %v3796_v31 = vpop.f32.mrb[95].mxu1  ;;  %v3837_v36 = vpop.f32.mrb[87].mxu0  ;;  %v11538_v43 = vld [vmem:[#allocation26_spill] sm:$0xff] }
 0x6f1   :  { %11531 = vst [vmem:[#allocation12_spill] sm:$0xff] %v10479_v56  ;;  %11533 = vst [vmem:[#allocation24_spill] sm:$0xff] %v10482_v13 }
 0x6fd   :  { %v3873_v42 = vpop.f32.mrb[96].mxu1  ;;  %v3914_v14 = vpop.f32.mrb[88].mxu0 }
 0x6fe   :  { %v10485_v35 = vadd.f32 %v3873_v42, %v11534_v39  ;;  %v10488_v0 = vadd.f32 %v3914_v14, %v11536_v62  ;;  %v3875_v1 = vpop.f32.mrb[97].mxu1  ;;  %v3916_v8 = vpop.f32.mrb[89].mxu0 }
 0x6ff   :  { %v10491_v48 = vadd.f32 %v3875_v1, %v11538_v43  ;;  %v10494_v45 = vadd.f32 %v3916_v8, %v11540_v49  ;;  %v3877_v46 = vpop.f32.mrb[98].mxu1  ;;  %v3918_v52 = vpop.f32.mrb[90].mxu0  ;;  %v10499_v43 = vld [vmem:[%s11326_s2] ss:$0 sm:$0xff] }
 0x700   :  { %11535 = vst [vmem:[#allocation11_spill] sm:$0xff] %v10485_v35  ;;  %11537 = vst [vmem:[#allocation25_spill] sm:$0xff] %v10488_v0  ;;  %v3878_v38 = vpop.f32.mrb[99].mxu1  ;;  %v3919_v31 = vpop.f32.mrb[91].mxu0 }
 0x701   :  { %11539 = vst [vmem:[#allocation13_spill] sm:$0xff] %v10491_v48  ;;  %11541 = vst [vmem:[#allocation26_spill] sm:$0xff] %v10494_v45  ;;  %v6921_v48 = vld [vmem:[%s11327_s3 + $0x6f0] sm:$0xff] }
 0x702   :  { %11542 = vst [vmem:[#allocation27_spill] sm:$0xff] %v10499_v43 }
 0x71d   :  { %v7596_v36 = vpop.f32.mrb[100].mxu1  ;;  %v7618_v13 = vpop.f32.mrb[92].mxu0 }
 0x71e   :  { %v7597_v56 = vpop.f32.mrb[101].mxu1  ;;  %v7619_v39 = vpop.f32.mrb[93].mxu0 }
 0x71f   :  { %v7598_v42 = vadd.f32 %v7597_v56, %v7596_v36  ;;  %v7599_v35 = vpop.f32.mrb[102].mxu1  ;;  %v7620_v14 = vadd.f32 %v7619_v39, %v7618_v13  ;;  %v7621_v62 = vpop.f32.mrb[94].mxu0  ;;  %v6905_v39 = vld [vmem:[%s11327_s3 + $0x670] sm:$0xff] }
 0x720   :  { %v7600_v0 = vpop.f32.mrb[103].mxu1  ;;  %v7622_v51 = vpop.f32.mrb[95].mxu0 }
 0x721   :  { %v4019_v8 = vadd.f32 %v10499_v43, %v7598_v42  ;;  %v6901_v51 = vld [vmem:[%s11327_s3 + $0x650] sm:$0xff]  ;;  %v6902_v42 = vld [vmem:[%s11327_s3 + $0x658] sm:$0xff] }
 0x722   :  { %v6917_v43 = vld [vmem:[%s11327_s3 + $0x6d0] sm:$0xff] }
 0x723   :  { %v4059_v1 = vadd.f32 %v7620_v14, %v4019_v8  ;;  %v6936_v8 = vcombine.high %v6901_v51, %v6905_v39 }
 0x725   :  { %v4138_v49 = vpop.f32.mrb[96].mxu0 }
 0x726   :  { %v7929_v46 = vpop.f32.mrb[97].mxu0 }
 0x727   :  { %v4141_v52 = vpop.f32.mrb[98].mxu0  ;;  %v6913_v46 = vld [vmem:[%s11327_s3 + $0x6b0] sm:$0xff] }
 0x728   :  { %v7930_v38 = vpop.f32.mrb[99].mxu0  ;;  %v6910_v52 = vld [vmem:[%s11327_s3 + $0x698] sm:$0xff] }
 0x729   :  { %v6914_v38 = vld [vmem:[%s11327_s3 + $0x6b8] sm:$0xff] }
 0x73d   :  { %v7640_v31 = vpop.f32.mrb[104].mxu1 }
 0x73e   :  { %v7641_v45 = vpop.f32.mrb[105].mxu1 }
 0x73f   :  { %v7642_v56 = vadd.f32 %v7641_v45, %v7640_v31  ;;  %v7643_v35 = vpop.f32.mrb[106].mxu1  ;;  %v6906_v45 = vld [vmem:[%s11327_s3 + $0x678] sm:$0xff]  ;;  %v6959_v31 = vld [vmem:[%s11324_s0 + $0x62] sm:$0xff] }
 0x740   :  { %v7644_v13 = vpop.f32.mrb[107].mxu1  ;;  %v11544_v35 = vcombine.low %v10457_v11, %v10464_v58  ;;  %v4519_v11 = vcombine.high %v6959_v31, %v6959_v31 }
 0x741   :  { %v4099_v36 = vadd.f32 %v7642_v56, %v4059_v1  ;;  %v6938_v1 = vcombine.high %v6902_v42, %v6906_v45  ;;  %v11543_v56 = vcombine.low %v10447_v28, %v10452_v18  ;;  %v6935_v13 = vcombine.low %v6901_v51, %v6905_v39  ;;  %v6918_v28 = vld [vmem:[%s11327_s3 + $0x6d8] sm:$0xff] }
 0x742   :  { %v6922_v18 = vld [vmem:[%s11327_s3 + $0x6f8] sm:$0xff]  ;;  %v6945_v51 = vcombine.low %v6910_v52, %v6914_v38  ;;  %v6952_v39 = vcombine.high %v6917_v43, %v6921_v48 }
 0x743   :  { %v4139_v0 = vadd.f32 %v4138_v49, %v4099_v36  ;;  %v6909_v49 = vld [vmem:[%s11327_s3 + $0x690] sm:$0xff]  ;;  %v6937_v36 = vcombine.low %v6902_v42, %v6906_v45  ;;  %v6954_v42 = vcombine.high %v6918_v28, %v6922_v18  ;;  %v4526_v45 = vrot.slane %v6959_v31, %v8507_v41 }
 0x744   :  { %v6943_v58 = vcombine.low %v6909_v49, %v6913_v46 }
 0x745   :  { %v4144_v14 = vmax.f32 %v4139_v0, 0.0  ;;  %v6944_v0 = vcombine.high %v6909_v49, %v6913_v46 }
 0x747   :  { %v4145_v62 = vpack.c.bf16 %v4144_v14, %v4144_v14  ;;  %v6946_v14 = vcombine.high %v6910_v52, %v6914_v38  ;;  %v6982_v52 = vld [vmem:[%s11327_s3 + $0x7a0] sm:$0xff]  ;;  %v6979_v38 = vld [vmem:[%s11327_s3 + $0x788] sm:$0xff] }
 0x749   :  { %6955 = vmatmul.mubr.msk.bf16.vlgmr.msra.gmra.mrb[100].mxu0 %vm1094_vm2, %v4145_v62  ;;  %6956 = vmatmul.mubr.msk.bf16.vlgmr.msra.gmra.mrb[108].mxu1 %vm1094_vm2, %v4145_v62 }
 0x74a   :  { %4425 = vmatpush1.bf16.msra.mxu0 %v11543_v56  ;;  %4466 = vmatpush1.bf16.msra.mxu1 %v11544_v35  ;;  %v6953_v56 = vcombine.low %v6918_v28, %v6922_v18  ;;  %v4534_v35 = vcombine.high %v4526_v45, %v4526_v45  ;;  %v6986_v28 = vld [vmem:[%s11327_s3 + $0x7c0] sm:$0xff] }
 0x74b   :  { %4426 = vmatprep.subr.bf16.mxu0 %v6936_v8  ;;  %4467 = vmatprep.subr.bf16.mxu1 %v6938_v1  ;;  %v4533_v8 = vrot.slane %v4519_v11, %v8507_v41  ;;  %v6951_v1 = vcombine.low %v6917_v43, %v6921_v48  ;;  %v6990_v18 = vld [vmem:[%s11327_s3 + $0x7e0] sm:$0xff]  ;;  %v6987_v11 = vld [vmem:[%s11327_s3 + $0x7c8] sm:$0xff] }
 0x74c   :  { %4456 = vmatprep.mubr.bf16.mxu0 %v11465_v63  ;;  %4497 = vmatprep.mubr.bf16.mxu1 %v11465_v63  ;;  %v4560_v49 = vpack.c.bf16 %v4534_v35, %v4534_v35 }
 0x74d   :  { %v4535_v63 = vcombine.high %v4533_v8, %v4533_v8 }
 0x74e   :  { %4427 = vmatpush1.bf16.msra.mxu0 %v6935_v13  ;;  %4468 = vmatpush1.bf16.msra.mxu1 %v6937_v36  ;;  %v6983_v13 = vld [vmem:[%s11327_s3 + $0x7a8] sm:$0xff] }
 0x74f   :  { %4428 = vmatprep.subr.bf16.mxu0 %v6944_v0  ;;  %4469 = vmatprep.subr.bf16.mxu1 %v6946_v14  ;;  %v4562_v46 = vpack.c.bf16 %v4535_v63, %v4535_v63  ;;  %v6960_v63 = vld [vmem:[%s11324_s0 + $0x6a] sm:$0x3f]  ;;  %v7012_v0 = vcombine.low %v6979_v38, %v6983_v13  ;;  %v7013_v14 = vcombine.high %v6979_v38, %v6983_v13 }
 0x752   :  { %4429 = vmatpush1.bf16.msra.mxu0 %v6943_v58  ;;  %4470 = vmatpush1.bf16.msra.mxu1 %v6945_v51  ;;  %v7019_v58 = vcombine.high %v6986_v28, %v6990_v18  ;;  %v6991_v51 = vld [vmem:[%s11327_s3 + $0x7e8] sm:$0xff] }
 0x753   :  { %4430 = vmatprep.subr.bf16.mxu0 %v6952_v39  ;;  %4471 = vmatprep.subr.bf16.mxu1 %v6954_v42  ;;  %v7018_v39 = vcombine.low %v6986_v28, %v6990_v18  ;;  %v7020_v42 = vcombine.low %v6987_v11, %v6991_v51  ;;  %v11567_v28 = vld [vmem:[#allocation27_spill] sm:$0xff] }
 0x756   :  { %4431 = vmatpush1.bf16.msra.mxu0 %v6951_v1  ;;  %4472 = vmatpush1.bf16.msra.mxu1 %v6953_v56  ;;  %v10673_v1 = vld [vmem:[%s11327_s3 + $0x730] sm:$0xff]  ;;  %v10678_v56 = vld [vmem:[%s11327_s3 + $0x718] sm:$0xff] }
 0x757   :  { %7649 = vmatprep.subr.bf16.mxu0 %v9865_v30  ;;  %7671 = vmatprep.subr.bf16.mxu1 %v9871_v10  ;;  %v4543_v30 = vrot.slane %v6960_v63, %v8507_v41 }
 0x759   :  { %6957 = vmatmul.mubr.msk.bf16.vlgmr.msra.gmra.mrb[104].mxu0 %vm1094_vm2, %v4145_v62  ;;  %6958 = vmatmul.mubr.msk.bf16.vlgmr.msra.gmra.mrb[112].mxu1 %vm1094_vm2, %v4145_v62  ;;  %v4551_v10 = vcombine.high %v4543_v30, %v4543_v30  ;;  %v6978_v62 = vld [vmem:[%s11327_s3 + $0x780] sm:$0xff] }
 0x75a   :  { %7650 = vmatpush3.bf16.msra.mxu0 %v9879_v15  ;;  %7672 = vmatpush3.bf16.msra.mxu1 %v9885_v40  ;;  %v4559_v15 = vpack.c.bf16 %v4526_v45, %v4526_v45  ;;  %v4561_v40 = vpack.c.bf16 %v4533_v8, %v4533_v8  ;;  %v7011_v31 = vcombine.high %v6978_v62, %v6982_v52  ;;  %v10668_v8 = vld [vmem:[%s11327_s3 + $0x710] sm:$0xff] }
 0x75b   :  { %7651 = vmatprep.subr.bf16.mxu0 %v9891_v17  ;;  %7673 = vmatprep.subr.bf16.mxu1 %v9897_v34  ;;  %v4536_v17 = vcombine.high %v6960_v63, %v6960_v63  ;;  %v4564_v34 = vpack.c.bf16 %v4551_v10, %v4551_v10  ;;  %v7010_v36 = vcombine.low %v6978_v62, %v6982_v52 }
 0x75c   :  { %4601 = vmatprep.mubr.bf16.mxu0 %v4560_v49  ;;  %4641 = vmatprep.mubr.bf16.mxu1 %v4562_v46  ;;  %v7021_v45 = vcombine.high %v6987_v11, %v6991_v51  ;;  %v6999_v35 = vcombine.high %v10668_v8, %v10673_v1  ;;  %v10685_v49 = vld [vmem:[%s11327_s3 + $0x738] sm:$0xff]  ;;  %v6998_v46 = vcombine.low %v10668_v8, %v10673_v1 }
 0x75d   :  { %v7000_v63 = vcombine.low %v10678_v56, %v10685_v49  ;;  %v6989_v8 = vld [vmem:[%s11327_s3 + $0x7d8] sm:$0xff] }
 0x75e   :  { %7652 = vmatpush3.bf16.msra.mxu0 %v9903_v21  ;;  %7674 = vmatpush3.bf16.msra.mxu1 %v9909_v47  ;;  %v4550_v21 = vrot.slane %v4536_v17, %v8507_v41  ;;  %v6993_v1 = vld [vmem:[%s11327_s3 + $0x7f8] sm:$0xff] }
 0x75f   :  { %7653 = vmatprep.subr.bf16.mxu0 %v9915_v44  ;;  %7675 = vmatprep.subr.bf16.mxu1 %v9921_v32  ;;  %v11545_v44 = vld [vmem:[#allocation17_spill] sm:$0xff]  ;;  %v11546_v32 = vld [vmem:[#allocation18_spill] sm:$0xff] }
 0x760   :  { %v4565_v47 = vpack.c.bf16 %v4550_v21, %v4550_v21 }
 0x762   :  { %7654 = vmatpush3.bf16.msra.mxu0 %v9927_v50  ;;  %7676 = vmatpush3.bf16.msra.mxu1 %v9933_v53  ;;  %v11547_v50 = vld [vmem:[#allocation19_spill] sm:$0xff]  ;;  %v11548_v53 = vmov 0  }
 0x763   :  { %7655 = vmatprep.subr.bf16.mxu0 %v9939_v54  ;;  %7677 = vmatprep.subr.bf16.mxu1 %v9945_v55  ;;  %v11549_v54 = vld [vmem:[#allocation20_spill] sm:$0xff]  ;;  %v11550_v55 = vld [vmem:[#allocation21_spill] sm:$0xff] }
 0x766   :  { %7656 = vmatpush3.bf16.msra.mxu0 %v9951_v57  ;;  %7678 = vmatpush3.bf16.msra.mxu1 %v9957_v59  ;;  %v11551_v57 = vld [vmem:[#allocation22_spill] sm:$0xff]  ;;  %v11552_v59 = vld [vmem:[#allocation7_spill] sm:$0xff] }
 0x767   :  { %7657 = vmatprep.subr.bf16.mxu0 %v9963_v60  ;;  %7679 = vmatprep.subr.bf16.mxu1 %v9969_v61  ;;  %v11553_v60 = vld [vmem:[#allocation8_spill] sm:$0xff]  ;;  %v11554_v61 = vld [vmem:[#allocation9_spill] sm:$0xff] }
 0x76a   :  { %7658 = vmatpush3.bf16.msra.mxu0 %v9975_v37  ;;  %7680 = vmatpush3.bf16.msra.mxu1 %v9981_v2  ;;  %v11555_v37 = vld [vmem:[#allocation10_spill] sm:$0xff] }
 0x76b   :  { %7659 = vmatprep.subr.bf16.mxu0 %v9987_v4  ;;  %7681 = vmatprep.subr.bf16.mxu1 %v9993_v12  ;;  %v11556_v2 = vld [vmem:[#allocation6_spill] sm:$0xff]  ;;  %v4563_v12 = vpack.c.bf16 %v4543_v30, %v4543_v30  ;;  %v7001_v30 = vcombine.high %v10678_v56, %v10685_v49 }
 0x76c   :  { %v11557_v4 = vld [vmem:[#allocation14_spill] sm:$0xff] }
 0x76e   :  { %7660 = vmatpush3.bf16.msra.mxu0 %v10002_v16  ;;  %7682 = vmatpush3.bf16.msra.mxu1 %v10008_v20  ;;  %v11558_v16 = vld [vmem:[#allocation15_spill] sm:$0xff]  ;;  %v6962_v20 = vld [vmem:[%s11327_s3 + $0x700] sm:$0xff] }
 0x76f   :  { %7661 = vmatprep.subr.bf16.mxu0 %v10014_v5  ;;  %7683 = vmatprep.subr.bf16.mxu1 %v10020_v9  ;;  %v6966_v5 = vld [vmem:[%s11327_s3 + $0x720] sm:$0xff]  ;;  %v6963_v9 = vld [vmem:[%s11327_s3 + $0x708] sm:$0xff] }
 0x772   :  { %7662 = vmatpush3.bf16.msra.mxu0 %v10027_v22  ;;  %7684 = vmatpush3.bf16.msra.mxu1 %v10033_v25  ;;  %v6994_v22 = vcombine.low %v6962_v20, %v6966_v5  ;;  %v6995_v25 = vcombine.high %v6962_v20, %v6966_v5  ;;  %v11563_v20 = vld [vmem:[#allocation11_spill] sm:$0xff] }
 0x773   :  { %7663 = vmatprep.subr.bf16.mxu0 %v10039_v33  ;;  %7685 = vmatprep.subr.bf16.mxu1 %v10045_v26  ;;  %v6967_v33 = vld [vmem:[%s11327_s3 + $0x728] sm:$0xff]  ;;  %v6970_v26 = vld [vmem:[%s11327_s3 + $0x740] sm:$0xff] }
 0x776   :  { %7664 = vmatpush3.bf16.msra.mxu0 %v10055_v24  ;;  %7686 = vmatpush3.bf16.msra.mxu1 %v10061_v27  ;;  %v6974_v24 = vld [vmem:[%s11327_s3 + $0x760] sm:$0xff]  ;;  %v6996_v27 = vcombine.low %v6963_v9, %v6967_v33 }
 0x777   :  { %7693 = vmatprep.subr.bf16.mxu0 %v10067_v23  ;;  %7931 = vmatprep.subr.bf16.mxu1 %v11445_v7  ;;  %v6997_v23 = vcombine.high %v6963_v9, %v6967_v33  ;;  %v7002_v48 = vcombine.low %v6970_v26, %v6974_v24  ;;  %v11564_v9 = vld [vmem:[#allocation25_spill] sm:$0xff] }
 0x779   :  { %4602 = vmatmul.mubr.bf16.vlgmr.msra.gmra.mrb[108].mxu0 %v4559_v15  ;;  %4642 = vmatmul.mubr.bf16.vlgmr.msra.gmra.mrb[116].mxu1 %v4561_v40  ;;  %v11559_v40 = vld [vmem:[#allocation16_spill] sm:$0xff] }
 0x77a   :  { %7694 = vmatpush3.bf16.msra.mxu0 %v11509_v3  ;;  %7932 = vmatpush3.bf16.msra.mxu1 %v11510_v19  ;;  %v7003_v3 = vcombine.high %v6970_v26, %v6974_v24  ;;  %v6971_v19 = vld [vmem:[%s11327_s3 + $0x748] sm:$0xff] }
 0x77b   :  { %7695 = vmatprep.subr.bf16.mxu0 %v11511_v6  ;;  %4681 = vmatprep.mubr.bf16.mxu0 %v4564_v34  ;;  %v6975_v6 = vld [vmem:[%s11327_s3 + $0x768] sm:$0xff]  ;;  %v11560_v34 = vld [vmem:[#allocation23_spill] sm:$0xff] }
 0x77c   :  { %7933 = vmatprep.subr.bf16.mxu1 %v11445_v7  ;;  %7935 = vmatprep.mubr.msk.bf16.mxu1 %vm8259_vm0, %v11445_v7  ;;  %v7004_v43 = vcombine.low %v6971_v19, %v6975_v6  ;;  %v11565_v26 = vld [vmem:[#allocation13_spill] sm:$0xff] }
 0x77e   :  { %7696 = vmatpush3.bf16.msra.mxu0 %v11512_v29  ;;  %7934 = vmatpush3.bf16.msra.mxu1 %v11545_v44  ;;  %v7005_v29 = vcombine.high %v6971_v19, %v6975_v6 }
 0x77f   :  { %7697 = vmatprep.subr.bf16.mxu0 %v11546_v32  ;;  %4927 = vmatprep.subr.bf16.mxu1 %v6995_v25  ;;  %v11561_v32 = vld [vmem:[#allocation12_spill] sm:$0xff] }
 0x781   :  { %7936 = vmatmul.mubr.msk.bf16.vlgmr.msra.gmra.mrb[120].mxu1 %vm486_vm1, %v4565_v47 }
 0x782   :  { %7698 = vmatpush3.bf16.msra.mxu0 %v11547_v50  ;;  %4959 = vmatprep.mubr.bf16.mxu1 %v11548_v53 }
 0x783   :  { %7699 = vmatprep.subr.bf16.mxu0 %v11549_v54  ;;  %4928 = vmatpush1.bf16.msra.mxu1 %v6994_v22  ;;  %v11562_v54 = vld [vmem:[#allocation24_spill] sm:$0xff] }
 0x784   :  { %4929 = vmatprep.subr.bf16.mxu1 %v7003_v3 }
 0x786   :  { %7700 = vmatpush3.bf16.msra.mxu0 %v11550_v55 }
 0x787   :  { %7701 = vmatprep.subr.bf16.mxu0 %v11551_v57  ;;  %4930 = vmatpush1.bf16.msra.mxu1 %v7002_v48 }
 0x788   :  { %4931 = vmatprep.subr.bf16.mxu1 %v7011_v31 }
 0x78a   :  { %7702 = vmatpush3.bf16.msra.mxu0 %v11552_v59 }
 0x78b   :  { %7703 = vmatprep.subr.bf16.mxu0 %v11553_v60  ;;  %4932 = vmatpush1.bf16.msra.mxu1 %v7010_v36 }
 0x78c   :  { %4933 = vmatprep.subr.bf16.mxu1 %v7019_v58 }
 0x78e   :  { %7704 = vmatpush3.bf16.msra.mxu0 %v11554_v61 }
 0x78f   :  { %7705 = vmatprep.subr.bf16.mxu0 %v11555_v37  ;;  %4934 = vmatpush1.bf16.msra.mxu1 %v7018_v39 }
 0x790   :  { %5009 = vmatprep.subr.bf16.mxu1 %v6999_v35 }
 0x792   :  { %7706 = vmatpush3.bf16.msra.mxu0 %v11556_v2 }
 0x793   :  { %7707 = vmatprep.subr.bf16.mxu0 %v11557_v4 }
 0x796   :  { %7708 = vmatpush3.bf16.msra.mxu0 %v11558_v16 }
 0x797   :  { %4968 = vmatprep.subr.bf16.mxu0 %v6997_v23 }
 0x799   :  { %4682 = vmatmul.mubr.bf16.vlgmr.msra.gmra.mrb[112].mxu0 %v4563_v12 }
 0x79a   :  { %5000 = vmatprep.mubr.bf16.mxu0 %v11548_v53  ;;  %4969 = vmatpush1.bf16.msra.mxu0 %v6996_v27  ;;  %v11566_v27 = vld [vmem:[#allocation26_spill] sm:$0xff] }
 0x79b   :  { %4970 = vmatprep.subr.bf16.mxu0 %v7005_v29 }
 0x79e   :  { %4971 = vmatpush1.bf16.msra.mxu0 %v7004_v43 }
 0x79f   :  { %4972 = vmatprep.subr.bf16.mxu0 %v7013_v14 }
 0x7a2   :  { %4973 = vmatpush1.bf16.msra.mxu0 %v7012_v0 }
 0x7a3   :  { %4974 = vmatprep.subr.bf16.mxu0 %v7021_v45 }
 0x7a6   :  { %4975 = vmatpush1.bf16.msra.mxu0 %v7020_v42 }
 0x7a7   :  { %5050 = vmatprep.subr.bf16.mxu0 %v7001_v30 }
 0x81c   :  { %v4376_v10 = vpop.f32.mrb[100].mxu0  ;;  %v4417_v15 = vpop.f32.mrb[108].mxu1 }
 0x81d   :  { %v10694_v17 = vadd.f32 %v4376_v10, %v11559_v40  ;;  %v10697_v21 = vadd.f32 %v4417_v15, %v11560_v34  ;;  %v4378_v47 = vpop.f32.mrb[101].mxu0  ;;  %v4419_v44 = vpop.f32.mrb[109].mxu1 }
 0x81e   :  { %v10700_v50 = vadd.f32 %v4378_v47, %v11561_v32  ;;  %v10703_v55 = vadd.f32 %v4419_v44, %v11562_v54  ;;  %v4380_v57 = vpop.f32.mrb[102].mxu0  ;;  %v4421_v59 = vpop.f32.mrb[110].mxu1  ;;  %v6972_v47 = vld [vmem:[%s11327_s3 + $0x750] sm:$0xff]  ;;  %v6973_v32 = vld [vmem:[%s11327_s3 + $0x758] sm:$0xff] }
 0x81f   :  { %v4381_v60 = vpop.f32.mrb[103].mxu0  ;;  %v4422_v61 = vpop.f32.mrb[111].mxu1  ;;  %v6976_v44 = vld [vmem:[%s11327_s3 + $0x770] sm:$0xff]  ;;  %v6977_v54 = vld [vmem:[%s11327_s3 + $0x778] sm:$0xff] }
 0x820   :  { %v7007_v60 = vcombine.high %v6972_v47, %v6976_v44  ;;  %v7009_v61 = vcombine.high %v6973_v32, %v6977_v54 }
 0x82c   :  { %v4458_v37 = vpop.f32.mrb[104].mxu0  ;;  %v4499_v12 = vpop.f32.mrb[112].mxu1 }
 0x82d   :  { %v10706_v5 = vadd.f32 %v4458_v37, %v11563_v20  ;;  %v10709_v22 = vadd.f32 %v4499_v12, %v11564_v9  ;;  %v4460_v25 = vpop.f32.mrb[105].mxu0  ;;  %v4501_v33 = vpop.f32.mrb[113].mxu1  ;;  %v6980_v37 = vld [vmem:[%s11327_s3 + $0x790] sm:$0xff]  ;;  %v6981_v20 = vld [vmem:[%s11327_s3 + $0x798] sm:$0xff] }
 0x82e   :  { %v10712_v24 = vadd.f32 %v4460_v25, %v11565_v26  ;;  %v10715_v23 = vadd.f32 %v4501_v33, %v11566_v27  ;;  %v4462_v3 = vpop.f32.mrb[106].mxu0  ;;  %v4503_v19 = vpop.f32.mrb[114].mxu1  ;;  %v6984_v12 = vld [vmem:[%s11327_s3 + $0x7b0] sm:$0xff]  ;;  %v6985_v9 = vld [vmem:[%s11327_s3 + $0x7b8] sm:$0xff]  ;;  %v7006_v33 = vcombine.low %v6972_v47, %v6976_v44  ;;  %v7008_v26 = vcombine.low %v6973_v32, %v6977_v54  ;;  %v8202_v44 = vld [vmem:[%s11325_s1 + $0x60] sm:$0xff]  }
 0x82f   :  { %v4463_v6 = vpop.f32.mrb[107].mxu0  ;;  %v4504_v29 = vpop.f32.mrb[115].mxu1  ;;  %v7030_v25 = vld [vmem:[%s11324_s0 + $0x70] sm:$0xff]  ;;  %v7015_v27 = vcombine.high %v6980_v37, %v6984_v12  ;;  %v7017_v3 = vcombine.high %v6981_v20, %v6985_v9  ;;  %v7014_v49 = vcombine.low %v6980_v37, %v6984_v12  ;;  %v8201_v47 = vld [vmem:[%s11325_s1 + $0x98] sm:$0xff]   ;;  %v8203_v32 = vld [vmem:[%s11325_s1 + $0xe0] sm:$0xff]  }
 0x830   :  { %v6988_v19 = vld [vmem:[%s11327_s3 + $0x7d0] sm:$0xff]  ;;  %v5104_v56 = vcombine.high %v7030_v25, %v7030_v25  ;;  %v7025_v29 = vcombine.high %v6989_v8, %v6993_v1  ;;  %v8204_v54 = vld [vmem:[%s11325_s1 + $0x20] sm:$0xff]   ;;  %v8208_v37 = vld [vmem:[%s11325_s1 + $0x28] sm:$0xff]  }
 0x831   :  { %v6992_v6 = vld [vmem:[%s11327_s3 + $0x7f0] sm:$0xff]  ;;  %v8209_v12 = vld [vmem:[%s11325_s1 + $0xa8] sm:$0xff]  }
 0x84c   :  { %v7665_v48 = vpop.f32.mrb[108].mxu0  ;;  %v7687_v43 = vpop.f32.mrb[116].mxu1 }
 0x84d   :  { %v7666_v62 = vpop.f32.mrb[109].mxu0  ;;  %v7688_v52 = vpop.f32.mrb[117].mxu1 }
 0x84e   :  { %v7667_v38 = vadd.f32 %v7666_v62, %v7665_v48  ;;  %v7668_v31 = vpop.f32.mrb[110].mxu0  ;;  %v7689_v13 = vadd.f32 %v7688_v52, %v7687_v43  ;;  %v7690_v36 = vpop.f32.mrb[118].mxu1  ;;  %v10768_v48 = vrot.slane %v7030_v25, %v8507_v41  ;;  %v10771_v43 = vrot.slane %v5104_v56, %v8507_v41  ;;  %v8216_v56 = vld [vmem:[%s11325_s1 + $0x38] sm:$0xff]  }
 0x84f   :  { %v7669_v0 = vpop.f32.mrb[111].mxu0  ;;  %v7691_v14 = vpop.f32.mrb[119].mxu1  ;;  %v7022_v62 = vcombine.low %v6988_v19, %v6992_v6  ;;  %v7024_v52 = vcombine.low %v6989_v8, %v6993_v1  ;;  %v8187_v36 = vld [vmem:[%s11325_s1 + $0xc0] sm:$0xff]  }
 0x850   :  { %v4604_v18 = vadd.f32 %v11567_v28, %v7667_v38  ;;  %v5119_v38 = vcombine.high %v10768_v48, %v10768_v48  ;;  %v5120_v31 = vcombine.high %v10771_v43, %v10771_v43  ;;  %v5146_v8 = vpack.c.bf16 %v10771_v43, %v10771_v43  ;;  %v8220_v43 = vld [vmem:[%s11325_s1 + $0x180] sm:$0xff]  }
 0x852   :  { %v4644_v11 = vadd.f32 %v7689_v13, %v4604_v18  ;;  %v8186_v13 = vld [vmem:[%s11325_s1 + $0x40] sm:$0xff]   ;;  %v5145_v0 = vpack.c.bf16 %v5119_v38, %v5119_v38  ;;  %v5147_v14 = vpack.c.bf16 %v5120_v31, %v5120_v31  ;;  %v8223_v38 = vld [vmem:[%s11325_s1 + $0x188] sm:$0xff]   ;;  %v8224_v31 = vld [vmem:[%s11325_s1 + $0x150] sm:$0xff]  }
 0x853   :  { %v8188_v18 = vld [vmem:[%s11325_s1] sm:$0xff]  }
 0x854   :  { %v4723_v58 = vpop.f32.mrb[120].mxu1 }
 0x855   :  { %v7937_v51 = vpop.f32.mrb[121].mxu1 }
 0x856   :  { %v4726_v39 = vpop.f32.mrb[122].mxu1  ;;  %v8191_v51 = vld [vmem:[%s11325_s1 + $0xc8] sm:$0xff]  }
 0x857   :  { %v7938_v42 = vpop.f32.mrb[123].mxu1  ;;  %v8192_v39 = vld [vmem:[%s11325_s1 + $0x8] sm:$0xff]  }
 0x858   :  { %v8193_v42 = vld [vmem:[%s11325_s1 + $0x88] sm:$0xff]  }
 0x86c   :  { %v7709_v45 = vpop.f32.mrb[112].mxu0 }
 0x86d   :  { %v7710_v35 = vpop.f32.mrb[113].mxu0 }
 0x86e   :  { %v7711_v30 = vadd.f32 %v7710_v35, %v7709_v45  ;;  %v7712_v10 = vpop.f32.mrb[114].mxu0  ;;  %v8194_v45 = vld [vmem:[%s11325_s1 + $0x50] sm:$0xff]  }
 0x86f   :  { %v7713_v15 = vpop.f32.mrb[115].mxu0  ;;  %v8195_v35 = vld [vmem:[%s11325_s1 + $0xd0] sm:$0xff]  }
 0x870   :  { %v4684_v40 = vadd.f32 %v7711_v30, %v4644_v11  ;;  %v8189_v11 = vld [vmem:[%s11325_s1 + $0x80] sm:$0xff]   ;;  %v8196_v30 = vld [vmem:[%s11325_s1 + $0x10] sm:$0xff]   ;;  %v8198_v15 = vld [vmem:[%s11325_s1 + $0x58] sm:$0xff]  }
 0x871   :  { %v8197_v10 = vld [vmem:[%s11325_s1 + $0x90] sm:$0xff]  }
 0x872   :  { %v4724_v34 = vadd.f32 %v4723_v58, %v4684_v40  ;;  %v8190_v58 = vld [vmem:[%s11325_s1 + $0x48] sm:$0xff]   ;;  %v8199_v40 = vld [vmem:[%s11325_s1 + $0xd8] sm:$0xff]  }
 0x874   :  { %v4729_v57 = vmax.f32 %v4724_v34, 0.0  ;;  %v8200_v34 = vld [vmem:[%s11325_s1 + $0x18] sm:$0xff]  }
 0x876   :  { %v4730_v59 = vpack.c.bf16 %v4729_v57, %v4729_v57  ;;  %v8205_v57 = vld [vmem:[%s11325_s1 + $0xa0] sm:$0xff]  }
 0x878   :  { %7026 = vmatmul.mubr.msk.bf16.vlgmr.msra.gmra.mrb[124].mxu1 %vm1094_vm2, %v4730_v59  ;;  %7027 = vmatmul.mubr.msk.bf16.vlgmr.msra.gmra.mrb[116].mxu0 %vm1094_vm2, %v4730_v59 }
 0x879   :  { %5010 = vmatpush1.bf16.msra.mxu1 %v6998_v46  ;;  %5051 = vmatpush1.bf16.msra.mxu0 %v7000_v63  ;;  %v7016_v46 = vcombine.low %v6981_v20, %v6985_v9  ;;  %v7023_v63 = vcombine.high %v6988_v19, %v6992_v6  ;;  %v8210_v20 = vld [vmem:[%s11325_s1 + $0x70] sm:$0xff]   ;;  %v5144_v6 = vpack.c.bf16 %v10768_v48, %v10768_v48  ;;  %v8219_v48 = vld [vmem:[%s11325_s1 + $0x100] sm:$0xff]  }
 0x87a   :  { %5011 = vmatprep.subr.bf16.mxu1 %v7007_v60  ;;  %5052 = vmatprep.subr.bf16.mxu0 %v7009_v61  ;;  %v8207_v60 = vld [vmem:[%s11325_s1 + $0xe8] sm:$0xff]   ;;  %v7031_v61 = vld [vmem:[%s11324_s0 + $0x78] sm:$0x3f]  ;;  %v8211_v9 = vld [vmem:[%s11325_s1 + $0xf0] sm:$0xff]  }
 0x87b   :  { %5041 = vmatprep.mubr.bf16.mxu1 %v11548_v53  ;;  %5082 = vmatprep.mubr.bf16.mxu0 %v11548_v53  ;;  %v5128_v25 = vrot.slane %v7031_v61, %v8507_v41  ;;  %v5121_v1 = vcombine.high %v7031_v61, %v7031_v61 }
 0x87d   :  { %5012 = vmatpush1.bf16.msra.mxu1 %v7006_v33  ;;  %5053 = vmatpush1.bf16.msra.mxu0 %v7008_v26  ;;  %v8212_v33 = vld [vmem:[%s11325_s1 + $0x30] sm:$0xff]   ;;  %v5136_v19 = vcombine.high %v5128_v25, %v5128_v25 }
 0x87e   :  { %5013 = vmatprep.subr.bf16.mxu1 %v7015_v27  ;;  %5054 = vmatprep.subr.bf16.mxu0 %v7017_v3  ;;  %v8213_v26 = vld [vmem:[%s11325_s1 + $0xb0] sm:$0xff]   ;;  %v8214_v27 = vld [vmem:[%s11325_s1 + $0x78] sm:$0xff]  }
 0x87f   :  { %v8215_v3 = vld [vmem:[%s11325_s1 + $0xf8] sm:$0xff]  }
 0x881   :  { %5014 = vmatpush1.bf16.msra.mxu1 %v7014_v49  ;;  %5055 = vmatpush1.bf16.msra.mxu0 %v7016_v46  ;;  %v8217_v49 = vld [vmem:[%s11325_s1 + $0xb8] sm:$0xff]   ;;  %v8218_v46 = vld [vmem:[%s11325_s1 + $0x140] sm:$0xff]  }
 0x882   :  { %5015 = vmatprep.subr.bf16.mxu1 %v7023_v63  ;;  %5056 = vmatprep.subr.bf16.mxu0 %v7025_v29  ;;  %v5149_v63 = vpack.c.bf16 %v5136_v19, %v5136_v19  ;;  %v5135_v29 = vrot.slane %v5121_v1, %v8507_v41  ;;  %v10990_v1 = vld [vmem:[%s11327_s3 + $0x810] sm:$0xff] }
 0x884   :  { %v5150_v41 = vpack.c.bf16 %v5135_v29, %v5135_v29 }
 0x885   :  { %5016 = vmatpush1.bf16.msra.mxu1 %v7022_v62  ;;  %5057 = vmatpush1.bf16.msra.mxu0 %v7024_v52  ;;  %v8221_v62 = vld [vmem:[%s11325_s1 + $0x148] sm:$0xff]  }
 0x886   :  { %7718 = vmatprep.subr.bf16.mxu1 %v8186_v13  ;;  %7740 = vmatprep.subr.bf16.mxu0 %v8187_v36  ;;  %v8222_v52 = vld [vmem:[%s11325_s1 + $0x108] sm:$0xff]   ;;  %v8226_v13 = vld [vmem:[%s11325_s1 + $0x158] sm:$0xff]  }
 0x887   :  { %v8227_v36 = vld [vmem:[%s11325_s1 + $0x118] sm:$0xff]  }
 0x888   :  { %7028 = vmatmul.mubr.msk.bf16.vlgmr.msra.gmra.mrb[128].mxu1 %vm1094_vm2, %v4730_v59  ;;  %7029 = vmatmul.mubr.msk.bf16.vlgmr.msra.gmra.mrb[120].mxu0 %vm1094_vm2, %v4730_v59  ;;  %v8206_v59 = vld [vmem:[%s11325_s1 + $0x68] sm:$0xff]  }
 0x889   :  { %7719 = vmatpush3.bf16.msra.mxu1 %v8188_v18  ;;  %7741 = vmatpush3.bf16.msra.mxu0 %v8189_v11  ;;  %v8230_v18 = vld [vmem:[%s11325_s1 + $0x168] sm:$0xff]  }
 0x88a   :  { %7720 = vmatprep.subr.bf16.mxu1 %v8190_v58  ;;  %7742 = vmatprep.subr.bf16.mxu0 %v8191_v51  ;;  %v8231_v11 = vld [vmem:[%s11325_s1 + $0x128] sm:$0xff]   ;;  %v8232_v58 = vld [vmem:[%s11325_s1 + $0x170] sm:$0xff]   ;;  %v5148_v51 = vpack.c.bf16 %v5128_v25, %v5128_v25  ;;  %v7057_v25 = vld [vmem:[%s11327_s3 + $0x8c0] sm:$0xff] }
 0x88b   :  { %5186 = vmatprep.mubr.bf16.mxu1 %v5145_v0  ;;  %5226 = vmatprep.mubr.bf16.mxu0 %v5147_v14  ;;  %v8228_v0 = vld [vmem:[%s11325_s1 + $0x160] sm:$0xff]  }
 0x88c   :  { %v8229_v14 = vld [vmem:[%s11325_s1 + $0x120] sm:$0xff]  }
 0x88d   :  { %7721 = vmatpush3.bf16.msra.mxu1 %v8192_v39  ;;  %7743 = vmatpush3.bf16.msra.mxu0 %v8193_v42  ;;  %v7033_v39 = vld [vmem:[%s11327_s3 + $0x800] sm:$0xff] }
 0x88e   :  { %7722 = vmatprep.subr.bf16.mxu1 %v8194_v45  ;;  %7744 = vmatprep.subr.bf16.mxu0 %v8195_v35  ;;  %v7037_v42 = vld [vmem:[%s11327_s3 + $0x820] sm:$0xff] }
 0x88f   :  { %v7065_v45 = vcombine.low %v7033_v39, %v7037_v42  ;;  %v7041_v35 = vld [vmem:[%s11327_s3 + $0x840] sm:$0xff] }
 0x891   :  { %7723 = vmatpush3.bf16.msra.mxu1 %v8196_v30  ;;  %7745 = vmatpush3.bf16.msra.mxu0 %v8197_v10  ;;  %v7045_v30 = vld [vmem:[%s11327_s3 + $0x860] sm:$0xff] }
 0x892   :  { %7724 = vmatprep.subr.bf16.mxu1 %v8198_v15  ;;  %7746 = vmatprep.subr.bf16.mxu0 %v8199_v40  ;;  %v7074_v40 = vcombine.high %v7041_v35, %v7045_v30 }
 0x895   :  { %7725 = vmatpush3.bf16.msra.mxu1 %v8200_v34  ;;  %7747 = vmatpush3.bf16.msra.mxu0 %v8201_v47  ;;  %v7042_v34 = vld [vmem:[%s11327_s3 + $0x848] sm:$0xff] }
 0x896   :  { %7726 = vmatprep.subr.bf16.mxu1 %v8202_v44  ;;  %7748 = vmatprep.subr.bf16.mxu0 %v8203_v32  ;;  %v7046_v47 = vld [vmem:[%s11327_s3 + $0x868] sm:$0xff]  ;;  %v7073_v32 = vcombine.low %v7041_v35, %v7045_v30 }
 0x897   :  { %v7076_v44 = vcombine.high %v7042_v34, %v7046_v47 }
 0x899   :  { %7727 = vmatpush3.bf16.msra.mxu1 %v8204_v54  ;;  %7749 = vmatpush3.bf16.msra.mxu0 %v8205_v57  ;;  %v7075_v54 = vcombine.low %v7042_v34, %v7046_v47  ;;  %v7049_v57 = vld [vmem:[%s11327_s3 + $0x880] sm:$0xff] }
 0x89a   :  { %7728 = vmatprep.subr.bf16.mxu1 %v8206_v59  ;;  %7750 = vmatprep.subr.bf16.mxu0 %v8207_v60  ;;  %v7053_v59 = vld [vmem:[%s11327_s3 + $0x8a0] sm:$0xff]  ;;  %v7050_v60 = vld [vmem:[%s11327_s3 + $0x888] sm:$0xff] }
 0x89b   :  { %v7082_v61 = vcombine.high %v7049_v57, %v7053_v59 }
 0x89d   :  { %7729 = vmatpush3.bf16.msra.mxu1 %v8208_v37  ;;  %7751 = vmatpush3.bf16.msra.mxu0 %v8209_v12  ;;  %v7054_v37 = vld [vmem:[%s11327_s3 + $0x8a8] sm:$0xff]  ;;  %v7081_v12 = vcombine.low %v7049_v57, %v7053_v59 }
 0x89e   :  { %7730 = vmatprep.subr.bf16.mxu1 %v8210_v20  ;;  %7752 = vmatprep.subr.bf16.mxu0 %v8211_v9  ;;  %v7083_v20 = vcombine.low %v7050_v60, %v7054_v37  ;;  %v7084_v9 = vcombine.high %v7050_v60, %v7054_v37 }
 0x8a1   :  { %7731 = vmatpush3.bf16.msra.mxu1 %v8212_v33  ;;  %7753 = vmatpush3.bf16.msra.mxu0 %v8213_v26  ;;  %v7061_v33 = vld [vmem:[%s11327_s3 + $0x8e0] sm:$0xff]  ;;  %v7058_v26 = vld [vmem:[%s11327_s3 + $0x8c8] sm:$0xff] }
 0x8a2   :  { %7732 = vmatprep.subr.bf16.mxu1 %v8214_v27  ;;  %7754 = vmatprep.subr.bf16.mxu0 %v8215_v3  ;;  %v7090_v27 = vcombine.high %v7057_v25, %v7061_v33  ;;  %v7062_v3 = vld [vmem:[%s11327_s3 + $0x8e8] sm:$0xff]  ;;  %v7089_v19 = vcombine.low %v7057_v25, %v7061_v33  ;;  %v7043_v33 = vld [vmem:[%s11327_s3 + $0x850] sm:$0xff] }
 0x8a5   :  { %7733 = vmatpush3.bf16.msra.mxu1 %v8216_v56  ;;  %7755 = vmatpush3.bf16.msra.mxu0 %v8217_v49  ;;  %v10995_v56 = vld [vmem:[%s11327_s3 + $0x830] sm:$0xff]  ;;  %v11000_v49 = vld [vmem:[%s11327_s3 + $0x818] sm:$0xff] }
 0x8a6   :  { %7762 = vmatprep.subr.bf16.mxu1 %v8218_v46  ;;  %7939 = vmatprep.subr.bf16.mxu0 %v11445_v7  ;;  %v7070_v46 = vcombine.high %v10990_v1, %v10995_v56  ;;  %v7069_v29 = vcombine.low %v10990_v1, %v10995_v56  ;;  %v7060_v1 = vld [vmem:[%s11327_s3 + $0x8d8] sm:$0xff] }
 0x8a7   :  { %v7064_v56 = vld [vmem:[%s11327_s3 + $0x8f8] sm:$0xff] }
 0x8a8   :  { %5187 = vmatmul.mubr.bf16.vlgmr.msra.gmra.mrb[132].mxu1 %v5144_v6  ;;  %5227 = vmatmul.mubr.bf16.vlgmr.msra.gmra.mrb[124].mxu0 %v5146_v8  ;;  %v7091_v6 = vcombine.low %v7058_v26, %v7062_v3  ;;  %v7092_v8 = vcombine.high %v7058_v26, %v7062_v3  ;;  %v7044_v26 = vld [vmem:[%s11327_s3 + $0x858] sm:$0xff] }
 0x8a9   :  { %7763 = vmatpush3.bf16.msra.mxu1 %v8219_v48  ;;  %7940 = vmatpush3.bf16.msra.mxu0 %v8220_v43 }
 0x8aa   :  { %7764 = vmatprep.subr.bf16.mxu1 %v8221_v62  ;;  %5266 = vmatprep.mubr.bf16.mxu1 %v5149_v63  ;;  %v11007_v63 = vld [vmem:[%s11327_s3 + $0x838] sm:$0xff] }
 0x8ab   :  { %7941 = vmatprep.subr.bf16.mxu0 %v11445_v7  ;;  %7943 = vmatprep.mubr.msk.bf16.mxu0 %vm8259_vm0, %v11445_v7  ;;  %v8225_v7 = vld [vmem:[%s11325_s1 + $0x110] sm:$0xff]   ;;  %v7071_v48 = vcombine.low %v11000_v49, %v11007_v63  ;;  %v7072_v43 = vcombine.high %v11000_v49, %v11007_v63 }
 0x8ad   :  { %7765 = vmatpush3.bf16.msra.mxu1 %v8222_v52  ;;  %7942 = vmatpush3.bf16.msra.mxu0 %v8223_v38 }
 0x8ae   :  { %7766 = vmatprep.subr.bf16.mxu1 %v8224_v31 }
 0x8b0   :  { %7944 = vmatmul.mubr.msk.bf16.vlgmr.msra.gmra.mrb[128].mxu0 %vm486_vm1, %v5150_v41 }
 0x8b1   :  { %7767 = vmatpush3.bf16.msra.mxu1 %v8225_v7  ;;  %5544 = vmatprep.mubr.bf16.mxu0 %v11548_v53 }
 0x8b2   :  { %7768 = vmatprep.subr.bf16.mxu1 %v8226_v13 }
 0x8b5   :  { %7769 = vmatpush3.bf16.msra.mxu1 %v8227_v36 }
 0x8b6   :  { %7770 = vmatprep.subr.bf16.mxu1 %v8228_v0 }
 0x8b9   :  { %7771 = vmatpush3.bf16.msra.mxu1 %v8229_v14 }
 0x8ba   :  { %7772 = vmatprep.subr.bf16.mxu1 %v8230_v18 }
 0x8bd   :  { %7773 = vmatpush3.bf16.msra.mxu1 %v8231_v11 }
 0x8be   :  { %7774 = vmatprep.subr.bf16.mxu1 %v8232_v58 }
 0x8c1   :  { %7775 = vmatpush3.bf16.msra.mxu1 %v11556_v2  ;;  %v7034_v2 = vld [vmem:[%s11327_s3 + $0x808] sm:$0xff] }
 0x8c2   :  { %7776 = vmatprep.subr.bf16.mxu1 %v11557_v4  ;;  %v7066_v4 = vcombine.high %v7033_v39, %v7037_v42 }
 0x8c4   :  { %5512 = vmatprep.subr.bf16.mxu0 %v7066_v4 }
 0x8c5   :  { %7777 = vmatpush3.bf16.msra.mxu1 %v11558_v16  ;;  %v7038_v16 = vld [vmem:[%s11327_s3 + $0x828] sm:$0xff]  ;;  %5513 = vmatpush1.bf16.msra.mxu0 %v7065_v45 }
 0x8c6   :  { %v7067_v10 = vcombine.low %v7034_v2, %v7038_v16  ;;  %v7068_v15 = vcombine.high %v7034_v2, %v7038_v16  ;;  %5514 = vmatprep.subr.bf16.mxu0 %v7074_v40 }
 0x8c8   :  { %5267 = vmatmul.mubr.bf16.vlgmr.msra.gmra.mrb[136].mxu1 %v5148_v51  ;;  %5553 = vmatprep.subr.bf16.mxu1 %v7068_v15 }
 0x8c9   :  { %5585 = vmatprep.mubr.bf16.mxu1 %v11548_v53  ;;  %5554 = vmatpush1.bf16.msra.mxu1 %v7067_v10 }
 0x8ca   :  { %5555 = vmatprep.subr.bf16.mxu1 %v7076_v44  ;;  %5515 = vmatpush1.bf16.msra.mxu0 %v7073_v32 }
 0x8cb   :  { %5516 = vmatprep.subr.bf16.mxu0 %v7082_v61 }
 0x8cd   :  { %5556 = vmatpush1.bf16.msra.mxu1 %v7075_v54 }
 0x8ce   :  { %5557 = vmatprep.subr.bf16.mxu1 %v7084_v9  ;;  %5517 = vmatpush1.bf16.msra.mxu0 %v7081_v12 }
 0x8cf   :  { %5518 = vmatprep.subr.bf16.mxu0 %v7090_v27  ;;  %v7048_v27 = vld [vmem:[%s11327_s3 + $0x878] sm:$0xff] }
 0x8d1   :  { %5558 = vmatpush1.bf16.msra.mxu1 %v7083_v20 }
 0x8d2   :  { %5559 = vmatprep.subr.bf16.mxu1 %v7092_v8  ;;  %5519 = vmatpush1.bf16.msra.mxu0 %v7089_v19  ;;  %v7080_v8 = vcombine.high %v7044_v26, %v7048_v27 }
 0x8d3   :  { %5594 = vmatprep.subr.bf16.mxu0 %v7070_v46  ;;  %v7051_v46 = vld [vmem:[%s11327_s3 + $0x890] sm:$0xff] }
 0x8d5   :  { %5560 = vmatpush1.bf16.msra.mxu1 %v7091_v6 }
 0x8d6   :  { %5635 = vmatprep.subr.bf16.mxu1 %v7072_v43  ;;  %v7055_v43 = vld [vmem:[%s11327_s3 + $0x8b0] sm:$0xff] }
 0x8d7   :  { %v7085_v49 = vcombine.low %v7051_v46, %v7055_v43 }
 0x94b   :  { %v4961_v62 = vpop.f32.mrb[124].mxu1  ;;  %v5002_v41 = vpop.f32.mrb[116].mxu0 }
 0x94c   :  { %v11016_v52 = vadd.f32 %v4961_v62, %v10694_v17  ;;  %v11019_v38 = vadd.f32 %v5002_v41, %v10697_v21  ;;  %v4963_v31 = vpop.f32.mrb[125].mxu1  ;;  %v5004_v7 = vpop.f32.mrb[117].mxu0  ;;  %v7052_v62 = vld [vmem:[%s11327_s3 + $0x898] sm:$0xff] }
 0x94d   :  { %v11022_v13 = vadd.f32 %v4963_v31, %v10700_v50  ;;  %v11025_v36 = vadd.f32 %v5004_v7, %v10703_v55  ;;  %v4965_v0 = vpop.f32.mrb[126].mxu1  ;;  %v5006_v14 = vpop.f32.mrb[118].mxu0  ;;  %v7056_v41 = vld [vmem:[%s11327_s3 + $0x8b8] sm:$0xff]  ;;  %v7079_v7 = vcombine.low %v7044_v26, %v7048_v27  ;;  %v8052_v26 = vld [vmem:[%s11329_s5 + $0x140] sm:$0xff]  }
 0x94e   :  { %v4966_v18 = vpop.f32.mrb[127].mxu1  ;;  %v5007_v11 = vpop.f32.mrb[119].mxu0  ;;  %v7086_v0 = vcombine.high %v7051_v46, %v7055_v43  ;;  %v7088_v14 = vcombine.high %v7052_v62, %v7056_v41  ;;  %v7087_v63 = vcombine.low %v7052_v62, %v7056_v41  ;;  %v8053_v27 = vld [vmem:[%s11329_s5 + $0x1c0] sm:$0xff]  }
 0x94f   :  { %v7059_v18 = vld [vmem:[%s11327_s3 + $0x8d0] sm:$0xff] }
 0x950   :  { %v7063_v11 = vld [vmem:[%s11327_s3 + $0x8f0] sm:$0xff] }
 0x95b   :  { %v5043_v58 = vpop.f32.mrb[128].mxu1  ;;  %v5084_v51 = vpop.f32.mrb[120].mxu0 }
 0x95c   :  { %v11028_v17 = vadd.f32 %v5043_v58, %v10706_v5  ;;  %v11031_v21 = vadd.f32 %v5084_v51, %v10709_v22  ;;  %v5045_v39 = vpop.f32.mrb[129].mxu1  ;;  %v5086_v42 = vpop.f32.mrb[121].mxu0  ;;  %v7093_v58 = vcombine.low %v7059_v18, %v7063_v11  ;;  %v7095_v51 = vcombine.low %v7060_v1, %v7064_v56 }
 0x95d   :  { %v11034_v50 = vadd.f32 %v5045_v39, %v10712_v24  ;;  %v11037_v55 = vadd.f32 %v5086_v42, %v10715_v23  ;;  %v5047_v2 = vpop.f32.mrb[130].mxu1  ;;  %v5088_v45 = vpop.f32.mrb[122].mxu0  ;;  %v8020_v39 = vld [vmem:[%s11329_s5 + $0x40] sm:$0xff]  }
 0x95e   :  { %v5048_v4 = vpop.f32.mrb[131].mxu1  ;;  %v5089_v16 = vpop.f32.mrb[123].mxu0  ;;  %v8022_v42 = vld [vmem:[%s11329_s5] sm:$0xff]   ;;  %v8024_v45 = vld [vmem:[%s11329_s5 + $0x48] sm:$0xff]  }
 0x95f   :  { %v8023_v2 = vld [vmem:[%s11329_s5 + $0x80] sm:$0xff]   ;;  %v8025_v4 = vld [vmem:[%s11329_s5 + $0xc8] sm:$0xff]  }
 0x960   :  { %v8026_v16 = vld [vmem:[%s11329_s5 + $0x8] sm:$0xff]  }
 0x97b   :  { %v7734_v35 = vpop.f32.mrb[132].mxu1  ;;  %v7756_v30 = vpop.f32.mrb[124].mxu0 }
 0x97c   :  { %v7735_v10 = vpop.f32.mrb[133].mxu1  ;;  %v7757_v5 = vpop.f32.mrb[125].mxu0 }
 0x97d   :  { %v7736_v15 = vadd.f32 %v7735_v10, %v7734_v35  ;;  %v7737_v40 = vpop.f32.mrb[134].mxu1  ;;  %v7758_v22 = vadd.f32 %v7757_v5, %v7756_v30  ;;  %v7759_v34 = vpop.f32.mrb[126].mxu0  ;;  %v8027_v35 = vld [vmem:[%s11329_s5 + $0x88] sm:$0xff]   ;;  %v8028_v30 = vld [vmem:[%s11329_s5 + $0x50] sm:$0xff]  }
 0x97e   :  { %v7738_v47 = vpop.f32.mrb[135].mxu1  ;;  %v7760_v44 = vpop.f32.mrb[127].mxu0  ;;  %v8029_v10 = vld [vmem:[%s11329_s5 + $0xd0] sm:$0xff]   ;;  %v8032_v40 = vld [vmem:[%s11329_s5 + $0x58] sm:$0xff]  }
 0x97f   :  { %v5189_v24 = vadd.f32 %v11567_v28, %v7736_v15  ;;  %v7047_v28 = vld [vmem:[%s11327_s3 + $0x870] sm:$0xff]  ;;  %v8034_v34 = vld [vmem:[%s11329_s5 + $0x18] sm:$0xff]   ;;  %v8036_v44 = vld [vmem:[%s11329_s5 + $0x60] sm:$0xff]  }
 0x980   :  { %v7078_v6 = vcombine.high %v7043_v33, %v7047_v28  ;;  %v7077_v31 = vcombine.low %v7043_v33, %v7047_v28  ;;  %v8030_v5 = vld [vmem:[%s11329_s5 + $0x10] sm:$0xff]   ;;  %v8035_v47 = vld [vmem:[%s11329_s5 + $0x98] sm:$0xff]  }
 0x981   :  { %v5229_v32 = vadd.f32 %v7758_v22, %v5189_v24  ;;  %v8031_v15 = vld [vmem:[%s11329_s5 + $0x90] sm:$0xff]   ;;  %v8033_v22 = vld [vmem:[%s11329_s5 + $0xd8] sm:$0xff]   ;;  %v8037_v24 = vld [vmem:[%s11329_s5 + $0xe0] sm:$0xff]  }
 0x982   :  { %v8050_v33 = vld [vmem:[%s11329_s5 + $0x38] sm:$0xff]  }
 0x983   :  { %v5308_v54 = vpop.f32.mrb[128].mxu0  ;;  %v8051_v28 = vld [vmem:[%s11329_s5 + $0xb8] sm:$0xff]  }
 0x984   :  { %v7945_v23 = vpop.f32.mrb[129].mxu0 }
 0x985   :  { %v5311_v57 = vpop.f32.mrb[130].mxu0  ;;  %v8040_v23 = vld [vmem:[%s11329_s5 + $0x68] sm:$0xff]  }
 0x986   :  { %v7946_v59 = vpop.f32.mrb[131].mxu0  ;;  %v8041_v57 = vld [vmem:[%s11329_s5 + $0xe8] sm:$0xff]  }
 0x987   :  { %v8042_v59 = vld [vmem:[%s11329_s5 + $0x28] sm:$0xff]  }
 0x99b   :  { %v7778_v60 = vpop.f32.mrb[136].mxu1 }
 0x99c   :  { %v7779_v61 = vpop.f32.mrb[137].mxu1 }
 0x99d   :  { %v7780_v37 = vadd.f32 %v7779_v61, %v7778_v60  ;;  %v7781_v12 = vpop.f32.mrb[138].mxu1  ;;  %v8043_v60 = vld [vmem:[%s11329_s5 + $0xa8] sm:$0xff]   ;;  %v8044_v61 = vld [vmem:[%s11329_s5 + $0x70] sm:$0xff]  }
 0x99e   :  { %v7782_v20 = vpop.f32.mrb[139].mxu1  ;;  %v8046_v12 = vld [vmem:[%s11329_s5 + $0x30] sm:$0xff]  }
 0x99f   :  { %v5269_v9 = vadd.f32 %v7780_v37, %v5229_v32  ;;  %v8038_v32 = vld [vmem:[%s11329_s5 + $0x20] sm:$0xff]   ;;  %v8045_v37 = vld [vmem:[%s11329_s5 + $0xf0] sm:$0xff]  }
 0x9a0   :  { %v8047_v20 = vld [vmem:[%s11329_s5 + $0xb0] sm:$0xff]  }
 0x9a1   :  { %v5309_v25 = vadd.f32 %v5308_v54, %v5269_v9  ;;  %v8039_v54 = vld [vmem:[%s11329_s5 + $0xa0] sm:$0xff]   ;;  %v8048_v9 = vld [vmem:[%s11329_s5 + $0x78] sm:$0xff]  }
 0x9a3   :  { %v5314_v3 = vmax.f32 %v5309_v25, 0.0  ;;  %v8049_v25 = vld [vmem:[%s11329_s5 + $0xf8] sm:$0xff]  }
 0x9a5   :  { %v5315_v19 = vpack.c.bf16 %v5314_v3, %v5314_v3  ;;  %v11568_v3 = vld [vmem:[#allocation5_spill] sm:$0xff] }
 0x9a6   :  { %v5692_v46 = vsub.s32 1, %v11568_v3  ;;  %v5700_v43 = vsub.s32 3, %v11568_v3 }
 0x9a7   :  { %7097 = vmatmul.mubr.msk.bf16.vlgmr.msra.gmra.mrb[132].mxu0 %vm1094_vm2, %v5315_v19  ;;  %7098 = vmatmul.mubr.msk.bf16.vlgmr.msra.gmra.mrb[140].mxu1 %vm1094_vm2, %v5315_v19 }
 0x9a8   :  { %5595 = vmatpush1.bf16.msra.mxu0 %v7069_v29  ;;  %5636 = vmatpush1.bf16.msra.mxu1 %v7071_v48  ;;  %v7094_v29 = vcombine.high %v7059_v18, %v7063_v11  ;;  %v7096_v48 = vcombine.high %v7060_v1, %v7064_v56 }
 0x9a9   :  { %5596 = vmatprep.subr.bf16.mxu0 %v7078_v6  ;;  %5637 = vmatprep.subr.bf16.mxu1 %v7080_v8  ;;  %v5696_v6 = vsub.s32 2, %v11568_v3  ;;  %v11195_v8 = vld [vmem:[%s11328_s4] sm:$0xff] }
 0x9aa   :  { %5626 = vmatprep.mubr.bf16.mxu0 %v11548_v53  ;;  %5667 = vmatprep.mubr.bf16.mxu1 %v11548_v53  ;;  %v8021_v53 = vld [vmem:[%s11329_s5 + $0xc0] sm:$0xff]  }
 0x9ab   :  { %v5697_v41 = vrot.slane %v11195_v8, %v5696_v6 }
 0x9ac   :  { %5597 = vmatpush1.bf16.msra.mxu0 %v7077_v31  ;;  %5638 = vmatpush1.bf16.msra.mxu1 %v7079_v7 }
 0x9ad   :  { %5598 = vmatprep.subr.bf16.mxu0 %v7086_v0  ;;  %5639 = vmatprep.subr.bf16.mxu1 %v7088_v14  ;;  %v5693_v0 = vrot.slane %v11195_v8, %v5692_v46  ;;  %v5701_v14 = vrot.slane %v11195_v8, %v5700_v43  ;;  %v8066_v46 = vld [vmem:[%s11329_s5 + $0x118] sm:$0xff]  }
 0x9ae   :  { %v8067_v43 = vld [vmem:[%s11329_s5 + $0x198] sm:$0xff]  }
 0x9b0   :  { %5599 = vmatpush1.bf16.msra.mxu0 %v7085_v49  ;;  %5640 = vmatpush1.bf16.msra.mxu1 %v7087_v63 }
 0x9b1   :  { %5600 = vmatprep.subr.bf16.mxu0 %v7094_v29  ;;  %5641 = vmatprep.subr.bf16.mxu1 %v7096_v48 }
 0x9b4   :  { %5601 = vmatpush1.bf16.msra.mxu0 %v7093_v58  ;;  %5642 = vmatpush1.bf16.msra.mxu1 %v7095_v51 }
 0x9b5   :  { %7787 = vmatprep.subr.bf16.mxu0 %v8020_v39  ;;  %7809 = vmatprep.subr.bf16.mxu1 %v8021_v53 }
 0x9b7   :  { %7099 = vmatmul.mubr.msk.bf16.vlgmr.msra.gmra.mrb[136].mxu0 %vm1094_vm2, %v5315_v19  ;;  %7100 = vmatmul.mubr.msk.bf16.vlgmr.msra.gmra.mrb[144].mxu1 %vm1094_vm2, %v5315_v19  ;;  %v5688_v19 = vsub.s32 0, %v11568_v3 }
 0x9b8   :  { %7788 = vmatpush3.bf16.msra.mxu0 %v8022_v42  ;;  %7810 = vmatpush3.bf16.msra.mxu1 %v8023_v2 }
 0x9b9   :  { %7789 = vmatprep.subr.bf16.mxu0 %v8024_v45  ;;  %7811 = vmatprep.subr.bf16.mxu1 %v8025_v4  ;;  %v5689_v62 = vrot.slane %v11195_v8, %v5688_v19 }
 0x9bc   :  { %7790 = vmatpush3.bf16.msra.mxu0 %v8026_v16  ;;  %7812 = vmatpush3.bf16.msra.mxu1 %v8027_v35 }
 0x9bd   :  { %7791 = vmatprep.subr.bf16.mxu0 %v8028_v30  ;;  %7813 = vmatprep.subr.bf16.mxu1 %v8029_v10 }
 0x9c0   :  { %7792 = vmatpush3.bf16.msra.mxu0 %v8030_v5  ;;  %7814 = vmatpush3.bf16.msra.mxu1 %v8031_v15  ;;  %v8056_v5 = vld [vmem:[%s11329_s5 + $0x148] sm:$0xff]  }
 0x9c1   :  { %7793 = vmatprep.subr.bf16.mxu0 %v8032_v40  ;;  %7815 = vmatprep.subr.bf16.mxu1 %v8033_v22  ;;  %v8057_v15 = vld [vmem:[%s11329_s5 + $0x1c8] sm:$0xff]  }
 0x9c2   :  { %v8058_v40 = vld [vmem:[%s11329_s5 + $0x108] sm:$0xff]  }
 0x9c3   :  { %v8059_v22 = vld [vmem:[%s11329_s5 + $0x188] sm:$0xff]  }
 0x9c4   :  { %7794 = vmatpush3.bf16.msra.mxu0 %v8034_v34  ;;  %7816 = vmatpush3.bf16.msra.mxu1 %v8035_v47  ;;  %v5708_v34 = vsub.s32 5, %v11568_v3  ;;  %v5716_v47 = vsub.s32 7, %v11568_v3 }
 0x9c5   :  { %7795 = vmatprep.subr.bf16.mxu0 %v8036_v44  ;;  %7817 = vmatprep.subr.bf16.mxu1 %v8037_v24  ;;  %v8060_v44 = vld [vmem:[%s11329_s5 + $0x150] sm:$0xff]  }
 0x9c6   :  { %v8061_v24 = vld [vmem:[%s11329_s5 + $0x1d0] sm:$0xff]  }
 0x9c8   :  { %7796 = vmatpush3.bf16.msra.mxu0 %v8038_v32  ;;  %7818 = vmatpush3.bf16.msra.mxu1 %v8039_v54 }
 0x9c9   :  { %7797 = vmatprep.subr.bf16.mxu0 %v8040_v23  ;;  %7819 = vmatprep.subr.bf16.mxu1 %v8041_v57  ;;  %v5709_v23 = vrot.slane %v11195_v8, %v5708_v34  ;;  %v5717_v57 = vrot.slane %v11195_v8, %v5716_v47 }
 0x9cc   :  { %7798 = vmatpush3.bf16.msra.mxu0 %v8042_v59  ;;  %7820 = vmatpush3.bf16.msra.mxu1 %v8043_v60  ;;  %v8062_v59 = vld [vmem:[%s11329_s5 + $0x110] sm:$0xff]  }
 0x9cd   :  { %7799 = vmatprep.subr.bf16.mxu0 %v8044_v61  ;;  %7821 = vmatprep.subr.bf16.mxu1 %v8045_v37  ;;  %v8063_v60 = vld [vmem:[%s11329_s5 + $0x190] sm:$0xff]  }
 0x9d0   :  { %7800 = vmatpush3.bf16.msra.mxu0 %v8046_v12  ;;  %7822 = vmatpush3.bf16.msra.mxu1 %v8047_v20 }
 0x9d1   :  { %7801 = vmatprep.subr.bf16.mxu0 %v8048_v9  ;;  %7823 = vmatprep.subr.bf16.mxu1 %v8049_v25  ;;  %v8064_v9 = vld [vmem:[%s11329_s5 + $0x158] sm:$0xff]  }
 0x9d2   :  { %v8065_v25 = vld [vmem:[%s11329_s5 + $0x1d8] sm:$0xff]  }
 0x9d4   :  { %7802 = vmatpush3.bf16.msra.mxu0 %v8050_v33  ;;  %7824 = vmatpush3.bf16.msra.mxu1 %v8051_v28 }
 0x9d5   :  { %7831 = vmatprep.subr.bf16.mxu0 %v8052_v26  ;;  %7853 = vmatprep.subr.bf16.mxu1 %v8053_v27 }
 0xa7a   :  { %v5546_v31 = vpop.f32.mrb[132].mxu0  ;;  %v5587_v7 = vpop.f32.mrb[140].mxu1 }
 0xa7b   :  { %v5676_v18 = vadd.f32 %v5546_v31, %v11016_v52  ;;  %v5678_v11 = vadd.f32 %v5587_v7, %v11019_v38  ;;  %v5548_v1 = vpop.f32.mrb[133].mxu0  ;;  %v5589_v56 = vpop.f32.mrb[141].mxu1 }
 0xa7c   :  { %v5677_v49 = vadd.f32 %v5548_v1, %v11022_v13  ;;  %v5679_v63 = vadd.f32 %v5589_v56, %v11025_v36  ;;  %v5550_v29 = vpop.f32.mrb[134].mxu0  ;;  %v5591_v48 = vpop.f32.mrb[142].mxu1  ;;  %v8054_v13 = vld [vmem:[%s11329_s5 + $0x100] sm:$0xff]   ;;  %v8072_v1 = vld [vmem:[%s11329_s5 + $0x168] sm:$0xff]  }
 0xa7d   :  { %v5726_v58 = vadd.f32 %v5689_v62, %v5676_v18  ;;  %v5728_v51 = vadd.f32 %v5697_v41, %v5678_v11  ;;  %v5551_v39 = vpop.f32.mrb[135].mxu0  ;;  %v5592_v53 = vpop.f32.mrb[143].mxu1  ;;  %v8055_v36 = vld [vmem:[%s11329_s5 + $0x180] sm:$0xff]   ;;  %v5704_v18 = vsub.s32 4, %v11568_v3  ;;  %v5712_v11 = vsub.s32 6, %v11568_v3  ;;  %v8073_v56 = vld [vmem:[%s11329_s5 + $0x1e8] sm:$0xff]  }
 0xa7e   :  { %v5727_v42 = vadd.f32 %v5693_v0, %v5677_v49  ;;  %v5729_v2 = vadd.f32 %v5701_v14, %v5679_v63  ;;  %v8070_v0 = vld [vmem:[%s11329_s5 + $0x120] sm:$0xff]   ;;  %v8074_v49 = vld [vmem:[%s11329_s5 + $0x128] sm:$0xff]   ;;  %v8076_v48 = vld [vmem:[%s11329_s5 + $0x170] sm:$0xff]  }
 0xa7f   :  { %v5734_v45 = vmax.f32 %v5726_v58, 0.0  ;;  %v5736_v4 = vmax.f32 %v5728_v51, 0.0  ;;  %v8071_v14 = vld [vmem:[%s11329_s5 + $0x1a0] sm:$0xff]   ;;  %v8075_v3 = vld [vmem:[%s11329_s5 + $0x1a8] sm:$0xff]   ;;  %v5705_v63 = vrot.slane %v11195_v8, %v5704_v18  ;;  %v5713_v29 = vrot.slane %v11195_v8, %v5712_v11  ;;  %v8077_v58 = vld [vmem:[%s11329_s5 + $0x1f0] sm:$0xff]  }
 0xa80   :  { %v5735_v16 = vmax.f32 %v5727_v42, 0.0  ;;  %v5737_v52 = vmax.f32 %v5729_v2, 0.0  ;;  %v8078_v51 = vld [vmem:[%s11329_s5 + $0x130] sm:$0xff]   ;;  %v8080_v42 = vld [vmem:[%s11329_s5 + $0x178] sm:$0xff]  }
 0xa81   :  { %v5742_v30 = vpack.c.bf16 %v5734_v45, %v5734_v45  ;;  %v5744_v10 = vpack.c.bf16 %v5736_v4, %v5736_v4  ;;  %v8079_v8 = vld [vmem:[%s11329_s5 + $0x1b0] sm:$0xff]   ;;  %v8081_v2 = vld [vmem:[%s11329_s5 + $0x1f8] sm:$0xff]  }
 0xa82   :  { %v5743_v35 = vpack.c.bf16 %v5735_v16, %v5735_v16  ;;  %v5745_v38 = vpack.c.bf16 %v5737_v52, %v5737_v52  ;;  %v8082_v45 = vld [vmem:[%s11329_s5 + $0x138] sm:$0xff]  }
 0xa83   :  { %v8083_v4 = vld [vmem:[%s11329_s5 + $0x1b8] sm:$0xff]  }
 0xa84   :  { %6301 = vmatprep.mubr.bf16.mxu0 %v5743_v35  ;;  %6341 = vmatprep.mubr.bf16.mxu1 %v5745_v38 }
 0xa85   :  { %6302 = vmatmul.mubr.bf16.vlgmr.msra.gmra.mrb[140].mxu0 %v5742_v30  ;;  %6342 = vmatmul.mubr.bf16.vlgmr.msra.gmra.mrb[148].mxu1 %v5744_v10  ;;  %v7101_v30 = vld [vmem:[%s11330_s6] ss:$0 sm:$0xff] }
 0xa86   :  { %7832 = vmatpush3.bf16.msra.mxu0 %v8054_v13  ;;  %7854 = vmatpush3.bf16.msra.mxu1 %v8055_v36 }
 0xa87   :  { %7833 = vmatprep.subr.bf16.mxu0 %v8056_v5  ;;  %7855 = vmatprep.subr.bf16.mxu1 %v8057_v15 }
 0xa8a   :  { %v5628_v32 = vpop.f32.mrb[136].mxu0  ;;  %v5669_v54 = vpop.f32.mrb[144].mxu1  ;;  %7834 = vmatpush3.bf16.msra.mxu0 %v8058_v40  ;;  %7856 = vmatpush3.bf16.msra.mxu1 %v8059_v22 }
 0xa8b   :  { %v5680_v61 = vadd.f32 %v5628_v32, %v11028_v17  ;;  %v5682_v37 = vadd.f32 %v5669_v54, %v11031_v21  ;;  %v5630_v12 = vpop.f32.mrb[137].mxu0  ;;  %v5671_v20 = vpop.f32.mrb[145].mxu1  ;;  %7835 = vmatprep.subr.bf16.mxu0 %v8060_v44  ;;  %7857 = vmatprep.subr.bf16.mxu1 %v8061_v24 }
 0xa8c   :  { %v5681_v33 = vadd.f32 %v5630_v12, %v11034_v50  ;;  %v5683_v28 = vadd.f32 %v5671_v20, %v11037_v55  ;;  %v5632_v26 = vpop.f32.mrb[138].mxu0  ;;  %v5673_v17 = vpop.f32.mrb[146].mxu1  ;;  %v8068_v50 = vld [vmem:[%s11329_s5 + $0x160] sm:$0xff]  }
 0xa8d   :  { %v5633_v27 = vpop.f32.mrb[139].mxu0  ;;  %v5674_v21 = vpop.f32.mrb[147].mxu1  ;;  %v8069_v55 = vld [vmem:[%s11329_s5 + $0x1e0] sm:$0xff]   ;;  %v5730_v39 = vadd.f32 %v5705_v63, %v5680_v61  ;;  %v5732_v53 = vadd.f32 %v5713_v29, %v5682_v37  ;;  %s8261_s5 = smov [#allocation2]  }
 0xa8e   :  { %v5731_v19 = vadd.f32 %v5709_v23, %v5681_v33  ;;  %v5733_v6 = vadd.f32 %v5717_v57, %v5683_v28  ;;  %7836 = vmatpush3.bf16.msra.mxu0 %v8062_v59  ;;  %7858 = vmatpush3.bf16.msra.mxu1 %v8063_v60  ;;  %s6437_s6 = sshll.u32 %s8261_s5, 4  ;;  %s6438_s6 = int_to_ptr.vmem [resolvable:$true] %s6437_s6 }
 0xa8f   :  { %7837 = vmatprep.subr.bf16.mxu0 %v8064_v9  ;;  %7859 = vmatprep.subr.bf16.mxu1 %v8065_v25  ;;  %v5738_v16 = vmax.f32 %v5730_v39, 0.0  ;;  %v5740_v52 = vmax.f32 %v5732_v53, 0.0  ;;  %s8233_s24 = scalar_lea.vmem %s6438_s6, 32  ;;  %p8238_p1 = scmp.lt.s32.totalorder %s6438_s6, %s6438_s6 }
 0xa90   :  { %v5739_v62 = vmax.f32 %v5731_v19, 0.0  ;;  %v5741_v41 = vmax.f32 %v5733_v6, 0.0  ;;  %p8234_p0 = scmp.ne.s32.totalorder %s6438_s6, %s8233_s24  ;;  %p8239_p2 = scmp.lt.s32.totalorder %s8233_s24, %s8233_s24 }
 0xa91   :  { %v5746_v35 = vpack.c.bf16 %v5738_v16, %v5738_v16  ;;  %v5748_v38 = vpack.c.bf16 %v5740_v52, %v5740_v52 }
 0xa92   :  { %v5747_v31 = vpack.c.bf16 %v5739_v62, %v5739_v62  ;;  %v5749_v7 = vpack.c.bf16 %v5741_v41, %v5741_v41  ;;  %7838 = vmatpush3.bf16.msra.mxu0 %v8066_v46  ;;  %7860 = vmatpush3.bf16.msra.mxu1 %v8067_v43  ;;  %p8240_p3 = por %p8239_p2, %p8238_p1 }
 0xa93   :  { %7839 = vmatprep.subr.bf16.mxu0 %v8068_v50  ;;  %7861 = vmatprep.subr.bf16.mxu1 %v8069_v55 }
 0xa94   :  { %6381 = vmatprep.mubr.bf16.mxu0 %v5747_v31  ;;  %6421 = vmatprep.mubr.bf16.mxu1 %v5749_v7  ;;  %p8241_p4 = pnand %p8240_p3, %p8234_p0 }
 0xa96   :  { %7840 = vmatpush3.bf16.msra.mxu0 %v8070_v0  ;;  %7862 = vmatpush3.bf16.msra.mxu1 %v8071_v14 }
 0xa97   :  { %7841 = vmatprep.subr.bf16.mxu0 %v8072_v1  ;;  %7863 = vmatprep.subr.bf16.mxu1 %v8073_v56 }
 0xa9a   :  { %7842 = vmatpush3.bf16.msra.mxu0 %v8074_v49  ;;  %7864 = vmatpush3.bf16.msra.mxu1 %v8075_v3 }
 0xa9b   :  { %7843 = vmatprep.subr.bf16.mxu0 %v8076_v48  ;;  %7865 = vmatprep.subr.bf16.mxu1 %v8077_v58 }
 0xa9e   :  { %7844 = vmatpush3.bf16.msra.mxu0 %v8078_v51  ;;  %7866 = vmatpush3.bf16.msra.mxu1 %v8079_v8 }
 0xa9f   :  { %7845 = vmatprep.subr.bf16.mxu0 %v8080_v42  ;;  %7867 = vmatprep.subr.bf16.mxu1 %v8081_v2 }
 0xaa2   :  { %7846 = vmatpush3.bf16.msra.mxu0 %v8082_v45  ;;  %7868 = vmatpush3.bf16.msra.mxu1 %v8083_v4 }
 0xaa5   :  { %6382 = vmatmul.mubr.bf16.vlgmr.msra.gmra.mrb[144].mxu0 %v5746_v35  ;;  %6422 = vmatmul.mubr.bf16.vlgmr.msra.gmra.mrb[152].mxu1 %v5748_v38 }
 0xb58   :  { %v7803_v13 = vpop.f32.mrb[140].mxu0  ;;  %v7825_v36 = vpop.f32.mrb[148].mxu1 }
 0xb59   :  { %v7804_v10 = vpop.f32.mrb[141].mxu0  ;;  %v7826_v5 = vpop.f32.mrb[149].mxu1 }
 0xb5a   :  { %v7805_v15 = vadd.f32 %v7804_v10, %v7803_v13  ;;  %v7827_v40 = vadd.f32 %v7826_v5, %v7825_v36  ;;  %v7806_v22 = vpop.f32.mrb[142].mxu0  ;;  %v7828_v34 = vpop.f32.mrb[150].mxu1 }
 0xb5b   :  { %v7807_v47 = vpop.f32.mrb[143].mxu0  ;;  %v7829_v44 = vpop.f32.mrb[151].mxu1 }
 0xb5c   :  { %v6304_v24 = vadd.f32 %v7805_v15, %v7101_v30 }
 0xb5e   :  { %v6344_v32 = vadd.f32 %v7827_v40, %v6304_v24 }
 0xb78   :  { %v7847_v54 = vpop.f32.mrb[144].mxu0  ;;  %v7869_v23 = vpop.f32.mrb[152].mxu1 }
 0xb79   :  { %v7848_v57 = vpop.f32.mrb[145].mxu0  ;;  %v7870_v59 = vpop.f32.mrb[153].mxu1 }
 0xb7a   :  { %v7849_v60 = vadd.f32 %v7848_v57, %v7847_v54  ;;  %v7871_v61 = vadd.f32 %v7870_v59, %v7869_v23  ;;  %v7850_v37 = vpop.f32.mrb[146].mxu0  ;;  %v7872_v12 = vpop.f32.mrb[154].mxu1 }
 0xb7b   :  { %v7851_v20 = vpop.f32.mrb[147].mxu0  ;;  %v7873_v9 = vpop.f32.mrb[155].mxu1 }
 0xb7c   :  { %v6384_v25 = vadd.f32 %v7849_v60, %v6344_v32 }
 0xb7e   :  { %v6424_v33 = vadd.f32 %v7871_v61, %v6384_v25 }
 0xb80   :  { %6430 = vst.msk [vmem:[#allocation2] sm:$0x3] %vm6429_vm3, %v6424_v33 }
 0xb81   :  { %8244 = shalt.err (!%p8241_p4)
}
 0xb82   :  { %s8245_s0 = scalar_lea.hbm %s11331_s7, 32 }
 0xb83   :  { %p8246_p5 = scmp.ne.s32.totalorder %s11331_s7, %s8245_s0  ;;  %p8249_p6 = scmp.lt.u32.totalorder %s8245_s0, %s11331_s7 }
 0xb85   :  { %p8251_p7 = pnand %p8249_p6, %p8246_p5 }
 0xb87   :  { %8254 = shalt.err (!%p8251_p7)
}
 0xb88   :  { %6440 = dma.vmem_to_hbm [thread:$0]  %s6438_s6, 32, %s11331_s7, [#allocation3]  }
 0xb89   :  { %8255 = dma.done.wait [#allocation3], 32  }
 0xb8a   :  { %8256 = vsyncadd [#allocation3], 4294967264 }
 0xb8b   :  { %6444 = vsyncpa [#allocation3], 1 }

</bundles_post_ra>
